<compile_context>
chip_gen: v7x
topology: tpu7x:2x2x1
jax: 0.10.0
libtpu: 0.0.40
codegen_flags: <defaults>
</compile_context>

<pallas_src>
import math

import numpy as np

import jax
import jax.numpy as jnp
from jax import lax
from jax.experimental import pallas as pl
from jax.experimental.pallas import tpu as pltpu

LEAKY_SLOPE = 0.01    # nn.LeakyReLU default negative_slope
BN_EPS = 1e-5         # nn.BatchNorm2d default eps
BIG_NEG = -1e30       # additive mask for invalid max-pool neighbours


# ----------------------------- Pallas kernels ------------------------------

def _conv_bn_pool(p, w, gamma, beta, pen_up, pen_dn, pen_lf, pen_rt, ow):
    """Fused: im2col-matmul -> LeakyReLU -> BatchNorm (batch stats) ->
    MaxPool2d(3, stride=1, padding=1) on the flat (N*OH*OW, Cout) layout.

    Rows are ordered (n, oh, ow); `pen_*` are (R, 1) additive penalties
    (0 or BIG_NEG) marking rows whose up/down/left/right neighbour is outside
    the image, so the 3x3 max never reads across image / row boundaries.
    """
    # Conv as matmul on the MXU: bf16 operands, f32 accumulate.
    y = jnp.dot(p.astype(jnp.bfloat16), w, preferred_element_type=jnp.float32)
    # LeakyReLU (f32).
    y = jnp.where(y >= 0, y, LEAKY_SLOPE * y)
    # Train-mode BatchNorm2d: normalize over N*H*W rows, biased variance.
    mean = jnp.mean(y, axis=0, keepdims=True)
    var = jnp.mean(jnp.square(y - mean), axis=0, keepdims=True)
    y = (y - mean) * lax.rsqrt(var + BN_EPS) * gamma + beta

    # MaxPool2d(3,1,1) via 8 static row shifts + boundary penalties.
    r_rows, c_cols = y.shape

    def shift_rows(v, s):
        fill = jnp.full((abs(s), c_cols), BIG_NEG, jnp.float32)
        if s > 0:
            return jnp.concatenate([v[s:, :], fill], axis=0)
        return jnp.concatenate([fill, v[:s, :]], axis=0)

    out = y                                   # centre tap always valid
    for a in (-1, 0, 1):
        for b in (-1, 0, 1):
            if a == 0 and b == 0:
                continue
            cand = shift_rows(y, a * ow + b)
            if a < 0:
                cand = cand + pen_up
            elif a > 0:
                cand = cand + pen_dn
            if b < 0:
                cand = cand + pen_lf
            elif b > 0:
                cand = cand + pen_rt
            out = jnp.maximum(out, cand)
    return out


def _make_conv_block_kernel(ow):
    def kernel(p_ref, w_ref, g_ref, b_ref,
               pu_ref, pd_ref, pl_ref, pr_ref, o_ref):
        o_ref[...] = _conv_bn_pool(
            p_ref[...], w_ref[...], g_ref[...], b_ref[...],
            pu_ref[...], pd_ref[...], pl_ref[...], pr_ref[...], ow)
    return kernel


def _make_block3_classifier_kernel(ow, n_batch, n_spatial):
    """Conv block 3 + (AdaptiveAvgPool folded into fc1) + Linear+LeakyReLU+Linear."""
    def kernel(p_ref, w_ref, g_ref, b_ref,
               pu_ref, pd_ref, pl_ref, pr_ref,
               w1_ref, b1_ref, w2_ref, b2_ref, o_ref):
        z = _conv_bn_pool(
            p_ref[...], w_ref[...], g_ref[...], b_ref[...],
            pu_ref[...], pd_ref[...], pl_ref[...], pr_ref[...], ow)
        # z: (n_batch * n_spatial, 256), rows ordered (n, h*OW + w).
        # fc1 with AdaptiveAvgPool2d(7) + NCHW flatten pre-folded into w1_ref,
        # accumulated as n_spatial small (N,256)@(256,64) MXU matmuls.
        cout_fc1 = w1_ref.shape[2]
        acc = jnp.zeros((n_batch, cout_fc1), jnp.float32)
        for q in range(n_spatial):
            rows = [z[n * n_spatial + q: n * n_spatial + q + 1, :]
                    for n in range(n_batch)]
            zq = jnp.concatenate(rows, axis=0).astype(jnp.bfloat16)
            acc = acc + jnp.dot(zq, w1_ref[q],
                                preferred_element_type=jnp.float32)
        h = acc + b1_ref[...]
        h = jnp.where(h >= 0, h, LEAKY_SLOPE * h)
        o_ref[...] = jnp.dot(h, w2_ref[...],
                             preferred_element_type=jnp.float32) + b2_ref[...]
    return kernel


# ------------------------------ pallas glue ---------------------------------

def _vmem_spec():
    return pl.BlockSpec(memory_space=pltpu.MemorySpace.VMEM)


def _call(kernel, out_shape, out_dtype, *inputs):
    return pl.pallas_call(
        kernel,
        out_shape=jax.ShapeDtypeStruct(out_shape, out_dtype),
        in_specs=[_vmem_spec() for _ in inputs],
        out_specs=_vmem_spec(),
    )(*inputs)


# ------------------------------- JAX wrapper --------------------------------

def _round_up(n, m):
    return ((n + m - 1) // m) * m


def _im2col(x, k, stride, pad):
    """x: (N, H, W, C) -> patches (N*OH*OW, K) with K = k*k*C padded to mult of 8.

    Column order is (kh, kw, cin); row order is (n, oh, ow).
    """
    n, h, w, c = x.shape
    xp = jnp.pad(x, ((0, 0), (pad, pad), (pad, pad), (0, 0)))
    oh = (h + 2 * pad - k) // stride + 1
    ow = (w + 2 * pad - k) // stride + 1
    cols = []
    for dh in range(k):
        for dw in range(k):
            cols.append(xp[:, dh:dh + stride * (oh - 1) + 1:stride,
                           dw:dw + stride * (ow - 1) + 1:stride, :])
    p = jnp.stack(cols, axis=3).reshape(n * oh * ow, k * k * c)
    kk = k * k * c
    kp = _round_up(kk, 8)
    if kp != kk:
        p = jnp.pad(p, ((0, 0), (0, kp - kk)))
    return p, oh, ow


def _pool_penalties(n, oh, ow):
    """(R,1) additive penalties for up/down/left/right neighbour validity."""
    r = np.arange(n * oh * ow)
    hh = (r // ow) % oh
    ww = r % ow
    def pen(invalid):
        return jnp.asarray(np.where(invalid, BIG_NEG, 0.0)
                           .astype(np.float32).reshape(-1, 1))
    return pen(hh == 0), pen(hh == oh - 1), pen(ww == 0), pen(ww == ow - 1)


def _adaptive_pool_matrix(in_size, out_size):
    """S[i, h] = averaging weight of input h for adaptive-pool output bin i."""
    s_mat = np.zeros((out_size, in_size), np.float32)
    for i in range(out_size):
        s = int(math.floor(i * in_size / out_size))
        e = int(math.ceil((i + 1) * in_size / out_size))
        s_mat[i, s:e] = 1.0 / (e - s)
    return jnp.asarray(s_mat)


def prepare_params(params):
    """One-time, outside the hot path: reshape / fold / bf16-cast the weights."""
    prep = {}

    def conv_w(w_pt):
        cout = w_pt.shape[0]
        wm = jnp.transpose(w_pt, (2, 3, 1, 0)).reshape(-1, cout)  # (k*k*cin, cout)
        kk = wm.shape[0]
        kp = _round_up(kk, 8)
        if kp != kk:
            wm = jnp.pad(wm, ((0, kp - kk), (0, 0)))
        return wm.astype(jnp.bfloat16)

    prep["w1"] = conv_w(params["w1"])
    prep["w2"] = conv_w(params["w2"])
    prep["w3"] = conv_w(params["w3"])
    for i in (1, 2, 3):
        prep[f"g{i}"] = params[f"g{i}"].reshape(1, -1).astype(jnp.float32)
        prep[f"b{i}"] = params[f"b{i}"].reshape(1, -1).astype(jnp.float32)

    # Fold AdaptiveAvgPool2d(7) (4x4 -> 7x7) + PyTorch NCHW flatten into fc1.
    # out1[n,j] = sum_{h,w,c} z[n,h,w,c] * W1eff[h,w,c,j]  with
    # W1eff[h,w,c,j] = sum_{i,jj} S[i,h] S[jj,w] fc1_w[c*49 + i*7 + jj, j].
    s_mat = _adaptive_pool_matrix(4, 7)                       # (7, 4)
    w1 = params["fc1_w"].reshape(256, 7, 7, 64)               # (c, i, jj, out)
    w1e = jnp.einsum("cijo,ih,jw->hwco", w1, s_mat, s_mat)    # (4, 4, 256, 64)
    prep["fc1_w"] = w1e.reshape(16, 256, 64).astype(jnp.bfloat16)
    prep["fc1_b"] = params["fc1_b"].reshape(1, -1).astype(jnp.float32)
    prep["fc2_w"] = params["fc2_w"].astype(jnp.float32)
    prep["fc2_b"] = params["fc2_b"].reshape(1, -1).astype(jnp.float32)
    return prep


def mnist_forward(x_nchw, prep):
    x = jnp.transpose(x_nchw, (0, 2, 3, 1)).astype(jnp.float32)  # NCHW -> NHWC
    n = x.shape[0]

    # Block 1: Conv(1->3,k7,s2,p3)+LeakyReLU+BN+MaxPool — one fused kernel.
    p, oh, ow = _im2col(x, k=7, stride=2, pad=3)
    pens = _pool_penalties(n, oh, ow)
    y = _call(_make_conv_block_kernel(ow), (p.shape[0], 3), jnp.float32,
              p, prep["w1"], prep["g1"], prep["b1"], *pens)
    x = y.reshape(n, oh, ow, 3)

    # Block 2: Conv(3->64,k5,s2,p2)+LeakyReLU+BN+MaxPool — one fused kernel.
    p, oh, ow = _im2col(x, k=5, stride=2, pad=2)
    pens = _pool_penalties(n, oh, ow)
    y = _call(_make_conv_block_kernel(ow), (p.shape[0], 64), jnp.float32,
              p, prep["w2"], prep["g2"], prep["b2"], *pens)
    x = y.reshape(n, oh, ow, 64)

    # Block 3 + AdaptiveAvgPool(folded) + classifier — one fused kernel.
    p, oh, ow = _im2col(x, k=3, stride=2, pad=1)
    assert oh * ow == prep["fc1_w"].shape[0], "avgpool fold assumes 4x4 feature map"
    pens = _pool_penalties(n, oh, ow)
    out = _call(_make_block3_classifier_kernel(ow, n, oh * ow), (n, 10),
                jnp.float32,
                p, prep["w3"], prep["g3"], prep["b3"], *pens,
                prep["fc1_w"], prep["fc1_b"], prep["fc2_w"], prep["fc2_b"])
    return out


def init_params(key):
    ks = jax.random.split(key, 7)
    p = {}
    # Conv weights in PyTorch layout (Cout, Cin, kh, kw), no bias.
    p["w1"] = jax.random.normal(ks[0], (3, 1, 7, 7), jnp.float32) * 0.10
    p["w2"] = jax.random.normal(ks[1], (64, 3, 5, 5), jnp.float32) * 0.10
    p["w3"] = jax.random.normal(ks[2], (256, 64, 3, 3), jnp.float32) * 0.05
    # BatchNorm affine params (PyTorch defaults: gamma=1, beta=0).
    p["g1"] = jnp.ones((3,), jnp.float32);   p["b1"] = jnp.zeros((3,), jnp.float32)
    p["g2"] = jnp.ones((64,), jnp.float32);  p["b2"] = jnp.zeros((64,), jnp.float32)
    p["g3"] = jnp.ones((256,), jnp.float32); p["b3"] = jnp.zeros((256,), jnp.float32)
    # Classifier: Linear(256*7*7, 64), Linear(64, 10) stored as (in, out),
    # fc1 input index ordered like PyTorch flatten: c*49 + i*7 + j.
    p["fc1_w"] = jax.random.normal(ks[3], (256 * 7 * 7, 64), jnp.float32) * 0.02
    p["fc1_b"] = jax.random.normal(ks[4], (64,), jnp.float32) * 0.02
    p["fc2_w"] = jax.random.normal(ks[5], (64, 10), jnp.float32) * 0.05
    p["fc2_b"] = jax.random.normal(ks[6], (10,), jnp.float32) * 0.05
    return p


if __name__ == "__main__":
    key = jax.random.PRNGKey(0)
    kx, kp = jax.random.split(key)
    # MNIST-shaped input: batch=2, 1 channel, 28x28 (NCHW, like PyTorch).
    x = jax.random.normal(kx, (2, 1, 28, 28), jnp.float32)
    params = init_params(kp)
    prep = prepare_params(params)          # one-time weight prep (off hot path)

    fwd = jax.jit(mnist_forward)
    out = fwd(x, prep)
    jax.block_until_ready(out)
    assert out.shape == (2, 10) and out.dtype == jnp.float32
    print("KERNEL_OK")
</pallas_src>

<mosaic_0001>
module attributes {stable_mosaic.version = 11 : i64} {
  func.func @kernel(%arg0: memref<392x56xf32, #tpu.memory_space<vmem>>, %arg1: memref<56x3xbf16, #tpu.memory_space<vmem>>, %arg2: memref<1x3xf32, #tpu.memory_space<vmem>>, %arg3: memref<1x3xf32, #tpu.memory_space<vmem>>, %arg4: memref<392x1xf32, #tpu.memory_space<vmem>>, %arg5: memref<392x1xf32, #tpu.memory_space<vmem>>, %arg6: memref<392x1xf32, #tpu.memory_space<vmem>>, %arg7: memref<392x1xf32, #tpu.memory_space<vmem>>, %arg8: memref<392x3xf32, #tpu.memory_space<vmem>>) attributes {dimension_semantics = [], scalar_prefetch = 0 : i64, scratch_operands = 0 : i64, tpu.core_type = #tpu.core_type<tc>} {
    %c0 = arith.constant 0 : index
    %c0_0 = arith.constant 0 : index
    %0 = vector.load %arg0[%c0, %c0_0] : memref<392x56xf32, #tpu.memory_space<vmem>>, vector<392x56xf32>
    %c0_1 = arith.constant 0 : index
    %c0_2 = arith.constant 0 : index
    %1 = vector.load %arg1[%c0_1, %c0_2] : memref<56x3xbf16, #tpu.memory_space<vmem>>, vector<56x3xbf16>
    %c0_3 = arith.constant 0 : index
    %c0_4 = arith.constant 0 : index
    %2 = vector.load %arg2[%c0_3, %c0_4] : memref<1x3xf32, #tpu.memory_space<vmem>>, vector<1x3xf32>
    %c0_5 = arith.constant 0 : index
    %c0_6 = arith.constant 0 : index
    %3 = vector.load %arg3[%c0_5, %c0_6] : memref<1x3xf32, #tpu.memory_space<vmem>>, vector<1x3xf32>
    %c0_7 = arith.constant 0 : index
    %c0_8 = arith.constant 0 : index
    %4 = vector.load %arg4[%c0_7, %c0_8] : memref<392x1xf32, #tpu.memory_space<vmem>>, vector<392x1xf32>
    %c0_9 = arith.constant 0 : index
    %c0_10 = arith.constant 0 : index
    %5 = vector.load %arg5[%c0_9, %c0_10] : memref<392x1xf32, #tpu.memory_space<vmem>>, vector<392x1xf32>
    %c0_11 = arith.constant 0 : index
    %c0_12 = arith.constant 0 : index
    %6 = vector.load %arg6[%c0_11, %c0_12] : memref<392x1xf32, #tpu.memory_space<vmem>>, vector<392x1xf32>
    %c0_13 = arith.constant 0 : index
    %c0_14 = arith.constant 0 : index
    %7 = vector.load %arg7[%c0_13, %c0_14] : memref<392x1xf32, #tpu.memory_space<vmem>>, vector<392x1xf32>
    %8 = arith.truncf %0 : vector<392x56xf32> to vector<392x56xbf16>
    %cst = arith.constant dense<0.000000e+00> : vector<392x3xf32>
    %9 = tpu.matmul %8, %1, %cst {dimension_numbers = #tpu.dot_dimension_numbers<[1], [0], [0], [1], [0, 0, 1, 1], [], []>} : vector<392x56xbf16>, vector<56x3xbf16>, vector<392x3xf32> -> vector<392x3xf32>
    %cst_15 = arith.constant 0.000000e+00 : f32
    %10 = vector.broadcast %cst_15 : f32 to vector<392x3xf32>
    %11 = arith.cmpf oge, %9, %10 : vector<392x3xf32>
    %cst_16 = arith.constant 0.00999999977 : f32
    %12 = vector.broadcast %cst_16 : f32 to vector<392x3xf32>
    %13 = arith.mulf %12, %9 : vector<392x3xf32>
    %14 = arith.select %11, %9, %13 : vector<392x3xi1>, vector<392x3xf32>
    %cst_17 = arith.constant dense<0.000000e+00> : vector<3xf32>
    %15 = vector.multi_reduction <add>, %14, %cst_17 [0] : vector<392x3xf32> to vector<3xf32>
    %16 = vector.shape_cast %15 : vector<3xf32> to vector<1x3xf32>
    %cst_18 = arith.constant 3.920000e+02 : f32
    %17 = vector.broadcast %cst_18 : f32 to vector<1x3xf32>
    %18 = arith.divf %16, %17 : vector<1x3xf32>
    %19 = vector.broadcast %18 : vector<1x3xf32> to vector<392x3xf32>
    %20 = arith.subf %14, %19 : vector<392x3xf32>
    %21 = arith.mulf %20, %20 : vector<392x3xf32>
    %cst_19 = arith.constant dense<0.000000e+00> : vector<3xf32>
    %22 = vector.multi_reduction <add>, %21, %cst_19 [0] : vector<392x3xf32> to vector<3xf32>
    %23 = vector.shape_cast %22 : vector<3xf32> to vector<1x3xf32>
    %cst_20 = arith.constant 3.920000e+02 : f32
    %24 = vector.broadcast %cst_20 : f32 to vector<1x3xf32>
    %25 = arith.divf %23, %24 : vector<1x3xf32>
    %26 = vector.broadcast %18 : vector<1x3xf32> to vector<392x3xf32>
    %27 = arith.subf %14, %26 : vector<392x3xf32>
    %cst_21 = arith.constant 9.99999974E-6 : f32
    %28 = vector.broadcast %cst_21 : f32 to vector<1x3xf32>
    %29 = arith.addf %25, %28 : vector<1x3xf32>
    %30 = math.rsqrt %29 : vector<1x3xf32>
    %31 = vector.broadcast %30 : vector<1x3xf32> to vector<392x3xf32>
    %32 = arith.mulf %27, %31 : vector<392x3xf32>
    %33 = vector.broadcast %2 : vector<1x3xf32> to vector<392x3xf32>
    %34 = arith.mulf %32, %33 : vector<392x3xf32>
    %35 = vector.broadcast %3 : vector<1x3xf32> to vector<392x3xf32>
    %36 = arith.addf %34, %35 : vector<392x3xf32>
    %cst_22 = arith.constant -1.000000e+30 : f32
    %37 = vector.broadcast %cst_22 : f32 to vector<15x3xf32>
    %38 = vector.extract_strided_slice %36 {offsets = [0, 0], sizes = [377, 3], strides = [1, 1]} : vector<392x3xf32> to vector<377x3xf32>
    %39 = tpu.concatenate %37, %38 in 0 : vector<15x3xf32>, vector<377x3xf32> -> vector<392x3xf32>
    %40 = vector.broadcast %4 : vector<392x1xf32> to vector<392x3xf32>
    %41 = arith.addf %39, %40 : vector<392x3xf32>
    %42 = vector.broadcast %6 : vector<392x1xf32> to vector<392x3xf32>
    %43 = arith.addf %41, %42 : vector<392x3xf32>
    %44 = arith.maximumf %36, %43 : vector<392x3xf32>
    %cst_23 = arith.constant -1.000000e+30 : f32
    %45 = vector.broadcast %cst_23 : f32 to vector<14x3xf32>
    %46 = vector.extract_strided_slice %36 {offsets = [0, 0], sizes = [378, 3], strides = [1, 1]} : vector<392x3xf32> to vector<378x3xf32>
    %47 = tpu.concatenate %45, %46 in 0 : vector<14x3xf32>, vector<378x3xf32> -> vector<392x3xf32>
    %48 = vector.broadcast %4 : vector<392x1xf32> to vector<392x3xf32>
    %49 = arith.addf %47, %48 : vector<392x3xf32>
    %50 = arith.maximumf %44, %49 : vector<392x3xf32>
    %cst_24 = arith.constant -1.000000e+30 : f32
    %51 = vector.broadcast %cst_24 : f32 to vector<13x3xf32>
    %52 = vector.extract_strided_slice %36 {offsets = [0, 0], sizes = [379, 3], strides = [1, 1]} : vector<392x3xf32> to vector<379x3xf32>
    %53 = tpu.concatenate %51, %52 in 0 : vector<13x3xf32>, vector<379x3xf32> -> vector<392x3xf32>
    %54 = vector.broadcast %4 : vector<392x1xf32> to vector<392x3xf32>
    %55 = arith.addf %53, %54 : vector<392x3xf32>
    %56 = vector.broadcast %7 : vector<392x1xf32> to vector<392x3xf32>
    %57 = arith.addf %55, %56 : vector<392x3xf32>
    %58 = arith.maximumf %50, %57 : vector<392x3xf32>
    %cst_25 = arith.constant -1.000000e+30 : f32
    %59 = vector.broadcast %cst_25 : f32 to vector<1x3xf32>
    %60 = vector.extract_strided_slice %36 {offsets = [0, 0], sizes = [391, 3], strides = [1, 1]} : vector<392x3xf32> to vector<391x3xf32>
    %61 = tpu.concatenate %59, %60 in 0 : vector<1x3xf32>, vector<391x3xf32> -> vector<392x3xf32>
    %62 = vector.broadcast %6 : vector<392x1xf32> to vector<392x3xf32>
    %63 = arith.addf %61, %62 : vector<392x3xf32>
    %64 = arith.maximumf %58, %63 : vector<392x3xf32>
    %cst_26 = arith.constant -1.000000e+30 : f32
    %65 = vector.broadcast %cst_26 : f32 to vector<1x3xf32>
    %66 = vector.extract_strided_slice %36 {offsets = [1, 0], sizes = [391, 3], strides = [1, 1]} : vector<392x3xf32> to vector<391x3xf32>
    %67 = tpu.concatenate %66, %65 in 0 : vector<391x3xf32>, vector<1x3xf32> -> vector<392x3xf32>
    %68 = vector.broadcast %7 : vector<392x1xf32> to vector<392x3xf32>
    %69 = arith.addf %67, %68 : vector<392x3xf32>
    %70 = arith.maximumf %64, %69 : vector<392x3xf32>
    %cst_27 = arith.constant -1.000000e+30 : f32
    %71 = vector.broadcast %cst_27 : f32 to vector<13x3xf32>
    %72 = vector.extract_strided_slice %36 {offsets = [13, 0], sizes = [379, 3], strides = [1, 1]} : vector<392x3xf32> to vector<379x3xf32>
    %73 = tpu.concatenate %72, %71 in 0 : vector<379x3xf32>, vector<13x3xf32> -> vector<392x3xf32>
    %74 = vector.broadcast %5 : vector<392x1xf32> to vector<392x3xf32>
    %75 = arith.addf %73, %74 : vector<392x3xf32>
    %76 = vector.broadcast %6 : vector<392x1xf32> to vector<392x3xf32>
    %77 = arith.addf %75, %76 : vector<392x3xf32>
    %78 = arith.maximumf %70, %77 : vector<392x3xf32>
    %cst_28 = arith.constant -1.000000e+30 : f32
    %79 = vector.broadcast %cst_28 : f32 to vector<14x3xf32>
    %80 = vector.extract_strided_slice %36 {offsets = [14, 0], sizes = [378, 3], strides = [1, 1]} : vector<392x3xf32> to vector<378x3xf32>
    %81 = tpu.concatenate %80, %79 in 0 : vector<378x3xf32>, vector<14x3xf32> -> vector<392x3xf32>
    %82 = vector.broadcast %5 : vector<392x1xf32> to vector<392x3xf32>
    %83 = arith.addf %81, %82 : vector<392x3xf32>
    %84 = arith.maximumf %78, %83 : vector<392x3xf32>
    %cst_29 = arith.constant -1.000000e+30 : f32
    %85 = vector.broadcast %cst_29 : f32 to vector<15x3xf32>
    %86 = vector.extract_strided_slice %36 {offsets = [15, 0], sizes = [377, 3], strides = [1, 1]} : vector<392x3xf32> to vector<377x3xf32>
    %87 = tpu.concatenate %86, %85 in 0 : vector<377x3xf32>, vector<15x3xf32> -> vector<392x3xf32>
    %88 = vector.broadcast %5 : vector<392x1xf32> to vector<392x3xf32>
    %89 = arith.addf %87, %88 : vector<392x3xf32>
    %90 = vector.broadcast %7 : vector<392x1xf32> to vector<392x3xf32>
    %91 = arith.addf %89, %90 : vector<392x3xf32>
    %92 = arith.maximumf %84, %91 : vector<392x3xf32>
    %c0_30 = arith.constant 0 : index
    %c0_31 = arith.constant 0 : index
    %93 = vector.load %arg8[%c0_30, %c0_31] : memref<392x3xf32, #tpu.memory_space<vmem>>, vector<392x3xf32>
    tpu.vector_store %arg8[%c0_30, %c0_31], %92 {strides = array<i32>} : memref<392x3xf32, #tpu.memory_space<vmem>>, vector<392x3xf32>,
    return
  }
}

module attributes {stable_mosaic.version = 11 : i64} {
  func.func @kernel(%arg0: memref<98x80xf32, #tpu.memory_space<vmem>>, %arg1: memref<80x64xbf16, #tpu.memory_space<vmem>>, %arg2: memref<1x64xf32, #tpu.memory_space<vmem>>, %arg3: memref<1x64xf32, #tpu.memory_space<vmem>>, %arg4: memref<98x1xf32, #tpu.memory_space<vmem>>, %arg5: memref<98x1xf32, #tpu.memory_space<vmem>>, %arg6: memref<98x1xf32, #tpu.memory_space<vmem>>, %arg7: memref<98x1xf32, #tpu.memory_space<vmem>>, %arg8: memref<98x64xf32, #tpu.memory_space<vmem>>) attributes {dimension_semantics = [], scalar_prefetch = 0 : i64, scratch_operands = 0 : i64, tpu.core_type = #tpu.core_type<tc>} {
    %c0 = arith.constant 0 : index
    %c0_0 = arith.constant 0 : index
    %0 = vector.load %arg0[%c0, %c0_0] : memref<98x80xf32, #tpu.memory_space<vmem>>, vector<98x80xf32>
    %c0_1 = arith.constant 0 : index
    %c0_2 = arith.constant 0 : index
    %1 = vector.load %arg1[%c0_1, %c0_2] : memref<80x64xbf16, #tpu.memory_space<vmem>>, vector<80x64xbf16>
    %c0_3 = arith.constant 0 : index
    %c0_4 = arith.constant 0 : index
    %2 = vector.load %arg2[%c0_3, %c0_4] : memref<1x64xf32, #tpu.memory_space<vmem>>, vector<1x64xf32>
    %c0_5 = arith.constant 0 : index
    %c0_6 = arith.constant 0 : index
    %3 = vector.load %arg3[%c0_5, %c0_6] : memref<1x64xf32, #tpu.memory_space<vmem>>, vector<1x64xf32>
    %c0_7 = arith.constant 0 : index
    %c0_8 = arith.constant 0 : index
    %4 = vector.load %arg4[%c0_7, %c0_8] : memref<98x1xf32, #tpu.memory_space<vmem>>, vector<98x1xf32>
    %c0_9 = arith.constant 0 : index
    %c0_10 = arith.constant 0 : index
    %5 = vector.load %arg5[%c0_9, %c0_10] : memref<98x1xf32, #tpu.memory_space<vmem>>, vector<98x1xf32>
    %c0_11 = arith.constant 0 : index
    %c0_12 = arith.constant 0 : index
    %6 = vector.load %arg6[%c0_11, %c0_12] : memref<98x1xf32, #tpu.memory_space<vmem>>, vector<98x1xf32>
    %c0_13 = arith.constant 0 : index
    %c0_14 = arith.constant 0 : index
    %7 = vector.load %arg7[%c0_13, %c0_14] : memref<98x1xf32, #tpu.memory_space<vmem>>, vector<98x1xf32>
    %8 = arith.truncf %0 : vector<98x80xf32> to vector<98x80xbf16>
    %cst = arith.constant dense<0.000000e+00> : vector<98x64xf32>
    %9 = tpu.matmul %8, %1, %cst {dimension_numbers = #tpu.dot_dimension_numbers<[1], [0], [0], [1], [0, 0, 1, 1], [], []>} : vector<98x80xbf16>, vector<80x64xbf16>, vector<98x64xf32> -> vector<98x64xf32>
    %cst_15 = arith.constant 0.000000e+00 : f32
    %10 = vector.broadcast %cst_15 : f32 to vector<98x64xf32>
    %11 = arith.cmpf oge, %9, %10 : vector<98x64xf32>
    %cst_16 = arith.constant 0.00999999977 : f32
    %12 = vector.broadcast %cst_16 : f32 to vector<98x64xf32>
    %13 = arith.mulf %12, %9 : vector<98x64xf32>
    %14 = arith.select %11, %9, %13 : vector<98x64xi1>, vector<98x64xf32>
    %cst_17 = arith.constant dense<0.000000e+00> : vector<64xf32>
    %15 = vector.multi_reduction <add>, %14, %cst_17 [0] : vector<98x64xf32> to vector<64xf32>
    %16 = vector.shape_cast %15 : vector<64xf32> to vector<1x64xf32>
    %cst_18 = arith.constant 9.800000e+01 : f32
    %17 = vector.broadcast %cst_18 : f32 to vector<1x64xf32>
    %18 = arith.divf %16, %17 : vector<1x64xf32>
    %19 = vector.broadcast %18 : vector<1x64xf32> to vector<98x64xf32>
    %20 = arith.subf %14, %19 : vector<98x64xf32>
    %21 = arith.mulf %20, %20 : vector<98x64xf32>
    %cst_19 = arith.constant dense<0.000000e+00> : vector<64xf32>
    %22 = vector.multi_reduction <add>, %21, %cst_19 [0] : vector<98x64xf32> to vector<64xf32>
    %23 = vector.shape_cast %22 : vector<64xf32> to vector<1x64xf32>
    %cst_20 = arith.constant 9.800000e+01 : f32
    %24 = vector.broadcast %cst_20 : f32 to vector<1x64xf32>
    %25 = arith.divf %23, %24 : vector<1x64xf32>
    %26 = vector.broadcast %18 : vector<1x64xf32> to vector<98x64xf32>
    %27 = arith.subf %14, %26 : vector<98x64xf32>
    %cst_21 = arith.constant 9.99999974E-6 : f32
    %28 = vector.broadcast %cst_21 : f32 to vector<1x64xf32>
    %29 = arith.addf %25, %28 : vector<1x64xf32>
    %30 = math.rsqrt %29 : vector<1x64xf32>
    %31 = vector.broadcast %30 : vector<1x64xf32> to vector<98x64xf32>
    %32 = arith.mulf %27, %31 : vector<98x64xf32>
    %33 = vector.broadcast %2 : vector<1x64xf32> to vector<98x64xf32>
    %34 = arith.mulf %32, %33 : vector<98x64xf32>
    %35 = vector.broadcast %3 : vector<1x64xf32> to vector<98x64xf32>
    %36 = arith.addf %34, %35 : vector<98x64xf32>
    %cst_22 = arith.constant -1.000000e+30 : f32
    %37 = vector.broadcast %cst_22 : f32 to vector<8x64xf32>
    %38 = vector.extract_strided_slice %36 {offsets = [0, 0], sizes = [90, 64], strides = [1, 1]} : vector<98x64xf32> to vector<90x64xf32>
    %39 = tpu.concatenate %37, %38 in 0 : vector<8x64xf32>, vector<90x64xf32> -> vector<98x64xf32>
    %40 = vector.broadcast %4 : vector<98x1xf32> to vector<98x64xf32>
    %41 = arith.addf %39, %40 : vector<98x64xf32>
    %42 = vector.broadcast %6 : vector<98x1xf32> to vector<98x64xf32>
    %43 = arith.addf %41, %42 : vector<98x64xf32>
    %44 = arith.maximumf %36, %43 : vector<98x64xf32>
    %cst_23 = arith.constant -1.000000e+30 : f32
    %45 = vector.broadcast %cst_23 : f32 to vector<7x64xf32>
    %46 = vector.extract_strided_slice %36 {offsets = [0, 0], sizes = [91, 64], strides = [1, 1]} : vector<98x64xf32> to vector<91x64xf32>
    %47 = tpu.concatenate %45, %46 in 0 : vector<7x64xf32>, vector<91x64xf32> -> vector<98x64xf32>
    %48 = vector.broadcast %4 : vector<98x1xf32> to vector<98x64xf32>
    %49 = arith.addf %47, %48 : vector<98x64xf32>
    %50 = arith.maximumf %44, %49 : vector<98x64xf32>
    %cst_24 = arith.constant -1.000000e+30 : f32
    %51 = vector.broadcast %cst_24 : f32 to vector<6x64xf32>
    %52 = vector.extract_strided_slice %36 {offsets = [0, 0], sizes = [92, 64], strides = [1, 1]} : vector<98x64xf32> to vector<92x64xf32>
    %53 = tpu.concatenate %51, %52 in 0 : vector<6x64xf32>, vector<92x64xf32> -> vector<98x64xf32>
    %54 = vector.broadcast %4 : vector<98x1xf32> to vector<98x64xf32>
    %55 = arith.addf %53, %54 : vector<98x64xf32>
    %56 = vector.broadcast %7 : vector<98x1xf32> to vector<98x64xf32>
    %57 = arith.addf %55, %56 : vector<98x64xf32>
    %58 = arith.maximumf %50, %57 : vector<98x64xf32>
    %cst_25 = arith.constant -1.000000e+30 : f32
    %59 = vector.broadcast %cst_25 : f32 to vector<1x64xf32>
    %60 = vector.extract_strided_slice %36 {offsets = [0, 0], sizes = [97, 64], strides = [1, 1]} : vector<98x64xf32> to vector<97x64xf32>
    %61 = tpu.concatenate %59, %60 in 0 : vector<1x64xf32>, vector<97x64xf32> -> vector<98x64xf32>
    %62 = vector.broadcast %6 : vector<98x1xf32> to vector<98x64xf32>
    %63 = arith.addf %61, %62 : vector<98x64xf32>
    %64 = arith.maximumf %58, %63 : vector<98x64xf32>
    %cst_26 = arith.constant -1.000000e+30 : f32
    %65 = vector.broadcast %cst_26 : f32 to vector<1x64xf32>
    %66 = vector.extract_strided_slice %36 {offsets = [1, 0], sizes = [97, 64], strides = [1, 1]} : vector<98x64xf32> to vector<97x64xf32>
    %67 = tpu.concatenate %66, %65 in 0 : vector<97x64xf32>, vector<1x64xf32> -> vector<98x64xf32>
    %68 = vector.broadcast %7 : vector<98x1xf32> to vector<98x64xf32>
    %69 = arith.addf %67, %68 : vector<98x64xf32>
    %70 = arith.maximumf %64, %69 : vector<98x64xf32>
    %cst_27 = arith.constant -1.000000e+30 : f32
    %71 = vector.broadcast %cst_27 : f32 to vector<6x64xf32>
    %72 = vector.extract_strided_slice %36 {offsets = [6, 0], sizes = [92, 64], strides = [1, 1]} : vector<98x64xf32> to vector<92x64xf32>
    %73 = tpu.concatenate %72, %71 in 0 : vector<92x64xf32>, vector<6x64xf32> -> vector<98x64xf32>
    %74 = vector.broadcast %5 : vector<98x1xf32> to vector<98x64xf32>
    %75 = arith.addf %73, %74 : vector<98x64xf32>
    %76 = vector.broadcast %6 : vector<98x1xf32> to vector<98x64xf32>
    %77 = arith.addf %75, %76 : vector<98x64xf32>
    %78 = arith.maximumf %70, %77 : vector<98x64xf32>
    %cst_28 = arith.constant -1.000000e+30 : f32
    %79 = vector.broadcast %cst_28 : f32 to vector<7x64xf32>
    %80 = vector.extract_strided_slice %36 {offsets = [7, 0], sizes = [91, 64], strides = [1, 1]} : vector<98x64xf32> to vector<91x64xf32>
    %81 = tpu.concatenate %80, %79 in 0 : vector<91x64xf32>, vector<7x64xf32> -> vector<98x64xf32>
    %82 = vector.broadcast %5 : vector<98x1xf32> to vector<98x64xf32>
    %83 = arith.addf %81, %82 : vector<98x64xf32>
    %84 = arith.maximumf %78, %83 : vector<98x64xf32>
    %cst_29 = arith.constant -1.000000e+30 : f32
    %85 = vector.broadcast %cst_29 : f32 to vector<8x64xf32>
    %86 = vector.extract_strided_slice %36 {offsets = [8, 0], sizes = [90, 64], strides = [1, 1]} : vector<98x64xf32> to vector<90x64xf32>
    %87 = tpu.concatenate %86, %85 in 0 : vector<90x64xf32>, vector<8x64xf32> -> vector<98x64xf32>
    %88 = vector.broadcast %5 : vector<98x1xf32> to vector<98x64xf32>
    %89 = arith.addf %87, %88 : vector<98x64xf32>
    %90 = vector.broadcast %7 : vector<98x1xf32> to vector<98x64xf32>
    %91 = arith.addf %89, %90 : vector<98x64xf32>
    %92 = arith.maximumf %84, %91 : vector<98x64xf32>
    %c0_30 = arith.constant 0 : index
    %c0_31 = arith.constant 0 : index
    %93 = vector.load %arg8[%c0_30, %c0_31] : memref<98x64xf32, #tpu.memory_space<vmem>>, vector<98x64xf32>
    tpu.vector_store %arg8[%c0_30, %c0_31], %92 {strides = array<i32>} : memref<98x64xf32, #tpu.memory_space<vmem>>, vector<98x64xf32>,
    return
  }
}

module attributes {stable_mosaic.version = 11 : i64} {
  func.func @kernel(%arg0: memref<32x576xf32, #tpu.memory_space<vmem>>, %arg1: memref<576x256xbf16, #tpu.memory_space<vmem>>, %arg2: memref<1x256xf32, #tpu.memory_space<vmem>>, %arg3: memref<1x256xf32, #tpu.memory_space<vmem>>, %arg4: memref<32x1xf32, #tpu.memory_space<vmem>>, %arg5: memref<32x1xf32, #tpu.memory_space<vmem>>, %arg6: memref<32x1xf32, #tpu.memory_space<vmem>>, %arg7: memref<32x1xf32, #tpu.memory_space<vmem>>, %arg8: memref<16x256x64xbf16, #tpu.memory_space<vmem>>, %arg9: memref<1x64xf32, #tpu.memory_space<vmem>>, %arg10: memref<64x10xf32, #tpu.memory_space<vmem>>, %arg11: memref<1x10xf32, #tpu.memory_space<vmem>>, %arg12: memref<2x10xf32, #tpu.memory_space<vmem>>) attributes {dimension_semantics = [], scalar_prefetch = 0 : i64, scratch_operands = 0 : i64, tpu.core_type = #tpu.core_type<tc>} {
    %c0 = arith.constant 0 : index
    %c0_0 = arith.constant 0 : index
    %0 = vector.load %arg0[%c0, %c0_0] : memref<32x576xf32, #tpu.memory_space<vmem>>, vector<32x576xf32>
    %c0_1 = arith.constant 0 : index
    %c0_2 = arith.constant 0 : index
    %1 = vector.load %arg1[%c0_1, %c0_2] : memref<576x256xbf16, #tpu.memory_space<vmem>>, vector<576x256xbf16>
    %c0_3 = arith.constant 0 : index
    %c0_4 = arith.constant 0 : index
    %2 = vector.load %arg2[%c0_3, %c0_4] : memref<1x256xf32, #tpu.memory_space<vmem>>, vector<1x256xf32>
    %c0_5 = arith.constant 0 : index
    %c0_6 = arith.constant 0 : index
    %3 = vector.load %arg3[%c0_5, %c0_6] : memref<1x256xf32, #tpu.memory_space<vmem>>, vector<1x256xf32>
    %c0_7 = arith.constant 0 : index
    %c0_8 = arith.constant 0 : index
    %4 = vector.load %arg4[%c0_7, %c0_8] : memref<32x1xf32, #tpu.memory_space<vmem>>, vector<32x1xf32>
    %c0_9 = arith.constant 0 : index
    %c0_10 = arith.constant 0 : index
    %5 = vector.load %arg5[%c0_9, %c0_10] : memref<32x1xf32, #tpu.memory_space<vmem>>, vector<32x1xf32>
    %c0_11 = arith.constant 0 : index
    %c0_12 = arith.constant 0 : index
    %6 = vector.load %arg6[%c0_11, %c0_12] : memref<32x1xf32, #tpu.memory_space<vmem>>, vector<32x1xf32>
    %c0_13 = arith.constant 0 : index
    %c0_14 = arith.constant 0 : index
    %7 = vector.load %arg7[%c0_13, %c0_14] : memref<32x1xf32, #tpu.memory_space<vmem>>, vector<32x1xf32>
    %8 = arith.truncf %0 : vector<32x576xf32> to vector<32x576xbf16>
    %cst = arith.constant dense<0.000000e+00> : vector<32x256xf32>
    %9 = tpu.matmul %8, %1, %cst {dimension_numbers = #tpu.dot_dimension_numbers<[1], [0], [0], [1], [0, 0, 1, 1], [], []>} : vector<32x576xbf16>, vector<576x256xbf16>, vector<32x256xf32> -> vector<32x256xf32>
    %cst_15 = arith.constant 0.000000e+00 : f32
    %10 = vector.broadcast %cst_15 : f32 to vector<32x256xf32>
    %11 = arith.cmpf oge, %9, %10 : vector<32x256xf32>
    %cst_16 = arith.constant 0.00999999977 : f32
    %12 = vector.broadcast %cst_16 : f32 to vector<32x256xf32>
    %13 = arith.mulf %12, %9 : vector<32x256xf32>
    %14 = arith.select %11, %9, %13 : vector<32x256xi1>, vector<32x256xf32>
    %cst_17 = arith.constant dense<0.000000e+00> : vector<256xf32>
    %15 = vector.multi_reduction <add>, %14, %cst_17 [0] : vector<32x256xf32> to vector<256xf32>
    %16 = vector.shape_cast %15 : vector<256xf32> to vector<1x256xf32>
    %cst_18 = arith.constant 3.200000e+01 : f32
    %17 = vector.broadcast %cst_18 : f32 to vector<1x256xf32>
    %18 = arith.divf %16, %17 : vector<1x256xf32>
    %19 = vector.broadcast %18 : vector<1x256xf32> to vector<32x256xf32>
    %20 = arith.subf %14, %19 : vector<32x256xf32>
    %21 = arith.mulf %20, %20 : vector<32x256xf32>
    %cst_19 = arith.constant dense<0.000000e+00> : vector<256xf32>
    %22 = vector.multi_reduction <add>, %21, %cst_19 [0] : vector<32x256xf32> to vector<256xf32>
    %23 = vector.shape_cast %22 : vector<256xf32> to vector<1x256xf32>
    %cst_20 = arith.constant 3.200000e+01 : f32
    %24 = vector.broadcast %cst_20 : f32 to vector<1x256xf32>
    %25 = arith.divf %23, %24 : vector<1x256xf32>
    %26 = vector.broadcast %18 : vector<1x256xf32> to vector<32x256xf32>
    %27 = arith.subf %14, %26 : vector<32x256xf32>
    %cst_21 = arith.constant 9.99999974E-6 : f32
    %28 = vector.broadcast %cst_21 : f32 to vector<1x256xf32>
    %29 = arith.addf %25, %28 : vector<1x256xf32>
    %30 = math.rsqrt %29 : vector<1x256xf32>
    %31 = vector.broadcast %30 : vector<1x256xf32> to vector<32x256xf32>
    %32 = arith.mulf %27, %31 : vector<32x256xf32>
    %33 = vector.broadcast %2 : vector<1x256xf32> to vector<32x256xf32>
    %34 = arith.mulf %32, %33 : vector<32x256xf32>
    %35 = vector.broadcast %3 : vector<1x256xf32> to vector<32x256xf32>
    %36 = arith.addf %34, %35 : vector<32x256xf32>
    %cst_22 = arith.constant -1.000000e+30 : f32
    %37 = vector.broadcast %cst_22 : f32 to vector<5x256xf32>
    %38 = vector.extract_strided_slice %36 {offsets = [0, 0], sizes = [27, 256], strides = [1, 1]} : vector<32x256xf32> to vector<27x256xf32>
    %39 = tpu.concatenate %37, %38 in 0 : vector<5x256xf32>, vector<27x256xf32> -> vector<32x256xf32>
    %40 = vector.broadcast %4 : vector<32x1xf32> to vector<32x256xf32>
    %41 = arith.addf %39, %40 : vector<32x256xf32>
    %42 = vector.broadcast %6 : vector<32x1xf32> to vector<32x256xf32>
    %43 = arith.addf %41, %42 : vector<32x256xf32>
    %44 = arith.maximumf %36, %43 : vector<32x256xf32>
    %cst_23 = arith.constant -1.000000e+30 : f32
    %45 = vector.broadcast %cst_23 : f32 to vector<4x256xf32>
    %46 = vector.extract_strided_slice %36 {offsets = [0, 0], sizes = [28, 256], strides = [1, 1]} : vector<32x256xf32> to vector<28x256xf32>
    %47 = tpu.concatenate %45, %46 in 0 : vector<4x256xf32>, vector<28x256xf32> -> vector<32x256xf32>
    %48 = vector.broadcast %4 : vector<32x1xf32> to vector<32x256xf32>
    %49 = arith.addf %47, %48 : vector<32x256xf32>
    %50 = arith.maximumf %44, %49 : vector<32x256xf32>
    %cst_24 = arith.constant -1.000000e+30 : f32
    %51 = vector.broadcast %cst_24 : f32 to vector<3x256xf32>
    %52 = vector.extract_strided_slice %36 {offsets = [0, 0], sizes = [29, 256], strides = [1, 1]} : vector<32x256xf32> to vector<29x256xf32>
    %53 = tpu.concatenate %51, %52 in 0 : vector<3x256xf32>, vector<29x256xf32> -> vector<32x256xf32>
    %54 = vector.broadcast %4 : vector<32x1xf32> to vector<32x256xf32>
    %55 = arith.addf %53, %54 : vector<32x256xf32>
    %56 = vector.broadcast %7 : vector<32x1xf32> to vector<32x256xf32>
    %57 = arith.addf %55, %56 : vector<32x256xf32>
    %58 = arith.maximumf %50, %57 : vector<32x256xf32>
    %cst_25 = arith.constant -1.000000e+30 : f32
    %59 = vector.broadcast %cst_25 : f32 to vector<1x256xf32>
    %60 = vector.extract_strided_slice %36 {offsets = [0, 0], sizes = [31, 256], strides = [1, 1]} : vector<32x256xf32> to vector<31x256xf32>
    %61 = tpu.concatenate %59, %60 in 0 : vector<1x256xf32>, vector<31x256xf32> -> vector<32x256xf32>
    %62 = vector.broadcast %6 : vector<32x1xf32> to vector<32x256xf32>
    %63 = arith.addf %61, %62 : vector<32x256xf32>
    %64 = arith.maximumf %58, %63 : vector<32x256xf32>
    %cst_26 = arith.constant -1.000000e+30 : f32
    %65 = vector.broadcast %cst_26 : f32 to vector<1x256xf32>
    %66 = vector.extract_strided_slice %36 {offsets = [1, 0], sizes = [31, 256], strides = [1, 1]} : vector<32x256xf32> to vector<31x256xf32>
    %67 = tpu.concatenate %66, %65 in 0 : vector<31x256xf32>, vector<1x256xf32> -> vector<32x256xf32>
    %68 = vector.broadcast %7 : vector<32x1xf32> to vector<32x256xf32>
    %69 = arith.addf %67, %68 : vector<32x256xf32>
    %70 = arith.maximumf %64, %69 : vector<32x256xf32>
    %cst_27 = arith.constant -1.000000e+30 : f32
    %71 = vector.broadcast %cst_27 : f32 to vector<3x256xf32>
    %72 = vector.extract_strided_slice %36 {offsets = [3, 0], sizes = [29, 256], strides = [1, 1]} : vector<32x256xf32> to vector<29x256xf32>
    %73 = tpu.concatenate %72, %71 in 0 : vector<29x256xf32>, vector<3x256xf32> -> vector<32x256xf32>
    %74 = vector.broadcast %5 : vector<32x1xf32> to vector<32x256xf32>
    %75 = arith.addf %73, %74 : vector<32x256xf32>
    %76 = vector.broadcast %6 : vector<32x1xf32> to vector<32x256xf32>
    %77 = arith.addf %75, %76 : vector<32x256xf32>
    %78 = arith.maximumf %70, %77 : vector<32x256xf32>
    %cst_28 = arith.constant -1.000000e+30 : f32
    %79 = vector.broadcast %cst_28 : f32 to vector<4x256xf32>
    %80 = vector.extract_strided_slice %36 {offsets = [4, 0], sizes = [28, 256], strides = [1, 1]} : vector<32x256xf32> to vector<28x256xf32>
    %81 = tpu.concatenate %80, %79 in 0 : vector<28x256xf32>, vector<4x256xf32> -> vector<32x256xf32>
    %82 = vector.broadcast %5 : vector<32x1xf32> to vector<32x256xf32>
    %83 = arith.addf %81, %82 : vector<32x256xf32>
    %84 = arith.maximumf %78, %83 : vector<32x256xf32>
    %cst_29 = arith.constant -1.000000e+30 : f32
    %85 = vector.broadcast %cst_29 : f32 to vector<5x256xf32>
    %86 = vector.extract_strided_slice %36 {offsets = [5, 0], sizes = [27, 256], strides = [1, 1]} : vector<32x256xf32> to vector<27x256xf32>
    %87 = tpu.concatenate %86, %85 in 0 : vector<27x256xf32>, vector<5x256xf32> -> vector<32x256xf32>
    %88 = vector.broadcast %5 : vector<32x1xf32> to vector<32x256xf32>
    %89 = arith.addf %87, %88 : vector<32x256xf32>
    %90 = vector.broadcast %7 : vector<32x1xf32> to vector<32x256xf32>
    %91 = arith.addf %89, %90 : vector<32x256xf32>
    %92 = arith.maximumf %84, %91 : vector<32x256xf32>
    %cst_30 = arith.constant 0.000000e+00 : f32
    %93 = vector.broadcast %cst_30 : f32 to vector<2x64xf32>
    %94 = vector.extract_strided_slice %92 {offsets = [0, 0], sizes = [1, 256], strides = [1, 1]} : vector<32x256xf32> to vector<1x256xf32>
    %95 = vector.extract_strided_slice %92 {offsets = [16, 0], sizes = [1, 256], strides = [1, 1]} : vector<32x256xf32> to vector<1x256xf32>
    %96 = tpu.concatenate %94, %95 in 0 : vector<1x256xf32>, vector<1x256xf32> -> vector<2x256xf32>
    %97 = arith.truncf %96 : vector<2x256xf32> to vector<2x256xbf16>
    %c0_31 = arith.constant 0 : index
    %c0_32 = arith.constant 0 : index
    %c0_33 = arith.constant 0 : index
    %98 = vector.load %arg8[%c0_31, %c0_32, %c0_33] : memref<16x256x64xbf16, #tpu.memory_space<vmem>>, vector<1x256x64xbf16>
    %99 = vector.shape_cast %98 : vector<1x256x64xbf16> to vector<256x64xbf16>
    %cst_34 = arith.constant dense<0.000000e+00> : vector<2x64xf32>
    %100 = tpu.matmul %97, %99, %cst_34 {dimension_numbers = #tpu.dot_dimension_numbers<[1], [0], [0], [1], [0, 0, 1, 1], [], []>} : vector<2x256xbf16>, vector<256x64xbf16>, vector<2x64xf32> -> vector<2x64xf32>
    %101 = arith.addf %93, %100 : vector<2x64xf32>
    %102 = vector.extract_strided_slice %92 {offsets = [1, 0], sizes = [1, 256], strides = [1, 1]} : vector<32x256xf32> to vector<1x256xf32>
    %103 = vector.extract_strided_slice %92 {offsets = [17, 0], sizes = [1, 256], strides = [1, 1]} : vector<32x256xf32> to vector<1x256xf32>
    %104 = tpu.concatenate %102, %103 in 0 : vector<1x256xf32>, vector<1x256xf32> -> vector<2x256xf32>
    %105 = arith.truncf %104 : vector<2x256xf32> to vector<2x256xbf16>
    %c1 = arith.constant 1 : index
    %c0_35 = arith.constant 0 : index
    %c0_36 = arith.constant 0 : index
    %106 = vector.load %arg8[%c1, %c0_35, %c0_36] : memref<16x256x64xbf16, #tpu.memory_space<vmem>>, vector<1x256x64xbf16>
    %107 = vector.shape_cast %106 : vector<1x256x64xbf16> to vector<256x64xbf16>
    %cst_37 = arith.constant dense<0.000000e+00> : vector<2x64xf32>
    %108 = tpu.matmul %105, %107, %cst_37 {dimension_numbers = #tpu.dot_dimension_numbers<[1], [0], [0], [1], [0, 0, 1, 1], [], []>} : vector<2x256xbf16>, vector<256x64xbf16>, vector<2x64xf32> -> vector<2x64xf32>
    %109 = arith.addf %101, %108 : vector<2x64xf32>
    %110 = vector.extract_strided_slice %92 {offsets = [2, 0], sizes = [1, 256], strides = [1, 1]} : vector<32x256xf32> to vector<1x256xf32>
    %111 = vector.extract_strided_slice %92 {offsets = [18, 0], sizes = [1, 256], strides = [1, 1]} : vector<32x256xf32> to vector<1x256xf32>
    %112 = tpu.concatenate %110, %111 in 0 : vector<1x256xf32>, vector<1x256xf32> -> vector<2x256xf32>
    %113 = arith.truncf %112 : vector<2x256xf32> to vector<2x256xbf16>
    %c2 = arith.constant 2 : index
    %c0_38 = arith.constant 0 : index
    %c0_39 = arith.constant 0 : index
    %114 = vector.load %arg8[%c2, %c0_38, %c0_39] : memref<16x256x64xbf16, #tpu.memory_space<vmem>>, vector<1x256x64xbf16>
    %115 = vector.shape_cast %114 : vector<1x256x64xbf16> to vector<256x64xbf16>
    %cst_40 = arith.constant dense<0.000000e+00> : vector<2x64xf32>
    %116 = tpu.matmul %113, %115, %cst_40 {dimension_numbers = #tpu.dot_dimension_numbers<[1], [0], [0], [1], [0, 0, 1, 1], [], []>} : vector<2x256xbf16>, vector<256x64xbf16>, vector<2x64xf32> -> vector<2x64xf32>
    %117 = arith.addf %109, %116 : vector<2x64xf32>
    %118 = vector.extract_strided_slice %92 {offsets = [3, 0], sizes = [1, 256], strides = [1, 1]} : vector<32x256xf32> to vector<1x256xf32>
    %119 = vector.extract_strided_slice %92 {offsets = [19, 0], sizes = [1, 256], strides = [1, 1]} : vector<32x256xf32> to vector<1x256xf32>
    %120 = tpu.concatenate %118, %119 in 0 : vector<1x256xf32>, vector<1x256xf32> -> vector<2x256xf32>
    %121 = arith.truncf %120 : vector<2x256xf32> to vector<2x256xbf16>
    %c3 = arith.constant 3 : index
    %c0_41 = arith.constant 0 : index
    %c0_42 = arith.constant 0 : index
    %122 = vector.load %arg8[%c3, %c0_41, %c0_42] : memref<16x256x64xbf16, #tpu.memory_space<vmem>>, vector<1x256x64xbf16>
    %123 = vector.shape_cast %122 : vector<1x256x64xbf16> to vector<256x64xbf16>
    %cst_43 = arith.constant dense<0.000000e+00> : vector<2x64xf32>
    %124 = tpu.matmul %121, %123, %cst_43 {dimension_numbers = #tpu.dot_dimension_numbers<[1], [0], [0], [1], [0, 0, 1, 1], [], []>} : vector<2x256xbf16>, vector<256x64xbf16>, vector<2x64xf32> -> vector<2x64xf32>
    %125 = arith.addf %117, %124 : vector<2x64xf32>
    %126 = vector.extract_strided_slice %92 {offsets = [4, 0], sizes = [1, 256], strides = [1, 1]} : vector<32x256xf32> to vector<1x256xf32>
    %127 = vector.extract_strided_slice %92 {offsets = [20, 0], sizes = [1, 256], strides = [1, 1]} : vector<32x256xf32> to vector<1x256xf32>
    %128 = tpu.concatenate %126, %127 in 0 : vector<1x256xf32>, vector<1x256xf32> -> vector<2x256xf32>
    %129 = arith.truncf %128 : vector<2x256xf32> to vector<2x256xbf16>
    %c4 = arith.constant 4 : index
    %c0_44 = arith.constant 0 : index
    %c0_45 = arith.constant 0 : index
    %130 = vector.load %arg8[%c4, %c0_44, %c0_45] : memref<16x256x64xbf16, #tpu.memory_space<vmem>>, vector<1x256x64xbf16>
    %131 = vector.shape_cast %130 : vector<1x256x64xbf16> to vector<256x64xbf16>
    %cst_46 = arith.constant dense<0.000000e+00> : vector<2x64xf32>
    %132 = tpu.matmul %129, %131, %cst_46 {dimension_numbers = #tpu.dot_dimension_numbers<[1], [0], [0], [1], [0, 0, 1, 1], [], []>} : vector<2x256xbf16>, vector<256x64xbf16>, vector<2x64xf32> -> vector<2x64xf32>
    %133 = arith.addf %125, %132 : vector<2x64xf32>
    %134 = vector.extract_strided_slice %92 {offsets = [5, 0], sizes = [1, 256], strides = [1, 1]} : vector<32x256xf32> to vector<1x256xf32>
    %135 = vector.extract_strided_slice %92 {offsets = [21, 0], sizes = [1, 256], strides = [1, 1]} : vector<32x256xf32> to vector<1x256xf32>
    %136 = tpu.concatenate %134, %135 in 0 : vector<1x256xf32>, vector<1x256xf32> -> vector<2x256xf32>
    %137 = arith.truncf %136 : vector<2x256xf32> to vector<2x256xbf16>
    %c5 = arith.constant 5 : index
    %c0_47 = arith.constant 0 : index
    %c0_48 = arith.constant 0 : index
    %138 = vector.load %arg8[%c5, %c0_47, %c0_48] : memref<16x256x64xbf16, #tpu.memory_space<vmem>>, vector<1x256x64xbf16>
    %139 = vector.shape_cast %138 : vector<1x256x64xbf16> to vector<256x64xbf16>
    %cst_49 = arith.constant dense<0.000000e+00> : vector<2x64xf32>
    %140 = tpu.matmul %137, %139, %cst_49 {dimension_numbers = #tpu.dot_dimension_numbers<[1], [0], [0], [1], [0, 0, 1, 1], [], []>} : vector<2x256xbf16>, vector<256x64xbf16>, vector<2x64xf32> -> vector<2x64xf32>
    %141 = arith.addf %133, %140 : vector<2x64xf32>
    %142 = vector.extract_strided_slice %92 {offsets = [6, 0], sizes = [1, 256], strides = [1, 1]} : vector<32x256xf32> to vector<1x256xf32>
    %143 = vector.extract_strided_slice %92 {offsets = [22, 0], sizes = [1, 256], strides = [1, 1]} : vector<32x256xf32> to vector<1x256xf32>
    %144 = tpu.concatenate %142, %143 in 0 : vector<1x256xf32>, vector<1x256xf32> -> vector<2x256xf32>
    %145 = arith.truncf %144 : vector<2x256xf32> to vector<2x256xbf16>
    %c6 = arith.constant 6 : index
    %c0_50 = arith.constant 0 : index
    %c0_51 = arith.constant 0 : index
    %146 = vector.load %arg8[%c6, %c0_50, %c0_51] : memref<16x256x64xbf16, #tpu.memory_space<vmem>>, vector<1x256x64xbf16>
    %147 = vector.shape_cast %146 : vector<1x256x64xbf16> to vector<256x64xbf16>
    %cst_52 = arith.constant dense<0.000000e+00> : vector<2x64xf32>
    %148 = tpu.matmul %145, %147, %cst_52 {dimension_numbers = #tpu.dot_dimension_numbers<[1], [0], [0], [1], [0, 0, 1, 1], [], []>} : vector<2x256xbf16>, vector<256x64xbf16>, vector<2x64xf32> -> vector<2x64xf32>
    %149 = arith.addf %141, %148 : vector<2x64xf32>
    %150 = vector.extract_strided_slice %92 {offsets = [7, 0], sizes = [1, 256], strides = [1, 1]} : vector<32x256xf32> to vector<1x256xf32>
    %151 = vector.extract_strided_slice %92 {offsets = [23, 0], sizes = [1, 256], strides = [1, 1]} : vector<32x256xf32> to vector<1x256xf32>
    %152 = tpu.concatenate %150, %151 in 0 : vector<1x256xf32>, vector<1x256xf32> -> vector<2x256xf32>
    %153 = arith.truncf %152 : vector<2x256xf32> to vector<2x256xbf16>
    %c7 = arith.constant 7 : index
    %c0_53 = arith.constant 0 : index
    %c0_54 = arith.constant 0 : index
    %154 = vector.load %arg8[%c7, %c0_53, %c0_54] : memref<16x256x64xbf16, #tpu.memory_space<vmem>>, vector<1x256x64xbf16>
    %155 = vector.shape_cast %154 : vector<1x256x64xbf16> to vector<256x64xbf16>
    %cst_55 = arith.constant dense<0.000000e+00> : vector<2x64xf32>
    %156 = tpu.matmul %153, %155, %cst_55 {dimension_numbers = #tpu.dot_dimension_numbers<[1], [0], [0], [1], [0, 0, 1, 1], [], []>} : vector<2x256xbf16>, vector<256x64xbf16>, vector<2x64xf32> -> vector<2x64xf32>
    %157 = arith.addf %149, %156 : vector<2x64xf32>
    %158 = vector.extract_strided_slice %92 {offsets = [8, 0], sizes = [1, 256], strides = [1, 1]} : vector<32x256xf32> to vector<1x256xf32>
    %159 = vector.extract_strided_slice %92 {offsets = [24, 0], sizes = [1, 256], strides = [1, 1]} : vector<32x256xf32> to vector<1x256xf32>
    %160 = tpu.concatenate %158, %159 in 0 : vector<1x256xf32>, vector<1x256xf32> -> vector<2x256xf32>
    %161 = arith.truncf %160 : vector<2x256xf32> to vector<2x256xbf16>
    %c8 = arith.constant 8 : index
    %c0_56 = arith.constant 0 : index
    %c0_57 = arith.constant 0 : index
    %162 = vector.load %arg8[%c8, %c0_56, %c0_57] : memref<16x256x64xbf16, #tpu.memory_space<vmem>>, vector<1x256x64xbf16>
    %163 = vector.shape_cast %162 : vector<1x256x64xbf16> to vector<256x64xbf16>
    %cst_58 = arith.constant dense<0.000000e+00> : vector<2x64xf32>
    %164 = tpu.matmul %161, %163, %cst_58 {dimension_numbers = #tpu.dot_dimension_numbers<[1], [0], [0], [1], [0, 0, 1, 1], [], []>} : vector<2x256xbf16>, vector<256x64xbf16>, vector<2x64xf32> -> vector<2x64xf32>
    %165 = arith.addf %157, %164 : vector<2x64xf32>
    %166 = vector.extract_strided_slice %92 {offsets = [9, 0], sizes = [1, 256], strides = [1, 1]} : vector<32x256xf32> to vector<1x256xf32>
    %167 = vector.extract_strided_slice %92 {offsets = [25, 0], sizes = [1, 256], strides = [1, 1]} : vector<32x256xf32> to vector<1x256xf32>
    %168 = tpu.concatenate %166, %167 in 0 : vector<1x256xf32>, vector<1x256xf32> -> vector<2x256xf32>
    %169 = arith.truncf %168 : vector<2x256xf32> to vector<2x256xbf16>
    %c9 = arith.constant 9 : index
    %c0_59 = arith.constant 0 : index
    %c0_60 = arith.constant 0 : index
    %170 = vector.load %arg8[%c9, %c0_59, %c0_60] : memref<16x256x64xbf16, #tpu.memory_space<vmem>>, vector<1x256x64xbf16>
    %171 = vector.shape_cast %170 : vector<1x256x64xbf16> to vector<256x64xbf16>
    %cst_61 = arith.constant dense<0.000000e+00> : vector<2x64xf32>
    %172 = tpu.matmul %169, %171, %cst_61 {dimension_numbers = #tpu.dot_dimension_numbers<[1], [0], [0], [1], [0, 0, 1, 1], [], []>} : vector<2x256xbf16>, vector<256x64xbf16>, vector<2x64xf32> -> vector<2x64xf32>
    %173 = arith.addf %165, %172 : vector<2x64xf32>
    %174 = vector.extract_strided_slice %92 {offsets = [10, 0], sizes = [1, 256], strides = [1, 1]} : vector<32x256xf32> to vector<1x256xf32>
    %175 = vector.extract_strided_slice %92 {offsets = [26, 0], sizes = [1, 256], strides = [1, 1]} : vector<32x256xf32> to vector<1x256xf32>
    %176 = tpu.concatenate %174, %175 in 0 : vector<1x256xf32>, vector<1x256xf32> -> vector<2x256xf32>
    %177 = arith.truncf %176 : vector<2x256xf32> to vector<2x256xbf16>
    %c10 = arith.constant 10 : index
    %c0_62 = arith.constant 0 : index
    %c0_63 = arith.constant 0 : index
    %178 = vector.load %arg8[%c10, %c0_62, %c0_63] : memref<16x256x64xbf16, #tpu.memory_space<vmem>>, vector<1x256x64xbf16>
    %179 = vector.shape_cast %178 : vector<1x256x64xbf16> to vector<256x64xbf16>
    %cst_64 = arith.constant dense<0.000000e+00> : vector<2x64xf32>
    %180 = tpu.matmul %177, %179, %cst_64 {dimension_numbers = #tpu.dot_dimension_numbers<[1], [0], [0], [1], [0, 0, 1, 1], [], []>} : vector<2x256xbf16>, vector<256x64xbf16>, vector<2x64xf32> -> vector<2x64xf32>
    %181 = arith.addf %173, %180 : vector<2x64xf32>
    %182 = vector.extract_strided_slice %92 {offsets = [11, 0], sizes = [1, 256], strides = [1, 1]} : vector<32x256xf32> to vector<1x256xf32>
    %183 = vector.extract_strided_slice %92 {offsets = [27, 0], sizes = [1, 256], strides = [1, 1]} : vector<32x256xf32> to vector<1x256xf32>
    %184 = tpu.concatenate %182, %183 in 0 : vector<1x256xf32>, vector<1x256xf32> -> vector<2x256xf32>
    %185 = arith.truncf %184 : vector<2x256xf32> to vector<2x256xbf16>
    %c11 = arith.constant 11 : index
    %c0_65 = arith.constant 0 : index
    %c0_66 = arith.constant 0 : index
    %186 = vector.load %arg8[%c11, %c0_65, %c0_66] : memref<16x256x64xbf16, #tpu.memory_space<vmem>>, vector<1x256x64xbf16>
    %187 = vector.shape_cast %186 : vector<1x256x64xbf16> to vector<256x64xbf16>
    %cst_67 = arith.constant dense<0.000000e+00> : vector<2x64xf32>
    %188 = tpu.matmul %185, %187, %cst_67 {dimension_numbers = #tpu.dot_dimension_numbers<[1], [0], [0], [1], [0, 0, 1, 1], [], []>} : vector<2x256xbf16>, vector<256x64xbf16>, vector<2x64xf32> -> vector<2x64xf32>
    %189 = arith.addf %181, %188 : vector<2x64xf32>
    %190 = vector.extract_strided_slice %92 {offsets = [12, 0], sizes = [1, 256], strides = [1, 1]} : vector<32x256xf32> to vector<1x256xf32>
    %191 = vector.extract_strided_slice %92 {offsets = [28, 0], sizes = [1, 256], strides = [1, 1]} : vector<32x256xf32> to vector<1x256xf32>
    %192 = tpu.concatenate %190, %191 in 0 : vector<1x256xf32>, vector<1x256xf32> -> vector<2x256xf32>
    %193 = arith.truncf %192 : vector<2x256xf32> to vector<2x256xbf16>
    %c12 = arith.constant 12 : index
    %c0_68 = arith.constant 0 : index
    %c0_69 = arith.constant 0 : index
    %194 = vector.load %arg8[%c12, %c0_68, %c0_69] : memref<16x256x64xbf16, #tpu.memory_space<vmem>>, vector<1x256x64xbf16>
    %195 = vector.shape_cast %194 : vector<1x256x64xbf16> to vector<256x64xbf16>
    %cst_70 = arith.constant dense<0.000000e+00> : vector<2x64xf32>
    %196 = tpu.matmul %193, %195, %cst_70 {dimension_numbers = #tpu.dot_dimension_numbers<[1], [0], [0], [1], [0, 0, 1, 1], [], []>} : vector<2x256xbf16>, vector<256x64xbf16>, vector<2x64xf32> -> vector<2x64xf32>
    %197 = arith.addf %189, %196 : vector<2x64xf32>
    %198 = vector.extract_strided_slice %92 {offsets = [13, 0], sizes = [1, 256], strides = [1, 1]} : vector<32x256xf32> to vector<1x256xf32>
    %199 = vector.extract_strided_slice %92 {offsets = [29, 0], sizes = [1, 256], strides = [1, 1]} : vector<32x256xf32> to vector<1x256xf32>
    %200 = tpu.concatenate %198, %199 in 0 : vector<1x256xf32>, vector<1x256xf32> -> vector<2x256xf32>
    %201 = arith.truncf %200 : vector<2x256xf32> to vector<2x256xbf16>
    %c13 = arith.constant 13 : index
    %c0_71 = arith.constant 0 : index
    %c0_72 = arith.constant 0 : index
    %202 = vector.load %arg8[%c13, %c0_71, %c0_72] : memref<16x256x64xbf16, #tpu.memory_space<vmem>>, vector<1x256x64xbf16>
    %203 = vector.shape_cast %202 : vector<1x256x64xbf16> to vector<256x64xbf16>
    %cst_73 = arith.constant dense<0.000000e+00> : vector<2x64xf32>
    %204 = tpu.matmul %201, %203, %cst_73 {dimension_numbers = #tpu.dot_dimension_numbers<[1], [0], [0], [1], [0, 0, 1, 1], [], []>} : vector<2x256xbf16>, vector<256x64xbf16>, vector<2x64xf32> -> vector<2x64xf32>
    %205 = arith.addf %197, %204 : vector<2x64xf32>
    %206 = vector.extract_strided_slice %92 {offsets = [14, 0], sizes = [1, 256], strides = [1, 1]} : vector<32x256xf32> to vector<1x256xf32>
    %207 = vector.extract_strided_slice %92 {offsets = [30, 0], sizes = [1, 256], strides = [1, 1]} : vector<32x256xf32> to vector<1x256xf32>
    %208 = tpu.concatenate %206, %207 in 0 : vector<1x256xf32>, vector<1x256xf32> -> vector<2x256xf32>
    %209 = arith.truncf %208 : vector<2x256xf32> to vector<2x256xbf16>
    %c14 = arith.constant 14 : index
    %c0_74 = arith.constant 0 : index
    %c0_75 = arith.constant 0 : index
    %210 = vector.load %arg8[%c14, %c0_74, %c0_75] : memref<16x256x64xbf16, #tpu.memory_space<vmem>>, vector<1x256x64xbf16>
    %211 = vector.shape_cast %210 : vector<1x256x64xbf16> to vector<256x64xbf16>
    %cst_76 = arith.constant dense<0.000000e+00> : vector<2x64xf32>
    %212 = tpu.matmul %209, %211, %cst_76 {dimension_numbers = #tpu.dot_dimension_numbers<[1], [0], [0], [1], [0, 0, 1, 1], [], []>} : vector<2x256xbf16>, vector<256x64xbf16>, vector<2x64xf32> -> vector<2x64xf32>
    %213 = arith.addf %205, %212 : vector<2x64xf32>
    %214 = vector.extract_strided_slice %92 {offsets = [15, 0], sizes = [1, 256], strides = [1, 1]} : vector<32x256xf32> to vector<1x256xf32>
    %215 = vector.extract_strided_slice %92 {offsets = [31, 0], sizes = [1, 256], strides = [1, 1]} : vector<32x256xf32> to vector<1x256xf32>
    %216 = tpu.concatenate %214, %215 in 0 : vector<1x256xf32>, vector<1x256xf32> -> vector<2x256xf32>
    %217 = arith.truncf %216 : vector<2x256xf32> to vector<2x256xbf16>
    %c15 = arith.constant 15 : index
    %c0_77 = arith.constant 0 : index
    %c0_78 = arith.constant 0 : index
    %218 = vector.load %arg8[%c15, %c0_77, %c0_78] : memref<16x256x64xbf16, #tpu.memory_space<vmem>>, vector<1x256x64xbf16>
    %219 = vector.shape_cast %218 : vector<1x256x64xbf16> to vector<256x64xbf16>
    %cst_79 = arith.constant dense<0.000000e+00> : vector<2x64xf32>
    %220 = tpu.matmul %217, %219, %cst_79 {dimension_numbers = #tpu.dot_dimension_numbers<[1], [0], [0], [1], [0, 0, 1, 1], [], []>} : vector<2x256xbf16>, vector<256x64xbf16>, vector<2x64xf32> -> vector<2x64xf32>
    %221 = arith.addf %213, %220 : vector<2x64xf32>
    %c0_80 = arith.constant 0 : index
    %c0_81 = arith.constant 0 : index
    %222 = vector.load %arg9[%c0_80, %c0_81] : memref<1x64xf32, #tpu.memory_space<vmem>>, vector<1x64xf32>
    %223 = vector.broadcast %222 : vector<1x64xf32> to vector<2x64xf32>
    %224 = arith.addf %221, %223 : vector<2x64xf32>
    %cst_82 = arith.constant 0.000000e+00 : f32
    %225 = vector.broadcast %cst_82 : f32 to vector<2x64xf32>
    %226 = arith.cmpf oge, %224, %225 : vector<2x64xf32>
    %cst_83 = arith.constant 0.00999999977 : f32
    %227 = vector.broadcast %cst_83 : f32 to vector<2x64xf32>
    %228 = arith.mulf %227, %224 : vector<2x64xf32>
    %229 = arith.select %226, %224, %228 : vector<2x64xi1>, vector<2x64xf32>
    %c0_84 = arith.constant 0 : index
    %c0_85 = arith.constant 0 : index
    %230 = vector.load %arg10[%c0_84, %c0_85] : memref<64x10xf32, #tpu.memory_space<vmem>>, vector<64x10xf32>
    %cst_86 = arith.constant dense<0.000000e+00> : vector<2x10xf32>
    %231 = tpu.matmul %229, %230, %cst_86 {dimension_numbers = #tpu.dot_dimension_numbers<[1], [0], [0], [1], [0, 0, 1, 1], [], []>} : vector<2x64xf32>, vector<64x10xf32>, vector<2x10xf32> -> vector<2x10xf32>
    %c0_87 = arith.constant 0 : index
    %c0_88 = arith.constant 0 : index
    %232 = vector.load %arg11[%c0_87, %c0_88] : memref<1x10xf32, #tpu.memory_space<vmem>>, vector<1x10xf32>
    %233 = vector.broadcast %232 : vector<1x10xf32> to vector<2x10xf32>
    %234 = arith.addf %231, %233 : vector<2x10xf32>
    %c0_89 = arith.constant 0 : index
    %c0_90 = arith.constant 0 : index
    %235 = vector.load %arg12[%c0_89, %c0_90] : memref<2x10xf32, #tpu.memory_space<vmem>>, vector<2x10xf32>
    tpu.vector_store %arg12[%c0_89, %c0_90], %234 {strides = array<i32>} : memref<2x10xf32, #tpu.memory_space<vmem>>, vector<2x10xf32>,
    return
  }
}

</mosaic_0001>

<bundles_post_ra>
// kernel: mnist_forward.3
= control target key start
LH: loop header
LB: loop body
LE: loop exit
PB: predicated region body
PF: predicated region fallthrough
CT: control target
= control target key end

     0   :  { %v4387_v0 = vmov 0   ;;  %v4388_v5 = vmov 0.0   ;;  %vm4389_vm0 = vmmov 0   ;;  %vm406_vm1 = vcmask 1043456   ;;  %s8516_s4 = inlined_call_operand.vmem [shape: f32[392,1], index: 4, kind: input, shape index: {}]   ;;  %s8517_s1 = inlined_call_operand.vmem [shape: bf16[56,3], index: 1, kind: input, shape index: {}]   ;;  %s8518_s0 = inlined_call_operand.vmem [shape: f32[392,56], index: 0, kind: input, shape index: {}]   ;;  %s8519_s6 = inlined_call_operand.vmem [shape: f32[392,1], index: 6, kind: input, shape index: {}]   ;;  %s8520_s7 = inlined_call_operand.vmem [shape: f32[392,1], index: 7, kind: input, shape index: {}]   ;;  %s8521_s5 = inlined_call_operand.vmem [shape: f32[392,1], index: 5, kind: input, shape index: {}]   ;;  %s8522_s2 = inlined_call_operand.vmem [shape: f32[1,3], index: 2, kind: input, shape index: {}]   ;;  %s8523_s3 = inlined_call_operand.vmem [shape: f32[1,3], index: 3, kind: input, shape index: {}]   ;;  %s8524_s8 = inlined_call_operand.vmem [shape: f32[392,3], index: 8, kind: output, shape index: {}]  }
   0x1   :  { %4376 = vset.pattern.permute.xlu1 %v4387_v0  ;;  %4375 = vset.pattern.permute.xlu0 %v4387_v0  ;;  %v90_v1 = vld [vmem:[%s8516_s4 + $0x10] sm:$0xff]  ;;  %v88_v2 = vld [vmem:[%s8516_s4] sm:$0xff]  ;;  %v91_v4 = vld [vmem:[%s8516_s4 + $0x18] sm:$0xff]  ;;  %vm330_vm2 = vcmask 457728   ;;  %vm789_vm6 = vcmask 23552  }
   0x2   :  { %1463 = vperm.xlu1 %4376, %v90_v1   ;;  %1453 = vperm.xlu0 %4375, %v88_v2   ;;  %v4377_v3 = vld [vmem:[%s8517_s1] sm:$0xff]   ;;  %v89_v6 = vld [vmem:[%s8516_s4 + $0x8] sm:$0xff]  ;;  %v4379_v10 = vld [vmem:[%s8517_s1 + $0x10] sm:$0xff]  }
   0x3   :  { %4256 = vmatprep.subr.bf16.mxu0 %v4388_v5  ;;  %4264 = vmatprep.mubr.msk.bf16.mxu0 %vm4389_vm0, %v4388_v5  ;;  %v4378_v7 = vld [vmem:[%s8517_s1 + $0x8] sm:$0xff]   ;;  %v92_v9 = vld [vmem:[%s8516_s4 + $0x20] sm:$0xff]  ;;  %v4380_v11 = vld [vmem:[%s8517_s1 + $0x18] ss:$0 sps:$4 sm:$0xff]  }
   0x4   :  { %4257 = vmatpush3.bf16.msra.mxu0 %v4377_v3  ;;  %4364 = vmatprep.subr.bf16.mxu1 %v4388_v5  ;;  %v93_v8 = vld [vmem:[%s8516_s4 + $0x28] sm:$0xff]  ;;  %v95_v12 = vld [vmem:[%s8516_s4 + $0x38] sm:$0xff]  ;;  %v94_v13 = vld [vmem:[%s8516_s4 + $0x30] sm:$0xff]  ;;  %v408_v16 = vsel %vm406_vm1, %v4380_v11, 0 }
   0x5   :  { %4258 = vmatprep.subr.bf16.mxu0 %v4388_v5  ;;  %4368 = vmatpush3.bf16.msra.mxu1 %v4377_v3  ;;  %v30_v14 = vld [vmem:[%s8518_s0] sm:$0xff]  ;;  %v31_v15 = vld [vmem:[%s8518_s0 + $0x8] sm:$0xff]  ;;  %v99_v20 = vld [vmem:[%s8516_s4 + $0x58] sm:$0xff] }
   0x6   :  { %1468 = vperm.xlu1 %4376, %v91_v4   ;;  %1458 = vperm.xlu0 %4375, %v89_v6   ;;  %v97_v17 = vld [vmem:[%s8516_s4 + $0x48] sm:$0xff]  ;;  %v96_v18 = vld [vmem:[%s8516_s4 + $0x40] sm:$0xff]  ;;  %v284_v19 = vpack.c.bf16 %v31_v15, %v30_v14  ;;  %v98_v21 = vld [vmem:[%s8516_s4 + $0x50] sm:$0xff] }
   0x7   :  { %4365 = vmatprep.subr.bf16.mxu1 %v4388_v5  ;;  %4316 = vmatprep.mubr.msk.bf16.mxu1 %vm4389_vm0, %v4388_v5  ;;  %v32_v22 = vld [vmem:[%s8518_s0 + $0x10] sm:$0xff]  ;;  %v33_v23 = vld [vmem:[%s8518_s0 + $0x18] sm:$0xff]  ;;  %v101_v27 = vld [vmem:[%s8516_s4 + $0x68] sm:$0xff] }
   0x8   :  { %4259 = vmatpush3.bf16.msra.mxu0 %v4378_v7  ;;  %v56_v24 = vld [vmem:[%s8518_s0 + $0xd0] sm:$0xff]  ;;  %v57_v25 = vld [vmem:[%s8518_s0 + $0xd8] sm:$0xff]  ;;  %v100_v28 = vld [vmem:[%s8516_s4 + $0x60] sm:$0xff]  ;;  %v285_v29 = vpack.c.bf16 %v33_v23, %v32_v22 }
   0x9   :  { %4260 = vmatprep.subr.bf16.mxu0 %v4388_v5  ;;  %4369 = vmatpush3.bf16.msra.mxu1 %v4378_v7  ;;  %v297_v26 = vpack.c.bf16 %v57_v25, %v56_v24  ;;  %v58_v30 = vld [vmem:[%s8518_s0 + $0xe0] sm:$0xff]  ;;  %v59_v31 = vld [vmem:[%s8518_s0 + $0xe8] sm:$0xff]  ;;  %v103_v32 = vld [vmem:[%s8516_s4 + $0x78] sm:$0xff] }
   0xa   :  { %1478 = vperm.xlu1 %4376, %v93_v8   ;;  %1473 = vperm.xlu0 %4375, %v92_v9   ;;  %v102_v33 = vld [vmem:[%s8516_s4 + $0x70] sm:$0xff]  ;;  %v34_v34 = vld [vmem:[%s8518_s0 + $0x20] sm:$0xff]  ;;  %v35_v35 = vld [vmem:[%s8518_s0 + $0x28] sm:$0xff]  ;;  %v298_v36 = vpack.c.bf16 %v59_v31, %v58_v30 }
   0xb   :  { %4366 = vmatprep.subr.bf16.mxu1 %v4388_v5  ;;  %v105_v37 = vld [vmem:[%s8516_s4 + $0x88] sm:$0xff]  ;;  %v104_v38 = vld [vmem:[%s8516_s4 + $0x80] sm:$0xff]  ;;  %v286_v39 = vpack.c.bf16 %v35_v35, %v34_v34  ;;  %v60_v40 = vld [vmem:[%s8518_s0 + $0xf0] sm:$0xff] }
   0xc   :  { %4261 = vmatpush3.bf16.msra.mxu0 %v4379_v10  ;;  %v61_v41 = vld [vmem:[%s8518_s0 + $0xf8] sm:$0xff]  ;;  %v106_v43 = vld [vmem:[%s8516_s4 + $0x90] sm:$0xff]  ;;  %v109_v47 = vld [vmem:[%s8516_s4 + $0xa8] sm:$0xff] }
   0xd   :  { %4262 = vmatprep.subr.bf16.mxu0 %v4388_v5  ;;  %4370 = vmatpush3.bf16.msra.mxu1 %v4379_v10  ;;  %v107_v42 = vld [vmem:[%s8516_s4 + $0x98] sm:$0xff]  ;;  %v36_v44 = vld [vmem:[%s8518_s0 + $0x30] sm:$0xff]  ;;  %v299_v46 = vpack.c.bf16 %v61_v41, %v60_v40  ;;  %v108_v48 = vld [vmem:[%s8516_s4 + $0xa0] sm:$0xff] }
   0xe   :  { %1488 = vperm.xlu1 %4376, %v95_v12   ;;  %1483 = vperm.xlu0 %4375, %v94_v13   ;;  %v37_v45 = vld [vmem:[%s8518_s0 + $0x38] sm:$0xff]  ;;  %v62_v50 = vld [vmem:[%s8518_s0 + $0x100] sm:$0xff]  ;;  %v63_v51 = vld [vmem:[%s8518_s0 + $0x108] sm:$0xff] }
   0xf   :  { %4367 = vmatprep.subr.bf16.mxu1 %v4388_v5  ;;  %v287_v49 = vpack.c.bf16 %v37_v45, %v36_v44  ;;  %v111_v52 = vld [vmem:[%s8516_s4 + $0xb8] sm:$0xff]  ;;  %v110_v53 = vld [vmem:[%s8516_s4 + $0xb0] sm:$0xff]  ;;  %v38_v54 = vld [vmem:[%s8518_s0 + $0x40] sm:$0xff]  ;;  %v300_v56 = vpack.c.bf16 %v63_v51, %v62_v50 }
  0x10   :  { %4263 = vmatpush3.bf16.msra.mxu0 %v408_v16  ;;  %v39_v55 = vld [vmem:[%s8518_s0 + $0x48] sm:$0xff]  ;;  %v112_v58 = vld [vmem:[%s8516_s4 + $0xc0] sm:$0xff]  ;;  %v64_v60 = vld [vmem:[%s8518_s0 + $0x110] sm:$0xff] }
  0x11   :  { %4371 = vmatpush3.bf16.msra.mxu1 %v408_v16  ;;  %v113_v57 = vld [vmem:[%s8516_s4 + $0xc8] sm:$0xff]  ;;  %v288_v59 = vpack.c.bf16 %v39_v55, %v38_v54  ;;  %v65_v61 = vld [vmem:[%s8518_s0 + $0x118] sm:$0xff]  ;;  %v114_v63 = vld [vmem:[%s8516_s4 + $0xd0] sm:$0xff] }
  0x12   :  { %1498 = vperm.xlu1 %4376, %v97_v17   ;;  %1493 = vperm.xlu0 %4375, %v96_v18   ;;  %v115_v62 = vld [vmem:[%s8516_s4 + $0xd8] sm:$0xff]  ;;  %v40_v0 = vld [vmem:[%s8518_s0 + $0x50] sm:$0xff]  ;;  %v301_v2 = vpack.c.bf16 %v65_v61, %v64_v60  ;;  %v117_v3 = vld [vmem:[%s8516_s4 + $0xe8] sm:$0xff] }
  0x13   :  { %4265 = vmatmul.mubr.msk.bf16.vlgmr.msra.gmra.mrb[0].mxu0 %vm330_vm2, %v284_v19  ;;  %v41_v1 = vld [vmem:[%s8518_s0 + $0x58] sm:$0xff]  ;;  %v116_v4 = vld [vmem:[%s8516_s4 + $0xe0] sm:$0xff]  ;;  %v67_v8 = vld [vmem:[%s8518_s0 + $0x128] sm:$0xff] }
  0x14   :  { %4268 = vmatprep.mubr.msk.bf16.mxu0 %vm4389_vm0, %v4388_v5  ;;  %4317 = vmatmul.mubr.msk.bf16.vlgmr.msra.gmra.mrb[0].mxu1 %vm330_vm2, %v297_v26  ;;  %v289_v6 = vpack.c.bf16 %v41_v1, %v40_v0  ;;  %v66_v7 = vld [vmem:[%s8518_s0 + $0x120] sm:$0xff]  ;;  %v119_v9 = vld [vmem:[%s8516_s4 + $0xf8] sm:$0xff]  ;;  %v118_v10 = vld [vmem:[%s8516_s4 + $0xf0] sm:$0xff] }
  0x15   :  { %4320 = vmatprep.mubr.msk.bf16.mxu1 %vm4389_vm0, %v4388_v5  ;;  %v42_v11 = vld [vmem:[%s8518_s0 + $0x60] sm:$0xff]  ;;  %v43_v12 = vld [vmem:[%s8518_s0 + $0x68] sm:$0xff]  ;;  %v302_v13 = vpack.c.bf16 %v67_v8, %v66_v7  ;;  %v68_v17 = vld [vmem:[%s8518_s0 + $0x130] sm:$0xff] }
  0x16   :  { %1508 = vperm.xlu1 %4376, %v99_v20   ;;  %1503 = vperm.xlu0 %4375, %v98_v21   ;;  %v121_v14 = vld [vmem:[%s8516_s4 + $0x108] sm:$0xff]  ;;  %v120_v15 = vld [vmem:[%s8516_s4 + $0x100] sm:$0xff]  ;;  %v290_v16 = vpack.c.bf16 %v43_v12, %v42_v11  ;;  %v69_v18 = vld [vmem:[%s8518_s0 + $0x138] sm:$0xff] }
  0x17   :  { %v123_v19 = vld [vmem:[%s8516_s4 + $0x118] sm:$0xff]  ;;  %v122_v20 = vld [vmem:[%s8516_s4 + $0x110] sm:$0xff]  ;;  %v303_v23 = vpack.c.bf16 %v69_v18, %v68_v17  ;;  %v125_v24 = vld [vmem:[%s8516_s4 + $0x128] sm:$0xff] }
  0x18   :  { %v44_v21 = vld [vmem:[%s8518_s0 + $0x70] sm:$0xff]  ;;  %v45_v22 = vld [vmem:[%s8518_s0 + $0x78] sm:$0xff]  ;;  %v124_v25 = vld [vmem:[%s8516_s4 + $0x120] sm:$0xff] }
  0x19   :  { %v291_v26 = vpack.c.bf16 %v45_v22, %v44_v21  ;;  %v126_v30 = vld [vmem:[%s8516_s4 + $0x130] sm:$0xff]  ;;  %v46_v31 = vld [vmem:[%s8518_s0 + $0x80] sm:$0xff]  ;;  %v129_v34 = vld [vmem:[%s8516_s4 + $0x148] sm:$0xff] }
  0x1a   :  { %1518 = vperm.xlu1 %4376, %v101_v27   ;;  %1513 = vperm.xlu0 %4375, %v100_v28   ;;  %v70_v27 = vld [vmem:[%s8518_s0 + $0x140] sm:$0xff]  ;;  %v71_v28 = vld [vmem:[%s8518_s0 + $0x148] sm:$0xff]  ;;  %v130_v40 = vld [vmem:[%s8516_s4 + $0x150] sm:$0xff] }
  0x1b   :  { %4269 = vmatmul.mubr.msk.bf16.gmra.mrb[4].mxu0 %vm330_vm2, %v285_v29  ;;  %v127_v29 = vld [vmem:[%s8516_s4 + $0x138] sm:$0xff]  ;;  %v128_v35 = vld [vmem:[%s8516_s4 + $0x140] sm:$0xff]  ;;  %v48_v41 = vld [vmem:[%s8518_s0 + $0x90] sm:$0xff] }
  0x1c   :  { %4272 = vmatprep.mubr.msk.bf16.mxu0 %vm4389_vm0, %v4388_v5  ;;  %4321 = vmatmul.mubr.msk.bf16.gmra.mrb[4].mxu1 %vm330_vm2, %v298_v36  ;;  %v133_v44 = vld [vmem:[%s8516_s4 + $0x168] sm:$0xff]  ;;  %v132_v45 = vld [vmem:[%s8516_s4 + $0x160] sm:$0xff]  ;;  %v134_v50 = vld [vmem:[%s8516_s4 + $0x170] sm:$0xff] }
  0x1d   :  { %4324 = vmatprep.mubr.msk.bf16.mxu1 %vm4389_vm0, %v4388_v5  ;;  %v50_v51 = vld [vmem:[%s8518_s0 + $0xa0] sm:$0xff]  ;;  %v187_v60 = vld [vmem:[%s8519_s6 + $0x8] sm:$0xff]  ;;  %v52_v61 = vld [vmem:[%s8518_s0 + $0xb0] sm:$0xff] }
  0x1e   :  { %1528 = vperm.xlu1 %4376, %v103_v32   ;;  %1523 = vperm.xlu0 %4375, %v102_v33   ;;  %v47_v32 = vld [vmem:[%s8518_s0 + $0x88] sm:$0xff]  ;;  %v304_v33 = vpack.c.bf16 %v71_v28, %v70_v27  ;;  %v186_v54 = vld [vmem:[%s8519_s6] sm:$0xff]  ;;  %v189_v1 = vld [vmem:[%s8519_s6 + $0x18] sm:$0xff] }
  0x1f   :  { %v292_v36 = vpack.c.bf16 %v47_v32, %v46_v31  ;;  %v136_v55 = vld [vmem:[%s8516_s4 + $0x180] sm:$0xff]  ;;  %v55_v8 = vld [vmem:[%s8518_s0 + $0xc8] sm:$0xff]  ;;  %v193_v11 = vld [vmem:[%s8519_s6 + $0x38] sm:$0xff] }
  0x20   :  { %v190_v0 = vld [vmem:[%s8519_s6 + $0x20] sm:$0xff]  ;;  %v196_v12 = vld [vmem:[%s8519_s6 + $0x50] sm:$0xff]  ;;  %v199_v17 = vld [vmem:[%s8519_s6 + $0x68] sm:$0xff] }
  0x21   :  { %v54_v7 = vld [vmem:[%s8518_s0 + $0xc0] sm:$0xff]  ;;  %v204_v22 = vld [vmem:[%s8519_s6 + $0x90] sm:$0xff]  ;;  %v205_v27 = vld [vmem:[%s8519_s6 + $0x98] sm:$0xff] }
  0x22   :  { %1538 = vperm.xlu1 %4376, %v105_v37   ;;  %1533 = vperm.xlu0 %4375, %v104_v38   ;;  %v72_v37 = vld [vmem:[%s8518_s0 + $0x150] sm:$0xff]  ;;  %v73_v38 = vld [vmem:[%s8518_s0 + $0x158] sm:$0xff]  ;;  %v202_v18 = vld [vmem:[%s8519_s6 + $0x80] sm:$0xff] }
  0x23   :  { %4273 = vmatmul.mubr.msk.bf16.gmra.mrb[8].mxu0 %vm330_vm2, %v286_v39  ;;  %v131_v39 = vld [vmem:[%s8516_s4 + $0x158] sm:$0xff]  ;;  %v207_v31 = vld [vmem:[%s8519_s6 + $0xa8] sm:$0xff] }
  0x24   :  { %4276 = vmatprep.mubr.msk.bf16.mxu0 %vm4389_vm0, %v4388_v5  ;;  %4325 = vmatmul.mubr.msk.bf16.gmra.mrb[8].mxu1 %vm330_vm2, %v299_v46 }
  0x25   :  { %4328 = vmatprep.mubr.msk.bf16.mxu1 %vm4389_vm0, %v4388_v5 }
  0x26   :  { %1548 = vperm.xlu1 %4376, %v107_v42   ;;  %1543 = vperm.xlu0 %4375, %v106_v43   ;;  %v49_v42 = vld [vmem:[%s8518_s0 + $0x98] sm:$0xff]  ;;  %v305_v43 = vpack.c.bf16 %v73_v38, %v72_v37  ;;  %v212_v38 = vld [vmem:[%s8519_s6 + $0xd0] sm:$0xff] }
  0x27   :  { %v293_v46 = vpack.c.bf16 %v49_v42, %v48_v41  ;;  %v214_v42 = vld [vmem:[%s8519_s6 + $0xe0] sm:$0xff] }
  0x2a   :  { %1558 = vperm.xlu1 %4376, %v109_v47   ;;  %1553 = vperm.xlu0 %4375, %v108_v48   ;;  %v74_v47 = vld [vmem:[%s8518_s0 + $0x160] sm:$0xff]  ;;  %v75_v48 = vld [vmem:[%s8518_s0 + $0x168] sm:$0xff] }
  0x2b   :  { %4277 = vmatmul.mubr.msk.bf16.gmra.mrb[12].mxu0 %vm330_vm2, %v287_v49  ;;  %v135_v49 = vld [vmem:[%s8516_s4 + $0x178] sm:$0xff] }
  0x2c   :  { %4280 = vmatprep.mubr.msk.bf16.mxu0 %vm4389_vm0, %v4388_v5  ;;  %4329 = vmatmul.mubr.msk.bf16.gmra.mrb[12].mxu1 %vm330_vm2, %v300_v56 }
  0x2d   :  { %4332 = vmatprep.mubr.msk.bf16.mxu1 %vm4389_vm0, %v4388_v5 }
  0x2e   :  { %1568 = vperm.xlu1 %4376, %v111_v52   ;;  %1563 = vperm.xlu0 %4375, %v110_v53   ;;  %v51_v52 = vld [vmem:[%s8518_s0 + $0xa8] sm:$0xff]  ;;  %v306_v53 = vpack.c.bf16 %v75_v48, %v74_v47 }
  0x2f   :  { %v294_v56 = vpack.c.bf16 %v51_v52, %v50_v51  ;;  %v215_v47 = vld [vmem:[%s8519_s6 + $0xe8] sm:$0xff]  ;;  %v217_v51 = vld [vmem:[%s8519_s6 + $0xf8] sm:$0xff] }
  0x32   :  { %1578 = vperm.xlu1 %4376, %v113_v57   ;;  %1573 = vperm.xlu0 %4375, %v112_v58   ;;  %v76_v57 = vld [vmem:[%s8518_s0 + $0x170] sm:$0xff]  ;;  %v77_v58 = vld [vmem:[%s8518_s0 + $0x178] sm:$0xff] }
  0x33   :  { %4281 = vmatmul.mubr.msk.bf16.gmra.mrb[16].mxu0 %vm330_vm2, %v288_v59  ;;  %v188_v59 = vld [vmem:[%s8519_s6 + $0x10] sm:$0xff] }
  0x34   :  { %4284 = vmatprep.mubr.msk.bf16.mxu0 %vm4389_vm0, %v4388_v5  ;;  %4333 = vmatmul.mubr.msk.bf16.gmra.mrb[16].mxu1 %vm330_vm2, %v301_v2 }
  0x35   :  { %4336 = vmatprep.mubr.msk.bf16.mxu1 %vm4389_vm0, %v4388_v5 }
  0x36   :  { %1588 = vperm.xlu1 %4376, %v115_v62   ;;  %1583 = vperm.xlu0 %4375, %v114_v63   ;;  %v53_v62 = vld [vmem:[%s8518_s0 + $0xb8] sm:$0xff]  ;;  %v307_v63 = vpack.c.bf16 %v77_v58, %v76_v57  ;;  %v222_v58 = vld [vmem:[%s8519_s6 + $0x120] sm:$0xff] }
  0x37   :  { %v295_v2 = vpack.c.bf16 %v53_v62, %v52_v61  ;;  %v224_v62 = vld [vmem:[%s8519_s6 + $0x130] sm:$0xff] }
  0x3a   :  { %1598 = vperm.xlu1 %4376, %v117_v3   ;;  %1593 = vperm.xlu0 %4375, %v116_v4   ;;  %v78_v3 = vld [vmem:[%s8518_s0 + $0x180] sm:$0xff]  ;;  %v192_v4 = vld [vmem:[%s8519_s6 + $0x30] sm:$0xff] }
  0x3b   :  { %4285 = vmatmul.mubr.msk.bf16.gmra.mrb[20].mxu0 %vm330_vm2, %v289_v6  ;;  %v191_v6 = vld [vmem:[%s8519_s6 + $0x28] sm:$0xff] }
  0x3c   :  { %4288 = vmatprep.mubr.msk.bf16.mxu0 %vm4389_vm0, %v4388_v5  ;;  %4337 = vmatmul.mubr.msk.bf16.gmra.mrb[20].mxu1 %vm330_vm2, %v302_v13  ;;  %v195_v13 = vld [vmem:[%s8519_s6 + $0x48] sm:$0xff] }
  0x3d   :  { %4340 = vmatprep.mubr.msk.bf16.mxu1 %vm4389_vm0, %v4388_v5 }
  0x3e   :  { %1608 = vperm.xlu1 %4376, %v119_v9   ;;  %1603 = vperm.xlu0 %4375, %v118_v10   ;;  %v308_v9 = vpack.c.bf16 %v78_v3, %v78_v3  ;;  %v194_v10 = vld [vmem:[%s8519_s6 + $0x40] sm:$0xff]  ;;  %v225_v3 = vld [vmem:[%s8519_s6 + $0x138] sm:$0xff] }
  0x42   :  { %1618 = vperm.xlu1 %4376, %v121_v14   ;;  %1613 = vperm.xlu0 %4375, %v120_v15   ;;  %v198_v14 = vld [vmem:[%s8519_s6 + $0x60] sm:$0xff]  ;;  %v197_v15 = vld [vmem:[%s8519_s6 + $0x58] sm:$0xff] }
  0x43   :  { %4289 = vmatmul.mubr.msk.bf16.gmra.mrb[24].mxu0 %vm330_vm2, %v290_v16  ;;  %v200_v16 = vld [vmem:[%s8519_s6 + $0x70] sm:$0xff] }
  0x44   :  { %4292 = vmatprep.mubr.msk.bf16.mxu0 %vm4389_vm0, %v4388_v5  ;;  %4341 = vmatmul.mubr.msk.bf16.gmra.mrb[24].mxu1 %vm330_vm2, %v303_v23  ;;  %v203_v23 = vld [vmem:[%s8519_s6 + $0x88] sm:$0xff] }
  0x45   :  { %4344 = vmatprep.mubr.msk.bf16.mxu1 %vm4389_vm0, %v4388_v5 }
  0x46   :  { %1628 = vperm.xlu1 %4376, %v123_v19   ;;  %1623 = vperm.xlu0 %4375, %v122_v20   ;;  %v201_v19 = vld [vmem:[%s8519_s6 + $0x78] sm:$0xff] }
  0x4a   :  { %1638 = vperm.xlu1 %4376, %v125_v24   ;;  %1633 = vperm.xlu0 %4375, %v124_v25  }
  0x4b   :  { %4293 = vmatmul.mubr.msk.bf16.gmra.mrb[28].mxu0 %vm330_vm2, %v291_v26  ;;  %v206_v26 = vld [vmem:[%s8519_s6 + $0xa0] sm:$0xff] }
  0x4c   :  { %4296 = vmatprep.mubr.msk.bf16.mxu0 %vm4389_vm0, %v4388_v5  ;;  %4345 = vmatmul.mubr.msk.bf16.gmra.mrb[28].mxu1 %vm330_vm2, %v304_v33 }
  0x4d   :  { %4348 = vmatprep.mubr.msk.bf16.mxu1 %vm4389_vm0, %v4388_v5 }
  0x4e   :  { %1648 = vperm.xlu1 %4376, %v127_v29   ;;  %1643 = vperm.xlu0 %4375, %v126_v30   ;;  %v208_v30 = vld [vmem:[%s8519_s6 + $0xb0] sm:$0xff] }
  0x52   :  { %1658 = vperm.xlu1 %4376, %v129_v34   ;;  %1653 = vperm.xlu0 %4375, %v128_v35   ;;  %v210_v34 = vld [vmem:[%s8519_s6 + $0xc0] sm:$0xff]  ;;  %v209_v35 = vld [vmem:[%s8519_s6 + $0xb8] sm:$0xff] }
  0x53   :  { %4297 = vmatmul.mubr.msk.bf16.gmra.mrb[32].mxu0 %vm330_vm2, %v292_v36 }
  0x54   :  { %4300 = vmatprep.mubr.msk.bf16.mxu0 %vm4389_vm0, %v4388_v5  ;;  %4349 = vmatmul.mubr.msk.bf16.gmra.mrb[32].mxu1 %vm330_vm2, %v305_v43  ;;  %v213_v43 = vld [vmem:[%s8519_s6 + $0xd8] sm:$0xff] }
  0x55   :  { %4352 = vmatprep.mubr.msk.bf16.mxu1 %vm4389_vm0, %v4388_v5 }
  0x56   :  { %1668 = vperm.xlu1 %4376, %v131_v39   ;;  %1663 = vperm.xlu0 %4375, %v130_v40   ;;  %v211_v39 = vld [vmem:[%s8519_s6 + $0xc8] sm:$0xff] }
  0x5a   :  { %1678 = vperm.xlu1 %4376, %v133_v44   ;;  %1673 = vperm.xlu0 %4375, %v132_v45  }
  0x5b   :  { %4301 = vmatmul.mubr.msk.bf16.gmra.mrb[36].mxu0 %vm330_vm2, %v293_v46  ;;  %v216_v46 = vld [vmem:[%s8519_s6 + $0xf0] sm:$0xff] }
  0x5c   :  { %4304 = vmatprep.mubr.msk.bf16.mxu0 %vm4389_vm0, %v4388_v5  ;;  %4353 = vmatmul.mubr.msk.bf16.gmra.mrb[36].mxu1 %vm330_vm2, %v306_v53 }
  0x5d   :  { %4356 = vmatprep.mubr.msk.bf16.mxu1 %vm4389_vm0, %v4388_v5 }
  0x5e   :  { %1688 = vperm.xlu1 %4376, %v135_v49   ;;  %1683 = vperm.xlu0 %4375, %v134_v50   ;;  %v218_v50 = vld [vmem:[%s8519_s6 + $0x100] sm:$0xff] }
  0x62   :  { %1747 = vperm.xlu1 %4376, %v186_v54   ;;  %1693 = vperm.xlu0 %4375, %v136_v55   ;;  %v220_v54 = vld [vmem:[%s8519_s6 + $0x110] sm:$0xff]  ;;  %v219_v55 = vld [vmem:[%s8519_s6 + $0x108] sm:$0xff] }
  0x63   :  { %4305 = vmatmul.mubr.msk.bf16.gmra.mrb[40].mxu0 %vm330_vm2, %v294_v56 }
  0x64   :  { %4308 = vmatprep.mubr.msk.bf16.mxu0 %vm4389_vm0, %v4388_v5  ;;  %4357 = vmatmul.mubr.msk.bf16.gmra.mrb[40].mxu1 %vm330_vm2, %v307_v63  ;;  %v223_v63 = vld [vmem:[%s8519_s6 + $0x128] sm:$0xff] }
  0x65   :  { %4360 = vmatprep.mubr.msk.bf16.mxu1 %vm4389_vm0, %v4388_v5 }
  0x66   :  { %1757 = vperm.xlu1 %4376, %v188_v59   ;;  %1752 = vperm.xlu0 %4375, %v187_v60   ;;  %v221_v59 = vld [vmem:[%s8519_s6 + $0x118] sm:$0xff] }
  0x6a   :  { %1767 = vperm.xlu1 %4376, %v190_v0   ;;  %1762 = vperm.xlu0 %4375, %v189_v1  }
  0x6b   :  { %4309 = vmatmul.mubr.msk.bf16.gmra.mrb[44].mxu0 %vm330_vm2, %v295_v2  ;;  %v226_v2 = vld [vmem:[%s8519_s6 + $0x140] sm:$0xff] }
  0x6c   :  { %4312 = vmatprep.mubr.msk.bf16.mxu0 %vm4389_vm0, %v4388_v5  ;;  %v296_v5 = vpack.c.bf16 %v55_v8, %v54_v7  ;;  %4361 = vmatmul.mubr.msk.bf16.gmra.mrb[44].mxu1 %vm330_vm2, %v308_v9  ;;  %v228_v7 = vld [vmem:[%s8519_s6 + $0x150] sm:$0xff]  ;;  %v227_v8 = vld [vmem:[%s8519_s6 + $0x148] sm:$0xff] }
  0x6e   :  { %1777 = vperm.xlu1 %4376, %v192_v4   ;;  %1772 = vperm.xlu0 %4375, %v191_v6  }
  0x72   :  { %1787 = vperm.xlu1 %4376, %v194_v10   ;;  %1782 = vperm.xlu0 %4375, %v193_v11   ;;  %v230_v11 = vld [vmem:[%s8519_s6 + $0x160] sm:$0xff] }
  0x73   :  { %4313 = vmatmul.mubr.msk.bf16.gmra.mrb[48].mxu0 %vm330_vm2, %v296_v5  ;;  %v229_v5 = vld [vmem:[%s8519_s6 + $0x158] sm:$0xff] }
  0x76   :  { %1797 = vperm.xlu1 %4376, %v196_v12   ;;  %1792 = vperm.xlu0 %4375, %v195_v13  }
  0x7a   :  { %1807 = vperm.xlu1 %4376, %v198_v14   ;;  %1802 = vperm.xlu0 %4375, %v197_v15   ;;  %v232_v14 = vld [vmem:[%s8519_s6 + $0x170] sm:$0xff]  ;;  %v231_v15 = vld [vmem:[%s8519_s6 + $0x168] sm:$0xff] }
  0x7e   :  { %1817 = vperm.xlu1 %4376, %v200_v16   ;;  %1812 = vperm.xlu0 %4375, %v199_v17  }
  0x81   :  { %v4875_v20 = vpop.permute.xlu1 %1463  ;;  %v4877_v21 = vpop.permute.xlu0 %1453 }
  0x82   :  { %8831 = vst [vmem:[#allocation2_spill] sm:$0xff] %v4875_v20  ;;  %8832 = vst [vmem:[#allocation3_spill] sm:$0xff] %v4877_v21  ;;  %1827 = vperm.xlu1 %4376, %v202_v18   ;;  %1822 = vperm.xlu0 %4375, %v201_v19   ;;  %v234_v18 = vld [vmem:[%s8519_s6 + $0x180] sm:$0xff]  ;;  %v233_v19 = vld [vmem:[%s8519_s6 + $0x178] sm:$0xff] }
  0x85   :  { %v4885_v24 = vpop.permute.xlu1 %1468  ;;  %v4887_v25 = vpop.permute.xlu0 %1458 }
  0x86   :  { %8833 = vst [vmem:[#allocation4_spill] sm:$0xff] %v4885_v24  ;;  %8834 = vst [vmem:[#allocation5_spill] sm:$0xff] %v4887_v25  ;;  %1837 = vperm.xlu1 %4376, %v204_v22   ;;  %1832 = vperm.xlu0 %4375, %v203_v23   ;;  %v236_v23 = vld [vmem:[%s8520_s7 + $0x8] sm:$0xff] }
  0x89   :  { %v4895_v28 = vpop.permute.xlu1 %1478  ;;  %v4897_v29 = vpop.permute.xlu0 %1473 }
  0x8a   :  { %8835 = vst [vmem:[#allocation6_spill] sm:$0xff] %v4895_v28  ;;  %8836 = vst [vmem:[#allocation7_spill] sm:$0xff] %v4897_v29  ;;  %1847 = vperm.xlu1 %4376, %v206_v26   ;;  %1842 = vperm.xlu0 %4375, %v205_v27   ;;  %v235_v26 = vld [vmem:[%s8520_s7] sm:$0xff]  ;;  %v270_v28 = vld [vmem:[%s8520_s7 + $0x118] sm:$0xff] }
  0x8d   :  { %v4905_v32 = vpop.permute.xlu1 %1488  ;;  %v4907_v33 = vpop.permute.xlu0 %1483 }
  0x8e   :  { %8837 = vst [vmem:[#allocation8_spill] sm:$0xff] %v4905_v32  ;;  %8838 = vst [vmem:[#allocation9_spill] sm:$0xff] %v4907_v33  ;;  %1857 = vperm.xlu1 %4376, %v208_v30   ;;  %1852 = vperm.xlu0 %4375, %v207_v31   ;;  %v238_v30 = vld [vmem:[%s8520_s7 + $0x18] sm:$0xff]  ;;  %v237_v31 = vld [vmem:[%s8520_s7 + $0x10] sm:$0xff] }
  0x91   :  { %v4915_v36 = vpop.permute.xlu1 %1498  ;;  %v4917_v37 = vpop.permute.xlu0 %1493 }
  0x92   :  { %8839 = vst [vmem:[#allocation10_spill] sm:$0xff] %v4915_v36  ;;  %8840 = vst [vmem:[#allocation11_spill] sm:$0xff] %v4917_v37  ;;  %1867 = vperm.xlu1 %4376, %v210_v34   ;;  %1862 = vperm.xlu0 %4375, %v209_v35  }
  0x95   :  { %v4925_v40 = vpop.permute.xlu1 %1508  ;;  %v4927_v41 = vpop.permute.xlu0 %1503 }
  0x96   :  { %8841 = vst [vmem:[#allocation12_spill] sm:$0xff] %v4925_v40  ;;  %8842 = vst [vmem:[#allocation13_spill] sm:$0xff] %v4927_v41  ;;  %1877 = vperm.xlu1 %4376, %v212_v38   ;;  %1872 = vperm.xlu0 %4375, %v211_v39   ;;  %v240_v38 = vld [vmem:[%s8520_s7 + $0x28] sm:$0xff]  ;;  %v239_v39 = vld [vmem:[%s8520_s7 + $0x20] sm:$0xff] }
  0x99   :  { %v4935_v44 = vpop.permute.xlu1 %1518  ;;  %v4937_v45 = vpop.permute.xlu0 %1513 }
  0x9a   :  { %8843 = vst [vmem:[#allocation14_spill] sm:$0xff] %v4935_v44  ;;  %8844 = vst [vmem:[#allocation15_spill] sm:$0xff] %v4937_v45  ;;  %1887 = vperm.xlu1 %4376, %v214_v42   ;;  %1882 = vperm.xlu0 %4375, %v213_v43   ;;  %v242_v43 = vld [vmem:[%s8520_s7 + $0x38] sm:$0xff] }
  0x9d   :  { %v4945_v48 = vpop.permute.xlu1 %1528  ;;  %v4947_v49 = vpop.permute.xlu0 %1523 }
  0x9e   :  { %8845 = vst [vmem:[#allocation16_spill] sm:$0xff] %v4945_v48  ;;  %8846 = vst [vmem:[#allocation17_spill] sm:$0xff] %v4947_v49  ;;  %1897 = vperm.xlu1 %4376, %v216_v46   ;;  %1892 = vperm.xlu0 %4375, %v215_v47   ;;  %v241_v46 = vld [vmem:[%s8520_s7 + $0x30] sm:$0xff] }
  0x9f   :  { %v265_v49 = vld [vmem:[%s8520_s7 + $0xf0] sm:$0xff] }
  0xa1   :  { %v4955_v52 = vpop.permute.xlu1 %1538  ;;  %v4957_v53 = vpop.permute.xlu0 %1533 }
  0xa2   :  { %8847 = vst [vmem:[#allocation18_spill] sm:$0xff] %v4955_v52  ;;  %8848 = vst [vmem:[#allocation19_spill] sm:$0xff] %v4957_v53  ;;  %1907 = vperm.xlu1 %4376, %v218_v50   ;;  %1902 = vperm.xlu0 %4375, %v217_v51   ;;  %v244_v50 = vld [vmem:[%s8520_s7 + $0x48] sm:$0xff]  ;;  %v243_v51 = vld [vmem:[%s8520_s7 + $0x40] sm:$0xff] }
  0xa5   :  { %v4965_v56 = vpop.permute.xlu1 %1548  ;;  %v4967_v57 = vpop.permute.xlu0 %1543 }
  0xa6   :  { %8849 = vst [vmem:[#allocation20_spill] sm:$0xff] %v4965_v56  ;;  %8850 = vst [vmem:[#allocation21_spill] sm:$0xff] %v4967_v57  ;;  %1917 = vperm.xlu1 %4376, %v220_v54   ;;  %1912 = vperm.xlu0 %4375, %v219_v55   ;;  %v263_v56 = vld [vmem:[%s8520_s7 + $0xe0] sm:$0xff] }
  0xa9   :  { %v4975_v60 = vpop.permute.xlu1 %1558  ;;  %v4977_v61 = vpop.permute.xlu0 %1553 }
  0xaa   :  { %8851 = vst [vmem:[#allocation22_spill] sm:$0xff] %v4975_v60  ;;  %8852 = vst [vmem:[#allocation23_spill] sm:$0xff] %v4977_v61  ;;  %1927 = vperm.xlu1 %4376, %v222_v58   ;;  %1922 = vperm.xlu0 %4375, %v221_v59   ;;  %v246_v58 = vld [vmem:[%s8520_s7 + $0x58] sm:$0xff]  ;;  %v245_v59 = vld [vmem:[%s8520_s7 + $0x50] sm:$0xff] }
  0xad   :  { %v4985_v0 = vpop.permute.xlu1 %1568  ;;  %v4987_v1 = vpop.permute.xlu0 %1563 }
  0xae   :  { %8853 = vst [vmem:[#allocation24_spill] sm:$0xff] %v4985_v0  ;;  %8854 = vst [vmem:[#allocation25_spill] sm:$0xff] %v4987_v1  ;;  %1937 = vperm.xlu1 %4376, %v224_v62   ;;  %1932 = vperm.xlu0 %4375, %v223_v63   ;;  %v248_v63 = vld [vmem:[%s8520_s7 + $0x68] sm:$0xff]  ;;  %v261_v0 = vld [vmem:[%s8520_s7 + $0xd0] sm:$0xff] }
  0xb1   :  { %v4995_v4 = vpop.permute.xlu1 %1578  ;;  %v4997_v6 = vpop.permute.xlu0 %1573 }
  0xb2   :  { %8855 = vst [vmem:[#allocation26_spill] sm:$0xff] %v4995_v4  ;;  %8856 = vst [vmem:[#allocation27_spill] sm:$0xff] %v4997_v6  ;;  %1947 = vperm.xlu1 %4376, %v226_v2   ;;  %1942 = vperm.xlu0 %4375, %v225_v3   ;;  %v247_v2 = vld [vmem:[%s8520_s7 + $0x60] sm:$0xff] }
  0xb5   :  { %v5005_v9 = vpop.permute.xlu1 %1588  ;;  %v5007_v10 = vpop.permute.xlu0 %1583 }
  0xb6   :  { %8857 = vst [vmem:[#allocation28_spill] sm:$0xff] %v5005_v9  ;;  %8858 = vst [vmem:[#allocation29_spill] sm:$0xff] %v5007_v10  ;;  %1957 = vperm.xlu1 %4376, %v228_v7   ;;  %1952 = vperm.xlu0 %4375, %v227_v8   ;;  %v250_v7 = vld [vmem:[%s8520_s7 + $0x78] sm:$0xff]  ;;  %v249_v8 = vld [vmem:[%s8520_s7 + $0x70] sm:$0xff] }
  0xb7   :  { %v153_v10 = vld [vmem:[%s8521_s5 + $0x80] sm:$0xff] }
  0xb9   :  { %v5015_v12 = vpop.permute.xlu1 %1598  ;;  %v5017_v13 = vpop.permute.xlu0 %1593 }
  0xba   :  { %8859 = vst [vmem:[#allocation30_spill] sm:$0xff] %v5015_v12  ;;  %8860 = vst [vmem:[#allocation31_spill] sm:$0xff] %v5017_v13  ;;  %1967 = vperm.xlu1 %4376, %v230_v11   ;;  %1962 = vperm.xlu0 %4375, %v229_v5  }
  0xbd   :  { %v5025_v16 = vpop.permute.xlu1 %1608  ;;  %v5027_v17 = vpop.permute.xlu0 %1603 }
  0xbe   :  { %8861 = vst [vmem:[#allocation32_spill] sm:$0xff] %v5025_v16  ;;  %1977 = vperm.xlu1 %4376, %v232_v14   ;;  %1972 = vperm.xlu0 %4375, %v231_v15   ;;  %8862 = vst [vmem:[#allocation33_spill] sm:$0xff] %v5027_v17  ;;  %v252_v14 = vld [vmem:[%s8520_s7 + $0x88] sm:$0xff]  ;;  %v251_v15 = vld [vmem:[%s8520_s7 + $0x80] sm:$0xff] }
  0xc1   :  { %v5035_v22 = vpop.permute.xlu1 %1618  ;;  %v5043_v27 = vpop.permute.xlu0 %1613 }
  0xc2   :  { %1987 = vperm.xlu1 %4376, %v234_v18   ;;  %1982 = vperm.xlu0 %4375, %v233_v19   ;;  %8863 = vst [vmem:[#allocation34_spill] sm:$0xff] %v5035_v22  ;;  %8864 = vst [vmem:[#allocation35_spill] sm:$0xff] %v5043_v27  ;;  %v145_v27 = vld [vmem:[%s8521_s5 + $0x40] sm:$0xff] }
  0xc5   :  { %v5051_v34 = vpop.permute.xlu1 %1628  ;;  %v5053_v35 = vpop.permute.xlu0 %1623 }
  0xc6   :  { %2530 = vperm.xlu1 %4376, %v236_v23   ;;  %2525 = vperm.xlu0 %4375, %v235_v26   ;;  %8865 = vst [vmem:[#allocation36_spill] sm:$0xff] %v5051_v34  ;;  %8866 = vst [vmem:[#allocation37_spill] sm:$0xff] %v5053_v35  ;;  %v254_v26 = vld [vmem:[%s8520_s7 + $0x98] sm:$0xff] }
  0xc9   :  { %v5061_v42 = vpop.permute.xlu1 %1638  ;;  %v5069_v47 = vpop.permute.xlu0 %1633 }
  0xca   :  { %2540 = vperm.xlu1 %4376, %v238_v30   ;;  %2535 = vperm.xlu0 %4375, %v237_v31   ;;  %8867 = vst [vmem:[#allocation38_spill] sm:$0xff] %v5061_v42  ;;  %8868 = vst [vmem:[#allocation39_spill] sm:$0xff] %v5069_v47  ;;  %v253_v30 = vld [vmem:[%s8520_s7 + $0x90] sm:$0xff] }
  0xcb   :  { %v139_v47 = vld [vmem:[%s8521_s5 + $0x10] sm:$0xff] }
  0xcd   :  { %v5077_v54 = vpop.permute.xlu1 %1648  ;;  %v5079_v55 = vpop.permute.xlu0 %1643 }
  0xce   :  { %2550 = vperm.xlu1 %4376, %v240_v38   ;;  %2545 = vperm.xlu0 %4375, %v239_v39   ;;  %8869 = vst [vmem:[#allocation40_spill] sm:$0xff] %v5077_v54  ;;  %8870 = vst [vmem:[#allocation41_spill] sm:$0xff] %v5079_v55 }
  0xd1   :  { %v5087_v62 = vpop.permute.xlu1 %1658  ;;  %v5095_v3 = vpop.permute.xlu0 %1653 }
  0xd2   :  { %2560 = vperm.xlu1 %4376, %v242_v43   ;;  %2555 = vperm.xlu0 %4375, %v241_v46   ;;  %8871 = vst [vmem:[#allocation42_spill] sm:$0xff] %v5087_v62  ;;  %8872 = vst [vmem:[#allocation43_spill] sm:$0xff] %v5095_v3  ;;  %v256_v43 = vld [vmem:[%s8520_s7 + $0xa8] sm:$0xff]  ;;  %v255_v46 = vld [vmem:[%s8520_s7 + $0xa0] sm:$0xff] }
  0xd5   :  { %v5103_v11 = vpop.permute.xlu1 %1668  ;;  %v5105_v5 = vpop.permute.xlu0 %1663 }
  0xd6   :  { %2570 = vperm.xlu1 %4376, %v244_v50   ;;  %2565 = vperm.xlu0 %4375, %v243_v51   ;;  %8873 = vst [vmem:[#allocation44_spill] sm:$0xff] %v5103_v11  ;;  %8874 = vst [vmem:[#allocation45_spill] sm:$0xff] %v5105_v5 }
  0xd9   :  { %v5115_v19 = vpop.permute.xlu1 %1678  ;;  %v5125_v38 = vpop.permute.xlu0 %1673 }
  0xda   :  { %2580 = vperm.xlu1 %4376, %v246_v58   ;;  %2575 = vperm.xlu0 %4375, %v245_v59   ;;  %8875 = vst [vmem:[#allocation46_spill] sm:$0xff] %v5115_v19  ;;  %8876 = vst [vmem:[#allocation47_spill] sm:$0xff] %v5125_v38  ;;  %v280_v19 = vld [vmem:[%s8520_s7 + $0x168] sm:$0xff] }
  0xdd   :  { %v5135_v58 = vpop.permute.xlu1 %1688 }
  0xde   :  { %2590 = vperm.xlu1 %4376, %v248_v63   ;;  %2585 = vperm.xlu0 %4375, %v247_v2   ;;  %8877 = vst [vmem:[#allocation48_spill] sm:$0xff] %v5135_v58  ;;  %v5139_v2 = vpop.permute.xlu0 %1683 }
  0xdf   :  { %8878 = vst [vmem:[#allocation49_spill] sm:$0xff] %v5139_v2 }
  0xe2   :  { %2600 = vperm.xlu1 %4376, %v250_v7   ;;  %2595 = vperm.xlu0 %4375, %v249_v8   ;;  %v258_v8 = vld [vmem:[%s8520_s7 + $0xb8] sm:$0xff] }
  0xe6   :  { %2610 = vperm.xlu1 %4376, %v252_v14   ;;  %2605 = vperm.xlu0 %4375, %v251_v15   ;;  %v5113_v18 = vpop.f32.mrb[0].mxu0  ;;  %v257_v14 = vld [vmem:[%s8520_s7 + $0xb0] sm:$0xff] }
  0xe7   :  { %v4266_v23 = vpop.f32.mrb[1].mxu0  ;;  %v5133_v50 = vpop.f32.mrb[0].mxu1  ;;  %v691_v52 = vmul.f32 0.01, %v5113_v18  ;;  %vm642_vm4 = vcmp.ge.f32.partialorder %v5113_v18, 0.0 }
  0xe8   :  { %v5123_v31 = vpop.f32.mrb[2].mxu0  ;;  %v4318_v51 = vpop.f32.mrb[1].mxu1 }
  0xe9   :  { %v4267_v39 = vpop.f32.mrb[3].mxu0  ;;  %v5137_v63 = vpop.f32.mrb[2].mxu1  ;;  %vm643_vm3 = vcmp.ge.f32.partialorder %v5123_v31, 0.0 }
  0xea   :  { %2620 = vperm.xlu1 %4376, %v254_v26   ;;  %2615 = vperm.xlu0 %4375, %v253_v30   ;;  %v4319_v23 = vpop.f32.mrb[3].mxu1  ;;  %v5149_v30 = vpop.permute.xlu1 %1747  ;;  %v260_v39 = vld [vmem:[%s8520_s7 + $0xc8] sm:$0xff] }
  0xeb   :  { %8879 = vst [vmem:[#allocation50_spill] sm:$0xff] %v5149_v30 }
  0xee   :  { %2630 = vperm.xlu1 %4376, %v256_v43   ;;  %2625 = vperm.xlu0 %4375, %v255_v46   ;;  %v452_v59 = vpop.f32.mrb[4].mxu0  ;;  %v259_v43 = vld [vmem:[%s8520_s7 + $0xc0] sm:$0xff]  ;;  %v5173_v60 = vpop.permute.xlu1 %1757 }
  0xef   :  { %v4270_v7 = vpop.f32.mrb[5].mxu0  ;;  %v5157_v46 = vpop.f32.mrb[4].mxu1  ;;  %8881 = vst [vmem:[#allocation52_spill] sm:$0xff] %v5173_v60  ;;  %v693_v53 = vmul.f32 0.01, %v452_v59  ;;  %vm644_vm5 = vcmp.ge.f32.partialorder %v452_v59, 0.0 }
  0xf0   :  { %v5147_v15 = vpop.f32.mrb[6].mxu0  ;;  %v4322_v51 = vpop.f32.mrb[5].mxu1 }
  0xf1   :  { %v4271_v26 = vpop.f32.mrb[7].mxu0  ;;  %v5159_v7 = vpop.permute.xlu0 %1693  ;;  %v5211_v41 = vsel %vm644_vm5, %v452_v59, %v693_v53  ;;  %v694_v36 = vmul.f32 0.01, %v5147_v15  ;;  %vm645_vm7 = vcmp.ge.f32.partialorder %v5147_v15, 0.0 }
  0xf2   :  { %2640 = vperm.xlu1 %4376, %v258_v8   ;;  %2635 = vperm.xlu0 %4375, %v257_v14   ;;  %8880 = vst [vmem:[#allocation51_spill] sm:$0xff] %v5159_v7  ;;  %v5163_v8 = vpop.f32.mrb[6].mxu1  ;;  %v262_v26 = vld [vmem:[%s8520_s7 + $0xd8] sm:$0xff]  ;;  %v5195_v48 = vpop.permute.xlu1 %1767  ;;  %v793_v59 = vsel %vm789_vm6, %v5211_v41, 0.0 }
  0xf3   :  { %v4323_v51 = vpop.f32.mrb[7].mxu1  ;;  %8883 = vst [vmem:[#allocation54_spill] sm:$0xff] %v5195_v48 }
  0xf4   :  { %v692_v51 = vmul.f32 0.01, %v5123_v31 }
  0xf6   :  { %2650 = vperm.xlu1 %4376, %v260_v39   ;;  %2645 = vperm.xlu0 %4375, %v259_v43   ;;  %v5161_v23 = vpop.f32.mrb[8].mxu0  ;;  %v5175_v43 = vpop.permute.xlu0 %1752  ;;  %v5204_v44 = vsel %vm643_vm3, %v5123_v31, %v692_v51  ;;  %v267_v31 = vld [vmem:[%s8520_s7 + $0x100] sm:$0xff] }
  0xf7   :  { %v4274_v14 = vpop.f32.mrb[9].mxu0  ;;  %8882 = vst [vmem:[#allocation53_spill] sm:$0xff] %v5175_v43  ;;  %v5183_v61 = vpop.f32.mrb[8].mxu1  ;;  %v695_v53 = vmul.f32 0.01, %v5161_v23  ;;  %vm646_vm8 = vcmp.ge.f32.partialorder %v5161_v23, 0.0 }
  0xf8   :  { %v5171_v1 = vpop.f32.mrb[10].mxu0  ;;  %v264_v14 = vld [vmem:[%s8520_s7 + $0xe8] sm:$0xff]  ;;  %v4326_v57 = vpop.f32.mrb[9].mxu1 }
  0xf9   :  { %v4275_v39 = vpop.f32.mrb[11].mxu0  ;;  %vm647_vm9 = vcmp.ge.f32.partialorder %v5171_v1, 0.0 }
  0xfa   :  { %2660 = vperm.xlu1 %4376, %v262_v26   ;;  %2655 = vperm.xlu0 %4375, %v261_v0   ;;  %v266_v26 = vld [vmem:[%s8520_s7 + $0xf8] sm:$0xff]  ;;  %v5192_v39 = vpop.f32.mrb[10].mxu1  ;;  %v5206_v40 = vpop.permute.xlu0 %1762 }
  0xfb   :  { %8884 = vst [vmem:[#allocation55_spill] sm:$0xff] %v5206_v40  ;;  %v269_v40 = vld [vmem:[%s8520_s7 + $0x110] sm:$0xff] }
  0xfe   :  { %2670 = vperm.xlu1 %4376, %v264_v14   ;;  %2665 = vperm.xlu0 %4375, %v263_v56   ;;  %v5187_v0 = vpop.f32.mrb[12].mxu0  ;;  %v4327_v14 = vpop.f32.mrb[11].mxu1 }
  0xff   :  { %v4278_v57 = vpop.f32.mrb[13].mxu0  ;;  %v268_v14 = vld [vmem:[%s8520_s7 + $0x108] sm:$0xff]  ;;  %v5220_v51 = vpop.f32.mrb[12].mxu1  ;;  %vm648_vm10 = vcmp.ge.f32.partialorder %v5187_v0, 0.0 }
 0x100   :  { %v5201_v56 = vpop.f32.mrb[14].mxu0  ;;  %v5209_v57 = vsel %vm642_vm4, %v5113_v18, %v691_v52  ;;  %v5225_v52 = vpop.permute.xlu1 %1777 }
 0x101   :  { %v4279_v45 = vpop.f32.mrb[15].mxu0  ;;  %8885 = vst [vmem:[#allocation56_spill] sm:$0xff] %v5225_v52  ;;  %v790_v18 = vsel %vm789_vm6, %v5209_v57, 0.0  ;;  %v5235_v33 = vpop.permute.xlu0 %1772  ;;  %v698_v60 = vmul.f32 0.01, %v5201_v56  ;;  %vm649_vm11 = vcmp.ge.f32.partialorder %v5201_v56, 0.0 }
 0x102   :  { %2680 = vperm.xlu1 %4376, %v266_v26   ;;  %2675 = vperm.xlu0 %4375, %v265_v49   ;;  %v791_v45 = vsel %vm789_vm6, %v5204_v44, 0.0  ;;  %v4330_v49 = vpop.f32.mrb[13].mxu1  ;;  %8886 = vst [vmem:[#allocation57_spill] sm:$0xff] %v5235_v33  ;;  %v697_v33 = vmul.f32 0.01, %v5187_v0 }
 0x103   :  { %v5233_v32 = vpop.f32.mrb[14].mxu1  ;;  %v792_v37 = vadd.f32 %v791_v45, %v790_v18  ;;  %v5238_v49 = vsel %vm645_vm7, %v5147_v15, %v694_v36  ;;  %v5249_v45 = vsel %vm646_vm8, %v5161_v23, %v695_v53  ;;  %v696_v18 = vmul.f32 0.01, %v5171_v1  ;;  %v271_v23 = vld [vmem:[%s8520_s7 + $0x120] sm:$0xff] }
 0x104   :  { %v795_v36 = vsel %vm789_vm6, %v5238_v49, 0.0  ;;  %v5277_v43 = vsel %vm648_vm10, %v5187_v0, %v697_v33 }
 0x105   :  { %v794_v24 = vadd.f32 %v793_v59, %v792_v37  ;;  %v272_v37 = vld [vmem:[%s8520_s7 + $0x128] sm:$0xff]  ;;  %v797_v59 = vsel %vm789_vm6, %v5249_v45, 0.0 }
 0x106   :  { %2690 = vperm.xlu1 %4376, %v268_v14   ;;  %2685 = vperm.xlu0 %4375, %v267_v31   ;;  %v476_v26 = vpop.f32.mrb[16].mxu0  ;;  %v4331_v31 = vpop.f32.mrb[15].mxu1 }
 0x107   :  { %v4282_v52 = vpop.f32.mrb[17].mxu0  ;;  %v5264_v53 = vpop.f32.mrb[16].mxu1  ;;  %v699_v0 = vmul.f32 0.01, %v476_v26  ;;  %vm650_vm12 = vcmp.ge.f32.partialorder %v476_v26, 0.0 }
 0x108   :  { %v5246_v14 = vpop.f32.mrb[18].mxu0  ;;  %v5255_v52 = vpop.permute.xlu1 %1787 }
 0x109   :  { %v4283_v15 = vpop.f32.mrb[19].mxu0  ;;  %8887 = vst [vmem:[#allocation58_spill] sm:$0xff] %v5255_v52  ;;  %v5269_v31 = vpop.permute.xlu0 %1782  ;;  %vm651_vm13 = vcmp.ge.f32.partialorder %v5246_v14, 0.0 }
 0x10a   :  { %2700 = vperm.xlu1 %4376, %v270_v28   ;;  %2695 = vperm.xlu0 %4375, %v269_v40   ;;  %v4334_v28 = vpop.f32.mrb[17].mxu1  ;;  %v796_v40 = vadd.f32 %v795_v36, %v794_v24  ;;  %8888 = vst [vmem:[#allocation59_spill] sm:$0xff] %v5269_v31  ;;  %v5272_v15 = vsel %vm647_vm9, %v5171_v1, %v696_v18  ;;  %v274_v24 = vld [vmem:[%s8520_s7 + $0x138] sm:$0xff]  ;;  %v273_v1 = vld [vmem:[%s8520_s7 + $0x130] sm:$0xff] }
 0x10b   :  { %v5274_v48 = vpop.f32.mrb[18].mxu1  ;;  %v799_v18 = vsel %vm789_vm6, %v5272_v15, 0.0 }
 0x10c   :  { %v798_v29 = vadd.f32 %v797_v59, %v796_v40  ;;  %v5289_v33 = vpop.permute.xlu1 %1797  ;;  %v5296_v40 = vsel %vm649_vm11, %v5201_v56, %v698_v60 }
 0x10d   :  { %8889 = vst [vmem:[#allocation60_spill] sm:$0xff] %v5289_v33  ;;  %v5293_v59 = vpop.permute.xlu0 %1792  ;;  %v275_v33 = vld [vmem:[%s8520_s7 + $0x140] sm:$0xff] }
 0x10e   :  { %2710 = vperm.xlu1 %4376, %v272_v37   ;;  %2705 = vperm.xlu0 %4375, %v271_v23   ;;  %v484_v52 = vpop.f32.mrb[20].mxu0  ;;  %v4335_v37 = vpop.f32.mrb[19].mxu1  ;;  %8890 = vst [vmem:[#allocation61_spill] sm:$0xff] %v5293_v59  ;;  %v800_v28 = vadd.f32 %v799_v18, %v798_v29  ;;  %v803_v29 = vsel %vm789_vm6, %v5296_v40, 0.0 }
 0x10f   :  { %v4286_v25 = vpop.f32.mrb[21].mxu0  ;;  %v276_v37 = vld [vmem:[%s8520_s7 + $0x148] sm:$0xff]  ;;  %v5304_v31 = vpop.f32.mrb[20].mxu1  ;;  %v701_v59 = vmul.f32 0.01, %v484_v52  ;;  %vm652_vm14 = vcmp.ge.f32.partialorder %v484_v52, 0.0 }
 0x110   :  { %v487_v36 = vpop.f32.mrb[22].mxu0  ;;  %v801_v25 = vsel %vm789_vm6, %v5277_v43, 0.0  ;;  %v4338_v20 = vpop.f32.mrb[21].mxu1 }
 0x111   :  { %v4287_v23 = vpop.f32.mrb[23].mxu0  ;;  %v5312_v56 = vpop.f32.mrb[22].mxu1  ;;  %v278_v20 = vld [vmem:[%s8520_s7 + $0x158] sm:$0xff]  ;;  %v5331_v58 = vsel %vm652_vm14, %v484_v52, %v701_v59  ;;  %v702_v38 = vmul.f32 0.01, %v487_v36  ;;  %vm653_vm15 = vcmp.ge.f32.partialorder %v487_v36, 0.0 }
 0x112   :  { %2720 = vperm.xlu1 %4376, %v274_v24   ;;  %2715 = vperm.xlu0 %4375, %v273_v1   ;;  %v802_v23 = vadd.f32 %v801_v25, %v800_v28  ;;  %v5306_v24 = vsel %vm650_vm12, %v476_v26, %v699_v0  ;;  %v700_v1 = vmul.f32 0.01, %v5246_v14  ;;  %v5314_v18 = vpop.permute.xlu1 %1807  ;;  %v277_v26 = vld [vmem:[%s8520_s7 + $0x150] sm:$0xff]  ;;  %v4339_v25 = vpop.f32.mrb[23].mxu1  ;;  %v809_v59 = vsel %vm789_vm6, %v5331_v58, 0.0 }
 0x113   :  { %8891 = vst [vmem:[#allocation62_spill] sm:$0xff] %v5314_v18  ;;  %v805_v0 = vsel %vm789_vm6, %v5306_v24, 0.0  ;;  %v5324_v28 = vpop.permute.xlu0 %1802  ;;  %vm668_vm14 = vcmp.ge.f32.partialorder %v5133_v50, 0.0 }
 0x114   :  { %8892 = vst [vmem:[#allocation63_spill] sm:$0xff] %v5324_v28 }
 0x116   :  { %2730 = vperm.xlu1 %4376, %v276_v37   ;;  %2725 = vperm.xlu0 %4375, %v275_v33   ;;  %v492_v60 = vpop.f32.mrb[24].mxu0  ;;  %v804_v37 = vadd.f32 %v803_v29, %v802_v23  ;;  %v279_v23 = vld [vmem:[%s8520_s7 + $0x160] sm:$0xff] }
 0x117   :  { %v4290_v7 = vpop.f32.mrb[25].mxu0  ;;  %v5339_v29 = vpop.f32.mrb[24].mxu1  ;;  %v703_v52 = vmul.f32 0.01, %v492_v60  ;;  %vm654_vm0 = vcmp.ge.f32.partialorder %v492_v60, 0.0 }
 0x118   :  { %v495_v33 = vpop.f32.mrb[26].mxu0  ;;  %v5329_v7 = vsel %vm651_vm13, %v5246_v14, %v700_v1  ;;  %v806_v2 = vadd.f32 %v805_v0, %v804_v37  ;;  %v4342_v1 = vpop.f32.mrb[25].mxu1  ;;  %v5351_v37 = vsel %vm653_vm15, %v487_v36, %v702_v38 }
 0x119   :  { %v4291_v18 = vpop.f32.mrb[27].mxu0  ;;  %v807_v14 = vsel %vm789_vm6, %v5329_v7, 0.0  ;;  %v5349_v0 = vpop.permute.xlu0 %1812  ;;  %v282_v1 = vld [vmem:[%s8520_s7 + $0x178] sm:$0xff]  ;;  %v5359_v11 = vsel %vm654_vm0, %v492_v60, %v703_v52  ;;  %v704_v3 = vmul.f32 0.01, %v495_v33  ;;  %vm655_vm1 = vcmp.ge.f32.partialorder %v495_v33, 0.0 }
 0x11a   :  { %2740 = vperm.xlu1 %4376, %v278_v20   ;;  %2735 = vperm.xlu0 %4375, %v277_v26   ;;  %v5343_v18 = vpop.permute.xlu1 %1817  ;;  %v5347_v26 = vpop.f32.mrb[26].mxu1  ;;  %8894 = vst [vmem:[#allocation65_spill] sm:$0xff] %v5349_v0  ;;  %v808_v25 = vadd.f32 %v807_v14, %v806_v2  ;;  %v811_v2 = vsel %vm789_vm6, %v5351_v37, 0.0  ;;  %v137_v14 = vld [vmem:[%s8521_s5] sm:$0xff]  ;;  %vm669_vm0 = vcmp.ge.f32.partialorder %v5137_v63, 0.0 }
 0x11b   :  { %8893 = vst [vmem:[#allocation64_spill] sm:$0xff] %v5343_v18  ;;  %v281_v18 = vld [vmem:[%s8520_s7 + $0x170] sm:$0xff]  ;;  %v283_v60 = vld [vmem:[%s8520_s7 + $0x180] sm:$0xff] }
 0x11e   :  { %2750 = vperm.xlu1 %4376, %v280_v19   ;;  %2745 = vperm.xlu0 %4375, %v279_v23   ;;  %v500_v20 = vpop.f32.mrb[28].mxu0  ;;  %v4343_v19 = vpop.f32.mrb[27].mxu1  ;;  %v810_v23 = vadd.f32 %v809_v59, %v808_v25  ;;  %v813_v59 = vsel %vm789_vm6, %v5359_v11, 0.0 }
 0x11f   :  { %v4294_v28 = vpop.f32.mrb[29].mxu0  ;;  %v5363_v36 = vpop.permute.xlu1 %1827  ;;  %vm656_vm2 = vcmp.ge.f32.partialorder %v500_v20, 0.0  ;;  %v5377_v19 = vsel %vm655_vm1, %v495_v33, %v704_v3  ;;  %vm670_vm1 = vcmp.ge.f32.partialorder %v5157_v46, 0.0 }
 0x120   :  { %v503_v5 = vpop.f32.mrb[30].mxu0  ;;  %8895 = vst [vmem:[#allocation66_spill] sm:$0xff] %v5363_v36  ;;  %v705_v28 = vmul.f32 0.01, %v500_v20  ;;  %v5371_v52 = vpop.f32.mrb[28].mxu1  ;;  %v815_v3 = vsel %vm789_vm6, %v5377_v19, 0.0 }
 0x121   :  { %v4295_v38 = vpop.f32.mrb[31].mxu0  ;;  %v4346_v25 = vpop.f32.mrb[29].mxu1  ;;  %v706_v55 = vmul.f32 0.01, %v503_v5  ;;  %vm657_vm3 = vcmp.ge.f32.partialorder %v503_v5, 0.0 }
 0x122   :  { %2760 = vperm.xlu1 %4376, %v282_v1   ;;  %2755 = vperm.xlu0 %4375, %v281_v18   ;;  %v5375_v1 = vpop.permute.xlu0 %1822  ;;  %v812_v18 = vadd.f32 %v811_v2, %v810_v23  ;;  %v5379_v36 = vpop.f32.mrb[30].mxu1  ;;  %v5381_v62 = vsel %vm656_vm2, %v500_v20, %v705_v28  ;;  %v138_v23 = vld [vmem:[%s8521_s5 + $0x8] sm:$0xff]  ;;  %vm671_vm2 = vcmp.ge.f32.partialorder %v5163_v8, 0.0 }
 0x123   :  { %8896 = vst [vmem:[#allocation67_spill] sm:$0xff] %v5375_v1  ;;  %v4347_v2 = vpop.f32.mrb[31].mxu1  ;;  %v5397_v25 = vsel %vm657_vm3, %v503_v5, %v706_v55  ;;  %vm672_vm3 = vcmp.ge.f32.partialorder %v5183_v61, 0.0 }
 0x124   :  { %v814_v0 = vadd.f32 %v813_v59, %v812_v18  ;;  %v141_v18 = vld [vmem:[%s8521_s5 + $0x20] sm:$0xff]  ;;  %v140_v2 = vld [vmem:[%s8521_s5 + $0x18] sm:$0xff] }
 0x126   :  { %3363 = vperm.xlu1 %4376, %v137_v14   ;;  %2765 = vperm.xlu0 %4375, %v283_v60   ;;  %v508_v38 = vpop.f32.mrb[32].mxu0  ;;  %v5391_v14 = vpop.permute.xlu1 %1837  ;;  %v816_v59 = vadd.f32 %v815_v3, %v814_v0  ;;  %v819_v0 = vsel %vm789_vm6, %v5397_v25, 0.0 }
 0x127   :  { %v4298_v54 = vpop.f32.mrb[33].mxu0  ;;  %8897 = vst [vmem:[#allocation68_spill] sm:$0xff] %v5391_v14  ;;  %v707_v20 = vmul.f32 0.01, %v508_v38  ;;  %vm658_vm4 = vcmp.ge.f32.partialorder %v508_v38, 0.0  ;;  %v5395_v60 = vpop.permute.xlu0 %1832 }
 0x128   :  { %v511_v33 = vpop.f32.mrb[34].mxu0  ;;  %v817_v54 = vsel %vm789_vm6, %v5381_v62, 0.0  ;;  %8898 = vst [vmem:[#allocation69_spill] sm:$0xff] %v5395_v60  ;;  %v5405_v14 = vpop.f32.mrb[32].mxu1 }
 0x129   :  { %v4299_v28 = vpop.f32.mrb[35].mxu0  ;;  %v4350_v1 = vpop.f32.mrb[33].mxu1  ;;  %v818_v42 = vadd.f32 %v817_v54, %v816_v59  ;;  %vm659_vm5 = vcmp.ge.f32.partialorder %v511_v33, 0.0 }
 0x12a   :  { %3373 = vperm.xlu1 %4376, %v139_v47   ;;  %3368 = vperm.xlu0 %4375, %v138_v23   ;;  %v5407_v28 = vsel %vm658_vm4, %v508_v38, %v707_v20  ;;  %v708_v47 = vmul.f32 0.01, %v511_v33  ;;  %v5411_v5 = vpop.f32.mrb[34].mxu1  ;;  %v5413_v23 = vpop.permute.xlu1 %1847  ;;  %v143_v1 = vld [vmem:[%s8521_s5 + $0x30] sm:$0xff]  ;;  %v142_v38 = vld [vmem:[%s8521_s5 + $0x28] sm:$0xff]  ;;  %vm673_vm4 = vcmp.ge.f32.partialorder %v5192_v39, 0.0 }
 0x12b   :  { %8899 = vst [vmem:[#allocation70_spill] sm:$0xff] %v5413_v23  ;;  %v821_v20 = vsel %vm789_vm6, %v5407_v28, 0.0  ;;  %v4351_v59 = vpop.f32.mrb[35].mxu1 }
 0x12c   :  { %v5426_v23 = vsel %vm659_vm5, %v511_v33, %v708_v47  ;;  %v144_v59 = vld [vmem:[%s8521_s5 + $0x38] sm:$0xff]  ;;  %vm674_vm5 = vcmp.ge.f32.partialorder %v5220_v51, 0.0 }
 0x12e   :  { %3383 = vperm.xlu1 %4376, %v141_v18   ;;  %3378 = vperm.xlu0 %4375, %v140_v2   ;;  %v516_v55 = vpop.f32.mrb[36].mxu0  ;;  %v5423_v18 = vpop.permute.xlu0 %1842  ;;  %v820_v2 = vadd.f32 %v819_v0, %v818_v42  ;;  %v823_v42 = vsel %vm789_vm6, %v5426_v23, 0.0 }
 0x12f   :  { %v709_v3 = vmul.f32 0.01, %v516_v55  ;;  %v4302_v60 = vpop.f32.mrb[37].mxu0  ;;  %vm660_vm7 = vcmp.ge.f32.partialorder %v516_v55, 0.0  ;;  %8900 = vst [vmem:[#allocation71_spill] sm:$0xff] %v5423_v18  ;;  %v5436_v18 = vpop.f32.mrb[36].mxu1 }
 0x130   :  { %v519_v54 = vpop.f32.mrb[38].mxu0  ;;  %v822_v34 = vadd.f32 %v821_v20, %v820_v2  ;;  %v4354_v33 = vpop.f32.mrb[37].mxu1 }
 0x131   :  { %v4303_v60 = vpop.f32.mrb[39].mxu0  ;;  %v5428_v35 = vsel %vm660_vm7, %v516_v55, %v709_v3  ;;  %v710_v22 = vmul.f32 0.01, %v519_v54  ;;  %vm661_vm8 = vcmp.ge.f32.partialorder %v519_v54, 0.0  ;;  %v5440_v47 = vpop.permute.xlu1 %1857  ;;  %v147_v33 = vld [vmem:[%s8521_s5 + $0x50] sm:$0xff]  ;;  %vm675_vm7 = vcmp.ge.f32.partialorder %v5233_v32, 0.0 }
 0x132   :  { %3393 = vperm.xlu1 %4376, %v143_v1   ;;  %3388 = vperm.xlu0 %4375, %v142_v38   ;;  %8901 = vst [vmem:[#allocation72_spill] sm:$0xff] %v5440_v47  ;;  %v825_v0 = vsel %vm789_vm6, %v5428_v35, 0.0  ;;  %v5444_v3 = vpop.f32.mrb[38].mxu1  ;;  %v5446_v1 = vpop.permute.xlu0 %1852  ;;  %v824_v38 = vadd.f32 %v823_v42, %v822_v34  ;;  %v148_v42 = vld [vmem:[%s8521_s5 + $0x58] sm:$0xff] }
 0x133   :  { %8902 = vst [vmem:[#allocation73_spill] sm:$0xff] %v5446_v1  ;;  %v5448_v20 = vsel %vm661_vm8, %v519_v54, %v710_v22  ;;  %v4355_v47 = vpop.f32.mrb[39].mxu1  ;;  %v149_v54 = vld [vmem:[%s8521_s5 + $0x60] sm:$0xff]  ;;  %vm676_vm8 = vcmp.ge.f32.partialorder %v5264_v53, 0.0 }
 0x134   :  { %v826_v17 = vadd.f32 %v825_v0, %v824_v38  ;;  %v827_v22 = vsel %vm789_vm6, %v5448_v20, 0.0 }
 0x135   :  { %v5470_v38 = vpop.permute.xlu1 %1867 }
 0x136   :  { %3403 = vperm.xlu1 %4376, %v145_v27   ;;  %3398 = vperm.xlu0 %4375, %v144_v59   ;;  %v524_v55 = vpop.f32.mrb[40].mxu0  ;;  %v146_v27 = vld [vmem:[%s8521_s5 + $0x48] sm:$0xff]  ;;  %8903 = vst [vmem:[#allocation74_spill] sm:$0xff] %v5470_v38 }
 0x137   :  { %vm662_vm9 = vcmp.ge.f32.partialorder %v524_v55, 0.0  ;;  %v711_v2 = vmul.f32 0.01, %v524_v55  ;;  %v4306_v60 = vpop.f32.mrb[41].mxu0  ;;  %v5466_v47 = vpop.f32.mrb[40].mxu1 }
 0x138   :  { %v527_v59 = vpop.f32.mrb[42].mxu0  ;;  %v828_v60 = vadd.f32 %v827_v22, %v826_v17 }
 0x139   :  { %v5456_v16 = vsel %vm662_vm9, %v524_v55, %v711_v2  ;;  %v712_v1 = vmul.f32 0.01, %v527_v59  ;;  %vm663_vm10 = vcmp.ge.f32.partialorder %v527_v59, 0.0  ;;  %v4307_v34 = vpop.f32.mrb[43].mxu0  ;;  %v4358_v55 = vpop.f32.mrb[41].mxu1  ;;  %vm677_vm9 = vcmp.ge.f32.partialorder %v5274_v48, 0.0 }
 0x13a   :  { %3413 = vperm.xlu1 %4376, %v147_v33   ;;  %3408 = vperm.xlu0 %4375, %v146_v27   ;;  %v829_v0 = vsel %vm789_vm6, %v5456_v16, 0.0  ;;  %v5472_v2 = vpop.permute.xlu0 %1862  ;;  %v5476_v34 = vpop.f32.mrb[42].mxu1  ;;  %v151_v55 = vld [vmem:[%s8521_s5 + $0x70] sm:$0xff] }
 0x13b   :  { %8904 = vst [vmem:[#allocation75_spill] sm:$0xff] %v5472_v2  ;;  %v5474_v33 = vsel %vm663_vm10, %v527_v59, %v712_v1  ;;  %v830_v12 = vadd.f32 %v829_v0, %v828_v60  ;;  %v150_v2 = vld [vmem:[%s8521_s5 + $0x68] sm:$0xff]  ;;  %v4359_v59 = vpop.f32.mrb[43].mxu1  ;;  %v5490_v0 = vpop.permute.xlu1 %1877  ;;  %vm678_vm10 = vcmp.ge.f32.partialorder %v5304_v31, 0.0 }
 0x13c   :  { %v831_v17 = vsel %vm789_vm6, %v5474_v33, 0.0  ;;  %8905 = vst [vmem:[#allocation76_spill] sm:$0xff] %v5490_v0 }
 0x13d   :  { %v832_v60 = vadd.f32 %v831_v17, %v830_v12 }
 0x13e   :  { %3423 = vperm.xlu1 %4376, %v149_v54   ;;  %3418 = vperm.xlu0 %4375, %v148_v42   ;;  %v532_v27 = vpop.f32.mrb[44].mxu0  ;;  %v5502_v59 = vpop.permute.xlu0 %1872 }
 0x13f   :  { %vm664_vm11 = vcmp.ge.f32.partialorder %v532_v27, 0.0  ;;  %v713_v13 = vmul.f32 0.01, %v532_v27  ;;  %v4310_v6 = vpop.f32.mrb[45].mxu0  ;;  %8906 = vst [vmem:[#allocation77_spill] sm:$0xff] %v5502_v59 }
 0x140   :  { %v535_v1 = vpop.f32.mrb[46].mxu0 }
 0x141   :  { %v5486_v22 = vsel %vm664_vm11, %v532_v27, %v713_v13  ;;  %vm665_vm12 = vcmp.ge.f32.partialorder %v535_v1, 0.0  ;;  %v714_v54 = vmul.f32 0.01, %v535_v1  ;;  %v4311_v42 = vpop.f32.mrb[47].mxu0  ;;  %v152_v13 = vld [vmem:[%s8521_s5 + $0x78] sm:$0xff]  ;;  %v5500_v27 = vpop.f32.mrb[44].mxu1 }
 0x142   :  { %v833_v6 = vsel %vm789_vm6, %v5486_v22, 0.0  ;;  %3433 = vperm.xlu1 %4376, %v151_v55   ;;  %3428 = vperm.xlu0 %4375, %v150_v2   ;;  %v4362_v42 = vpop.f32.mrb[45].mxu1  ;;  %v717_v2 = vmul.f32 0.01, %v5133_v50  ;;  %v5519_v30 = vpop.permute.xlu0 %1882  ;;  %vm679_vm11 = vcmp.ge.f32.partialorder %v5312_v56, 0.0 }
 0x143   :  { %v5492_v38 = vsel %vm665_vm12, %v535_v1, %v714_v54  ;;  %v834_v55 = vadd.f32 %v833_v6, %v832_v60  ;;  %v155_v1 = vld [vmem:[%s8521_s5 + $0x90] sm:$0xff]  ;;  %v639_v54 = vpop.f32.mrb[46].mxu1  ;;  %v154_v6 = vld [vmem:[%s8521_s5 + $0x88] sm:$0xff]  ;;  %v718_v42 = vmul.f32 0.01, %v5137_v63  ;;  %8908 = vst [vmem:[#allocation79_spill] sm:$0xff] %v5519_v30 }
 0x144   :  { %v835_v12 = vsel %vm789_vm6, %v5492_v38, 0.0  ;;  %v4363_v60 = vpop.f32.mrb[47].mxu1  ;;  %v5525_v21 = vsel %vm668_vm14, %v5133_v50, %v717_v2  ;;  %vm680_vm12 = vcmp.ge.f32.partialorder %v5339_v29, 0.0  ;;  %vm682_vm14 = vcmp.ge.f32.partialorder %v5371_v52, 0.0 }
 0x145   :  { %v836_v59 = vadd.f32 %v835_v12, %v834_v55  ;;  %v157_v12 = vld [vmem:[%s8521_s5 + $0xa0] sm:$0xff]  ;;  %v5540_v50 = vsel %vm669_vm0, %v5137_v63, %v718_v42  ;;  %v159_v63 = vld [vmem:[%s8521_s5 + $0xb0] sm:$0xff]  ;;  %v158_v42 = vld [vmem:[%s8521_s5 + $0xa8] sm:$0xff]  ;;  %vm684_vm0 = vcmp.ge.f32.partialorder %v5405_v14, 0.0 }
 0x146   :  { %3443 = vperm.xlu1 %4376, %v153_v10   ;;  %3438 = vperm.xlu0 %4375, %v152_v13   ;;  %v540_v17 = vpop.f32.mrb[48].mxu0  ;;  %v5515_v13 = vpop.permute.xlu1 %1887 }
 0x147   :  { %vm666_vm13 = vcmp.ge.f32.partialorder %v540_v17, 0.0  ;;  %v715_v0 = vmul.f32 0.01, %v540_v17  ;;  %v4314_v9 = vpop.f32.mrb[49].mxu0  ;;  %8907 = vst [vmem:[#allocation78_spill] sm:$0xff] %v5515_v13 }
 0x148   :  { %v543_v10 = vpop.f32.mrb[50].mxu0  ;;  %v719_v13 = vmul.f32 0.01, %v5157_v46 }
 0x149   :  { %v5517_v4 = vsel %vm666_vm13, %v540_v17, %v715_v0  ;;  %vm667_vm15 = vcmp.ge.f32.partialorder %v543_v10, 0.0  ;;  %v716_v54 = vmul.f32 0.01, %v543_v10  ;;  %v4315_v60 = vpop.f32.mrb[51].mxu0  ;;  %v156_v17 = vld [vmem:[%s8521_s5 + $0x98] sm:$0xff]  ;;  %vm681_vm13 = vcmp.ge.f32.partialorder %v5347_v26, 0.0 }
 0x14a   :  { %v837_v9 = vsel %vm789_vm6, %v5517_v4, 0.0  ;;  %3453 = vperm.xlu1 %4376, %v155_v1   ;;  %3448 = vperm.xlu0 %4375, %v154_v6   ;;  %v841_v6 = vsel %vm789_vm6, %v5525_v21, 0.0  ;;  %v843_v60 = vsel %vm789_vm6, %v5540_v50, 0.0 }
 0x14b   :  { %v838_v55 = vadd.f32 %v837_v9, %v836_v59  ;;  %v5528_v0 = vsel %vm667_vm15, %v543_v10, %v716_v54  ;;  %v720_v59 = vmul.f32 0.01, %v5163_v8  ;;  %v5547_v10 = vsel %vm670_vm1, %v5157_v46, %v719_v13 }
 0x14c   :  { %v839_v1 = vsel %vm789_vm6, %v5528_v0, 0.0  ;;  %v721_v54 = vmul.f32 0.01, %v5183_v61  ;;  %v722_v13 = vmul.f32 0.01, %v5192_v39  ;;  %vm683_vm15 = vcmp.ge.f32.partialorder %v5379_v36, 0.0 }
 0x14d   :  { %v840_v2 = vadd.f32 %v839_v1, %v838_v55  ;;  %v5558_v55 = vpop.permute.xlu1 %1897  ;;  %v5564_v46 = vsel %vm671_vm2, %v5163_v8, %v720_v59  ;;  %v845_v1 = vsel %vm789_vm6, %v5547_v10, 0.0  ;;  %v161_v8 = vld [vmem:[%s8521_s5 + $0xc0] sm:$0xff]  ;;  %v160_v59 = vld [vmem:[%s8521_s5 + $0xb8] sm:$0xff]  ;;  %vm685_vm1 = vcmp.ge.f32.partialorder %v5411_v5, 0.0 }
 0x14e   :  { %3463 = vperm.xlu1 %4376, %v157_v12   ;;  %3458 = vperm.xlu0 %4375, %v156_v17   ;;  %8909 = vst [vmem:[#allocation80_spill] sm:$0xff] %v5558_v55  ;;  %v5560_v12 = vpop.permute.xlu0 %1892  ;;  %vm686_vm2 = vcmp.ge.f32.partialorder %v5436_v18, 0.0 }
 0x14f   :  { %v842_v9 = vadd.f32 %v841_v6, %v840_v2  ;;  %8910 = vst [vmem:[#allocation81_spill] sm:$0xff] %v5560_v12  ;;  %v5571_v2 = vsel %vm672_vm3, %v5183_v61, %v721_v54  ;;  %v723_v6 = vmul.f32 0.01, %v5220_v51  ;;  %v724_v61 = vmul.f32 0.01, %v5233_v32 }
 0x150   :  { %vm687_vm3 = vcmp.ge.f32.partialorder %v5444_v3, 0.0 }
 0x151   :  { %v844_v17 = vadd.f32 %v843_v60, %v842_v9  ;;  %v847_v9 = vsel %vm789_vm6, %v5564_v46, 0.0 }
 0x152   :  { %3473 = vperm.xlu1 %4376, %v159_v63   ;;  %3468 = vperm.xlu0 %4375, %v158_v42   ;;  %v5584_v63 = vsel %vm673_vm4, %v5192_v39, %v722_v13  ;;  %v5587_v42 = vpop.permute.xlu1 %1907  ;;  %v5589_v60 = vpop.permute.xlu0 %1902  ;;  %v725_v39 = vmul.f32 0.01, %v5264_v53  ;;  %vm688_vm4 = vcmp.ge.f32.partialorder %v5466_v47, 0.0 }
 0x153   :  { %v846_v55 = vadd.f32 %v845_v1, %v844_v17  ;;  %8911 = vst [vmem:[#allocation82_spill] sm:$0xff] %v5587_v42  ;;  %8912 = vst [vmem:[#allocation83_spill] sm:$0xff] %v5589_v60  ;;  %v849_v17 = vsel %vm789_vm6, %v5571_v2, 0.0  ;;  %v5595_v1 = vsel %vm674_vm5, %v5220_v51, %v723_v6  ;;  %v851_v42 = vsel %vm789_vm6, %v5584_v63, 0.0 }
 0x154   :  { %v726_v51 = vmul.f32 0.01, %v5274_v48  ;;  %vm689_vm5 = vcmp.ge.f32.partialorder %v5476_v34, 0.0 }
 0x155   :  { %v848_v54 = vadd.f32 %v847_v9, %v846_v55  ;;  %v163_v55 = vld [vmem:[%s8521_s5 + $0xd0] sm:$0xff]  ;;  %v162_v9 = vld [vmem:[%s8521_s5 + $0xc8] sm:$0xff] }
 0x156   :  { %3483 = vperm.xlu1 %4376, %v161_v8   ;;  %3478 = vperm.xlu0 %4375, %v160_v59   ;;  %v5608_v8 = vsel %vm675_vm7, %v5233_v32, %v724_v61  ;;  %v853_v59 = vsel %vm789_vm6, %v5595_v1, 0.0  ;;  %v165_v32 = vld [vmem:[%s8521_s5 + $0xe0] sm:$0xff]  ;;  %v164_v61 = vld [vmem:[%s8521_s5 + $0xd8] sm:$0xff]  ;;  %vm690_vm7 = vcmp.ge.f32.partialorder %v5500_v27, 0.0 }
 0x157   :  { %v850_v13 = vadd.f32 %v849_v17, %v848_v54  ;;  %v5615_v54 = vsel %vm676_vm8, %v5264_v53, %v725_v39  ;;  %v727_v17 = vmul.f32 0.01, %v5304_v31  ;;  %v5632_v53 = vsel %vm677_vm9, %v5274_v48, %v726_v51  ;;  %v167_v48 = vld [vmem:[%s8521_s5 + $0xf0] sm:$0xff] }
 0x158   :  { %v728_v39 = vmul.f32 0.01, %v5312_v56  ;;  %v859_v51 = vsel %vm789_vm6, %v5632_v53, 0.0  ;;  %vm1306_vm8 = vcmask 1046528   ;;  %vm2088_vm9 = vcmask 1045504  }
 0x159   :  { %v852_v6 = vadd.f32 %v851_v42, %v850_v13  ;;  %v5624_v42 = vpop.permute.xlu1 %1917  ;;  %v5626_v13 = vpop.permute.xlu0 %1912 }
 0x15a   :  { %3493 = vperm.xlu1 %4376, %v163_v55   ;;  %3488 = vperm.xlu0 %4375, %v162_v9   ;;  %8913 = vst [vmem:[#allocation84_spill] sm:$0xff] %v5624_v42  ;;  %8914 = vst [vmem:[#allocation85_spill] sm:$0xff] %v5626_v13  ;;  %v855_v55 = vsel %vm789_vm6, %v5608_v8, 0.0  ;;  %v729_v42 = vmul.f32 0.01, %v5339_v29 }
 0x15b   :  { %v854_v60 = vadd.f32 %v853_v59, %v852_v6  ;;  %v857_v6 = vsel %vm789_vm6, %v5615_v54, 0.0  ;;  %v5639_v59 = vsel %vm678_vm10, %v5304_v31, %v727_v17  ;;  %v730_v17 = vmul.f32 0.01, %v5347_v26 }
 0x15c   :  { %vm2330_vm10 = vcmask 1044480  }
 0x15d   :  { %v856_v9 = vadd.f32 %v855_v55, %v854_v60  ;;  %v166_v60 = vld [vmem:[%s8521_s5 + $0xe8] sm:$0xff]  ;;  %v5657_v55 = vpop.permute.xlu0 %1922 }
 0x15e   :  { %3503 = vperm.xlu1 %4376, %v165_v32   ;;  %3498 = vperm.xlu0 %4375, %v164_v61   ;;  %v5652_v32 = vsel %vm679_vm11, %v5312_v56, %v728_v39  ;;  %v5655_v61 = vpop.permute.xlu1 %1927  ;;  %8916 = vst [vmem:[#allocation87_spill] sm:$0xff] %v5657_v55  ;;  %v731_v56 = vmul.f32 0.01, %v5371_v52  ;;  %v168_v39 = vld [vmem:[%s8521_s5 + $0xf8] sm:$0xff]  ;;  %vm2867_vm11 = vcmask 1040384  }
 0x15f   :  { %v858_v13 = vadd.f32 %v857_v6, %v856_v9  ;;  %8915 = vst [vmem:[#allocation86_spill] sm:$0xff] %v5655_v61  ;;  %v861_v9 = vsel %vm789_vm6, %v5639_v59, 0.0  ;;  %v5663_v6 = vsel %vm680_vm12, %v5339_v29, %v729_v42  ;;  %v5676_v29 = vsel %vm681_vm13, %v5347_v26, %v730_v17  ;;  %v171_v26 = vld [vmem:[%s8521_s5 + $0x110] sm:$0xff] }
 0x160   :  { %v732_v42 = vmul.f32 0.01, %v5379_v36  ;;  %v733_v61 = vmul.f32 0.01, %v5405_v14  ;;  %vm3216_vm12 = vcmask 1042432   ;;  %vm3753_vm13 = vcmask 1041408  }
 0x161   :  { %v860_v31 = vadd.f32 %v859_v51, %v858_v13  ;;  %v169_v13 = vld [vmem:[%s8521_s5 + $0x100] sm:$0xff]  ;;  %v863_v51 = vsel %vm789_vm6, %v5652_v32, 0.0 }
 0x162   :  { %3513 = vperm.xlu1 %4376, %v167_v48   ;;  %3508 = vperm.xlu0 %4375, %v166_v60   ;;  %v865_v60 = vsel %vm789_vm6, %v5663_v6, 0.0  ;;  %v5692_v17 = vpop.permute.xlu1 %1937 }
 0x163   :  { %v862_v12 = vadd.f32 %v861_v9, %v860_v31  ;;  %v5683_v9 = vsel %vm682_vm14, %v5371_v52, %v731_v56  ;;  %8917 = vst [vmem:[#allocation88_spill] sm:$0xff] %v5692_v17  ;;  %v5700_v56 = vsel %vm683_vm15, %v5379_v36, %v732_v42  ;;  %v5707_v17 = vsel %vm684_vm0, %v5405_v14, %v733_v61  ;;  %v173_v36 = vld [vmem:[%s8521_s5 + $0x120] sm:$0xff]  ;;  %v172_v42 = vld [vmem:[%s8521_s5 + $0x118] sm:$0xff] }
 0x164   :  { %v736_v14 = vmul.f32 0.01, %v5444_v3 }
 0x165   :  { %v864_v48 = vadd.f32 %v863_v51, %v862_v12  ;;  %v170_v12 = vld [vmem:[%s8521_s5 + $0x108] sm:$0xff]  ;;  %v5694_v51 = vpop.permute.xlu0 %1932 }
 0x166   :  { %3523 = vperm.xlu1 %4376, %v169_v13   ;;  %3518 = vperm.xlu0 %4375, %v168_v39   ;;  %8918 = vst [vmem:[#allocation89_spill] sm:$0xff] %v5694_v51  ;;  %v867_v13 = vsel %vm789_vm6, %v5676_v29, 0.0  ;;  %v734_v39 = vmul.f32 0.01, %v5411_v5  ;;  %v735_v51 = vmul.f32 0.01, %v5436_v18  ;;  %v5723_v61 = vpop.permute.xlu1 %1947 }
 0x167   :  { %v866_v31 = vadd.f32 %v865_v60, %v864_v48  ;;  %v869_v48 = vsel %vm789_vm6, %v5683_v9, 0.0  ;;  %8919 = vst [vmem:[#allocation90_spill] sm:$0xff] %v5723_v61  ;;  %v739_v61 = vmul.f32 0.01, %v5500_v27 }
 0x168   :  { %v5731_v55 = vsel %vm686_vm2, %v5436_v18, %v735_v51  ;;  %v738_v18 = vmul.f32 0.01, %v5476_v34 }
 0x169   :  { %v868_v52 = vadd.f32 %v867_v13, %v866_v31  ;;  %v871_v31 = vsel %vm789_vm6, %v5700_v56, 0.0  ;;  %v5725_v13 = vpop.permute.xlu0 %1942  ;;  %v877_v51 = vsel %vm789_vm6, %v5731_v55, 0.0 }
 0x16a   :  { %3533 = vperm.xlu1 %4376, %v171_v26   ;;  %3528 = vperm.xlu0 %4375, %v170_v12   ;;  %v5720_v12 = vsel %vm685_vm1, %v5411_v5, %v734_v39  ;;  %8920 = vst [vmem:[#allocation91_spill] sm:$0xff] %v5725_v13  ;;  %v737_v5 = vmul.f32 0.01, %v5466_v47  ;;  %v175_v39 = vld [vmem:[%s8521_s5 + $0x130] sm:$0xff] }
 0x16b   :  { %v870_v60 = vadd.f32 %v869_v48, %v868_v52  ;;  %v873_v52 = vsel %vm789_vm6, %v5707_v17, 0.0 }
 0x16d   :  { %v872_v26 = vadd.f32 %v871_v31, %v870_v60  ;;  %v174_v60 = vld [vmem:[%s8521_s5 + $0x128] sm:$0xff]  ;;  %v875_v31 = vsel %vm789_vm6, %v5720_v12, 0.0 }
 0x16e   :  { %3543 = vperm.xlu1 %4376, %v173_v36   ;;  %3538 = vperm.xlu0 %4375, %v172_v42   ;;  %v5744_v42 = vsel %vm687_vm3, %v5444_v3, %v736_v14  ;;  %v177_v3 = vld [vmem:[%s8521_s5 + $0x140] sm:$0xff]  ;;  %v176_v14 = vld [vmem:[%s8521_s5 + $0x138] sm:$0xff] }
 0x16f   :  { %v874_v48 = vadd.f32 %v873_v52, %v872_v26  ;;  %v5751_v52 = vsel %vm688_vm4, %v5466_v47, %v737_v5  ;;  %v5768_v5 = vsel %vm689_vm5, %v5476_v34, %v738_v18 }
 0x170   :  { %v883_v34 = vsel %vm789_vm6, %v5768_v5, 0.0 }
 0x171   :  { %v876_v36 = vadd.f32 %v875_v31, %v874_v48  ;;  %v5760_v48 = vpop.permute.xlu1 %1957  ;;  %v5762_v31 = vpop.permute.xlu0 %1952 }
 0x172   :  { %3553 = vperm.xlu1 %4376, %v175_v39   ;;  %3548 = vperm.xlu0 %4375, %v174_v60   ;;  %8921 = vst [vmem:[#allocation92_spill] sm:$0xff] %v5760_v48  ;;  %8922 = vst [vmem:[#allocation93_spill] sm:$0xff] %v5762_v31  ;;  %v879_v39 = vsel %vm789_vm6, %v5744_v42, 0.0  ;;  %v881_v60 = vsel %vm789_vm6, %v5751_v52, 0.0  ;;  %v179_v48 = vld [vmem:[%s8521_s5 + $0x150] sm:$0xff] }
 0x173   :  { %v878_v26 = vadd.f32 %v877_v51, %v876_v36  ;;  %v5773_v51 = vsel %vm690_vm7, %v5500_v27, %v739_v61 }
 0x174   :  { %v885_v27 = vsel %vm789_vm6, %v5773_v51, 0.0 }
 0x175   :  { %v880_v47 = vadd.f32 %v879_v39, %v878_v26  ;;  %v178_v26 = vld [vmem:[%s8521_s5 + $0x148] sm:$0xff]  ;;  %v5783_v39 = vpop.permute.xlu1 %1967 }
 0x176   :  { %3563 = vperm.xlu1 %4376, %v177_v3   ;;  %3558 = vperm.xlu0 %4375, %v176_v14   ;;  %8923 = vst [vmem:[#allocation94_spill] sm:$0xff] %v5783_v39  ;;  %v5785_v3 = vpop.permute.xlu0 %1962  ;;  %v181_v14 = vld [vmem:[%s8521_s5 + $0x160] sm:$0xff] }
 0x177   :  { %v882_v36 = vadd.f32 %v881_v60, %v880_v47  ;;  %8924 = vst [vmem:[#allocation95_spill] sm:$0xff] %v5785_v3  ;;  %v180_v47 = vld [vmem:[%s8521_s5 + $0x158] sm:$0xff] }
 0x179   :  { %v884_v18 = vadd.f32 %v883_v34, %v882_v36  ;;  %v183_v36 = vld [vmem:[%s8521_s5 + $0x170] sm:$0xff] }
 0x17a   :  { %3573 = vperm.xlu1 %4376, %v179_v48   ;;  %3568 = vperm.xlu0 %4375, %v178_v26   ;;  %v182_v48 = vld [vmem:[%s8521_s5 + $0x168] sm:$0xff]  ;;  %v5801_v26 = vpop.permute.xlu1 %1977  ;;  %v5803_v34 = vpop.permute.xlu0 %1972 }
 0x17b   :  { %v886_v61 = vadd.f32 %v885_v27, %v884_v18  ;;  %8925 = vst [vmem:[#allocation96_spill] sm:$0xff] %v5801_v26  ;;  %8926 = vst [vmem:[#allocation97_spill] sm:$0xff] %v5803_v34  ;;  %v185_v27 = vld [vmem:[%s8521_s5 + $0x180] sm:$0xff] }
 0x17d   :  { %v887_v60 = vrot.slane %v886_v61, 4 }
 0x17e   :  { %3583 = vperm.xlu1 %4376, %v181_v14   ;;  %3578 = vperm.xlu0 %4375, %v180_v47   ;;  %v184_v14 = vld [vmem:[%s8521_s5 + $0x178] sm:$0xff]  ;;  %v5811_v47 = vpop.permute.xlu1 %1987  ;;  %v5813_v39 = vpop.permute.xlu0 %1982 }
 0x17f   :  { %v888_v18 = vadd.f32 %v887_v60, %v886_v61  ;;  %8927 = vst [vmem:[#allocation98_spill] sm:$0xff] %v5811_v47  ;;  %8928 = vst [vmem:[#allocation99_spill] sm:$0xff] %v5813_v39 }
 0x181   :  { %v889_v26 = vrot.slane %v888_v18, 2 }
 0x182   :  { %3593 = vperm.xlu1 %4376, %v183_v36   ;;  %3588 = vperm.xlu0 %4375, %v182_v48  }
 0x183   :  { %v890_v3 = vadd.f32 %v889_v26, %v888_v18 }
 0x185   :  { %v891_v34 = vrot.slane %v890_v3, 1 }
 0x186   :  { %3603 = vperm.xlu1 %4376, %v185_v27   ;;  %3598 = vperm.xlu0 %4375, %v184_v14  }
 0x187   :  { %v892_v36 = vadd.f32 %v891_v34, %v890_v3 }
 0x189   :  { %v5815_v48 = vmul.f32 0.0025510204, %v892_v36 }
 0x18b   :  { %v5819_v61 = vsub.f32 %v5209_v57, %v5815_v48  ;;  %v5823_v60 = vsub.f32 %v5204_v44, %v5815_v48  ;;  %v5827_v47 = vsub.f32 %v5211_v41, %v5815_v48  ;;  %v5831_v27 = vsub.f32 %v5238_v49, %v5815_v48 }
 0x18c   :  { %v5839_v57 = vsub.f32 %v5249_v45, %v5815_v48  ;;  %v5845_v41 = vsub.f32 %v5272_v15, %v5815_v48  ;;  %v5853_v36 = vsub.f32 %v5277_v43, %v5815_v48  ;;  %v5860_v15 = vsub.f32 %v5296_v40, %v5815_v48 }
 0x18d   :  { %8929 = vst [vmem:[#allocation100_spill] sm:$0xff] %v5823_v60  ;;  %8930 = vst [vmem:[#allocation101_spill] sm:$0xff] %v5827_v47  ;;  %v944_v3 = vmul.f32 %v5819_v61, %v5819_v61  ;;  %v945_v26 = vmul.f32 %v5823_v60, %v5823_v60  ;;  %v946_v44 = vmul.f32 %v5827_v47, %v5827_v47 }
 0x18e   :  { %8931 = vst [vmem:[#allocation102_spill] sm:$0xff] %v5831_v27  ;;  %8932 = vst [vmem:[#allocation103_spill] sm:$0xff] %v5839_v57  ;;  %v947_v49 = vmul.f32 %v5831_v27, %v5831_v27  ;;  %v948_v45 = vmul.f32 %v5839_v57, %v5839_v57  ;;  %v5867_v43 = vsub.f32 %v5306_v24, %v5815_v48 }
 0x18f   :  { %8933 = vst [vmem:[#allocation104_spill] sm:$0xff] %v5845_v41  ;;  %v993_v34 = vsel %vm789_vm6, %v944_v3, 0.0  ;;  %v994_v18 = vsel %vm789_vm6, %v945_v26, 0.0  ;;  %8934 = vst [vmem:[#allocation105_spill] sm:$0xff] %v5853_v36  ;;  %v996_v47 = vsel %vm789_vm6, %v946_v44, 0.0  ;;  %v949_v3 = vmul.f32 %v5845_v41, %v5845_v41  ;;  %v8991_v41 = vld [vmem:[#allocation28_spill] sm:$0xff] }
 0x190   :  { %v995_v14 = vadd.f32 %v994_v18, %v993_v34  ;;  %8935 = vst [vmem:[#allocation106_spill] sm:$0xff] %v5860_v15  ;;  %v998_v26 = vsel %vm789_vm6, %v947_v49, 0.0  ;;  %8936 = vst [vmem:[#allocation107_spill] sm:$0xff] %v5867_v43  ;;  %v950_v18 = vmul.f32 %v5853_v36, %v5853_v36  ;;  %v1000_v44 = vsel %vm789_vm6, %v948_v45, 0.0 }
 0x191   :  { %v5874_v40 = vsub.f32 %v5329_v7, %v5815_v48  ;;  %v1002_v49 = vsel %vm789_vm6, %v949_v3, 0.0  ;;  %v5881_v24 = vsub.f32 %v5331_v58, %v5815_v48  ;;  %v5888_v7 = vsub.f32 %v5351_v37, %v5815_v48 }
 0x192   :  { %v997_v60 = vadd.f32 %v996_v47, %v995_v14  ;;  %v951_v14 = vmul.f32 %v5860_v15, %v5860_v15  ;;  %v1004_v45 = vsel %vm789_vm6, %v950_v18, 0.0  ;;  %v5895_v58 = vsub.f32 %v5359_v11, %v5815_v48  ;;  %v8990_v15 = vld [vmem:[#allocation26_spill] sm:$0xff] }
 0x193   :  { %8937 = vst [vmem:[#allocation108_spill] sm:$0xff] %v5874_v40  ;;  %8938 = vst [vmem:[#allocation109_spill] sm:$0xff] %v5881_v24  ;;  %v5902_v37 = vsub.f32 %v5377_v19, %v5815_v48  ;;  %v5909_v11 = vsub.f32 %v5381_v62, %v5815_v48  ;;  %v5916_v19 = vsub.f32 %v5397_v25, %v5815_v48 }
 0x194   :  { %v999_v34 = vadd.f32 %v998_v26, %v997_v60  ;;  %v952_v26 = vmul.f32 %v5867_v43, %v5867_v43  ;;  %8939 = vst [vmem:[#allocation110_spill] sm:$0xff] %v5888_v7  ;;  %v1006_v3 = vsel %vm789_vm6, %v951_v14, 0.0  ;;  %8940 = vst [vmem:[#allocation111_spill] sm:$0xff] %v5895_v58  ;;  %v5923_v62 = vsub.f32 %v5407_v28, %v5815_v48 }
 0x195   :  { %8941 = vst [vmem:[#allocation112_spill] sm:$0xff] %v5902_v37  ;;  %8942 = vst [vmem:[#allocation113_spill] sm:$0xff] %v5909_v11  ;;  %v5930_v25 = vsub.f32 %v5426_v23, %v5815_v48  ;;  %v5937_v28 = vsub.f32 %v5428_v35, %v5815_v48  ;;  %v5944_v23 = vsub.f32 %v5448_v20, %v5815_v48 }
 0x196   :  { %v1001_v47 = vadd.f32 %v1000_v44, %v999_v34  ;;  %v953_v44 = vmul.f32 %v5874_v40, %v5874_v40  ;;  %v1008_v18 = vsel %vm789_vm6, %v952_v26, 0.0  ;;  %8943 = vst [vmem:[#allocation114_spill] sm:$0xff] %v5916_v19  ;;  %8944 = vst [vmem:[#allocation115_spill] sm:$0xff] %v5923_v62  ;;  %v5951_v35 = vsub.f32 %v5456_v16, %v5815_v48 }
 0x197   :  { %8945 = vst [vmem:[#allocation116_spill] sm:$0xff] %v5930_v25  ;;  %8946 = vst [vmem:[#allocation117_spill] sm:$0xff] %v5937_v28  ;;  %v5958_v20 = vsub.f32 %v5474_v33, %v5815_v48  ;;  %v5965_v16 = vsub.f32 %v5486_v22, %v5815_v48  ;;  %v5972_v33 = vsub.f32 %v5492_v38, %v5815_v48 }
 0x198   :  { %v1003_v60 = vadd.f32 %v1002_v49, %v1001_v47  ;;  %v954_v49 = vmul.f32 %v5881_v24, %v5881_v24  ;;  %v1010_v14 = vsel %vm789_vm6, %v953_v44, 0.0  ;;  %8947 = vst [vmem:[#allocation118_spill] sm:$0xff] %v5944_v23  ;;  %8948 = vst [vmem:[#allocation119_spill] sm:$0xff] %v5951_v35  ;;  %v5979_v22 = vsub.f32 %v5517_v4, %v5815_v48 }
 0x199   :  { %8949 = vst [vmem:[#allocation120_spill] sm:$0xff] %v5958_v20  ;;  %v5986_v38 = vsub.f32 %v5528_v0, %v5815_v48  ;;  %v5993_v4 = vsub.f32 %v5525_v21, %v5815_v48  ;;  %v6000_v0 = vsub.f32 %v5540_v50, %v5815_v48  ;;  %v6007_v21 = vsub.f32 %v5547_v10, %v5815_v48 }
 0x19a   :  { %v1005_v34 = vadd.f32 %v1004_v45, %v1003_v60  ;;  %v955_v45 = vmul.f32 %v5888_v7, %v5888_v7  ;;  %v1012_v26 = vsel %vm789_vm6, %v954_v49, 0.0  ;;  %v6014_v50 = vsub.f32 %v5564_v46, %v5815_v48 }
 0x19b   :  { %v6021_v10 = vsub.f32 %v5571_v2, %v5815_v48  ;;  %v6028_v46 = vsub.f32 %v5584_v63, %v5815_v48  ;;  %v6035_v2 = vsub.f32 %v5595_v1, %v5815_v48  ;;  %v6042_v63 = vsub.f32 %v5608_v8, %v5815_v48 }
 0x19c   :  { %v1007_v47 = vadd.f32 %v1006_v3, %v1005_v34  ;;  %v956_v3 = vmul.f32 %v5895_v58, %v5895_v58  ;;  %v1014_v44 = vsel %vm789_vm6, %v955_v45, 0.0  ;;  %v6049_v1 = vsub.f32 %v5615_v54, %v5815_v48 }
 0x19d   :  { %v6056_v8 = vsub.f32 %v5632_v53, %v5815_v48  ;;  %v6063_v54 = vsub.f32 %v5639_v59, %v5815_v48  ;;  %v6070_v53 = vsub.f32 %v5652_v32, %v5815_v48  ;;  %v6077_v59 = vsub.f32 %v5663_v6, %v5815_v48 }
 0x19e   :  { %v1009_v60 = vadd.f32 %v1008_v18, %v1007_v47  ;;  %v957_v18 = vmul.f32 %v5902_v37, %v5902_v37  ;;  %v1016_v49 = vsel %vm789_vm6, %v956_v3, 0.0  ;;  %v6084_v32 = vsub.f32 %v5676_v29, %v5815_v48 }
 0x19f   :  { %v6093_v6 = vsub.f32 %v5683_v9, %v5815_v48  ;;  %v6100_v29 = vsub.f32 %v5700_v56, %v5815_v48  ;;  %v6109_v9 = vsub.f32 %v5707_v17, %v5815_v48  ;;  %v6125_v17 = vsub.f32 %v5731_v55, %v5815_v48 }
 0x1a0   :  { %v1011_v34 = vadd.f32 %v1010_v14, %v1009_v60  ;;  %v958_v14 = vmul.f32 %v5909_v11, %v5909_v11  ;;  %v1018_v45 = vsel %vm789_vm6, %v957_v18, 0.0  ;;  %v941_v55 = vsub.f32 %v5751_v52, %v5815_v48 }
 0x1a2   :  { %v1013_v47 = vadd.f32 %v1012_v26, %v1011_v34  ;;  %v959_v26 = vmul.f32 %v5916_v19, %v5916_v19  ;;  %v1020_v3 = vsel %vm789_vm6, %v958_v14, 0.0 }
 0x1a4   :  { %v1015_v60 = vadd.f32 %v1014_v44, %v1013_v47  ;;  %v960_v44 = vmul.f32 %v5923_v62, %v5923_v62  ;;  %v1022_v18 = vsel %vm789_vm6, %v959_v26, 0.0 }
 0x1a6   :  { %v1017_v34 = vadd.f32 %v1016_v49, %v1015_v60  ;;  %v961_v49 = vmul.f32 %v5930_v25, %v5930_v25  ;;  %v1024_v14 = vsel %vm789_vm6, %v960_v44, 0.0 }
 0x1a8   :  { %v1019_v47 = vadd.f32 %v1018_v45, %v1017_v34  ;;  %v962_v45 = vmul.f32 %v5937_v28, %v5937_v28  ;;  %v1026_v26 = vsel %vm789_vm6, %v961_v49, 0.0 }
 0x1aa   :  { %v1021_v60 = vadd.f32 %v1020_v3, %v1019_v47  ;;  %v963_v3 = vmul.f32 %v5944_v23, %v5944_v23  ;;  %v1028_v44 = vsel %vm789_vm6, %v962_v45, 0.0 }
 0x1ac   :  { %v1023_v34 = vadd.f32 %v1022_v18, %v1021_v60  ;;  %v964_v18 = vmul.f32 %v5951_v35, %v5951_v35  ;;  %v1030_v49 = vsel %vm789_vm6, %v963_v3, 0.0  ;;  %v6118_v35 = vsub.f32 %v5720_v12, %v5815_v48 }
 0x1ad   :  { %v940_v12 = vsub.f32 %v5744_v42, %v5815_v48  ;;  %v942_v42 = vsub.f32 %v5768_v5, %v5815_v48 }
 0x1ae   :  { %v1025_v47 = vadd.f32 %v1024_v14, %v1023_v34  ;;  %v965_v14 = vmul.f32 %v5958_v20, %v5958_v20  ;;  %v1032_v45 = vsel %vm789_vm6, %v964_v18, 0.0  ;;  %v987_v28 = vmul.f32 %v6118_v35, %v6118_v35 }
 0x1b0   :  { %v1027_v60 = vadd.f32 %v1026_v26, %v1025_v47  ;;  %v966_v26 = vmul.f32 %v5965_v16, %v5965_v16  ;;  %v1034_v3 = vsel %vm789_vm6, %v965_v14, 0.0  ;;  %v1078_v62 = vsel %vm789_vm6, %v987_v28, 0.0 }
 0x1b2   :  { %v1029_v34 = vadd.f32 %v1028_v44, %v1027_v60  ;;  %v967_v44 = vmul.f32 %v5972_v33, %v5972_v33  ;;  %v1036_v18 = vsel %vm789_vm6, %v966_v26, 0.0 }
 0x1b4   :  { %v1031_v47 = vadd.f32 %v1030_v49, %v1029_v34  ;;  %v968_v49 = vmul.f32 %v5979_v22, %v5979_v22  ;;  %v1038_v14 = vsel %vm789_vm6, %v967_v44, 0.0 }
 0x1b6   :  { %v1033_v60 = vadd.f32 %v1032_v45, %v1031_v47  ;;  %v969_v45 = vmul.f32 %v5986_v38, %v5986_v38  ;;  %v1040_v26 = vsel %vm789_vm6, %v968_v49, 0.0 }
 0x1b8   :  { %v1035_v34 = vadd.f32 %v1034_v3, %v1033_v60  ;;  %v970_v3 = vmul.f32 %v5993_v4, %v5993_v4  ;;  %v1042_v44 = vsel %vm789_vm6, %v969_v45, 0.0 }
 0x1ba   :  { %v1037_v47 = vadd.f32 %v1036_v18, %v1035_v34  ;;  %v971_v18 = vmul.f32 %v6000_v0, %v6000_v0  ;;  %v1044_v49 = vsel %vm789_vm6, %v970_v3, 0.0 }
 0x1bc   :  { %v1039_v60 = vadd.f32 %v1038_v14, %v1037_v47  ;;  %v972_v14 = vmul.f32 %v6007_v21, %v6007_v21  ;;  %v1046_v45 = vsel %vm789_vm6, %v971_v18, 0.0 }
 0x1be   :  { %v1041_v34 = vadd.f32 %v1040_v26, %v1039_v60  ;;  %v973_v26 = vmul.f32 %v6014_v50, %v6014_v50  ;;  %v1048_v3 = vsel %vm789_vm6, %v972_v14, 0.0 }
 0x1c0   :  { %v1043_v47 = vadd.f32 %v1042_v44, %v1041_v34  ;;  %v974_v44 = vmul.f32 %v6021_v10, %v6021_v10  ;;  %v1050_v18 = vsel %vm789_vm6, %v973_v26, 0.0 }
 0x1c2   :  { %v1045_v60 = vadd.f32 %v1044_v49, %v1043_v47  ;;  %v975_v49 = vmul.f32 %v6028_v46, %v6028_v46  ;;  %v1052_v14 = vsel %vm789_vm6, %v974_v44, 0.0 }
 0x1c4   :  { %v1047_v34 = vadd.f32 %v1046_v45, %v1045_v60  ;;  %v976_v45 = vmul.f32 %v6035_v2, %v6035_v2  ;;  %v1054_v26 = vsel %vm789_vm6, %v975_v49, 0.0 }
 0x1c6   :  { %v1049_v47 = vadd.f32 %v1048_v3, %v1047_v34  ;;  %v977_v3 = vmul.f32 %v6042_v63, %v6042_v63  ;;  %v1056_v44 = vsel %vm789_vm6, %v976_v45, 0.0 }
 0x1c8   :  { %v1051_v60 = vadd.f32 %v1050_v18, %v1049_v47  ;;  %v978_v18 = vmul.f32 %v6049_v1, %v6049_v1  ;;  %v1058_v49 = vsel %vm789_vm6, %v977_v3, 0.0 }
 0x1ca   :  { %v1053_v34 = vadd.f32 %v1052_v14, %v1051_v60  ;;  %v979_v14 = vmul.f32 %v6056_v8, %v6056_v8  ;;  %v1060_v45 = vsel %vm789_vm6, %v978_v18, 0.0  ;;  %v982_v18 = vmul.f32 %v6077_v59, %v6077_v59 }
 0x1cc   :  { %v1055_v47 = vadd.f32 %v1054_v26, %v1053_v34  ;;  %v980_v26 = vmul.f32 %v6063_v54, %v6063_v54  ;;  %v1062_v3 = vsel %vm789_vm6, %v979_v14, 0.0  ;;  %v983_v14 = vmul.f32 %v6084_v32, %v6084_v32 }
 0x1ce   :  { %v1057_v60 = vadd.f32 %v1056_v44, %v1055_v47  ;;  %v981_v44 = vmul.f32 %v6070_v53, %v6070_v53 }
 0x1d0   :  { %v1059_v34 = vadd.f32 %v1058_v49, %v1057_v60  ;;  %v6089_v49 = vpop.permute.xlu1 %2530 }
 0x1d1   :  { %8950 = vst [vmem:[#allocation121_spill] sm:$0xff] %v6089_v49 }
 0x1d2   :  { %v1061_v47 = vadd.f32 %v1060_v45, %v1059_v34  ;;  %v1064_v34 = vsel %vm789_vm6, %v980_v26, 0.0  ;;  %v984_v26 = vmul.f32 %v6093_v6, %v6093_v6 }
 0x1d4   :  { %v1063_v60 = vadd.f32 %v1062_v3, %v1061_v47  ;;  %v1066_v47 = vsel %vm789_vm6, %v981_v44, 0.0  ;;  %v6105_v3 = vpop.permute.xlu0 %2525  ;;  %v6114_v56 = vpop.permute.xlu1 %2540  ;;  %v985_v44 = vmul.f32 %v6100_v29, %v6100_v29 }
 0x1d5   :  { %8951 = vst [vmem:[#allocation122_spill] sm:$0xff] %v6105_v3  ;;  %8952 = vst [vmem:[#allocation123_spill] sm:$0xff] %v6114_v56 }
 0x1d6   :  { %v1065_v45 = vadd.f32 %v1064_v34, %v1063_v60  ;;  %v1068_v60 = vsel %vm789_vm6, %v982_v18, 0.0  ;;  %v986_v18 = vmul.f32 %v6109_v9, %v6109_v9 }
 0x1d8   :  { %v1067_v20 = vadd.f32 %v1066_v47, %v1065_v45  ;;  %v1070_v45 = vsel %vm789_vm6, %v983_v14, 0.0  ;;  %v1074_v14 = vsel %vm789_vm6, %v985_v44, 0.0  ;;  %v1076_v25 = vsel %vm789_vm6, %v986_v18, 0.0 }
 0x1d9   :  { %v943_v44 = vsub.f32 %v5773_v51, %v5815_v48  ;;  %v991_v18 = vmul.f32 %v942_v42, %v942_v42 }
 0x1da   :  { %v1069_v34 = vadd.f32 %v1068_v60, %v1067_v20  ;;  %v1072_v20 = vsel %vm789_vm6, %v984_v26, 0.0  ;;  %v6130_v60 = vpop.permute.xlu0 %2535  ;;  %v988_v26 = vmul.f32 %v6125_v17, %v6125_v17 }
 0x1db   :  { %8953 = vst [vmem:[#allocation124_spill] sm:$0xff] %v6130_v60  ;;  %v992_v5 = vmul.f32 %v943_v44, %v943_v44 }
 0x1dc   :  { %v1071_v47 = vadd.f32 %v1070_v45, %v1069_v34  ;;  %v6137_v45 = vpop.permute.xlu1 %2550  ;;  %v1080_v52 = vsel %vm789_vm6, %v988_v26, 0.0 }
 0x1dd   :  { %8954 = vst [vmem:[#allocation125_spill] sm:$0xff] %v6137_v45  ;;  %v1088_v48 = vsel %vm789_vm6, %v992_v5, 0.0 }
 0x1de   :  { %v1073_v23 = vadd.f32 %v1072_v20, %v1071_v47  ;;  %v989_v20 = vmul.f32 %v940_v12, %v940_v12  ;;  %v6147_v19 = vpop.permute.xlu0 %2545 }
 0x1df   :  { %8955 = vst [vmem:[#allocation126_spill] sm:$0xff] %v6147_v19  ;;  %v8994_v19 = vld [vmem:[#allocation29_spill] sm:$0xff] }
 0x1e0   :  { %v1075_v34 = vadd.f32 %v1074_v14, %v1073_v23  ;;  %v990_v14 = vmul.f32 %v941_v55, %v941_v55  ;;  %v6152_v37 = vpop.permute.xlu1 %2560 }
 0x1e1   :  { %8956 = vst [vmem:[#allocation127_spill] sm:$0xff] %v6152_v37 }
 0x1e2   :  { %v1077_v47 = vadd.f32 %v1076_v25, %v1075_v34  ;;  %v1082_v25 = vsel %vm789_vm6, %v989_v20, 0.0  ;;  %v1084_v58 = vsel %vm789_vm6, %v990_v14, 0.0  ;;  %v6156_v28 = vpop.permute.xlu0 %2555 }
 0x1e3   :  { %8957 = vst [vmem:[#allocation128_spill] sm:$0xff] %v6156_v28 }
 0x1e4   :  { %v1079_v23 = vadd.f32 %v1078_v62, %v1077_v47  ;;  %v1086_v62 = vsel %vm789_vm6, %v991_v18, 0.0  ;;  %v6159_v51 = vpop.permute.xlu1 %2570 }
 0x1e5   :  { %8958 = vst [vmem:[#allocation129_spill] sm:$0xff] %v6159_v51 }
 0x1e6   :  { %v1081_v11 = vadd.f32 %v1080_v52, %v1079_v23  ;;  %v6162_v23 = vpop.permute.xlu0 %2565 }
 0x1e7   :  { %8959 = vst [vmem:[#allocation130_spill] sm:$0xff] %v6162_v23 }
 0x1e8   :  { %v1083_v34 = vadd.f32 %v1082_v25, %v1081_v11  ;;  %v6164_v20 = vpop.permute.xlu1 %2580 }
 0x1e9   :  { %8960 = vst [vmem:[#allocation131_spill] sm:$0xff] %v6164_v20 }
 0x1ea   :  { %v1085_v7 = vadd.f32 %v1084_v58, %v1083_v34  ;;  %v6166_v25 = vpop.permute.xlu0 %2575 }
 0x1eb   :  { %8961 = vst [vmem:[#allocation132_spill] sm:$0xff] %v6166_v25 }
 0x1ec   :  { %v1087_v47 = vadd.f32 %v1086_v62, %v1085_v7  ;;  %v6168_v58 = vpop.permute.xlu1 %2590 }
 0x1ed   :  { %8962 = vst [vmem:[#allocation133_spill] sm:$0xff] %v6168_v58  ;;  %v6214_v58 = vld [vmem:[%s8523_s3] ss:$0 sm:$0xff] }
 0x1ee   :  { %v1089_v26 = vadd.f32 %v1088_v48, %v1087_v47  ;;  %v6170_v7 = vpop.permute.xlu0 %2585 }
 0x1ef   :  { %8963 = vst [vmem:[#allocation134_spill] sm:$0xff] %v6170_v7 }
 0x1f0   :  { %v1090_v52 = vrot.slane %v1089_v26, 4  ;;  %v6172_v5 = vpop.permute.xlu1 %2600 }
 0x1f1   :  { %8964 = vst [vmem:[#allocation135_spill] sm:$0xff] %v6172_v5 }
 0x1f2   :  { %v1091_v24 = vadd.f32 %v1090_v52, %v1089_v26  ;;  %v6174_v47 = vpop.permute.xlu0 %2595  ;;  %v8968_v52 = vld [vmem:[#allocation3_spill] sm:$0xff] }
 0x1f3   :  { %8965 = vst [vmem:[#allocation136_spill] sm:$0xff] %v6174_v47  ;;  %v6181_v20 = vadd.f32 -1e+30, %v8968_v52 }
 0x1f4   :  { %v1092_v11 = vrot.slane %v1091_v24, 2  ;;  %v6176_v48 = vpop.permute.xlu1 %2610 }
 0x1f5   :  { %8966 = vst [vmem:[#allocation137_spill] sm:$0xff] %v6176_v48  ;;  %8969 = vst [vmem:[#allocation3_spill] sm:$0xff] %v6181_v20 }
 0x1f6   :  { %v1093_v14 = vadd.f32 %v1092_v11, %v1091_v24  ;;  %v6178_v26 = vpop.permute.xlu0 %2605 }
 0x1f7   :  { %8967 = vst [vmem:[#allocation138_spill] sm:$0xff] %v6178_v26 }
 0x1f8   :  { %v1094_v40 = vrot.slane %v1093_v14, 1 }
 0x1fa   :  { %v1095_v18 = vadd.f32 %v1094_v40, %v1093_v14  ;;  %v8970_v40 = vld [vmem:[#allocation50_spill] sm:$0xff]  ;;  %v6191_v14 = vadd.f32 %v6105_v3, %v6181_v20  ;;  %v6223_v47 = vpop.permute.xlu0 %2615 }
 0x1fb   :  { %v6187_v11 = vadd.f32 %v8970_v40, %v6181_v20  ;;  %8973 = vst [vmem:[#allocation141_spill] sm:$0xff] %v6223_v47 }
 0x1fc   :  { %v1096_v34 = vmul.f32 0.0025510204, %v1095_v18  ;;  %8971 = vst [vmem:[#allocation139_spill] sm:$0xff] %v6191_v14  ;;  %v6193_v18 = vpop.permute.xlu1 %2620 }
 0x1fd   :  { %8972 = vst [vmem:[#allocation140_spill] sm:$0xff] %v6193_v18 }
 0x1fe   :  { %v1097_v62 = vadd.f32 1e-05, %v1096_v34  ;;  %v6198_v34 = vld [vmem:[%s8522_s2] ss:$0 sm:$0xff] }
 0x200   :  { %4381 = vrsqrt.f32 %v1097_v62 }
 0x20a   :  { %v6183_v24 = vpop.eup %4381 }
 0x20b   :  { %v1139_v62 = vmul.f32 %v6183_v24, %v6093_v6  ;;  %v1140_v52 = vmul.f32 %v6183_v24, %v6100_v29  ;;  %v1141_v48 = vmul.f32 %v6183_v24, %v6109_v9  ;;  %v1142_v5 = vmul.f32 %v6183_v24, %v6118_v35 }
 0x20c   :  { %v1143_v18 = vmul.f32 %v6183_v24, %v6125_v17  ;;  %v1144_v26 = vmul.f32 %v6183_v24, %v940_v12  ;;  %v6218_v6 = vmul.f32 %v6183_v24, %v6077_v59  ;;  %v1145_v29 = vmul.f32 %v6183_v24, %v941_v55 }
 0x20d   :  { %v1146_v9 = vmul.f32 %v6183_v24, %v942_v42  ;;  %v1147_v35 = vmul.f32 %v6183_v24, %v943_v44  ;;  %v6227_v17 = vmul.f32 %v6183_v24, %v6084_v32  ;;  %v1196_v12 = vmul.f32 %v6198_v34, %v1141_v48 }
 0x20e   :  { %v1197_v7 = vmul.f32 %v6198_v34, %v1142_v5  ;;  %v1198_v51 = vmul.f32 %v6198_v34, %v1143_v18  ;;  %v6233_v59 = vmul.f32 %v6198_v34, %v1139_v62  ;;  %v1199_v55 = vmul.f32 %v6198_v34, %v1144_v26  ;;  %v6247_v62 = vpop.permute.xlu1 %2630 }
 0x20f   :  { %v1200_v42 = vmul.f32 %v6198_v34, %v1145_v29  ;;  %v1201_v44 = vmul.f32 %v6198_v34, %v1146_v9  ;;  %v6239_v32 = vmul.f32 %v6198_v34, %v1140_v52  ;;  %v1202_v48 = vmul.f32 %v6198_v34, %v1147_v35  ;;  %8975 = vst [vmem:[#allocation143_spill] sm:$0xff] %v6247_v62  ;;  %v6277_v62 = vpop.permute.xlu0 %2625 }
 0x210   :  { %v6243_v5 = vadd.f32 %v6214_v58, %v1196_v12  ;;  %v1122_v18 = vmul.f32 %v6183_v24, %v5972_v33  ;;  %v6250_v26 = vadd.f32 %v6214_v58, %v1197_v7  ;;  %v6253_v29 = vadd.f32 %v6214_v58, %v1198_v51  ;;  %8981 = vst [vmem:[#allocation149_spill] sm:$0xff] %v6277_v62 }
 0x211   :  { %v6256_v52 = vadd.f32 %v6214_v58, %v1199_v55  ;;  %v6259_v9 = vadd.f32 %v6214_v58, %v1200_v42  ;;  %v1123_v35 = vmul.f32 %v6183_v24, %v5979_v22  ;;  %v1124_v33 = vmul.f32 %v6183_v24, %v5986_v38 }
 0x212   :  { %8974 = vst [vmem:[#allocation142_spill] sm:$0xff] %v6243_v5  ;;  %8976 = vst [vmem:[#allocation144_spill] sm:$0xff] %v6250_v26  ;;  %v1125_v12 = vmul.f32 %v6183_v24, %v5993_v4  ;;  %v1177_v7 = vmul.f32 %v6198_v34, %v1122_v18  ;;  %v6269_v51 = vadd.f32 %v6214_v58, %v1201_v44 }
 0x213   :  { %8977 = vst [vmem:[#allocation145_spill] sm:$0xff] %v6253_v29  ;;  %8978 = vst [vmem:[#allocation146_spill] sm:$0xff] %v6256_v52  ;;  %v1121_v55 = vmul.f32 %v6183_v24, %v5965_v16  ;;  %v1126_v42 = vmul.f32 %v6183_v24, %v6000_v0  ;;  %v1127_v22 = vmul.f32 %v6183_v24, %v6007_v21 }
 0x214   :  { %8979 = vst [vmem:[#allocation147_spill] sm:$0xff] %v6259_v9  ;;  %8980 = vst [vmem:[#allocation148_spill] sm:$0xff] %v6269_v51  ;;  %v1178_v38 = vmul.f32 %v6198_v34, %v1123_v35  ;;  %v1179_v4 = vmul.f32 %v6198_v34, %v1124_v33  ;;  %v1180_v18 = vmul.f32 %v6198_v34, %v1125_v12 }
 0x215   :  { %v6283_v44 = vadd.f32 %v6214_v58, %v1177_v7  ;;  %v6286_v47 = vadd.f32 %v6214_v58, %v1202_v48  ;;  %v1176_v16 = vmul.f32 %v6198_v34, %v1121_v55  ;;  %v1181_v0 = vmul.f32 %v6198_v34, %v1126_v42  ;;  %v6304_v7 = vpop.permute.xlu1 %2640 }
 0x216   :  { %v6292_v21 = vmul.f32 %v6183_v24, %v6014_v50  ;;  %v6295_v35 = vadd.f32 %v6214_v58, %v1178_v38  ;;  %v6298_v33 = vadd.f32 %v6214_v58, %v1179_v4  ;;  %v6301_v12 = vadd.f32 %v6214_v58, %v1180_v18  ;;  %8987 = vst [vmem:[#allocation155_spill] sm:$0xff] %v6304_v7 }
 0x217   :  { %8982 = vst [vmem:[#allocation150_spill] sm:$0xff] %v6283_v44  ;;  %8983 = vst [vmem:[#allocation151_spill] sm:$0xff] %v6286_v47  ;;  %v1352_v48 = vrot.slane %v6283_v44, 1  ;;  %v2134_v55 = vrot.slane %v6283_v44, 2  ;;  %v2376_v42 = vrot.slane %v6283_v44, 3  ;;  %v6309_v50 = vadd.f32 %v6214_v58, %v1176_v16  ;;  %v6320_v16 = vpop.permute.xlu0 %2635 }
 0x218   :  { %8984 = vst [vmem:[#allocation152_spill] sm:$0xff] %v6295_v35  ;;  %8985 = vst [vmem:[#allocation153_spill] sm:$0xff] %v6298_v33  ;;  %v1182_v38 = vmul.f32 %v6198_v34, %v1127_v22  ;;  %v1354_v62 = vrot.slane %v6295_v35, 1  ;;  %v1356_v4 = vrot.slane %v6298_v33, 1  ;;  %v1358_v18 = vrot.slane %v6301_v12, 1 }
 0x219   :  { %8986 = vst [vmem:[#allocation154_spill] sm:$0xff] %v6301_v12  ;;  %v2136_v25 = vrot.slane %v6295_v35, 2  ;;  %v2378_v37 = vrot.slane %v6295_v35, 3  ;;  %8988 = vst [vmem:[#allocation156_spill] sm:$0xff] %v6320_v16  ;;  %v1129_v44 = vmul.f32 %v6183_v24, %v6021_v10  ;;  %v8992_v49 = vrot.slane %v6309_v50, 1  ;;  %v8997_v10 = vld [vmem:[#allocation27_spill] sm:$0xff] }
 0x21a   :  { %v6323_v22 = vsel %vm1306_vm8, %v1352_v48, %v1354_v62  ;;  %v1359_v45 = vsel %vm1306_vm8, %v1356_v4, %v1358_v18  ;;  %v1357_v43 = vsel %vm1306_vm8, %v1354_v62, %v1356_v4  ;;  %v6342_v62 = vadd.f32 %v6214_v58, %v1181_v0  ;;  %v6344_v4 = vpop.permute.xlu1 %2650 }
 0x21b   :  { %8989 = vst [vmem:[#allocation157_spill] sm:$0xff] %v6323_v22  ;;  %v2137_v28 = vsel %vm2088_vm9, %v2134_v55, %v2136_v25  ;;  %v1721_v36 = vadd.f32 %v8990_v15, %v6323_v22  ;;  %v1723_v7 = vadd.f32 %v8991_v41, %v1359_v45  ;;  %v2379_v23 = vsel %vm2330_vm10, %v2376_v42, %v2378_v37  ;;  %v8996_v22 = vld [vmem:[#allocation77_spill] sm:$0xff] }
 0x21c   :  { %v2499_v16 = vadd.f32 %v2379_v23, %v8990_v15  ;;  %v6338_v56 = vsel %vm1306_vm8, %v8992_v49, %v1352_v48  ;;  %v1722_v57 = vadd.f32 %v8994_v19, %v1357_v43  ;;  %8995 = vst [vmem:[#allocation28_spill] sm:$0xff] %v6344_v4  ;;  %v2257_v3 = vadd.f32 %v2137_v28, %v8990_v15  ;;  %v9002_v28 = vld [vmem:[#allocation74_spill] sm:$0xff] }
 0x21d   :  { %8993 = vst [vmem:[#allocation26_spill] sm:$0xff] %v6338_v56  ;;  %v2015_v60 = vadd.f32 %v8996_v22, %v1721_v36  ;;  %v1720_v40 = vadd.f32 %v8997_v10, %v6338_v56  ;;  %v8998_v23 = vrot.slane %v6309_v50, 2  ;;  %v2017_v49 = vadd.f32 %v5519_v30, %v1723_v7  ;;  %v9003_v56 = vld [vmem:[#allocation76_spill] sm:$0xff] }
 0x21e   :  { %v6355_v48 = vadd.f32 %v6344_v4, %v2499_v16  ;;  %v6358_v0 = vadd.f32 %v6344_v4, %v1359_v45  ;;  %v9001_v27 = vrot.slane %v6309_v50, 3  ;;  %v2016_v20 = vadd.f32 %v9003_v56, %v1722_v57 }
 0x21f   :  { %v2135_v14 = vsel %vm2088_vm9, %v8998_v23, %v2134_v55  ;;  %v2064_v15 = vmax.f32 %v6298_v33, %v2015_v60  ;;  %v2014_v22 = vadd.f32 %v9002_v28, %v1720_v40  ;;  %v6367_v23 = vpop.permute.xlu0 %2645  ;;  %v6371_v16 = vadd.f32 %v6214_v58, %v1182_v38 }
 0x220   :  { %8999 = vst [vmem:[#allocation29_spill] sm:$0xff] %v6355_v48  ;;  %9000 = vst [vmem:[#allocation27_spill] sm:$0xff] %v6358_v0  ;;  %v2377_v36 = vsel %vm2330_vm10, %v9001_v27, %v2376_v42  ;;  %v2256_v55 = vadd.f32 %v2135_v14, %v8997_v10  ;;  %v1360_v45 = vrot.slane %v6342_v62, 1  ;;  %v2138_v4 = vrot.slane %v6298_v33, 2 }
 0x221   :  { %9004 = vst [vmem:[#allocation158_spill] sm:$0xff] %v6367_v23  ;;  %v2498_v7 = vadd.f32 %v2377_v36, %v8997_v10  ;;  %v6375_v27 = vmax.f32 %v2064_v15, %v2257_v3  ;;  %v2063_v60 = vmax.f32 %v6295_v35, %v2014_v22  ;;  %v6379_v40 = vadd.f32 %v6367_v23, %v1357_v43  ;;  %v9007_v22 = vld [vmem:[#allocation31_spill] sm:$0xff] }
 0x222   :  { %v2140_v57 = vrot.slane %v6301_v12, 2  ;;  %v1362_v14 = vrot.slane %v6371_v16, 1  ;;  %v2380_v42 = vrot.slane %v6298_v33, 3  ;;  %v2382_v38 = vrot.slane %v6301_v12, 3  ;;  %v6398_v33 = vpop.permute.xlu1 %2660 }
 0x223   :  { %9005 = vst [vmem:[#allocation159_spill] sm:$0xff] %v6375_v27  ;;  %9006 = vst [vmem:[#allocation160_spill] sm:$0xff] %v6379_v40  ;;  %v1361_v10 = vsel %vm1306_vm8, %v1358_v18, %v1360_v45  ;;  %v6386_v36 = vmax.f32 %v2063_v60, %v2256_v55  ;;  %v2066_v3 = vmax.f32 %v6342_v62, %v2017_v49  ;;  %v9009_v18 = vld [vmem:[#allocation30_spill] sm:$0xff] }
 0x224   :  { %v2141_v15 = vsel %vm2088_vm9, %v2138_v4, %v2140_v57  ;;  %v1724_v30 = vadd.f32 %v9007_v22, %v1361_v10  ;;  %v6394_v0 = vadd.f32 %v6367_v23, %v2498_v7  ;;  %v1363_v56 = vsel %vm1306_vm8, %v1360_v45, %v1362_v14  ;;  %9008 = vst [vmem:[#allocation31_spill] sm:$0xff] %v6398_v33  ;;  %v9012_v23 = vld [vmem:[#allocation78_spill] sm:$0xff] }
 0x225   :  { %v2383_v40 = vsel %vm2330_vm10, %v2380_v42, %v2382_v38  ;;  %v1725_v55 = vadd.f32 %v9009_v18, %v1363_v56  ;;  %v2259_v49 = vadd.f32 %v2141_v15, %v8991_v41  ;;  %v2065_v28 = vmax.f32 %v6301_v12, %v2016_v20  ;;  %v6417_v12 = vpop.permute.xlu0 %2655 }
 0x226   :  { %v2501_v60 = vadd.f32 %v2383_v40, %v8991_v41  ;;  %v6407_v7 = vadd.f32 %v6398_v33, %v1363_v56  ;;  %v2139_v45 = vsel %vm2088_vm9, %v2136_v25, %v2138_v4  ;;  %v2381_v48 = vsel %vm2330_vm10, %v2378_v37, %v2380_v42  ;;  %v9013_v40 = vld [vmem:[#allocation81_spill] sm:$0xff]  ;;  %9014 = vst [vmem:[#allocation78_spill] sm:$0xff] %v6417_v12 }
 0x227   :  { %v6411_v27 = vmax.f32 %v2066_v3, %v2259_v49  ;;  %v2018_v35 = vadd.f32 %v9012_v23, %v1724_v30  ;;  %v2258_v15 = vadd.f32 %v2139_v45, %v8994_v19  ;;  %v2500_v41 = vadd.f32 %v2381_v48, %v8994_v19 }
 0x228   :  { %9010 = vst [vmem:[#allocation30_spill] sm:$0xff] %v6407_v7  ;;  %v2019_v20 = vadd.f32 %v9013_v40, %v1725_v55  ;;  %v1183_v56 = vmul.f32 %v6198_v34, %v6292_v21  ;;  %v1184_v43 = vmul.f32 %v6198_v34, %v1129_v44  ;;  %v2142_v25 = vrot.slane %v6342_v62, 2 }
 0x229   :  { %9011 = vst [vmem:[#allocation161_spill] sm:$0xff] %v6411_v27  ;;  %v6424_v37 = vadd.f32 %v6398_v33, %v2501_v60  ;;  %v6426_v4 = vmax.f32 %v2065_v28, %v2258_v15  ;;  %v6429_v30 = vadd.f32 %v6417_v12, %v2500_v41  ;;  %v2144_v19 = vrot.slane %v6371_v16, 2 }
 0x22a   :  { %v6433_v48 = vadd.f32 %v6214_v58, %v1183_v56  ;;  %v6436_v42 = vadd.f32 %v6214_v58, %v1184_v43  ;;  %v2384_v44 = vrot.slane %v6342_v62, 3  ;;  %v2386_v21 = vrot.slane %v6371_v16, 3 }
 0x22b   :  { %9015 = vst [vmem:[#allocation162_spill] sm:$0xff] %v6424_v37  ;;  %v6445_v55 = vadd.f32 %v6417_v12, %v1361_v10  ;;  %v2145_v49 = vsel %vm2088_vm9, %v2142_v25, %v2144_v19  ;;  %v2143_v15 = vsel %vm2088_vm9, %v2140_v57, %v2142_v25  ;;  %v1130_v10 = vmul.f32 %v6183_v24, %v6028_v46  ;;  %v9018_v57 = vld [vmem:[#allocation32_spill] sm:$0xff]  ;;  %v9020_v37 = vld [vmem:[#allocation33_spill] sm:$0xff] }
 0x22c   :  { %9016 = vst [vmem:[#allocation163_spill] sm:$0xff] %v6436_v42  ;;  %v1364_v60 = vrot.slane %v6433_v48, 1  ;;  %v1366_v43 = vrot.slane %v6436_v42, 1  ;;  %v2068_v45 = vmax.f32 %v6433_v48, %v2019_v20  ;;  %v2261_v41 = vadd.f32 %v2145_v49, %v9009_v18  ;;  %v6461_v20 = vpop.permute.xlu1 %2670 }
 0x22d   :  { %v2387_v56 = vsel %vm2330_vm10, %v2384_v44, %v2386_v21  ;;  %v2385_v3 = vsel %vm2330_vm10, %v2382_v38, %v2384_v44  ;;  %v2067_v40 = vmax.f32 %v6371_v16, %v2018_v35  ;;  %9017 = vst [vmem:[#allocation164_spill] sm:$0xff] %v6461_v20  ;;  %v2260_v38 = vadd.f32 %v2143_v15, %v9007_v22 }
 0x22e   :  { %v1367_v28 = vsel %vm1306_vm8, %v1364_v60, %v1366_v43  ;;  %v2503_v33 = vadd.f32 %v2387_v56, %v9009_v18  ;;  %v1365_v7 = vsel %vm1306_vm8, %v1362_v14, %v1364_v60  ;;  %v6464_v49 = vmax.f32 %v2068_v45, %v2261_v41  ;;  %v9023_v18 = vld [vmem:[#allocation83_spill] sm:$0xff]  ;;  %v6478_v56 = vpop.permute.xlu0 %2665  ;;  %v9025_v45 = vld [vmem:[#allocation80_spill] sm:$0xff] }
 0x22f   :  { %v1727_v25 = vadd.f32 %v9018_v57, %v1367_v28  ;;  %v1726_v27 = vadd.f32 %v9020_v37, %v1365_v7  ;;  %v6472_v44 = vadd.f32 %v6461_v20, %v1367_v28  ;;  %v2502_v14 = vadd.f32 %v2385_v3, %v9007_v22  ;;  %9024 = vst [vmem:[#allocation166_spill] sm:$0xff] %v6478_v56 }
 0x230   :  { %9019 = vst [vmem:[#allocation32_spill] sm:$0xff] %v6464_v49  ;;  %v6469_v46 = vadd.f32 %v6461_v20, %v2503_v33  ;;  %v1131_v35 = vmul.f32 %v6183_v24, %v6035_v2  ;;  %v1185_v12 = vmul.f32 %v6198_v34, %v1130_v10  ;;  %v2146_v15 = vrot.slane %v6433_v48, 2 }
 0x231   :  { %9022 = vst [vmem:[#allocation165_spill] sm:$0xff] %v6472_v44  ;;  %v2021_v60 = vadd.f32 %v9023_v18, %v1727_v25  ;;  %v2020_v41 = vadd.f32 %v9025_v45, %v1726_v27  ;;  %v6483_v33 = vmax.f32 %v2067_v40, %v2260_v38  ;;  %v6486_v28 = vadd.f32 %v6478_v56, %v1365_v7 }
 0x232   :  { %9021 = vst [vmem:[#allocation33_spill] sm:$0xff] %v6469_v46  ;;  %v1186_v22 = vmul.f32 %v6198_v34, %v1131_v35  ;;  %v2148_v3 = vrot.slane %v6436_v42, 2  ;;  %v6493_v25 = vadd.f32 %v6214_v58, %v1185_v12  ;;  %v2388_v27 = vrot.slane %v6433_v48, 3 }
 0x233   :  { %9026 = vst [vmem:[#allocation167_spill] sm:$0xff] %v6486_v28  ;;  %v2390_v10 = vrot.slane %v6436_v42, 3  ;;  %v6498_v40 = vadd.f32 %v6478_v56, %v2502_v14  ;;  %v2147_v35 = vsel %vm2088_vm9, %v2144_v19, %v2146_v15  ;;  %v2069_v18 = vmax.f32 %v6436_v42, %v2020_v41  ;;  %v6520_v56 = vpop.permute.xlu1 %2680  ;;  %v9039_v28 = vld [vmem:[#allocation85_spill] sm:$0xff] }
 0x234   :  { %9027 = vst [vmem:[#allocation168_spill] sm:$0xff] %v6493_v25  ;;  %v6501_v7 = vadd.f32 %v6214_v58, %v1186_v22  ;;  %v2149_v38 = vsel %vm2088_vm9, %v2146_v15, %v2148_v3  ;;  %v1368_v20 = vrot.slane %v6493_v25, 1  ;;  %v2070_v2 = vmax.f32 %v6493_v25, %v2021_v60  ;;  %9029 = vst [vmem:[#allocation170_spill] sm:$0xff] %v6520_v56 }
 0x235   :  { %v2391_v12 = vsel %vm2330_vm10, %v2388_v27, %v2390_v10  ;;  %v2263_v14 = vadd.f32 %v2149_v38, %v9018_v57  ;;  %v2389_v22 = vsel %vm2330_vm10, %v2386_v21, %v2388_v27  ;;  %v2262_v19 = vadd.f32 %v2147_v35, %v9020_v37  ;;  %v9032_v27 = vld [vmem:[#allocation34_spill] sm:$0xff] }
 0x236   :  { %9028 = vst [vmem:[#allocation169_spill] sm:$0xff] %v6501_v7  ;;  %v1370_v44 = vrot.slane %v6501_v7, 1  ;;  %v2505_v46 = vadd.f32 %v2391_v12, %v9018_v57  ;;  %v1369_v49 = vsel %vm1306_vm8, %v1366_v43, %v1368_v20  ;;  %v2504_v15 = vadd.f32 %v2389_v22, %v9020_v37  ;;  %v9031_v57 = vld [vmem:[#allocation35_spill] sm:$0xff]  ;;  %v9037_v22 = vld [vmem:[#allocation82_spill] sm:$0xff] }
 0x237   :  { %v1132_v60 = vmul.f32 %v6183_v24, %v6042_v63  ;;  %v6523_v45 = vmax.f32 %v2070_v2, %v2263_v14  ;;  %v1728_v21 = vadd.f32 %v9031_v57, %v1369_v49  ;;  %v6533_v63 = vpop.permute.xlu0 %2675  ;;  %v6535_v12 = vmax.f32 %v2069_v18, %v2262_v19 }
 0x238   :  { %v1371_v38 = vsel %vm1306_vm8, %v1368_v20, %v1370_v44  ;;  %v6528_v35 = vadd.f32 %v6520_v56, %v2505_v46  ;;  %9035 = vst [vmem:[#allocation172_spill] sm:$0xff] %v6533_v63  ;;  %v6539_v20 = vadd.f32 %v6533_v63, %v2504_v15  ;;  %v1133_v2 = vmul.f32 %v6183_v24, %v6049_v1 }
 0x239   :  { %9030 = vst [vmem:[#allocation171_spill] sm:$0xff] %v6523_v45  ;;  %v1729_v43 = vadd.f32 %v9032_v27, %v1371_v38  ;;  %v6531_v37 = vadd.f32 %v6520_v56, %v1371_v38  ;;  %9036 = vst [vmem:[#allocation173_spill] sm:$0xff] %v6535_v12  ;;  %v2022_v41 = vadd.f32 %v9037_v22, %v1728_v21  ;;  %v2150_v38 = vrot.slane %v6493_v25, 2 }
 0x23a   :  { %9033 = vst [vmem:[#allocation35_spill] sm:$0xff] %v6528_v35  ;;  %9038 = vst [vmem:[#allocation174_spill] sm:$0xff] %v6539_v20  ;;  %v1187_v14 = vmul.f32 %v6198_v34, %v1132_v60  ;;  %v6546_v42 = vadd.f32 %v6533_v63, %v1369_v49  ;;  %v2152_v18 = vrot.slane %v6501_v7, 2  ;;  %v1188_v19 = vmul.f32 %v6198_v34, %v1133_v2 }
 0x23b   :  { %9034 = vst [vmem:[#allocation34_spill] sm:$0xff] %v6531_v37  ;;  %v2023_v46 = vadd.f32 %v9039_v28, %v1729_v43  ;;  %v2392_v15 = vrot.slane %v6493_v25, 3  ;;  %v2394_v1 = vrot.slane %v6501_v7, 3  ;;  %v2071_v49 = vmax.f32 %v6501_v7, %v2022_v41  ;;  %v9056_v25 = vld [vmem:[#allocation39_spill] sm:$0xff] }
 0x23c   :  { %9040 = vst [vmem:[#allocation175_spill] sm:$0xff] %v6546_v42  ;;  %v6552_v21 = vadd.f32 %v6214_v58, %v1187_v14  ;;  %v2153_v43 = vsel %vm2088_vm9, %v2150_v38, %v2152_v18  ;;  %v2151_v56 = vsel %vm2088_vm9, %v2148_v3, %v2150_v38  ;;  %v6562_v37 = vadd.f32 %v6214_v58, %v1188_v19  ;;  %v6586_v42 = vpop.permute.xlu0 %2685 }
 0x23d   :  { %v1134_v28 = vmul.f32 %v6183_v24, %v6056_v8  ;;  %v2265_v63 = vadd.f32 %v2153_v43, %v9032_v27  ;;  %v2395_v60 = vsel %vm2330_vm10, %v2392_v15, %v2394_v1  ;;  %v2393_v35 = vsel %vm2330_vm10, %v2390_v10, %v2392_v15  ;;  %v9043_v43 = vld [vmem:[#allocation37_spill] sm:$0xff]  ;;  %v6583_v15 = vpop.permute.xlu1 %2690  ;;  %9045 = vst [vmem:[#allocation178_spill] sm:$0xff] %v6586_v42 }
 0x23e   :  { %9041 = vst [vmem:[#allocation176_spill] sm:$0xff] %v6552_v21  ;;  %v1372_v2 = vrot.slane %v6552_v21, 1  ;;  %v2072_v14 = vmax.f32 %v6552_v21, %v2023_v46  ;;  %v1135_v41 = vmul.f32 %v6183_v24, %v6063_v54  ;;  %v1374_v3 = vrot.slane %v6562_v37, 1  ;;  %9044 = vst [vmem:[#allocation37_spill] sm:$0xff] %v6583_v15 }
 0x23f   :  { %v2507_v38 = vadd.f32 %v2395_v60, %v9032_v27  ;;  %v2264_v46 = vadd.f32 %v2151_v56, %v9031_v57  ;;  %v2506_v10 = vadd.f32 %v2393_v35, %v9031_v57  ;;  %v9046_v60 = vld [vmem:[#allocation36_spill] sm:$0xff] }
 0x240   :  { %v1373_v19 = vsel %vm1306_vm8, %v1370_v44, %v1372_v2  ;;  %v6579_v45 = vmax.f32 %v2072_v14, %v2265_v63  ;;  %v1375_v54 = vsel %vm1306_vm8, %v1372_v2, %v1374_v3  ;;  %v1189_v44 = vmul.f32 %v6198_v34, %v1134_v28  ;;  %v9050_v35 = vld [vmem:[#allocation84_spill] sm:$0xff] }
 0x241   :  { %v1730_v22 = vadd.f32 %v9043_v43, %v1373_v19  ;;  %v6588_v27 = vmax.f32 %v2071_v49, %v2264_v46  ;;  %v1190_v56 = vmul.f32 %v6198_v34, %v1135_v41  ;;  %v1731_v8 = vadd.f32 %v9046_v60, %v1375_v54  ;;  %v9053_v46 = vld [vmem:[#allocation87_spill] sm:$0xff] }
 0x242   :  { %9042 = vst [vmem:[#allocation177_spill] sm:$0xff] %v6579_v45  ;;  %v6594_v63 = vadd.f32 %v6583_v15, %v2507_v38  ;;  %v6597_v14 = vadd.f32 %v6583_v15, %v1375_v54  ;;  %v6600_v57 = vadd.f32 %v6586_v42, %v1373_v19  ;;  %v6604_v49 = vadd.f32 %v6214_v58, %v1189_v44  ;;  %v6629_v45 = vpop.permute.xlu1 %2700 }
 0x243   :  { %v2024_v2 = vadd.f32 %v9050_v35, %v1730_v22  ;;  %v6607_v28 = vadd.f32 %v6214_v58, %v1190_v56  ;;  %v2154_v41 = vrot.slane %v6552_v21, 2  ;;  %v2025_v7 = vadd.f32 %v9053_v46, %v1731_v8  ;;  %9054 = vst [vmem:[#allocation183_spill] sm:$0xff] %v6629_v45 }
 0x244   :  { %9047 = vst [vmem:[#allocation36_spill] sm:$0xff] %v6594_v63  ;;  %9048 = vst [vmem:[#allocation179_spill] sm:$0xff] %v6597_v14  ;;  %v6612_v38 = vadd.f32 %v6586_v42, %v2506_v10  ;;  %v2156_v54 = vrot.slane %v6562_v37, 2  ;;  %v2396_v19 = vrot.slane %v6552_v21, 3  ;;  %v1376_v44 = vrot.slane %v6604_v49, 1 }
 0x245   :  { %9049 = vst [vmem:[#allocation180_spill] sm:$0xff] %v6600_v57  ;;  %9051 = vst [vmem:[#allocation181_spill] sm:$0xff] %v6604_v49  ;;  %v1378_v15 = vrot.slane %v6607_v28, 1  ;;  %v2398_v56 = vrot.slane %v6562_v37, 3  ;;  %v2074_v14 = vmax.f32 %v6604_v49, %v2025_v7  ;;  %v2155_v10 = vsel %vm2088_vm9, %v2152_v18, %v2154_v41  ;;  %v9055_v57 = vld [vmem:[#allocation38_spill] sm:$0xff] }
 0x246   :  { %9052 = vst [vmem:[#allocation182_spill] sm:$0xff] %v6607_v28  ;;  %v2157_v8 = vsel %vm2088_vm9, %v2154_v41, %v2156_v54  ;;  %v2397_v46 = vsel %vm2330_vm10, %v2394_v1, %v2396_v19  ;;  %v1377_v63 = vsel %vm1306_vm8, %v1374_v3, %v1376_v44  ;;  %v2073_v18 = vmax.f32 %v6562_v37, %v2024_v2  ;;  %v9062_v1 = vld [vmem:[#allocation89_spill] sm:$0xff] }
 0x247   :  { %v1379_v42 = vsel %vm1306_vm8, %v1376_v44, %v1378_v15  ;;  %v2267_v35 = vadd.f32 %v2157_v8, %v9046_v60  ;;  %v2399_v22 = vsel %vm2330_vm10, %v2396_v19, %v2398_v56  ;;  %v1732_v20 = vadd.f32 %v9056_v25, %v1377_v63  ;;  %v6642_v19 = vpop.permute.xlu0 %2695  ;;  %v9060_v44 = vld [vmem:[#allocation86_spill] sm:$0xff] }
 0x248   :  { %v1733_v21 = vadd.f32 %v9055_v57, %v1379_v42  ;;  %v2509_v7 = vadd.f32 %v2399_v22, %v9046_v60  ;;  %v6640_v8 = vadd.f32 %v6629_v45, %v1379_v42  ;;  %9059 = vst [vmem:[#allocation184_spill] sm:$0xff] %v6642_v19  ;;  %v2508_v3 = vadd.f32 %v2397_v46, %v9043_v43 }
 0x249   :  { %v6637_v41 = vmax.f32 %v2074_v14, %v2267_v35  ;;  %v2026_v12 = vadd.f32 %v9060_v44, %v1732_v20  ;;  %v2266_v60 = vadd.f32 %v2155_v10, %v9043_v43  ;;  %v6648_v22 = vadd.f32 %v6642_v19, %v1377_v63 }
 0x24a   :  { %9058 = vst [vmem:[#allocation39_spill] sm:$0xff] %v6640_v8  ;;  %v1136_v2 = vmul.f32 %v6183_v24, %v6070_v53  ;;  %v2027_v14 = vadd.f32 %v9062_v1, %v1733_v21  ;;  %v6654_v35 = vadd.f32 %v6629_v45, %v2509_v7  ;;  %v1192_v42 = vmul.f32 %v6198_v34, %v6218_v6 }
 0x24b   :  { %9057 = vst [vmem:[#allocation38_spill] sm:$0xff] %v6637_v41  ;;  %9061 = vst [vmem:[#allocation185_spill] sm:$0xff] %v6648_v22  ;;  %v2158_v46 = vrot.slane %v6604_v49, 2  ;;  %v6659_v8 = vmax.f32 %v2073_v18, %v2266_v60  ;;  %v2160_v43 = vrot.slane %v6607_v28, 2  ;;  %v2400_v63 = vrot.slane %v6604_v49, 3 }
 0x24c   :  { %9063 = vst [vmem:[#allocation186_spill] sm:$0xff] %v6654_v35  ;;  %v1191_v20 = vmul.f32 %v6198_v34, %v1136_v2  ;;  %v6665_v53 = vadd.f32 %v6642_v19, %v2508_v3  ;;  %v6668_v21 = vadd.f32 %v6214_v58, %v1192_v42  ;;  %v2402_v10 = vrot.slane %v6607_v28, 3 }
 0x24d   :  { %v2075_v6 = vmax.f32 %v6607_v28, %v2026_v12  ;;  %v2161_v18 = vsel %vm2088_vm9, %v2158_v46, %v2160_v43  ;;  %v2159_v60 = vsel %vm2088_vm9, %v2156_v54, %v2158_v46  ;;  %v2401_v2 = vsel %vm2330_vm10, %v2398_v56, %v2400_v63  ;;  %v9072_v56 = vld [vmem:[#allocation41_spill] sm:$0xff]  ;;  %v9084_v28 = vld [vmem:[#allocation90_spill] sm:$0xff] }
 0x24e   :  { %v6673_v7 = vadd.f32 %v6214_v58, %v1191_v20  ;;  %v1382_v45 = vrot.slane %v6668_v21, 1  ;;  %v2269_v3 = vadd.f32 %v2161_v18, %v9055_v57  ;;  %v2403_v42 = vsel %vm2330_vm10, %v2400_v63, %v2402_v10  ;;  %v6696_v18 = vpop.permute.xlu1 %2710 }
 0x24f   :  { %v2268_v1 = vadd.f32 %v2159_v60, %v9056_v25  ;;  %v2511_v20 = vadd.f32 %v2403_v42, %v9055_v57  ;;  %v2510_v44 = vadd.f32 %v2401_v2, %v9056_v25  ;;  %v1193_v46 = vmul.f32 %v6198_v34, %v6227_v17  ;;  %9066 = vst [vmem:[#allocation189_spill] sm:$0xff] %v6696_v18  ;;  %v9069_v2 = vld [vmem:[#allocation40_spill] sm:$0xff]  ;;  %v6708_v17 = vpop.permute.xlu0 %2705 }
 0x250   :  { %9064 = vst [vmem:[#allocation187_spill] sm:$0xff] %v6673_v7  ;;  %v1380_v19 = vrot.slane %v6673_v7, 1  ;;  %v2076_v12 = vmax.f32 %v6673_v7, %v2027_v14  ;;  %v6694_v63 = vadd.f32 %v6214_v58, %v6233_v59  ;;  %9071 = vst [vmem:[#allocation192_spill] sm:$0xff] %v6708_v17  ;;  %v2162_v35 = vrot.slane %v6673_v7, 2 }
 0x251   :  { %v6702_v60 = vmax.f32 %v2075_v6, %v2268_v1  ;;  %v6706_v54 = vadd.f32 %v6696_v18, %v2511_v20  ;;  %v2164_v22 = vrot.slane %v6668_v21, 2 }
 0x252   :  { %9065 = vst [vmem:[#allocation188_spill] sm:$0xff] %v6694_v63  ;;  %v1383_v14 = vsel %vm1306_vm8, %v1380_v19, %v1382_v45  ;;  %v6699_v57 = vmax.f32 %v2076_v12, %v2269_v3  ;;  %v1381_v25 = vsel %vm1306_vm8, %v1378_v15, %v1380_v19  ;;  %v6716_v3 = vadd.f32 %v6708_v17, %v2510_v44  ;;  %v9076_v12 = vld [vmem:[#allocation88_spill] sm:$0xff] }
 0x253   :  { %9068 = vst [vmem:[#allocation191_spill] sm:$0xff] %v6702_v60  ;;  %v1735_v42 = vadd.f32 %v9069_v2, %v1383_v14  ;;  %9070 = vst [vmem:[#allocation40_spill] sm:$0xff] %v6706_v54  ;;  %v1734_v59 = vadd.f32 %v9072_v56, %v1381_v25  ;;  %v6713_v41 = vadd.f32 %v6696_v18, %v1383_v14  ;;  %v1386_v1 = vrot.slane %v6694_v63, 1  ;;  %v6761_v49 = vpop.permute.xlu0 %2715 }
 0x254   :  { %9067 = vst [vmem:[#allocation190_spill] sm:$0xff] %v6699_v57  ;;  %9074 = vst [vmem:[#allocation193_spill] sm:$0xff] %v6716_v3  ;;  %v6719_v15 = vadd.f32 %v6214_v58, %v1193_v46  ;;  %v6728_v14 = vadd.f32 %v6708_v17, %v1381_v25  ;;  %v2404_v18 = vrot.slane %v6673_v7, 3  ;;  %v2406_v46 = vrot.slane %v6668_v21, 3  ;;  %v6742_v17 = vpop.permute.xlu1 %2720  ;;  %v9080_v7 = vld [vmem:[#allocation43_spill] sm:$0xff] }
 0x255   :  { %9073 = vst [vmem:[#allocation41_spill] sm:$0xff] %v6713_v41  ;;  %v2029_v19 = vadd.f32 %v5725_v13, %v1735_v42  ;;  %v2028_v20 = vadd.f32 %v9076_v12, %v1734_v59  ;;  %v2165_v6 = vsel %vm2088_vm9, %v2162_v35, %v2164_v22  ;;  %v2163_v59 = vsel %vm2088_vm9, %v2160_v43, %v2162_v35  ;;  %v9079_v12 = vld [vmem:[#allocation42_spill] sm:$0xff] }
 0x256   :  { %9075 = vst [vmem:[#allocation194_spill] sm:$0xff] %v6719_v15  ;;  %9077 = vst [vmem:[#allocation195_spill] sm:$0xff] %v6728_v14  ;;  %v1384_v44 = vrot.slane %v6719_v15, 1  ;;  %v2271_v25 = vadd.f32 %v2165_v6, %v9069_v2  ;;  %v2407_v54 = vsel %vm2330_vm10, %v2404_v18, %v2406_v46  ;;  %v2270_v43 = vadd.f32 %v2163_v59, %v9072_v56 }
 0x257   :  { %v2078_v42 = vmax.f32 %v6719_v15, %v2029_v19  ;;  %9078 = vst [vmem:[#allocation196_spill] sm:$0xff] %v6742_v17  ;;  %v2513_v41 = vadd.f32 %v2407_v54, %v9069_v2  ;;  %v2077_v3 = vmax.f32 %v6668_v21, %v2028_v20  ;;  %v2405_v6 = vsel %vm2330_vm10, %v2402_v10, %v2404_v18 }
 0x258   :  { %v1387_v13 = vsel %vm1306_vm8, %v1384_v44, %v1386_v1  ;;  %v1385_v57 = vsel %vm1306_vm8, %v1382_v45, %v1384_v44  ;;  %v2512_v2 = vadd.f32 %v2405_v6, %v9072_v56  ;;  %9085 = vst [vmem:[#allocation198_spill] sm:$0xff] %v6761_v49  ;;  %v6765_v20 = vadd.f32 %v6214_v58, %v6239_v32 }
 0x259   :  { %v1737_v14 = vadd.f32 %v9079_v12, %v1387_v13  ;;  %v1736_v19 = vadd.f32 %v9080_v7, %v1385_v57  ;;  %v6748_v60 = vmax.f32 %v2078_v42, %v2271_v25  ;;  %v6751_v35 = vadd.f32 %v6742_v17, %v1387_v13 }
 0x25a   :  { %v6757_v44 = vadd.f32 %v6742_v17, %v2513_v41  ;;  %9086 = vst [vmem:[#allocation199_spill] sm:$0xff] %v6765_v20  ;;  %v1390_v13 = vrot.slane %v6243_v5, 1  ;;  %v2166_v42 = vrot.slane %v6719_v15, 2  ;;  %v2168_v10 = vrot.slane %v6694_v63, 2 }
 0x25b   :  { %9081 = vst [vmem:[#allocation42_spill] sm:$0xff] %v6748_v60  ;;  %9082 = vst [vmem:[#allocation43_spill] sm:$0xff] %v6751_v35  ;;  %v2031_v45 = vadd.f32 %v5762_v31, %v1737_v14  ;;  %v2030_v54 = vadd.f32 %v9084_v28, %v1736_v19  ;;  %v6770_v18 = vmax.f32 %v2077_v3, %v2270_v43  ;;  %v2408_v14 = vrot.slane %v6719_v15, 3 }
 0x25c   :  { %9083 = vst [vmem:[#allocation197_spill] sm:$0xff] %v6757_v44  ;;  %v6773_v41 = vadd.f32 %v6761_v49, %v1385_v57  ;;  %v2410_v56 = vrot.slane %v6694_v63, 3  ;;  %v1388_v32 = vrot.slane %v6765_v20, 1  ;;  %v2169_v19 = vsel %vm2088_vm9, %v2166_v42, %v2168_v10  ;;  %v6794_v44 = vpop.permute.xlu1 %2730 }
 0x25d   :  { %9087 = vst [vmem:[#allocation200_spill] sm:$0xff] %v6770_v18  ;;  %v2080_v25 = vmax.f32 %v6765_v20, %v2031_v45  ;;  %v6783_v6 = vadd.f32 %v6761_v49, %v2512_v2  ;;  %v2273_v3 = vadd.f32 %v2169_v19, %v9079_v12  ;;  %v2167_v43 = vsel %vm2088_vm9, %v2164_v22, %v2166_v42  ;;  %v9091_v2 = vld [vmem:[#allocation44_spill] sm:$0xff]  ;;  %v9093_v49 = vld [vmem:[#allocation45_spill] sm:$0xff]  ;;  %v9096_v42 = vld [vmem:[#allocation95_spill] sm:$0xff] }
 0x25e   :  { %9088 = vst [vmem:[#allocation201_spill] sm:$0xff] %v6773_v41  ;;  %v2411_v57 = vsel %vm2330_vm10, %v2408_v14, %v2410_v56  ;;  %v1391_v17 = vsel %vm1306_vm8, %v1388_v32, %v1390_v13  ;;  %v1389_v59 = vsel %vm1306_vm8, %v1386_v1, %v1388_v32  ;;  %v2079_v31 = vmax.f32 %v6694_v63, %v2030_v54 }
 0x25f   :  { %9089 = vst [vmem:[#allocation202_spill] sm:$0xff] %v6783_v6  ;;  %v2515_v35 = vadd.f32 %v2411_v57, %v9079_v12  ;;  %9090 = vst [vmem:[#allocation203_spill] sm:$0xff] %v6794_v44  ;;  %v1739_v60 = vadd.f32 %v9091_v2, %v1391_v17  ;;  %v6797_v19 = vmax.f32 %v2080_v25, %v2273_v3  ;;  %v9097_v57 = vld [vmem:[#allocation92_spill] sm:$0xff]  ;;  %v1392_v25 = vrot.slane %v6250_v26, 1  ;;  %v6812_v3 = vpop.permute.xlu0 %2725 }
 0x260   :  { %v1738_v28 = vadd.f32 %v9093_v49, %v1389_v59  ;;  %v6804_v12 = vadd.f32 %v6794_v44, %v1391_v17  ;;  %v2272_v1 = vadd.f32 %v2167_v43, %v9080_v7  ;;  %v2409_v54 = vsel %vm2330_vm10, %v2406_v46, %v2408_v14  ;;  %9098 = vst [vmem:[#allocation205_spill] sm:$0xff] %v6812_v3 }
 0x261   :  { %9092 = vst [vmem:[#allocation44_spill] sm:$0xff] %v6797_v19  ;;  %v6801_v22 = vadd.f32 %v6794_v44, %v2515_v35  ;;  %v2033_v32 = vadd.f32 %v9096_v42, %v1739_v60  ;;  %v2514_v41 = vadd.f32 %v2409_v54, %v9080_v7  ;;  %v1394_v35 = vrot.slane %v6253_v29, 1  ;;  %v9102_v42 = vld [vmem:[#allocation46_spill] sm:$0xff] }
 0x262   :  { %9095 = vst [vmem:[#allocation204_spill] sm:$0xff] %v6804_v12  ;;  %v2032_v45 = vadd.f32 %v9097_v57, %v1738_v28  ;;  %v6814_v63 = vmax.f32 %v2079_v31, %v2272_v1  ;;  %v2170_v17 = vrot.slane %v6765_v20, 2  ;;  %v2172_v43 = vrot.slane %v6243_v5, 2 }
 0x263   :  { %9094 = vst [vmem:[#allocation45_spill] sm:$0xff] %v6801_v22  ;;  %v6822_v60 = vadd.f32 %v6812_v3, %v1389_v59  ;;  %v2412_v28 = vrot.slane %v6765_v20, 3  ;;  %v2414_v7 = vrot.slane %v6243_v5, 3  ;;  %v1395_v14 = vsel %vm1306_vm8, %v1392_v25, %v1394_v35  ;;  %v6836_v22 = vpop.permute.xlu1 %2740 }
 0x264   :  { %9099 = vst [vmem:[#allocation206_spill] sm:$0xff] %v6814_v63  ;;  %v2082_v31 = vmax.f32 %v6250_v26, %v2033_v32  ;;  %v2173_v1 = vsel %vm2088_vm9, %v2170_v17, %v2172_v43  ;;  %v1393_v54 = vsel %vm1306_vm8, %v1390_v13, %v1392_v25  ;;  %v6831_v44 = vadd.f32 %v6812_v3, %v2514_v41  ;;  %v9104_v32 = vld [vmem:[#allocation47_spill] sm:$0xff]  ;;  %v9105_v41 = vld [vmem:[#allocation97_spill] sm:$0xff] }
 0x265   :  { %9100 = vst [vmem:[#allocation207_spill] sm:$0xff] %v6822_v60  ;;  %v1741_v46 = vadd.f32 %v9102_v42, %v1395_v14  ;;  %v2415_v59 = vsel %vm2330_vm10, %v2412_v28, %v2414_v7  ;;  %v2081_v12 = vmax.f32 %v6243_v5, %v2032_v45  ;;  %9103 = vst [vmem:[#allocation46_spill] sm:$0xff] %v6836_v22 }
 0x266   :  { %9101 = vst [vmem:[#allocation208_spill] sm:$0xff] %v6831_v44  ;;  %v2275_v19 = vadd.f32 %v2173_v1, %v9091_v2  ;;  %v2517_v57 = vadd.f32 %v2415_v59, %v9091_v2  ;;  %v1740_v60 = vadd.f32 %v9104_v32, %v1393_v54  ;;  %v2171_v20 = vsel %vm2088_vm9, %v2168_v10, %v2170_v17  ;;  %v6854_v2 = vpop.permute.xlu0 %2735  ;;  %v9110_v17 = vld [vmem:[#allocation94_spill] sm:$0xff] }
 0x267   :  { %v2035_v25 = vadd.f32 %v9105_v41, %v1741_v46  ;;  %v6846_v3 = vadd.f32 %v6836_v22, %v1395_v14  ;;  %v2413_v45 = vsel %vm2330_vm10, %v2410_v56, %v2412_v28  ;;  %9109 = vst [vmem:[#allocation211_spill] sm:$0xff] %v6854_v2  ;;  %v2274_v59 = vadd.f32 %v2171_v20, %v9093_v49  ;;  %v6884_v44 = vpop.permute.xlu1 %2750 }
 0x268   :  { %v6849_v5 = vmax.f32 %v2082_v31, %v2275_v19  ;;  %v6852_v1 = vadd.f32 %v6836_v22, %v2517_v57  ;;  %v2516_v10 = vadd.f32 %v2413_v45, %v9093_v49  ;;  %v2034_v13 = vadd.f32 %v9110_v17, %v1740_v60  ;;  %v9115_v17 = vld [vmem:[#allocation49_spill] sm:$0xff] }
 0x269   :  { %9106 = vst [vmem:[#allocation47_spill] sm:$0xff] %v6846_v3  ;;  %v6860_v46 = vadd.f32 %v6854_v2, %v1393_v54  ;;  %v1396_v14 = vrot.slane %v6256_v52, 1  ;;  %v1398_v56 = vrot.slane %v6259_v9, 1  ;;  %v6864_v19 = vmax.f32 %v2081_v12, %v2274_v59  ;;  %v9114_v59 = vld [vmem:[#allocation48_spill] sm:$0xff] }
 0x26a   :  { %9107 = vst [vmem:[#allocation209_spill] sm:$0xff] %v6849_v5  ;;  %9108 = vst [vmem:[#allocation210_spill] sm:$0xff] %v6852_v1  ;;  %v2084_v57 = vmax.f32 %v6256_v52, %v2035_v25  ;;  %v2174_v28 = vrot.slane %v6250_v26, 2  ;;  %v2176_v31 = vrot.slane %v6253_v29, 2  ;;  %v2416_v49 = vrot.slane %v6250_v26, 3  ;;  %v9118_v5 = vld [vmem:[#allocation96_spill] sm:$0xff] }
 0x26b   :  { %9111 = vst [vmem:[#allocation212_spill] sm:$0xff] %v6860_v46  ;;  %9112 = vst [vmem:[#allocation213_spill] sm:$0xff] %v6864_v19  ;;  %v1399_v20 = vsel %vm1306_vm8, %v1396_v14, %v1398_v56  ;;  %v2418_v60 = vrot.slane %v6253_v29, 3  ;;  %v1397_v54 = vsel %vm1306_vm8, %v1394_v35, %v1396_v14  ;;  %v6876_v12 = vadd.f32 %v6854_v2, %v2516_v10  ;;  %v9125_v1 = vld [vmem:[#allocation51_spill] sm:$0xff] }
 0x26c   :  { %v1743_v25 = vadd.f32 %v9114_v59, %v1399_v20  ;;  %v2177_v22 = vsel %vm2088_vm9, %v2174_v28, %v2176_v31  ;;  %v1742_v46 = vadd.f32 %v9115_v17, %v1397_v54  ;;  %v2083_v26 = vmax.f32 %v6253_v29, %v2034_v13  ;;  %9116 = vst [vmem:[#allocation48_spill] sm:$0xff] %v6884_v44 }
 0x26d   :  { %9113 = vst [vmem:[#allocation214_spill] sm:$0xff] %v6876_v12  ;;  %v2277_v3 = vadd.f32 %v2177_v22, %v9102_v42  ;;  %v2419_v41 = vsel %vm2330_vm10, %v2416_v49, %v2418_v60  ;;  %v2175_v10 = vsel %vm2088_vm9, %v2172_v43, %v2174_v28  ;;  %v2417_v45 = vsel %vm2330_vm10, %v2414_v7, %v2416_v49 }
 0x26e   :  { %v2037_v35 = vadd.f32 %v5813_v39, %v1743_v25  ;;  %v2519_v14 = vadd.f32 %v2419_v41, %v9102_v42  ;;  %v6893_v22 = vadd.f32 %v6884_v44, %v1399_v20  ;;  %v2036_v2 = vadd.f32 %v9118_v5, %v1742_v46  ;;  %v6902_v42 = vpop.permute.xlu0 %2745 }
 0x26f   :  { %v2518_v13 = vadd.f32 %v2417_v45, %v9104_v32  ;;  %v6897_v29 = vmax.f32 %v2084_v57, %v2277_v3  ;;  %9121 = vst [vmem:[#allocation217_spill] sm:$0xff] %v6902_v42  ;;  %v2276_v43 = vadd.f32 %v2175_v10, %v9104_v32  ;;  %v1400_v7 = vrot.slane %v6269_v51, 1 }
 0x270   :  { %9117 = vst [vmem:[#allocation49_spill] sm:$0xff] %v6893_v22  ;;  %v6900_v25 = vadd.f32 %v6884_v44, %v2519_v14  ;;  %v6907_v41 = vadd.f32 %v6902_v42, %v1397_v54  ;;  %v2086_v28 = vmax.f32 %v6269_v51, %v2037_v35  ;;  %v2178_v46 = vrot.slane %v6256_v52, 2 }
 0x271   :  { %9119 = vst [vmem:[#allocation215_spill] sm:$0xff] %v6897_v29  ;;  %v2180_v20 = vrot.slane %v6259_v9, 2  ;;  %v6912_v3 = vmax.f32 %v2083_v26, %v2276_v43  ;;  %v2420_v57 = vrot.slane %v6256_v52, 3  ;;  %v2422_v49 = vrot.slane %v6259_v9, 3  ;;  %v9143_v29 = vld [vmem:[#allocation52_spill] sm:$0xff] }
 0x272   :  { %9120 = vst [vmem:[#allocation216_spill] sm:$0xff] %v6900_v25  ;;  %9122 = vst [vmem:[#allocation218_spill] sm:$0xff] %v6907_v41  ;;  %v3113_v45 = vrot.slane %v6286_v47, 1  ;;  %v6918_v32 = vadd.f32 %v6902_v42, %v2518_v13  ;;  %v1401_v14 = vsel %vm1306_vm8, %v1398_v56, %v1400_v7  ;;  %v2085_v35 = vmax.f32 %v6259_v9, %v2036_v2  ;;  %v6932_v56 = vpop.permute.xlu1 %2760 }
 0x273   :  { %9123 = vst [vmem:[#allocation219_spill] sm:$0xff] %v6912_v3  ;;  %v2181_v54 = vsel %vm2088_vm9, %v2178_v46, %v2180_v20  ;;  %v2423_v26 = vsel %vm2330_vm10, %v2420_v57, %v2422_v49  ;;  %v1744_v44 = vadd.f32 %v9125_v1, %v1401_v14  ;;  %v2179_v39 = vsel %vm2088_vm9, %v2176_v31, %v2178_v46  ;;  %v6946_v31 = vpop.permute.xlu0 %2755 }
 0x274   :  { %9124 = vst [vmem:[#allocation220_spill] sm:$0xff] %v6918_v32  ;;  %v2279_v10 = vadd.f32 %v2181_v54, %v9114_v59  ;;  %v3114_v43 = vsel %vm1306_vm8, %v1400_v7, %v3113_v45  ;;  %v2521_v13 = vadd.f32 %v2423_v26, %v9114_v59  ;;  %v2421_v42 = vsel %vm2330_vm10, %v2418_v60, %v2420_v57  ;;  %v9128_v54 = vld [vmem:[#allocation98_spill] sm:$0xff] }
 0x275   :  { %9126 = vst [vmem:[#allocation51_spill] sm:$0xff] %v6932_v56  ;;  %v6937_v5 = vadd.f32 %v9128_v54, %v1744_v44  ;;  %v2278_v7 = vadd.f32 %v2179_v39, %v9115_v17  ;;  %v2520_v41 = vadd.f32 %v2421_v42, %v9115_v17  ;;  %v6944_v59 = vadd.f32 %v3114_v43, %v6932_v56  ;;  %v9135_v42 = vld [vmem:[#allocation101_spill] sm:$0xff]  ;;  %v9142_v54 = vld [vmem:[#allocation139_spill] sm:$0xff] }
 0x276   :  { %v6934_v2 = vmax.f32 %v2086_v28, %v2279_v10  ;;  %9130 = vst [vmem:[#allocation223_spill] sm:$0xff] %v6946_v31  ;;  %v1099_v60 = vmul.f32 %v6183_v24, %v5819_v61  ;;  %v9131_v28 = vld [vmem:[#allocation100_spill] sm:$0xff]  ;;  %v6953_v46 = vadd.f32 %v6932_v56, %v2521_v13  ;;  %v6958_v17 = vadd.f32 %v6946_v31, %v1401_v14  ;;  %v9139_v56 = vld [vmem:[#allocation2_spill] sm:$0xff] }
 0x277   :  { %9129 = vst [vmem:[#allocation222_spill] sm:$0xff] %v6944_v59  ;;  %v1100_v44 = vmul.f32 %v6183_v24, %v9131_v28  ;;  %v6955_v39 = vmax.f32 %v2085_v35, %v2278_v7  ;;  %v1101_v57 = vmul.f32 %v6183_v24, %v9135_v42  ;;  %v6963_v10 = vadd.f32 %v6946_v31, %v2520_v41  ;;  %v7047_v19 = vpop.permute.xlu0 %2765 }
 0x278   :  { %9127 = vst [vmem:[#allocation221_spill] sm:$0xff] %v6934_v2  ;;  %9132 = vst [vmem:[#allocation100_spill] sm:$0xff] %v6953_v46  ;;  %v1154_v26 = vmul.f32 %v6198_v34, %v1099_v60  ;;  %v2182_v43 = vrot.slane %v6269_v51, 2  ;;  %v2087_v14 = vmax.f32 %v6286_v47, %v6937_v5  ;;  %v2424_v7 = vrot.slane %v6269_v51, 3  ;;  %v9140_v46 = vld [vmem:[#allocation102_spill] sm:$0xff] }
 0x279   :  { %9133 = vst [vmem:[#allocation224_spill] sm:$0xff] %v6955_v39  ;;  %9134 = vst [vmem:[#allocation225_spill] sm:$0xff] %v6958_v17  ;;  %v1155_v61 = vmul.f32 %v6198_v34, %v1100_v44  ;;  %v1156_v35 = vmul.f32 %v6198_v34, %v1101_v57  ;;  %v6989_v57 = vsel %vm1306_vm8, %v3113_v45, -1e+30  ;;  %v1102_v2 = vmul.f32 %v6183_v24, %v9140_v46  ;;  %v9145_v46 = vld [vmem:[#allocation122_spill] sm:$0xff] }
 0x27a   :  { %9136 = vst [vmem:[#allocation101_spill] sm:$0xff] %v6963_v10  ;;  %v6977_v60 = vadd.f32 %v6214_v58, %v1154_v26  ;;  %v2183_v44 = vsel %vm2088_vm9, %v2180_v20, %v2182_v43  ;;  %v2425_v5 = vsel %vm2330_vm10, %v2422_v49, %v2424_v7  ;;  %9137 = vst [vmem:[#allocation226_spill] sm:$0xff] %v6989_v57  ;;  %v9138_v7 = vld [vmem:[#allocation3_spill] sm:$0xff] }
 0x27b   :  { %v6980_v28 = vadd.f32 %v6214_v58, %v1155_v61  ;;  %v6984_v42 = vadd.f32 %v6214_v58, %v1156_v35  ;;  %v2280_v34 = vadd.f32 %v2183_v44, %v9125_v1  ;;  %9148 = vst [vmem:[#allocation2_spill] sm:$0xff] %v7047_v19 }
 0x27c   :  { %v1307_v13 = vrot.slane %v6977_v60, 1  ;;  %v2039_v61 = vmax.f32 %v6977_v60, %v6187_v11  ;;  %v8762_v41 = vrot.slane %v6977_v60, 2  ;;  %v8765_v58 = vrot.slane %v6977_v60, 3 }
 0x27d   :  { %v1308_v26 = vrot.slane %v6980_v28, 1  ;;  %v2090_v20 = vrot.slane %v6980_v28, 2  ;;  %v8766_v43 = vrot.slane %v6980_v28, 3  ;;  %v2868_v49 = vrot.slane %v6977_v60, 7 }
 0x27e   :  { %v1450_v35 = vsel %vm1306_vm8, -1e+30, %v1307_v13  ;;  %v2281_v44 = vmax.f32 %v2039_v61, %v9138_v7  ;;  %v2869_v22 = vrot.slane %v6980_v28, 7  ;;  %v8774_v51 = vrot.slane %v6984_v42, 7 }
 0x27f   :  { %v1309_v45 = vsel %vm1306_vm8, %v1307_v13, %v1308_v26  ;;  %v2091_v59 = vsel %vm2088_vm9, %v8762_v41, %v2090_v20  ;;  %v2333_v31 = vsel %vm2330_vm10, %v8765_v58, %v8766_v43  ;;  %v9141_v13 = vld [vmem:[#allocation5_spill] sm:$0xff]  ;;  %v3014_v58 = vsel %vm2867_vm11, -1e+30, %v2868_v49  ;;  %v9144_v43 = vld [vmem:[#allocation50_spill] sm:$0xff] }
 0x280   :  { %v1698_v11 = vadd.f32 %v9139_v56, %v1309_v45  ;;  %v1697_v17 = vadd.f32 %v9141_v13, %v1450_v35  ;;  %v2234_v61 = vadd.f32 %v2091_v59, %v9139_v56  ;;  %v2476_v7 = vadd.f32 %v2333_v31, %v9139_v56  ;;  %v3364_v56 = vpop.permute.xlu1 %3363 }
 0x281   :  { %v2817_v25 = vmax.f32 %v2281_v44, %v9142_v54  ;;  %v7021_v41 = vsel %vm2867_vm11, %v2868_v49, %v2869_v22  ;;  %v3015_v10 = vadd.f32 %v3014_v58, %v9144_v43  ;;  %v3118_v39 = vadd.f32 %v9145_v46, %v1309_v45  ;;  %v9146_v49 = vld [vmem:[#allocation124_spill] sm:$0xff] }
 0x282   :  { %v1992_v47 = vadd.f32 %v9143_v29, %v1698_v11  ;;  %v3217_v35 = vrot.slane %v6980_v28, 5  ;;  %v8782_v59 = vrot.slane %v6984_v42, 5  ;;  %v2872_v31 = vsel %vm2867_vm11, %v2869_v22, %v8774_v51 }
 0x283   :  { %v3754_v44 = vrot.slane %v6980_v28, 6  ;;  %v8781_v11 = vrot.slane %v6984_v42, 6  ;;  %v2770_v57 = vadd.f32 %v9146_v49, %v2476_v7  ;;  %v3064_v58 = vmax.f32 %v2817_v25, %v3015_v10 }
 0x284   :  { %v2041_v54 = vmax.f32 %v6984_v42, %v1992_v47  ;;  %v3219_v45 = vsel %vm3216_vm12, %v3217_v35, %v8782_v59  ;;  %v3997_v9 = vadd.f32 %v3364_v56, %v2872_v31  ;;  %v3017_v32 = vadd.f32 %v2872_v31, %v9143_v29  ;;  %v9149_v35 = vld [vmem:[#allocation103_spill] sm:$0xff]  ;;  %v9151_v31 = vld [vmem:[#allocation53_spill] sm:$0xff]  ;;  %v9154_v59 = vld [vmem:[#allocation126_spill] sm:$0xff] }
 0x285   :  { %v3606_v47 = vadd.f32 %v3364_v56, %v3219_v45  ;;  %v3756_v22 = vsel %vm3753_vm13, %v3754_v44, %v8781_v11  ;;  %v3167_v51 = vmax.f32 %v3064_v58, %v3118_v39  ;;  %v7043_v12 = vmax.f32 %v2087_v14, %v2280_v34 }
 0x286   :  { %v2283_v52 = vmax.f32 %v2041_v54, %v2234_v61  ;;  %v3898_v3 = vadd.f32 %v3756_v22, %v3364_v56  ;;  %v2522_v7 = vadd.f32 %v2425_v5, %v9125_v1  ;;  %v1103_v61 = vmul.f32 %v6183_v24, %v9149_v35  ;;  %v7054_v54 = vld [vmem:[%s8522_s2] ss:$0 sm:$0xff]  ;;  %v9152_v35 = vld [vmem:[#allocation7_spill] sm:$0xff] }
 0x287   :  { %9147 = vst [vmem:[#allocation3_spill] sm:$0xff] %v7043_v12  ;;  %v3655_v10 = vadd.f32 %v3606_v47, %v9144_v43  ;;  %v1157_v39 = vmul.f32 %v7054_v54, %v1102_v2  ;;  %v4045_v14 = vadd.f32 %v3997_v9, %v9145_v46  ;;  %v2092_v1 = vrot.slane %v6984_v42, 2  ;;  %v7067_v43 = vld [vmem:[%s8523_s3] ss:$0 sm:$0xff] }
 0x288   :  { %v2819_v25 = vmax.f32 %v2283_v52, %v2770_v57  ;;  %v7059_v34 = vadd.f32 %v7047_v19, %v2522_v7  ;;  %v1310_v52 = vrot.slane %v6984_v42, 1  ;;  %v1158_v57 = vmul.f32 %v7054_v54, %v1103_v61 }
 0x289   :  { %v3704_v5 = vmax.f32 %v3167_v51, %v3655_v10  ;;  %v7070_v56 = vadd.f32 %v7067_v43, %v1157_v39  ;;  %v2334_v9 = vrot.slane %v6984_v42, 3  ;;  %v1991_v44 = vadd.f32 %v9151_v31, %v1697_v17 }
 0x28a   :  { %9150 = vst [vmem:[#allocation102_spill] sm:$0xff] %v7059_v34  ;;  %v3066_v2 = vmax.f32 %v2819_v25, %v3017_v32  ;;  %v1311_v46 = vsel %vm1306_vm8, %v1308_v26, %v1310_v52  ;;  %v2093_v58 = vsel %vm2088_vm9, %v2090_v20, %v2092_v1  ;;  %v7077_v45 = vadd.f32 %v7067_v43, %v1158_v57 }
 0x28b   :  { %v3946_v51 = vmax.f32 %v3704_v5, %v3898_v3  ;;  %v8780_v47 = vrot.slane %v7070_v56, 1  ;;  %v8778_v22 = vrot.slane %v7070_v56, 2  ;;  %v8779_v7 = vrot.slane %v7070_v56, 3 }
 0x28c   :  { %v2873_v10 = vrot.slane %v7070_v56, 7  ;;  %v3220_v32 = vrot.slane %v7070_v56, 5  ;;  %v3757_v26 = vrot.slane %v7070_v56, 6  ;;  %v8785_v20 = vrot.slane %v7077_v45, 7 }
 0x28d   :  { %v4094_v25 = vmax.f32 %v3946_v51, %v4045_v14  ;;  %v1313_v3 = vsel %vm1306_vm8, %v1310_v52, %v8780_v47  ;;  %v2095_v17 = vsel %vm2088_vm9, %v2092_v1, %v8778_v22  ;;  %v2337_v5 = vsel %vm2330_vm10, %v2334_v9, %v8779_v7  ;;  %v3374_v52 = vpop.permute.xlu1 %3373  ;;  %v9153_v22 = vld [vmem:[#allocation54_spill] sm:$0xff] }
 0x28e   :  { %v1700_v61 = vadd.f32 %v9152_v35, %v1313_v3  ;;  %v2236_v39 = vadd.f32 %v2095_v17, %v9152_v35  ;;  %v3120_v14 = vadd.f32 %v9146_v49, %v1313_v3  ;;  %v2478_v1 = vadd.f32 %v2337_v5, %v9152_v35  ;;  %v9155_v5 = vld [vmem:[#allocation4_spill] sm:$0xff] }
 0x28f   :  { %4143 = vst.msk [vmem:[%s8524_s8] sm:$0xff] %vm789_vm6, %v4094_v25  ;;  %v2876_v57 = vsel %vm2867_vm11, %v2873_v10, %v8785_v20  ;;  %v8787_v51 = vrot.slane %v7077_v45, 5  ;;  %v8791_v17 = vrot.slane %v7077_v45, 6  ;;  %v1699_v20 = vadd.f32 %v9155_v5, %v1311_v46 }
 0x290   :  { %v1994_v7 = vadd.f32 %v9153_v22, %v1700_v61  ;;  %v3019_v3 = vadd.f32 %v2876_v57, %v9153_v22  ;;  %v3169_v47 = vmax.f32 %v3066_v2, %v3120_v14  ;;  %v3999_v11 = vadd.f32 %v3374_v52, %v2876_v57  ;;  %v9156_v2 = vld [vmem:[#allocation55_spill] sm:$0xff] }
 0x291   :  { %v2772_v19 = vadd.f32 %v9154_v59, %v2478_v1  ;;  %v3223_v25 = vsel %vm3216_vm12, %v3220_v32, %v8787_v51  ;;  %v3760_v35 = vsel %vm3753_vm13, %v3757_v26, %v8791_v17  ;;  %v1993_v14 = vadd.f32 %v9156_v2, %v1699_v20 }
 0x292   :  { %v2043_v12 = vmax.f32 %v7077_v45, %v1994_v7  ;;  %v3608_v34 = vadd.f32 %v3374_v52, %v3223_v25  ;;  %v3900_v61 = vadd.f32 %v3760_v35, %v3374_v52  ;;  %v4047_v63 = vadd.f32 %v3999_v11, %v9146_v49 }
 0x293   :  { %v2040_v1 = vmax.f32 %v6980_v28, %v1991_v44  ;;  %v9157_v57 = vrot.slane %v6977_v60, 2  ;;  %v2235_v15 = vadd.f32 %v2093_v58, %v9155_v5  ;;  %v9158_v7 = vrot.slane %v6980_v28, 3 }
 0x294   :  { %v2285_v6 = vmax.f32 %v2043_v12, %v2236_v39  ;;  %v3657_v17 = vadd.f32 %v3608_v34, %v9143_v29  ;;  %v2042_v11 = vmax.f32 %v7070_v56, %v1993_v14  ;;  %v9159_v49 = vrot.slane %v6977_v60, 3 }
 0x295   :  { %v2232_v51 = vsel %vm2088_vm9, -1e+30, %v9157_v57  ;;  %v2335_v52 = vsel %vm2330_vm10, %v9158_v7, %v2334_v9  ;;  %v9160_v25 = vrot.slane %v6984_v42, 7  ;;  %v3016_v35 = vadd.f32 %v7021_v41, %v9151_v31  ;;  %v3369_v57 = vpop.permute.xlu0 %3368  ;;  %v9162_v7 = vld [vmem:[#allocation121_spill] sm:$0xff] }
 0x296   :  { %v2233_v18 = vadd.f32 %v2232_v51, %v9141_v13  ;;  %v2474_v44 = vsel %vm2330_vm10, -1e+30, %v9159_v49  ;;  %v2477_v20 = vadd.f32 %v2335_v52, %v9155_v5  ;;  %v2821_v58 = vmax.f32 %v2285_v6, %v2772_v19  ;;  %v9161_v51 = vld [vmem:[#allocation123_spill] sm:$0xff]  ;;  %v9165_v49 = vld [vmem:[#allocation104_spill] sm:$0xff] }
 0x297   :  { %v2874_v12 = vsel %vm2867_vm11, %v9160_v25, %v2873_v10  ;;  %v3706_v29 = vmax.f32 %v3169_v47, %v3657_v17  ;;  %v2475_v39 = vadd.f32 %v2474_v44, %v9141_v13  ;;  %v2284_v28 = vmax.f32 %v2042_v11, %v2235_v15  ;;  %v9166_v44 = vld [vmem:[#allocation105_spill] sm:$0xff] }
 0x298   :  { %v2282_v34 = vmax.f32 %v2040_v1, %v2233_v18  ;;  %v2771_v9 = vadd.f32 %v9161_v51, %v2477_v20  ;;  %v3018_v60 = vadd.f32 %v2874_v12, %v9156_v2  ;;  %v7144_v14 = vmax.f32 %v2821_v58, %v3019_v3 }
 0x299   :  { %v3948_v5 = vmax.f32 %v3706_v29, %v3900_v61  ;;  %v2769_v52 = vadd.f32 %v9162_v7, %v2475_v39  ;;  %v3119_v6 = vadd.f32 %v9162_v7, %v1311_v46  ;;  %v9163_v18 = vrot.slane %v6984_v42, 5  ;;  %v9167_v29 = vld [vmem:[#allocation106_spill] sm:$0xff] }
 0x29a   :  { %v2820_v19 = vmax.f32 %v2284_v28, %v2771_v9  ;;  %v9164_v13 = vrot.slane %v6984_v42, 6  ;;  %v3998_v41 = vadd.f32 %v3369_v57, %v2874_v12  ;;  %v1104_v46 = vmul.f32 %v6183_v24, %v9165_v49 }
 0x29b   :  { %v3221_v15 = vsel %vm3216_vm12, %v9163_v18, %v3220_v32  ;;  %v4096_v10 = vmax.f32 %v3948_v5, %v4047_v63  ;;  %v2818_v17 = vmax.f32 %v2282_v34, %v2769_v52  ;;  %v1105_v20 = vmul.f32 %v6183_v24, %v9166_v44  ;;  %v9171_v52 = vld [vmem:[#allocation6_spill] sm:$0xff] }
 0x29c   :  { %v3758_v47 = vsel %vm3753_vm13, %v9164_v13, %v3757_v26  ;;  %v3607_v3 = vadd.f32 %v3369_v57, %v3221_v15  ;;  %v7154_v61 = vmax.f32 %v2820_v19, %v3018_v60  ;;  %v4046_v11 = vadd.f32 %v3998_v41, %v9162_v7  ;;  %v9170_v60 = vld [vmem:[#allocation107_spill] sm:$0xff] }
 0x29d   :  { %v3899_v1 = vadd.f32 %v3758_v47, %v3369_v57  ;;  %4145 = vst.msk [vmem:[%s8524_s8 + $0x10] sm:$0xff] %vm789_vm6, %v4096_v10  ;;  %v3065_v42 = vmax.f32 %v2818_v17, %v3016_v35  ;;  %v1314_v32 = vrot.slane %v7077_v45, 1  ;;  %v2096_v26 = vrot.slane %v7077_v45, 2 }
 0x29e   :  { %v3656_v63 = vadd.f32 %v3607_v3, %v9151_v31  ;;  %v1159_v25 = vmul.f32 %v7054_v54, %v1104_v46  ;;  %v1160_v12 = vmul.f32 %v7054_v54, %v1105_v20  ;;  %v2338_v58 = vrot.slane %v7077_v45, 3 }
 0x29f   :  { %v1106_v34 = vmul.f32 %v6183_v24, %v9167_v29  ;;  %v3168_v39 = vmax.f32 %v3065_v42, %v3119_v6  ;;  %v9168_v28 = vrot.slane %v7070_v56, 1  ;;  %v9169_v31 = vrot.slane %v7070_v56, 2  ;;  %v9173_v29 = vld [vmem:[#allocation9_spill] sm:$0xff] }
 0x2a0   :  { %v1107_v5 = vmul.f32 %v6183_v24, %v9170_v60  ;;  %v7182_v57 = vadd.f32 %v7067_v43, %v1159_v25  ;;  %v7185_v7 = vadd.f32 %v7067_v43, %v1160_v12  ;;  %v9172_v15 = vrot.slane %v7070_v56, 3  ;;  %v9175_v60 = vld [vmem:[#allocation128_spill] sm:$0xff] }
 0x2a1   :  { %v1315_v9 = vsel %vm1306_vm8, %v9168_v28, %v1314_v32  ;;  %v2097_v35 = vsel %vm2088_vm9, %v9169_v31, %v2096_v26  ;;  %v3705_v18 = vmax.f32 %v3168_v39, %v3656_v63  ;;  %v1161_v41 = vmul.f32 %v7054_v54, %v1106_v34 }
 0x2a2   :  { %v1701_v19 = vadd.f32 %v9171_v52, %v1315_v9  ;;  %v2237_v6 = vadd.f32 %v2097_v35, %v9171_v52  ;;  %v2339_v13 = vsel %vm2330_vm10, %v9172_v15, %v2338_v58  ;;  %v7193_v47 = vadd.f32 %v9161_v51, %v1315_v9  ;;  %v3384_v9 = vpop.permute.xlu1 %3383 }
 0x2a3   :  { %v8798_v10 = vrot.slane %v7182_v57, 1  ;;  %v8797_v17 = vrot.slane %v7182_v57, 2  ;;  %v8795_v3 = vrot.slane %v7182_v57, 3  ;;  %v2877_v49 = vrot.slane %v7182_v57, 7 }
 0x2a4   :  { %v3947_v46 = vmax.f32 %v3705_v18, %v3899_v1  ;;  %v8794_v44 = vrot.slane %v7185_v7, 7  ;;  %v3224_v56 = vrot.slane %v7182_v57, 5  ;;  %v8793_v20 = vrot.slane %v7185_v7, 5 }
 0x2a5   :  { %v1317_v42 = vsel %vm1306_vm8, %v1314_v32, %v8798_v10  ;;  %v2099_v63 = vsel %vm2088_vm9, %v2096_v26, %v8797_v17  ;;  %v2341_v25 = vsel %vm2330_vm10, %v2338_v58, %v8795_v3  ;;  %v3761_v1 = vrot.slane %v7182_v57, 6  ;;  %v3379_v17 = vpop.permute.xlu0 %3378 }
 0x2a6   :  { %v4095_v12 = vmax.f32 %v3947_v46, %v4046_v11  ;;  %v1702_v34 = vadd.f32 %v9173_v29, %v1317_v42  ;;  %v2238_v39 = vadd.f32 %v2099_v63, %v9173_v29  ;;  %v2480_v28 = vadd.f32 %v2341_v25, %v9173_v29  ;;  %v9174_v11 = vld [vmem:[#allocation56_spill] sm:$0xff]  ;;  %v9176_v29 = vld [vmem:[#allocation57_spill] sm:$0xff] }
 0x2a7   :  { %v2880_v32 = vsel %vm2867_vm11, %v2877_v49, %v8794_v44  ;;  %v3122_v26 = vadd.f32 %v9154_v59, %v1317_v42  ;;  %v3227_v58 = vsel %vm3216_vm12, %v3224_v56, %v8793_v20  ;;  %v8796_v31 = vrot.slane %v7185_v7, 6 }
 0x2a8   :  { %4144 = vst.msk [vmem:[%s8524_s8 + $0x8] sm:$0xff] %vm789_vm6, %v4095_v12  ;;  %v1996_v35 = vadd.f32 %v9174_v11, %v1702_v34  ;;  %v2774_v18 = vadd.f32 %v9175_v60, %v2480_v28  ;;  %v3021_v15 = vadd.f32 %v2880_v32, %v9174_v11  ;;  %v3610_v46 = vadd.f32 %v3384_v9, %v3227_v58 }
 0x2a9   :  { %v3171_v42 = vmax.f32 %v7144_v14, %v3122_v26  ;;  %v3764_v63 = vsel %vm3753_vm13, %v3761_v1, %v8796_v31  ;;  %v4001_v25 = vadd.f32 %v3384_v9, %v2880_v32  ;;  %v1995_v20 = vadd.f32 %v9176_v29, %v1701_v19 }
 0x2aa   :  { %v2045_v44 = vmax.f32 %v7185_v7, %v1996_v35  ;;  %v3659_v12 = vadd.f32 %v3610_v46, %v9153_v22  ;;  %v3902_v3 = vadd.f32 %v3764_v63, %v3384_v9  ;;  %v2479_v34 = vadd.f32 %v2339_v13, %v9171_v52  ;;  %v9178_v35 = vld [vmem:[#allocation125_spill] sm:$0xff] }
 0x2ab   :  { %v4049_v28 = vadd.f32 %v4001_v25, %v9154_v59  ;;  %v2044_v58 = vmax.f32 %v7182_v57, %v1995_v20  ;;  %v9177_v14 = vrot.slane %v7077_v45, 7  ;;  %v3170_v32 = vmax.f32 %v7154_v61, %v7193_v47 }
 0x2ac   :  { %v2287_v31 = vmax.f32 %v2045_v44, %v2238_v39  ;;  %v3708_v19 = vmax.f32 %v3171_v42, %v3659_v12  ;;  %v2773_v10 = vadd.f32 %v9178_v35, %v2479_v34  ;;  %v9179_v52 = vrot.slane %v7077_v45, 5 }
 0x2ad   :  { %v2878_v26 = vsel %vm2867_vm11, %v9177_v14, %v2877_v49  ;;  %v2286_v9 = vmax.f32 %v2044_v58, %v2237_v6  ;;  %v9180_v13 = vrot.slane %v7077_v45, 6  ;;  %v1162_v42 = vmul.f32 %v7054_v54, %v1107_v5  ;;  %v9181_v58 = vld [vmem:[#allocation11_spill] sm:$0xff] }
 0x2ae   :  { %v3020_v22 = vadd.f32 %v2878_v26, %v9176_v29  ;;  %v3225_v59 = vsel %vm3216_vm12, %v9179_v52, %v3224_v56  ;;  %v4000_v49 = vadd.f32 %v3379_v17, %v2878_v26  ;;  %v2823_v46 = vmax.f32 %v2287_v31, %v2774_v18 }
 0x2af   :  { %v3762_v20 = vsel %vm3753_vm13, %v9180_v13, %v3761_v1  ;;  %v3950_v63 = vmax.f32 %v3708_v19, %v3902_v3  ;;  %v3609_v61 = vadd.f32 %v3379_v17, %v3225_v59  ;;  %v2822_v44 = vmax.f32 %v2286_v9, %v2773_v10  ;;  %v9182_v13 = vld [vmem:[#allocation58_spill] sm:$0xff] }
 0x2b0   :  { %v3901_v47 = vadd.f32 %v3762_v20, %v3379_v17  ;;  %v4048_v39 = vadd.f32 %v4000_v49, %v9161_v51  ;;  %v7257_v6 = vadd.f32 %v7067_v43, %v1161_v41  ;;  %v3070_v25 = vmax.f32 %v2823_v46, %v3021_v15 }
 0x2b1   :  { %v4098_v12 = vmax.f32 %v3950_v63, %v4049_v28  ;;  %v3658_v56 = vadd.f32 %v3609_v61, %v9156_v2  ;;  %v1318_v45 = vrot.slane %v7185_v7, 1  ;;  %v7261_v1 = vmax.f32 %v2822_v44, %v3020_v22  ;;  %v3394_v63 = vpop.permute.xlu1 %3393  ;;  %v9183_v61 = vld [vmem:[#allocation130_spill] sm:$0xff] }
 0x2b2   :  { %v7264_v3 = vadd.f32 %v7067_v43, %v1162_v42  ;;  %v1320_v10 = vrot.slane %v7257_v6, 1  ;;  %v2100_v51 = vrot.slane %v7185_v7, 2  ;;  %v8803_v41 = vrot.slane %v7257_v6, 2 }
 0x2b3   :  { %4147 = vst.msk [vmem:[%s8524_s8 + $0x20] sm:$0xff] %vm789_vm6, %v4098_v12  ;;  %v3707_v5 = vmax.f32 %v3170_v32, %v3658_v56  ;;  %v2342_v2 = vrot.slane %v7185_v7, 3  ;;  %v8802_v17 = vrot.slane %v7257_v6, 3  ;;  %v2881_v18 = vrot.slane %v7257_v6, 7 }
 0x2b4   :  { %v1321_v31 = vsel %vm1306_vm8, %v1318_v45, %v1320_v10  ;;  %v8801_v15 = vrot.slane %v7264_v3, 7  ;;  %v3228_v34 = vrot.slane %v7257_v6, 5  ;;  %v2103_v26 = vsel %vm2088_vm9, %v2100_v51, %v8803_v41 }
 0x2b5   :  { %v3949_v28 = vmax.f32 %v3707_v5, %v3901_v47  ;;  %v1704_v14 = vadd.f32 %v9181_v58, %v1321_v31  ;;  %v2345_v32 = vsel %vm2330_vm10, %v2342_v2, %v8802_v17  ;;  %v2240_v19 = vadd.f32 %v2103_v26, %v9181_v58 }
 0x2b6   :  { %v2482_v22 = vadd.f32 %v2345_v32, %v9181_v58  ;;  %v2884_v9 = vsel %vm2867_vm11, %v2881_v18, %v8801_v15  ;;  %v3124_v52 = vadd.f32 %v9175_v60, %v1321_v31  ;;  %v8799_v46 = vrot.slane %v7264_v3, 5 }
 0x2b7   :  { %v4097_v59 = vmax.f32 %v3949_v28, %v4048_v39  ;;  %v1998_v20 = vadd.f32 %v9182_v13, %v1704_v14  ;;  %v3023_v49 = vadd.f32 %v2884_v9, %v9182_v13  ;;  %v3765_v42 = vrot.slane %v7257_v6, 6  ;;  %v9185_v14 = vld [vmem:[#allocation8_spill] sm:$0xff] }
 0x2b8   :  { %v2776_v47 = vadd.f32 %v9183_v61, %v2482_v22  ;;  %v3173_v44 = vmax.f32 %v3070_v25, %v3124_v52  ;;  %v8800_v12 = vrot.slane %v7264_v3, 6  ;;  %v3231_v56 = vsel %vm3216_vm12, %v3228_v34, %v8799_v46 }
 0x2b9   :  { %4146 = vst.msk [vmem:[%s8524_s8 + $0x18] sm:$0xff] %vm789_vm6, %v4097_v59  ;;  %v2047_v39 = vmax.f32 %v7264_v3, %v1998_v20  ;;  %v4003_v5 = vadd.f32 %v3394_v63, %v2884_v9  ;;  %v9184_v31 = vrot.slane %v7182_v57, 1  ;;  %v3612_v28 = vadd.f32 %v3394_v63, %v3231_v56 }
 0x2ba   :  { %v3768_v58 = vsel %vm3753_vm13, %v3765_v42, %v8800_v12  ;;  %v9186_v32 = vrot.slane %v7182_v57, 2  ;;  %v9189_v15 = vrot.slane %v7185_v7, 7 }
 0x2bb   :  { %v1319_v25 = vsel %vm1306_vm8, %v9184_v31, %v1318_v45  ;;  %v2289_v52 = vmax.f32 %v2047_v39, %v2240_v19  ;;  %v3904_v59 = vadd.f32 %v3768_v58, %v3394_v63  ;;  %v4051_v20 = vadd.f32 %v4003_v5, %v9175_v60  ;;  %v9187_v45 = vld [vmem:[#allocation59_spill] sm:$0xff]  ;;  %v3389_v39 = vpop.permute.xlu0 %3388 }
 0x2bc   :  { %v1703_v26 = vadd.f32 %v9185_v14, %v1319_v25  ;;  %v2101_v22 = vsel %vm2088_vm9, %v9186_v32, %v2100_v51  ;;  %v3661_v46 = vadd.f32 %v3612_v28, %v9174_v11  ;;  %v9188_v31 = vrot.slane %v7182_v57, 3  ;;  %v9193_v32 = vld [vmem:[#allocation108_spill] sm:$0xff] }
 0x2bd   :  { %v2239_v9 = vadd.f32 %v2101_v22, %v9185_v14  ;;  %v2882_v17 = vsel %vm2867_vm11, %v9189_v15, %v2881_v18  ;;  %v2825_v41 = vmax.f32 %v2289_v52, %v2776_v47  ;;  %v3123_v60 = vadd.f32 %v9178_v35, %v1319_v25  ;;  %v9192_v15 = vld [vmem:[#allocation127_spill] sm:$0xff]  ;;  %v9194_v22 = vld [vmem:[#allocation109_spill] sm:$0xff] }
 0x2be   :  { %v1997_v56 = vadd.f32 %v9187_v45, %v1703_v26  ;;  %v2343_v12 = vsel %vm2330_vm10, %v9188_v31, %v2342_v2  ;;  %v3022_v19 = vadd.f32 %v2882_v17, %v9187_v45  ;;  %v3710_v63 = vmax.f32 %v3173_v44, %v3661_v46 }
 0x2bf   :  { %v2481_v51 = vadd.f32 %v2343_v12, %v9185_v14  ;;  %v9190_v5 = vrot.slane %v7185_v7, 5  ;;  %v9191_v2 = vrot.slane %v7185_v7, 6  ;;  %v7338_v18 = vmax.f32 %v2825_v41, %v3023_v49 }
 0x2c0   :  { %v2046_v11 = vmax.f32 %v7257_v6, %v1997_v56  ;;  %v3172_v12 = vmax.f32 %v7261_v1, %v3123_v60  ;;  %v3952_v25 = vmax.f32 %v3710_v63, %v3904_v59  ;;  %v4002_v14 = vadd.f32 %v3389_v39, %v2882_v17 }
 0x2c1   :  { %v3229_v57 = vsel %vm3216_vm12, %v9190_v5, %v3228_v34  ;;  %v3766_v28 = vsel %vm3753_vm13, %v9191_v2, %v3765_v42  ;;  %v2775_v47 = vadd.f32 %v9192_v15, %v2481_v51  ;;  %v1108_v34 = vmul.f32 %v6183_v24, %v9193_v32  ;;  %v9196_v51 = vld [vmem:[#allocation110_spill] sm:$0xff] }
 0x2c2   :  { %v3611_v58 = vadd.f32 %v3389_v39, %v3229_v57  ;;  %v2288_v46 = vmax.f32 %v2046_v11, %v2239_v9  ;;  %v3903_v44 = vadd.f32 %v3766_v28, %v3389_v39  ;;  %v1109_v7 = vmul.f32 %v6183_v24, %v9194_v22 }
 0x2c3   :  { %v1322_v41 = vrot.slane %v7264_v3, 1  ;;  %v4100_v49 = vmax.f32 %v3952_v25, %v4051_v20  ;;  %v4050_v52 = vadd.f32 %v4002_v14, %v9178_v35  ;;  %v2104_v1 = vrot.slane %v7264_v3, 2 }
 0x2c4   :  { %v3660_v26 = vadd.f32 %v3611_v58, %v9176_v29  ;;  %v2824_v42 = vmax.f32 %v2288_v46, %v2775_v47  ;;  %v1163_v9 = vmul.f32 %v7054_v54, %v1108_v34  ;;  %v1164_v17 = vmul.f32 %v7054_v54, %v1109_v7  ;;  %v9199_v47 = vld [vmem:[#allocation111_spill] sm:$0xff] }
 0x2c5   :  { %v2346_v29 = vrot.slane %v7264_v3, 3  ;;  %4149 = vst.msk [vmem:[%s8524_s8 + $0x30] sm:$0xff] %vm789_vm6, %v4100_v49  ;;  %v1323_v35 = vsel %vm1306_vm8, %v1320_v10, %v1322_v41  ;;  %v9195_v20 = vrot.slane %v7257_v6, 2  ;;  %v1110_v60 = vmul.f32 %v6183_v24, %v9196_v51 }
 0x2c6   :  { %v3709_v59 = vmax.f32 %v3172_v12, %v3660_v26  ;;  %v7357_v56 = vmax.f32 %v2824_v42, %v3022_v19  ;;  %v7368_v39 = vadd.f32 %v7067_v43, %v1163_v9  ;;  %v7371_v11 = vadd.f32 %v7067_v43, %v1164_v17  ;;  %v9197_v19 = vld [vmem:[#allocation10_spill] sm:$0xff]  ;;  %v9200_v42 = vld [vmem:[#allocation13_spill] sm:$0xff]  ;;  %v3404_v17 = vpop.permute.xlu1 %3403 }
 0x2c7   :  { %v2105_v31 = vsel %vm2088_vm9, %v9195_v20, %v2104_v1  ;;  %v1705_v5 = vadd.f32 %v9197_v19, %v1323_v35  ;;  %v9198_v10 = vrot.slane %v7257_v6, 3  ;;  %v7379_v28 = vadd.f32 %v9192_v15, %v1323_v35  ;;  %v9201_v35 = vld [vmem:[#allocation60_spill] sm:$0xff] }
 0x2c8   :  { %v3951_v63 = vmax.f32 %v3709_v59, %v3903_v44  ;;  %v2241_v57 = vadd.f32 %v2105_v31, %v9197_v19  ;;  %v1111_v12 = vmul.f32 %v6183_v24, %v9199_v47  ;;  %v1324_v25 = vrot.slane %v7368_v39, 1 }
 0x2c9   :  { %v2347_v2 = vsel %vm2330_vm10, %v9198_v10, %v2346_v29  ;;  %v8807_v46 = vrot.slane %v7368_v39, 2  ;;  %v8806_v44 = vrot.slane %v7368_v39, 3  ;;  %v2885_v14 = vrot.slane %v7368_v39, 7 }
 0x2ca   :  { %v4099_v58 = vmax.f32 %v3951_v63, %v4050_v52  ;;  %v8804_v26 = vrot.slane %v7371_v11, 7  ;;  %v3232_v6 = vrot.slane %v7368_v39, 5  ;;  %v8805_v32 = vrot.slane %v7371_v11, 5  ;;  %v9202_v63 = vld [vmem:[#allocation132_spill] sm:$0xff] }
 0x2cb   :  { %v1325_v34 = vsel %vm1306_vm8, %v1322_v41, %v1324_v25  ;;  %v2107_v22 = vsel %vm2088_vm9, %v2104_v1, %v8807_v46  ;;  %v2349_v7 = vsel %vm2330_vm10, %v2346_v29, %v8806_v44  ;;  %v3769_v49 = vrot.slane %v7368_v39, 6 }
 0x2cc   :  { %4148 = vst.msk [vmem:[%s8524_s8 + $0x28] sm:$0xff] %vm789_vm6, %v4099_v58  ;;  %v1706_v52 = vadd.f32 %v9200_v42, %v1325_v34  ;;  %v2242_v59 = vadd.f32 %v2107_v22, %v9200_v42  ;;  %v2484_v9 = vadd.f32 %v2349_v7, %v9200_v42  ;;  %v2888_v41 = vsel %vm2867_vm11, %v2885_v14, %v8804_v26  ;;  %v9203_v42 = vld [vmem:[#allocation61_spill] sm:$0xff] }
 0x2cd   :  { %v3025_v20 = vadd.f32 %v2888_v41, %v9201_v35  ;;  %v3126_v1 = vadd.f32 %v9183_v61, %v1325_v34  ;;  %v3235_v29 = vsel %vm3216_vm12, %v3232_v6, %v8805_v32  ;;  %v8808_v31 = vrot.slane %v7371_v11, 6 }
 0x2ce   :  { %v2000_v51 = vadd.f32 %v9201_v35, %v1706_v52  ;;  %v2778_v10 = vadd.f32 %v9202_v63, %v2484_v9  ;;  %v3614_v47 = vadd.f32 %v3404_v17, %v3235_v29  ;;  %v4005_v58 = vadd.f32 %v3404_v17, %v2888_v41  ;;  %v9204_v41 = vld [vmem:[#allocation129_spill] sm:$0xff] }
 0x2cf   :  { %v3175_v22 = vmax.f32 %v7338_v18, %v3126_v1  ;;  %v3772_v7 = vsel %vm3753_vm13, %v3769_v49, %v8808_v31  ;;  %v1999_v34 = vadd.f32 %v9203_v42, %v1705_v5  ;;  %v2483_v26 = vadd.f32 %v2347_v2, %v9197_v19  ;;  %v3399_v2 = vpop.permute.xlu0 %3398 }
 0x2d0   :  { %v2049_v32 = vmax.f32 %v7371_v11, %v2000_v51  ;;  %v3663_v44 = vadd.f32 %v3614_v47, %v9182_v13  ;;  %v3906_v46 = vadd.f32 %v3772_v7, %v3404_v17  ;;  %v4053_v52 = vadd.f32 %v4005_v58, %v9183_v61 }
 0x2d1   :  { %v2048_v9 = vmax.f32 %v7368_v39, %v1999_v34  ;;  %v2777_v29 = vadd.f32 %v9204_v41, %v2483_v26  ;;  %v9205_v18 = vrot.slane %v7264_v3, 7  ;;  %v3174_v5 = vmax.f32 %v7357_v56, %v7379_v28 }
 0x2d2   :  { %v2291_v31 = vmax.f32 %v2049_v32, %v2242_v59  ;;  %v3712_v19 = vmax.f32 %v3175_v22, %v3663_v44  ;;  %v9206_v13 = vrot.slane %v7264_v3, 5  ;;  %v9207_v26 = vrot.slane %v7264_v3, 6 }
 0x2d3   :  { %v2886_v1 = vsel %vm2867_vm11, %v9205_v18, %v2885_v14  ;;  %v2290_v17 = vmax.f32 %v2048_v9, %v2241_v57  ;;  %v1165_v56 = vmul.f32 %v7054_v54, %v1110_v60  ;;  %v1166_v59 = vmul.f32 %v7054_v54, %v1111_v12 }
 0x2d4   :  { %v3024_v51 = vadd.f32 %v2886_v1, %v9203_v42  ;;  %v3233_v61 = vsel %vm3216_vm12, %v9206_v13, %v3232_v6  ;;  %v3770_v58 = vsel %vm3753_vm13, %v9207_v26, %v3769_v49  ;;  %v4004_v7 = vadd.f32 %v3399_v2, %v2886_v1  ;;  %v9208_v13 = vld [vmem:[#allocation15_spill] sm:$0xff]  ;;  %v3414_v26 = vpop.permute.xlu1 %3413 }
 0x2d5   :  { %v3613_v47 = vadd.f32 %v3399_v2, %v3233_v61  ;;  %v2827_v14 = vmax.f32 %v2291_v31, %v2778_v10  ;;  %v3954_v34 = vmax.f32 %v3712_v19, %v3906_v46  ;;  %v3905_v18 = vadd.f32 %v3770_v58, %v3399_v2 }
 0x2d6   :  { %v2826_v28 = vmax.f32 %v2290_v17, %v2777_v29  ;;  %v4052_v32 = vadd.f32 %v4004_v7, %v9192_v15  ;;  %v7446_v22 = vadd.f32 %v7067_v43, %v1165_v56  ;;  %v1326_v3 = vrot.slane %v7371_v11, 1 }
 0x2d7   :  { %v3662_v44 = vadd.f32 %v3613_v47, %v9187_v45  ;;  %v3074_v6 = vmax.f32 %v2827_v14, %v3025_v20  ;;  %v4102_v57 = vmax.f32 %v3954_v34, %v4053_v52  ;;  %v7452_v31 = vadd.f32 %v7067_v43, %v1166_v59 }
 0x2d8   :  { %v7449_v49 = vmax.f32 %v2826_v28, %v3024_v51  ;;  %v2108_v60 = vrot.slane %v7371_v11, 2  ;;  %v1328_v45 = vrot.slane %v7446_v22, 1  ;;  %v2110_v15 = vrot.slane %v7446_v22, 2  ;;  %v9210_v28 = vld [vmem:[#allocation134_spill] sm:$0xff] }
 0x2d9   :  { %v3711_v46 = vmax.f32 %v3174_v5, %v3662_v44  ;;  %4151 = vst.msk [vmem:[%s8524_s8 + $0x40] sm:$0xff] %vm789_vm6, %v4102_v57  ;;  %v2350_v12 = vrot.slane %v7371_v11, 3  ;;  %v2352_v20 = vrot.slane %v7446_v22, 3  ;;  %v2889_v52 = vrot.slane %v7446_v22, 7 }
 0x2da   :  { %v8810_v9 = vrot.slane %v7452_v31, 7  ;;  %v3236_v29 = vrot.slane %v7446_v22, 5  ;;  %v1329_v1 = vsel %vm1306_vm8, %v1326_v3, %v1328_v45  ;;  %v2111_v5 = vsel %vm2088_vm9, %v2108_v60, %v2110_v15 }
 0x2db   :  { %v3953_v10 = vmax.f32 %v3711_v46, %v3905_v18  ;;  %v2353_v19 = vsel %vm2330_vm10, %v2350_v12, %v2352_v20  ;;  %v8809_v2 = vrot.slane %v7452_v31, 5  ;;  %v1708_v61 = vadd.f32 %v9208_v13, %v1329_v1  ;;  %v9209_v18 = vld [vmem:[#allocation62_spill] sm:$0xff] }
 0x2dc   :  { %v2244_v17 = vadd.f32 %v2111_v5, %v9208_v13  ;;  %v2486_v47 = vadd.f32 %v2353_v19, %v9208_v13  ;;  %v2892_v58 = vsel %vm2867_vm11, %v2889_v52, %v8810_v9  ;;  %v3128_v7 = vadd.f32 %v9202_v63, %v1329_v1 }
 0x2dd   :  { %v4101_v51 = vmax.f32 %v3953_v10, %v4052_v32  ;;  %v3239_v14 = vsel %vm3216_vm12, %v3236_v29, %v8809_v2  ;;  %v3773_v34 = vrot.slane %v7446_v22, 6  ;;  %v2002_v56 = vadd.f32 %v9209_v18, %v1708_v61 }
 0x2de   :  { %v2780_v44 = vadd.f32 %v9210_v28, %v2486_v47  ;;  %v3027_v32 = vadd.f32 %v2892_v58, %v9209_v18  ;;  %v3616_v59 = vadd.f32 %v3414_v26, %v3239_v14  ;;  %v3177_v57 = vmax.f32 %v3074_v6, %v3128_v7 }
 0x2df   :  { %4150 = vst.msk [vmem:[%s8524_s8 + $0x38] sm:$0xff] %vm789_vm6, %v4101_v51  ;;  %v8811_v46 = vrot.slane %v7452_v31, 6  ;;  %v4007_v10 = vadd.f32 %v3414_v26, %v2892_v58  ;;  %v1327_v1 = vsel %vm1306_vm8, %v1324_v25, %v1326_v3  ;;  %v2051_v5 = vmax.f32 %v7452_v31, %v2002_v56  ;;  %v9211_v51 = vld [vmem:[#allocation12_spill] sm:$0xff] }
 0x2e0   :  { %v3665_v19 = vadd.f32 %v3616_v59, %v9201_v35  ;;  %v1707_v13 = vadd.f32 %v9211_v51, %v1327_v1  ;;  %v9212_v61 = vrot.slane %v7368_v39, 2  ;;  %v9213_v25 = vrot.slane %v7368_v39, 3  ;;  %v9214_v59 = vld [vmem:[#allocation63_spill] sm:$0xff] }
 0x2e1   :  { %v3776_v6 = vsel %vm3753_vm13, %v3773_v34, %v8811_v46  ;;  %v4055_v58 = vadd.f32 %v4007_v10, %v9202_v63  ;;  %v2293_v14 = vmax.f32 %v2051_v5, %v2244_v17  ;;  %v3127_v46 = vadd.f32 %v9204_v41, %v1327_v1 }
 0x2e2   :  { %v2109_v47 = vsel %vm2088_vm9, %v9212_v61, %v2108_v60  ;;  %v2351_v3 = vsel %vm2330_vm10, %v9213_v25, %v2350_v12  ;;  %v3714_v35 = vmax.f32 %v3177_v57, %v3665_v19  ;;  %v3908_v56 = vadd.f32 %v3776_v6, %v3414_v26  ;;  %v3409_v12 = vpop.permute.xlu0 %3408  ;;  %v9217_v57 = vld [vmem:[#allocation131_spill] sm:$0xff] }
 0x2e3   :  { %v2243_v7 = vadd.f32 %v2109_v47, %v9211_v51  ;;  %v2001_v2 = vadd.f32 %v9214_v59, %v1707_v13  ;;  %v2485_v9 = vadd.f32 %v2351_v3, %v9211_v51  ;;  %v9215_v60 = vrot.slane %v7371_v11, 7 }
 0x2e4   :  { %v9216_v63 = vrot.slane %v7371_v11, 5  ;;  %v2829_v39 = vmax.f32 %v2293_v14, %v2780_v44  ;;  %v3956_v47 = vmax.f32 %v3714_v35, %v3908_v56  ;;  %v3176_v19 = vmax.f32 %v7449_v49, %v3127_v46  ;;  %v9220_v35 = vld [vmem:[#allocation113_spill] sm:$0xff] }
 0x2e5   :  { %v2890_v61 = vsel %vm2867_vm11, %v9215_v60, %v2889_v52  ;;  %v2050_v17 = vmax.f32 %v7446_v22, %v2001_v2  ;;  %v2779_v5 = vadd.f32 %v9217_v57, %v2485_v9  ;;  %v9218_v52 = vrot.slane %v7371_v11, 6  ;;  %v9219_v2 = vld [vmem:[#allocation112_spill] sm:$0xff] }
 0x2e6   :  { %v3237_v10 = vsel %vm3216_vm12, %v9216_v63, %v3236_v29  ;;  %v3026_v26 = vadd.f32 %v2890_v61, %v9214_v59  ;;  %v7528_v13 = vmax.f32 %v2829_v39, %v3027_v32  ;;  %v4104_v6 = vmax.f32 %v3956_v47, %v4055_v58  ;;  %v9221_v47 = vld [vmem:[#allocation14_spill] sm:$0xff] }
 0x2e7   :  { %v3615_v51 = vadd.f32 %v3409_v12, %v3237_v10  ;;  %v3774_v1 = vsel %vm3753_vm13, %v9218_v52, %v3773_v34  ;;  %v2292_v29 = vmax.f32 %v2050_v17, %v2243_v7  ;;  %v4006_v3 = vadd.f32 %v3409_v12, %v2890_v61 }
 0x2e8   :  { %v3907_v44 = vadd.f32 %v3774_v1, %v3409_v12  ;;  %v1112_v14 = vmul.f32 %v6183_v24, %v9219_v2  ;;  %v1113_v9 = vmul.f32 %v6183_v24, %v9220_v35  ;;  %4153 = vst.msk [vmem:[%s8524_s8 + $0x50] sm:$0xff] %vm789_vm6, %v4104_v6  ;;  %v1330_v49 = vrot.slane %v7452_v31, 1 }
 0x2e9   :  { %v3664_v25 = vadd.f32 %v3615_v51, %v9203_v42  ;;  %v2828_v11 = vmax.f32 %v2292_v29, %v2779_v5  ;;  %v2112_v34 = vrot.slane %v7452_v31, 2  ;;  %v2354_v32 = vrot.slane %v7452_v31, 3 }
 0x2ea   :  { %v4054_v46 = vadd.f32 %v4006_v3, %v9204_v41  ;;  %v1167_v58 = vmul.f32 %v7054_v54, %v1112_v14  ;;  %v1168_v7 = vmul.f32 %v7054_v54, %v1113_v9  ;;  %v1331_v60 = vsel %vm1306_vm8, %v1328_v45, %v1330_v49  ;;  %v9223_v14 = vld [vmem:[#allocation17_spill] sm:$0xff] }
 0x2eb   :  { %v3713_v42 = vmax.f32 %v3176_v19, %v3664_v25  ;;  %v7545_v56 = vmax.f32 %v2828_v11, %v3026_v26  ;;  %v2113_v61 = vsel %vm2088_vm9, %v2110_v15, %v2112_v34  ;;  %v2355_v63 = vsel %vm2330_vm10, %v2352_v20, %v2354_v32  ;;  %v9222_v15 = vld [vmem:[#allocation114_spill] sm:$0xff] }
 0x2ec   :  { %v7557_v41 = vadd.f32 %v7067_v43, %v1167_v58  ;;  %v7560_v39 = vadd.f32 %v7067_v43, %v1168_v7  ;;  %v1709_v12 = vadd.f32 %v9221_v47, %v1331_v60  ;;  %v2245_v17 = vadd.f32 %v2113_v61, %v9221_v47  ;;  %v9225_v61 = vld [vmem:[#allocation136_spill] sm:$0xff] }
 0x2ed   :  { %v3955_v10 = vmax.f32 %v3713_v42, %v3907_v44  ;;  %v2487_v45 = vadd.f32 %v2355_v63, %v9221_v47  ;;  %v3129_v26 = vadd.f32 %v9217_v57, %v1331_v60  ;;  %v1114_v22 = vmul.f32 %v6183_v24, %v9222_v15  ;;  %v3424_v42 = vpop.permute.xlu1 %3423 }
 0x2ee   :  { %v1332_v20 = vrot.slane %v7557_v41, 1  ;;  %v8816_v19 = vrot.slane %v7557_v41, 2  ;;  %v8814_v51 = vrot.slane %v7557_v41, 3  ;;  %v2893_v52 = vrot.slane %v7557_v41, 7 }
 0x2ef   :  { %v4103_v5 = vmax.f32 %v3955_v10, %v4054_v46  ;;  %v8813_v1 = vrot.slane %v7560_v39, 7  ;;  %v3240_v6 = vrot.slane %v7557_v41, 5  ;;  %v8812_v29 = vrot.slane %v7560_v39, 5  ;;  %v9224_v46 = vld [vmem:[#allocation64_spill] sm:$0xff] }
 0x2f0   :  { %v1333_v44 = vsel %vm1306_vm8, %v1330_v49, %v1332_v20  ;;  %v2115_v25 = vsel %vm2088_vm9, %v2112_v34, %v8816_v19  ;;  %v2357_v3 = vsel %vm2330_vm10, %v2354_v32, %v8814_v51  ;;  %v3777_v2 = vrot.slane %v7557_v41, 6 }
 0x2f1   :  { %4152 = vst.msk [vmem:[%s8524_s8 + $0x48] sm:$0xff] %vm789_vm6, %v4103_v5  ;;  %v1710_v35 = vadd.f32 %v9223_v14, %v1333_v44  ;;  %v2246_v9 = vadd.f32 %v2115_v25, %v9223_v14  ;;  %v2488_v11 = vadd.f32 %v2357_v3, %v9223_v14  ;;  %v2896_v49 = vsel %vm2867_vm11, %v2893_v52, %v8813_v1  ;;  %v9226_v25 = vld [vmem:[#allocation65_spill] sm:$0xff] }
 0x2f2   :  { %v3029_v58 = vadd.f32 %v2896_v49, %v9224_v46  ;;  %v3130_v34 = vadd.f32 %v9210_v28, %v1333_v44  ;;  %v3243_v32 = vsel %vm3216_vm12, %v3240_v6, %v8812_v29  ;;  %v8815_v7 = vrot.slane %v7560_v39, 6  ;;  %v9227_v3 = vld [vmem:[#allocation133_spill] sm:$0xff] }
 0x2f3   :  { %v2004_v60 = vadd.f32 %v9224_v46, %v1710_v35  ;;  %v2782_v63 = vadd.f32 %v9225_v61, %v2488_v11  ;;  %v3618_v10 = vadd.f32 %v3424_v42, %v3243_v32  ;;  %v4009_v47 = vadd.f32 %v3424_v42, %v2896_v49  ;;  %v3419_v11 = vpop.permute.xlu0 %3418 }
 0x2f4   :  { %v3179_v15 = vmax.f32 %v7528_v13, %v3130_v34  ;;  %v3780_v5 = vsel %vm3753_vm13, %v3777_v2, %v8815_v7  ;;  %v2003_v44 = vadd.f32 %v9226_v25, %v1709_v12  ;;  %v2781_v14 = vadd.f32 %v9227_v3, %v2487_v45 }
 0x2f5   :  { %v2053_v29 = vmax.f32 %v7560_v39, %v2004_v60  ;;  %v3667_v1 = vadd.f32 %v3618_v10, %v9209_v18  ;;  %v3910_v51 = vadd.f32 %v3780_v5, %v3424_v42  ;;  %v4057_v35 = vadd.f32 %v4009_v47, %v9210_v28 }
 0x2f6   :  { %v2052_v49 = vmax.f32 %v7557_v41, %v2003_v44  ;;  %v9228_v13 = vrot.slane %v7452_v31, 7  ;;  %v3178_v32 = vmax.f32 %v7545_v56, %v3129_v26  ;;  %v9229_v12 = vrot.slane %v7452_v31, 5  ;;  %v9231_v44 = vld [vmem:[#allocation115_spill] sm:$0xff] }
 0x2f7   :  { %v2295_v7 = vmax.f32 %v2053_v29, %v2246_v9  ;;  %v3716_v60 = vmax.f32 %v3179_v15, %v3667_v1  ;;  %v9230_v28 = vrot.slane %v7452_v31, 6  ;;  %v1169_v29 = vmul.f32 %v7054_v54, %v1114_v22 }
 0x2f8   :  { %v2894_v34 = vsel %vm2867_vm11, %v9228_v13, %v2893_v52  ;;  %v3241_v45 = vsel %vm3216_vm12, %v9229_v12, %v3240_v6  ;;  %v2294_v10 = vmax.f32 %v2052_v49, %v2245_v17  ;;  %v1115_v52 = vmul.f32 %v6183_v24, %v9231_v44  ;;  %v3434_v44 = vpop.permute.xlu1 %3433 }
 0x2f9   :  { %v3028_v18 = vadd.f32 %v2894_v34, %v9226_v25  ;;  %v3617_v42 = vadd.f32 %v3419_v11, %v3241_v45  ;;  %v3778_v47 = vsel %vm3753_vm13, %v9230_v28, %v3777_v2  ;;  %v4008_v5 = vadd.f32 %v3419_v11, %v2894_v34 }
 0x2fa   :  { %v2831_v13 = vmax.f32 %v2295_v7, %v2782_v63  ;;  %v3958_v56 = vmax.f32 %v3716_v60, %v3910_v51  ;;  %v3909_v19 = vadd.f32 %v3778_v47, %v3419_v11  ;;  %v2830_v6 = vmax.f32 %v2294_v10, %v2781_v14 }
 0x2fb   :  { %v3666_v26 = vadd.f32 %v3617_v42, %v9214_v59  ;;  %v4056_v1 = vadd.f32 %v4008_v5, %v9217_v57  ;;  %v1170_v17 = vmul.f32 %v7054_v54, %v1115_v52  ;;  %v1334_v2 = vrot.slane %v7560_v39, 1  ;;  %v9233_v42 = vld [vmem:[#allocation19_spill] sm:$0xff]  ;;  %v9234_v52 = vld [vmem:[#allocation66_spill] sm:$0xff] }
 0x2fc   :  { %v3078_v9 = vmax.f32 %v2831_v13, %v3029_v58  ;;  %v4106_v31 = vmax.f32 %v3958_v56, %v4057_v35  ;;  %v7631_v49 = vmax.f32 %v2830_v6, %v3028_v18  ;;  %v7634_v7 = vadd.f32 %v7067_v43, %v1169_v29  ;;  %v9232_v58 = vld [vmem:[#allocation116_spill] sm:$0xff]  ;;  %v9235_v29 = vld [vmem:[#allocation138_spill] sm:$0xff] }
 0x2fd   :  { %v3715_v15 = vmax.f32 %v3178_v32, %v3666_v26  ;;  %v7637_v59 = vadd.f32 %v7067_v43, %v1170_v17  ;;  %v2116_v51 = vrot.slane %v7560_v39, 2  ;;  %v2358_v57 = vrot.slane %v7560_v39, 3 }
 0x2fe   :  { %4155 = vst.msk [vmem:[%s8524_s8 + $0x60] sm:$0xff] %vm789_vm6, %v4106_v31  ;;  %v1335_v22 = vsel %vm1306_vm8, %v1332_v20, %v1334_v2  ;;  %v7650_v63 = vmul.f32 %v6183_v24, %v9232_v58  ;;  %v1336_v43 = vrot.slane %v7634_v7, 1  ;;  %v2118_v14 = vrot.slane %v7634_v7, 2  ;;  %v9236_v58 = vld [vmem:[#allocation16_spill] sm:$0xff] }
 0x2ff   :  { %v3957_v54 = vmax.f32 %v3715_v15, %v3909_v19  ;;  %v2360_v35 = vrot.slane %v7634_v7, 3  ;;  %v2897_v11 = vrot.slane %v7634_v7, 7  ;;  %v8819_v19 = vrot.slane %v7637_v59, 7 }
 0x300   :  { %v3244_v32 = vrot.slane %v7634_v7, 5  ;;  %v8818_v12 = vrot.slane %v7637_v59, 5  ;;  %v1337_v20 = vsel %vm1306_vm8, %v1334_v2, %v1336_v43  ;;  %v2119_v45 = vsel %vm2088_vm9, %v2116_v51, %v2118_v14 }
 0x301   :  { %v4105_v34 = vmax.f32 %v3957_v54, %v4056_v1  ;;  %v2361_v60 = vsel %vm2330_vm10, %v2358_v57, %v2360_v35  ;;  %v3781_v18 = vrot.slane %v7634_v7, 6  ;;  %v1712_v10 = vadd.f32 %v9233_v42, %v1337_v20 }
 0x302   :  { %v2248_v28 = vadd.f32 %v2119_v45, %v9233_v42  ;;  %v2490_v47 = vadd.f32 %v2361_v60, %v9233_v42  ;;  %v2900_v5 = vsel %vm2867_vm11, %v2897_v11, %v8819_v19  ;;  %v3132_v56 = vadd.f32 %v9225_v61, %v1337_v20 }
 0x303   :  { %4154 = vst.msk [vmem:[%s8524_s8 + $0x58] sm:$0xff] %vm789_vm6, %v4105_v34  ;;  %v3031_v13 = vadd.f32 %v2900_v5, %v9234_v52  ;;  %v3247_v26 = vsel %vm3216_vm12, %v3244_v32, %v8818_v12  ;;  %v8817_v6 = vrot.slane %v7637_v59, 6  ;;  %v2006_v1 = vadd.f32 %v9234_v52, %v1712_v10 }
 0x304   :  { %v2784_v17 = vadd.f32 %v9235_v29, %v2490_v47  ;;  %v3620_v31 = vadd.f32 %v3434_v44, %v3247_v26  ;;  %v4011_v15 = vadd.f32 %v3434_v44, %v2900_v5  ;;  %v3181_v2 = vmax.f32 %v3078_v9, %v3132_v56  ;;  %v9238_v26 = vld [vmem:[#allocation67_spill] sm:$0xff] }
 0x305   :  { %v3784_v54 = vsel %vm3753_vm13, %v3781_v18, %v8817_v6  ;;  %v1711_v34 = vadd.f32 %v9236_v58, %v1335_v22  ;;  %v9237_v20 = vrot.slane %v7557_v41, 2  ;;  %v2055_v60 = vmax.f32 %v7637_v59, %v2006_v1 }
 0x306   :  { %v3669_v42 = vadd.f32 %v3620_v31, %v9224_v46  ;;  %v3912_v10 = vadd.f32 %v3784_v54, %v3434_v44  ;;  %v4059_v47 = vadd.f32 %v4011_v15, %v9225_v61  ;;  %v9239_v56 = vrot.slane %v7557_v41, 3  ;;  %v3429_v44 = vpop.permute.xlu0 %3428 }
 0x307   :  { %v2117_v45 = vsel %vm2088_vm9, %v9237_v20, %v2116_v51  ;;  %v2005_v5 = vadd.f32 %v9238_v26, %v1711_v34  ;;  %v9240_v12 = vrot.slane %v7560_v39, 7  ;;  %v2297_v51 = vmax.f32 %v2055_v60, %v2248_v28  ;;  %v9243_v28 = vld [vmem:[#allocation135_spill] sm:$0xff] }
 0x308   :  { %v2247_v9 = vadd.f32 %v2117_v45, %v9236_v58  ;;  %v2359_v6 = vsel %vm2330_vm10, %v9239_v56, %v2358_v57  ;;  %v3718_v20 = vmax.f32 %v3181_v2, %v3669_v42  ;;  %v3131_v31 = vadd.f32 %v9227_v3, %v1335_v22 }
 0x309   :  { %v2898_v19 = vsel %vm2867_vm11, %v9240_v12, %v2897_v11  ;;  %v2489_v1 = vadd.f32 %v2359_v6, %v9236_v58  ;;  %v2054_v61 = vmax.f32 %v7634_v7, %v2005_v5  ;;  %v9241_v15 = vrot.slane %v7560_v39, 5 }
 0x30a   :  { %v3030_v46 = vadd.f32 %v2898_v19, %v9238_v26  ;;  %v9242_v57 = vrot.slane %v7560_v39, 6  ;;  %v2833_v11 = vmax.f32 %v2297_v51, %v2784_v17  ;;  %v3960_v12 = vmax.f32 %v3718_v20, %v3912_v10  ;;  %v7726_v17 = vld [vmem:[%s8522_s2] ss:$0 sm:$0xff] }
 0x30b   :  { %v3245_v41 = vsel %vm3216_vm12, %v9241_v15, %v3244_v32  ;;  %v2783_v2 = vadd.f32 %v9243_v28, %v2489_v1  ;;  %v2296_v58 = vmax.f32 %v2054_v61, %v2247_v9  ;;  %v3180_v34 = vmax.f32 %v7631_v49, %v3131_v31  ;;  %v9244_v32 = vld [vmem:[#allocation117_spill] sm:$0xff]  ;;  %v9245_v20 = vld [vmem:[#allocation118_spill] sm:$0xff] }
 0x30c   :  { %v3782_v54 = vsel %vm3753_vm13, %v9242_v57, %v3781_v18  ;;  %v3619_v6 = vadd.f32 %v3429_v44, %v3245_v41  ;;  %v4010_v60 = vadd.f32 %v3429_v44, %v2898_v19  ;;  %v7717_v42 = vmax.f32 %v2833_v11, %v3031_v13 }
 0x30d   :  { %v3911_v45 = vadd.f32 %v3782_v54, %v3429_v44  ;;  %v4108_v22 = vmax.f32 %v3960_v12, %v4059_v47  ;;  %v1117_v39 = vmul.f32 %v6183_v24, %v9244_v32  ;;  %v2832_v56 = vmax.f32 %v2296_v58, %v2783_v2 }
 0x30e   :  { %v3668_v5 = vadd.f32 %v3619_v6, %v9226_v25  ;;  %v4058_v18 = vadd.f32 %v4010_v60, %v9227_v3  ;;  %v1171_v49 = vmul.f32 %v7726_v17, %v7650_v63  ;;  %v1338_v19 = vrot.slane %v7637_v59, 1  ;;  %v7743_v63 = vld [vmem:[%s8523_s3] ss:$0 sm:$0xff]  ;;  %v9247_v60 = vld [vmem:[#allocation21_spill] sm:$0xff] }
 0x30f   :  { %4157 = vst.msk [vmem:[%s8524_s8 + $0x70] sm:$0xff] %vm789_vm6, %v4108_v22  ;;  %v1172_v13 = vmul.f32 %v7726_v17, %v1117_v39  ;;  %v2120_v3 = vrot.slane %v7637_v59, 2  ;;  %v2362_v10 = vrot.slane %v7637_v59, 3  ;;  %v7738_v47 = vmax.f32 %v2832_v56, %v3030_v46  ;;  %v9246_v46 = vld [vmem:[#allocation18_spill] sm:$0xff]  ;;  %v3444_v56 = vpop.permute.xlu1 %3443 }
 0x310   :  { %v3717_v25 = vmax.f32 %v3180_v34, %v3668_v5  ;;  %v7746_v9 = vadd.f32 %v7743_v63, %v1171_v49  ;;  %v1339_v51 = vsel %vm1306_vm8, %v1336_v43, %v1338_v19  ;;  %v1118_v1 = vmul.f32 %v6183_v24, %v9245_v20  ;;  %v9249_v20 = vld [vmem:[#allocation141_spill] sm:$0xff] }
 0x311   :  { %v7754_v61 = vadd.f32 %v7743_v63, %v1172_v13  ;;  %v1713_v31 = vadd.f32 %v9246_v46, %v1339_v51  ;;  %v2121_v15 = vsel %vm2088_vm9, %v2118_v14, %v2120_v3  ;;  %v9252_v7 = vrot.slane %v7637_v59, 5 }
 0x312   :  { %v3959_v44 = vmax.f32 %v3717_v25, %v3911_v45  ;;  %v8824_v41 = vrot.slane %v7746_v9, 1  ;;  %v8823_v57 = vrot.slane %v7746_v9, 2  ;;  %v8821_v54 = vrot.slane %v7746_v9, 3 }
 0x313   :  { %v2901_v43 = vrot.slane %v7746_v9, 7  ;;  %v8820_v12 = vrot.slane %v7754_v61, 7  ;;  %v3248_v2 = vrot.slane %v7746_v9, 5  ;;  %v8822_v6 = vrot.slane %v7754_v61, 5 }
 0x314   :  { %v4107_v11 = vmax.f32 %v3959_v44, %v4058_v18  ;;  %v1341_v58 = vsel %vm1306_vm8, %v1338_v19, %v8824_v41  ;;  %v2123_v14 = vsel %vm2088_vm9, %v2120_v3, %v8823_v57  ;;  %v2365_v34 = vsel %vm2330_vm10, %v2362_v10, %v8821_v54  ;;  %v9248_v18 = vld [vmem:[#allocation68_spill] sm:$0xff] }
 0x315   :  { %v3785_v45 = vrot.slane %v7746_v9, 6  ;;  %v1714_v22 = vadd.f32 %v9247_v60, %v1341_v58  ;;  %v2250_v5 = vadd.f32 %v2123_v14, %v9247_v60  ;;  %v2492_v32 = vadd.f32 %v2365_v34, %v9247_v60 }
 0x316   :  { %4156 = vst.msk [vmem:[%s8524_s8 + $0x68] sm:$0xff] %vm789_vm6, %v4107_v11  ;;  %v2904_v39 = vsel %vm2867_vm11, %v2901_v43, %v8820_v12  ;;  %v3134_v19 = vadd.f32 %v9235_v29, %v1341_v58  ;;  %v3251_v25 = vsel %vm3216_vm12, %v3248_v2, %v8822_v6  ;;  %v3787_v13 = vrot.slane %v7754_v61, 6  ;;  %v9250_v12 = vld [vmem:[#allocation69_spill] sm:$0xff] }
 0x317   :  { %v3033_v49 = vadd.f32 %v2904_v39, %v9248_v18  ;;  %v2008_v3 = vadd.f32 %v9248_v18, %v1714_v22  ;;  %v2786_v44 = vadd.f32 %v9249_v20, %v2492_v32  ;;  %v3622_v11 = vadd.f32 %v3444_v56, %v3251_v25 }
 0x318   :  { %v4013_v14 = vadd.f32 %v3444_v56, %v2904_v39  ;;  %v3183_v34 = vmax.f32 %v7717_v42, %v3134_v19  ;;  %v3788_v60 = vsel %vm3753_vm13, %v3785_v45, %v3787_v13  ;;  %v2007_v58 = vadd.f32 %v9250_v12, %v1713_v31 }
 0x319   :  { %v2249_v54 = vadd.f32 %v2121_v15, %v9246_v46  ;;  %v2057_v6 = vmax.f32 %v7754_v61, %v2008_v3  ;;  %v3671_v57 = vadd.f32 %v3622_v11, %v9234_v52  ;;  %v3914_v41 = vadd.f32 %v3788_v60, %v3444_v56  ;;  %v3439_v56 = vpop.permute.xlu0 %3438  ;;  %v9255_v60 = vld [vmem:[#allocation119_spill] sm:$0xff] }
 0x31a   :  { %v4061_v22 = vadd.f32 %v4013_v14, %v9235_v29  ;;  %v2056_v32 = vmax.f32 %v7746_v9, %v2007_v58  ;;  %v2363_v42 = vsel %vm2330_vm10, %v2360_v35, %v2362_v10  ;;  %v9251_v39 = vrot.slane %v7637_v59, 7 }
 0x31b   :  { %v3133_v31 = vadd.f32 %v9243_v28, %v1339_v51  ;;  %v2299_v15 = vmax.f32 %v2057_v6, %v2250_v5  ;;  %v3720_v25 = vmax.f32 %v3183_v34, %v3671_v57  ;;  %v2491_v3 = vadd.f32 %v2363_v42, %v9246_v46  ;;  %v9254_v6 = vld [vmem:[#allocation137_spill] sm:$0xff] }
 0x31c   :  { %v2902_v19 = vsel %vm2867_vm11, %v9251_v39, %v2901_v43  ;;  %v2298_v29 = vmax.f32 %v2056_v32, %v2249_v54  ;;  %v3249_v35 = vsel %vm3216_vm12, %v9252_v7, %v3248_v2  ;;  %v9253_v10 = vrot.slane %v7637_v59, 6 }
 0x31d   :  { %v3032_v52 = vadd.f32 %v2902_v19, %v9250_v12  ;;  %v3182_v11 = vmax.f32 %v7738_v47, %v3133_v31  ;;  %v2835_v14 = vmax.f32 %v2299_v15, %v2786_v44  ;;  %v3962_v51 = vmax.f32 %v3720_v25, %v3914_v41 }
 0x31e   :  { %v3786_v43 = vsel %vm3753_vm13, %v9253_v10, %v3785_v45  ;;  %v2785_v57 = vadd.f32 %v9254_v6, %v2491_v3  ;;  %v3621_v5 = vadd.f32 %v3439_v56, %v3249_v35  ;;  %v4012_v34 = vadd.f32 %v3439_v56, %v2902_v19  ;;  %v9256_v10 = vld [vmem:[#allocation23_spill] sm:$0xff] }
 0x31f   :  { %v3913_v46 = vadd.f32 %v3786_v43, %v3439_v56  ;;  %v1119_v54 = vmul.f32 %v6183_v24, %v9255_v60  ;;  %v1173_v47 = vmul.f32 %v7726_v17, %v1118_v1  ;;  %v3082_v58 = vmax.f32 %v2835_v14, %v3033_v49 }
 0x320   :  { %v4110_v32 = vmax.f32 %v3962_v51, %v4061_v22  ;;  %v2834_v42 = vmax.f32 %v2298_v29, %v2785_v57  ;;  %v3670_v2 = vadd.f32 %v3621_v5, %v9238_v26  ;;  %v4060_v59 = vadd.f32 %v4012_v34, %v9243_v28  ;;  %v3454_v57 = vpop.permute.xlu1 %3453 }
 0x321   :  { %v1174_v45 = vmul.f32 %v7726_v17, %v1119_v54  ;;  %v7829_v41 = vadd.f32 %v7743_v63, %v1173_v47  ;;  %v1342_v44 = vrot.slane %v7754_v61, 1  ;;  %v2124_v22 = vrot.slane %v7754_v61, 2  ;;  %v9257_v54 = vld [vmem:[#allocation70_spill] sm:$0xff] }
 0x322   :  { %4159 = vst.msk [vmem:[%s8524_s8 + $0x80] sm:$0xff] %vm789_vm6, %v4110_v32  ;;  %v7836_v1 = vmax.f32 %v2834_v42, %v3032_v52  ;;  %v3719_v49 = vmax.f32 %v3182_v11, %v3670_v2  ;;  %v2366_v26 = vrot.slane %v7754_v61, 3  ;;  %v9258_v32 = vld [vmem:[#allocation149_spill] sm:$0xff] }
 0x323   :  { %v7841_v28 = vadd.f32 %v7743_v63, %v1174_v45  ;;  %v1344_v39 = vrot.slane %v7829_v41, 1  ;;  %v2126_v19 = vrot.slane %v7829_v41, 2  ;;  %v2368_v31 = vrot.slane %v7829_v41, 3 }
 0x324   :  { %v3961_v15 = vmax.f32 %v3719_v49, %v3913_v46  ;;  %v2905_v25 = vrot.slane %v7829_v41, 7  ;;  %v3252_v3 = vrot.slane %v7829_v41, 5  ;;  %v3789_v52 = vrot.slane %v7829_v41, 6 }
 0x325   :  { %v1345_v56 = vsel %vm1306_vm8, %v1342_v44, %v1344_v39  ;;  %v2127_v29 = vsel %vm2088_vm9, %v2124_v22, %v2126_v19  ;;  %v2369_v11 = vsel %vm2330_vm10, %v2366_v26, %v2368_v31  ;;  %v8827_v7 = vrot.slane %v7841_v28, 7 }
 0x326   :  { %v4109_v35 = vmax.f32 %v3961_v15, %v4060_v59  ;;  %v1716_v43 = vadd.f32 %v9256_v10, %v1345_v56  ;;  %v2252_v14 = vadd.f32 %v2127_v29, %v9256_v10  ;;  %v2494_v51 = vadd.f32 %v2369_v11, %v9256_v10 }
 0x327   :  { %v2908_v5 = vsel %vm2867_vm11, %v2905_v25, %v8827_v7  ;;  %v3136_v46 = vadd.f32 %v9249_v20, %v1345_v56  ;;  %v8825_v34 = vrot.slane %v7841_v28, 5  ;;  %v8826_v60 = vrot.slane %v7841_v28, 6 }
 0x328   :  { %4158 = vst.msk [vmem:[%s8524_s8 + $0x78] sm:$0xff] %vm789_vm6, %v4109_v35  ;;  %v2010_v47 = vadd.f32 %v9257_v54, %v1716_v43  ;;  %v2788_v42 = vadd.f32 %v9258_v32, %v2494_v51  ;;  %v3035_v2 = vadd.f32 %v2908_v5, %v9257_v54  ;;  %v4015_v59 = vadd.f32 %v3454_v57, %v2908_v5  ;;  %v9260_v51 = vld [vmem:[#allocation20_spill] sm:$0xff] }
 0x329   :  { %v3185_v45 = vmax.f32 %v3082_v58, %v3136_v46  ;;  %v3255_v49 = vsel %vm3216_vm12, %v3252_v3, %v8825_v34  ;;  %v3792_v15 = vsel %vm3753_vm13, %v3789_v52, %v8826_v60  ;;  %v9259_v56 = vrot.slane %v7746_v9, 1 }
 0x32a   :  { %v2059_v11 = vmax.f32 %v7841_v28, %v2010_v47  ;;  %v3624_v35 = vadd.f32 %v3454_v57, %v3255_v49  ;;  %v3916_v10 = vadd.f32 %v3792_v15, %v3454_v57  ;;  %v4063_v43 = vadd.f32 %v4015_v59, %v9249_v20  ;;  %v3449_v59 = vpop.permute.xlu0 %3448  ;;  %v9264_v49 = vld [vmem:[#allocation71_spill] sm:$0xff] }
 0x32b   :  { %v1343_v29 = vsel %vm1306_vm8, %v9259_v56, %v1342_v44  ;;  %v9261_v5 = vrot.slane %v7746_v9, 2  ;;  %v9262_v34 = vrot.slane %v7746_v9, 3  ;;  %v9263_v7 = vrot.slane %v7754_v61, 7 }
 0x32c   :  { %v1715_v58 = vadd.f32 %v9260_v51, %v1343_v29  ;;  %v2301_v56 = vmax.f32 %v2059_v11, %v2252_v14  ;;  %v3673_v47 = vadd.f32 %v3624_v35, %v9248_v18  ;;  %v3135_v9 = vadd.f32 %v9254_v6, %v1343_v29 }
 0x32d   :  { %v2125_v46 = vsel %vm2088_vm9, %v9261_v5, %v2124_v22  ;;  %v2367_v60 = vsel %vm2330_vm10, %v9262_v34, %v2366_v26  ;;  %v2906_v44 = vsel %vm2867_vm11, %v9263_v7, %v2905_v25  ;;  %v9265_v26 = vrot.slane %v7754_v61, 5  ;;  %v9266_v7 = vld [vmem:[#allocation140_spill] sm:$0xff] }
 0x32e   :  { %v2251_v57 = vadd.f32 %v2125_v46, %v9260_v51  ;;  %v2493_v20 = vadd.f32 %v2367_v60, %v9260_v51  ;;  %v2009_v15 = vadd.f32 %v9264_v49, %v1715_v58  ;;  %v3034_v22 = vadd.f32 %v2906_v44, %v9264_v49 }
 0x32f   :  { %v3253_v34 = vsel %vm3216_vm12, %v9265_v26, %v3252_v3  ;;  %v2837_v5 = vmax.f32 %v2301_v56, %v2788_v42  ;;  %v3722_v25 = vmax.f32 %v3185_v45, %v3673_v47  ;;  %v3184_v60 = vmax.f32 %v7836_v1, %v3135_v9  ;;  %v9267_v56 = vld [vmem:[#allocation120_spill] sm:$0xff] }
 0x330   :  { %v2787_v14 = vadd.f32 %v9266_v7, %v2493_v20  ;;  %v3623_v18 = vadd.f32 %v3449_v59, %v3253_v34  ;;  %v2058_v11 = vmax.f32 %v7829_v41, %v2009_v15  ;;  %v3790_v35 = vsel %vm3753_vm13, %v3787_v13, %v3789_v52 }
 0x331   :  { %v4014_v51 = vadd.f32 %v3449_v59, %v2906_v44  ;;  %v7911_v58 = vmax.f32 %v2837_v5, %v3035_v2  ;;  %v3964_v29 = vmax.f32 %v3722_v25, %v3916_v10  ;;  %v3915_v3 = vadd.f32 %v3790_v35, %v3449_v59  ;;  %v9268_v59 = vld [vmem:[#allocation22_spill] sm:$0xff] }
 0x332   :  { %v3672_v46 = vadd.f32 %v3623_v18, %v9250_v12  ;;  %v2300_v42 = vmax.f32 %v2058_v11, %v2251_v57  ;;  %v1120_v47 = vmul.f32 %v6183_v24, %v9267_v56  ;;  %v1346_v20 = vrot.slane %v7841_v28, 1  ;;  %v9269_v25 = vld [vmem:[#allocation150_spill] sm:$0xff]  ;;  %v9270_v11 = vld [vmem:[#allocation73_spill] sm:$0xff] }
 0x333   :  { %v4062_v45 = vadd.f32 %v4014_v51, %v9254_v6  ;;  %v4112_v1 = vmax.f32 %v3964_v29, %v4063_v43  ;;  %v2128_v61 = vrot.slane %v7841_v28, 2  ;;  %v2370_v13 = vrot.slane %v7841_v28, 3 }
 0x334   :  { %v3721_v15 = vmax.f32 %v3184_v60, %v3672_v46  ;;  %v2836_v52 = vmax.f32 %v2300_v42, %v2787_v14  ;;  %v1175_v2 = vmul.f32 %v7726_v17, %v1120_v47  ;;  %v8830_v12 = vrot.slane %v6309_v50, 7  ;;  %v3464_v42 = vpop.permute.xlu1 %3463 }
 0x335   :  { %v8828_v10 = vrot.slane %v6309_v50, 5  ;;  %4161 = vst.msk [vmem:[%s8524_s8 + $0x90] sm:$0xff] %vm789_vm6, %v4112_v1  ;;  %v8829_v6 = vrot.slane %v6309_v50, 6  ;;  %v1347_v43 = vsel %vm1306_vm8, %v1344_v39, %v1346_v20  ;;  %v2129_v17 = vsel %vm2088_vm9, %v2126_v19, %v2128_v61 }
 0x336   :  { %v3963_v24 = vmax.f32 %v3721_v15, %v3915_v3  ;;  %v7934_v44 = vmax.f32 %v2836_v52, %v3034_v22  ;;  %v7937_v57 = vadd.f32 %v7743_v63, %v1175_v2  ;;  %v1717_v9 = vadd.f32 %v9268_v59, %v1347_v43 }
 0x337   :  { %v2253_v26 = vadd.f32 %v2129_v17, %v9268_v59  ;;  %v2371_v5 = vsel %vm2330_vm10, %v2368_v31, %v2370_v13  ;;  %v3137_v39 = vadd.f32 %v9266_v7, %v1347_v43  ;;  %v2913_v14 = vrot.slane %v9269_v25, 7  ;;  %v9273_v43 = vld [vmem:[#allocation156_spill] sm:$0xff] }
 0x338   :  { %v4111_v34 = vmax.f32 %v3963_v24, %v4062_v45  ;;  %v1348_v19 = vrot.slane %v7937_v57, 1  ;;  %v2130_v22 = vrot.slane %v7937_v57, 2  ;;  %v2372_v63 = vrot.slane %v7937_v57, 3  ;;  %v9271_v45 = vld [vmem:[#allocation25_spill] sm:$0xff] }
 0x339   :  { %v2909_v18 = vrot.slane %v7937_v57, 7  ;;  %v3256_v41 = vrot.slane %v7937_v57, 5  ;;  %v3793_v31 = vrot.slane %v7937_v57, 6  ;;  %v2011_v60 = vadd.f32 %v9270_v11, %v1717_v9 }
 0x33a   :  { %4160 = vst.msk [vmem:[%s8524_s8 + $0x88] sm:$0xff] %vm789_vm6, %v4111_v34  ;;  %v2495_v35 = vadd.f32 %v2371_v5, %v9268_v59  ;;  %v1349_v51 = vsel %vm1306_vm8, %v1346_v20, %v1348_v19  ;;  %v2131_v29 = vsel %vm2088_vm9, %v2128_v61, %v2130_v22  ;;  %v2373_v46 = vsel %vm2330_vm10, %v2370_v13, %v2372_v63  ;;  %v9272_v20 = vld [vmem:[#allocation72_spill] sm:$0xff] }
 0x33b   :  { %v2912_v3 = vsel %vm2867_vm11, %v2909_v18, %v8830_v12  ;;  %v1718_v56 = vadd.f32 %v9271_v45, %v1349_v51  ;;  %v2254_v47 = vadd.f32 %v2131_v29, %v9271_v45  ;;  %v2496_v1 = vadd.f32 %v2373_v46, %v9271_v45  ;;  %v9274_v29 = vld [vmem:[#allocation143_spill] sm:$0xff] }
 0x33c   :  { %v3037_v15 = vadd.f32 %v2912_v3, %v9272_v20  ;;  %v3138_v52 = vadd.f32 %v9258_v32, %v1349_v51  ;;  %v3259_v61 = vsel %vm3216_vm12, %v3256_v41, %v8828_v10  ;;  %v3796_v13 = vsel %vm3753_vm13, %v3793_v31, %v8829_v6 }
 0x33d   :  { %v4017_v2 = vadd.f32 %v3464_v42, %v2912_v3  ;;  %v2012_v24 = vadd.f32 %v9272_v20, %v1718_v56  ;;  %v2790_v17 = vadd.f32 %v9273_v43, %v2496_v1  ;;  %v3626_v59 = vadd.f32 %v3464_v42, %v3259_v61  ;;  %v3459_v61 = vpop.permute.xlu0 %3458 }
 0x33e   :  { %v3918_v9 = vadd.f32 %v3796_v13, %v3464_v42  ;;  %v3187_v34 = vmax.f32 %v7911_v58, %v3138_v52  ;;  %v2060_v51 = vmax.f32 %v7937_v57, %v2011_v60  ;;  %v2789_v46 = vadd.f32 %v9274_v29, %v2495_v35 }
 0x33f   :  { %v4065_v5 = vadd.f32 %v4017_v2, %v9258_v32  ;;  %v2061_v45 = vmax.f32 %v6309_v50, %v2012_v24  ;;  %v3675_v10 = vadd.f32 %v3626_v59, %v9257_v54  ;;  %v9275_v3 = vrot.slane %v7841_v28, 7 }
 0x340   :  { %v3186_v1 = vmax.f32 %v7934_v44, %v3137_v39  ;;  %v2302_v42 = vmax.f32 %v2060_v51, %v2253_v26  ;;  %v9276_v32 = vrot.slane %v7841_v28, 5  ;;  %v9277_v35 = vrot.slane %v7841_v28, 6  ;;  %v9279_v39 = vld [vmem:[#allocation26_spill] sm:$0xff] }
 0x341   :  { %v2910_v56 = vsel %vm2867_vm11, %v9275_v3, %v2909_v18  ;;  %v2303_v13 = vmax.f32 %v2061_v45, %v2254_v47  ;;  %v3724_v54 = vmax.f32 %v3187_v34, %v3675_v10  ;;  %v9278_v3 = vld [vmem:[#allocation152_spill] sm:$0xff]  ;;  %v3140_v26 = vadd.f32 %v9273_v43, %v9279_v39 }
 0x342   :  { %v3036_v58 = vadd.f32 %v2910_v56, %v9270_v11  ;;  %v3257_v60 = vsel %vm3216_vm12, %v9276_v32, %v3256_v41  ;;  %v3794_v52 = vsel %vm3753_vm13, %v9277_v35, %v3793_v31  ;;  %v2838_v59 = vmax.f32 %v2302_v42, %v2789_v46 }
 0x343   :  { %v3625_v2 = vadd.f32 %v3459_v61, %v3257_v60  ;;  %v3917_v24 = vadd.f32 %v3794_v52, %v3459_v61  ;;  %v4016_v18 = vadd.f32 %v3459_v61, %v2910_v56  ;;  %v2915_v44 = vrot.slane %v9278_v3, 7 }
 0x344   :  { %v2839_v51 = vmax.f32 %v2303_v13, %v2790_v17  ;;  %v3966_v6 = vmax.f32 %v3724_v54, %v3918_v9  ;;  %v3260_v41 = vrot.slane %v9269_v25, 5  ;;  %v3085_v28 = vmax.f32 %v2838_v59, %v3036_v58  ;;  %v3474_v17 = vpop.permute.xlu1 %3473  ;;  %v9280_v9 = vld [vmem:[#allocation74_spill] sm:$0xff] }
 0x345   :  { %v3674_v12 = vadd.f32 %v3625_v2, %v9264_v49  ;;  %v4064_v31 = vadd.f32 %v4016_v18, %v9266_v7  ;;  %v2916_v10 = vsel %vm2867_vm11, %v2913_v14, %v2915_v44  ;;  %v3262_v47 = vrot.slane %v9278_v3, 5  ;;  %v9284_v2 = vld [vmem:[#allocation24_spill] sm:$0xff] }
 0x346   :  { %v3086_v34 = vmax.f32 %v2839_v51, %v3037_v15  ;;  %v4114_v46 = vmax.f32 %v3966_v6, %v4065_v5  ;;  %v3039_v56 = vadd.f32 %v2916_v10, %v9280_v9  ;;  %v3797_v7 = vrot.slane %v9269_v25, 6  ;;  %v9287_v51 = vld [vmem:[#allocation75_spill] sm:$0xff] }
 0x347   :  { %v3723_v45 = vmax.f32 %v3186_v1, %v3674_v12  ;;  %v3263_v49 = vsel %vm3216_vm12, %v3260_v41, %v3262_v47  ;;  %v3799_v61 = vrot.slane %v9278_v3, 6  ;;  %v4019_v42 = vadd.f32 %v3474_v17, %v2916_v10 }
 0x348   :  { %4163 = vst.msk [vmem:[%s8524_s8 + $0xa0] sm:$0xff] %vm789_vm6, %v4114_v46  ;;  %v9281_v12 = vmax.f32 %v6386_v36, %v6394_v0  ;;  %v3189_v5 = vmax.f32 %v3086_v34, %v3140_v26  ;;  %v3628_v1 = vadd.f32 %v3474_v17, %v3263_v49  ;;  %v9282_v60 = vrot.slane %v6309_v50, 1  ;;  %v3469_v26 = vpop.permute.xlu0 %3468 }
 0x349   :  { %v3965_v15 = vmax.f32 %v3723_v45, %v3917_v24  ;;  %v3800_v58 = vsel %vm3753_vm13, %v3797_v7, %v3799_v61  ;;  %v4067_v32 = vadd.f32 %v4019_v42, %v9273_v43  ;;  %v9283_v52 = vrot.slane %v6309_v50, 2  ;;  %v9290_v42 = vld [vmem:[#allocation155_spill] sm:$0xff] }
 0x34a   :  { %v8025_v6 = vmax.f32 %v9281_v12, %v3039_v56  ;;  %v1351_v35 = vsel %vm1306_vm8, %v1348_v19, %v9282_v60  ;;  %v3677_v13 = vadd.f32 %v3628_v1, %v9272_v20  ;;  %v3920_v54 = vadd.f32 %v3800_v58, %v3474_v17  ;;  %v9291_v58 = vld [vmem:[#allocation153_spill] sm:$0xff]  ;;  %v9292_v60 = vld [vmem:[#allocation154_spill] sm:$0xff] }
 0x34b   :  { %v2133_v0 = vsel %vm2088_vm9, %v2130_v22, %v9283_v52  ;;  %v4113_v36 = vmax.f32 %v3965_v15, %v4064_v31  ;;  %v1719_v24 = vadd.f32 %v9284_v2, %v1351_v35  ;;  %v9285_v59 = vrot.slane %v6309_v50, 3 }
 0x34c   :  { %v2255_v43 = vadd.f32 %v2133_v0, %v9284_v2  ;;  %v9286_v18 = vrot.slane %v6309_v50, 7  ;;  %v3139_v39 = vadd.f32 %v9274_v29, %v1351_v35  ;;  %v3726_v20 = vmax.f32 %v3189_v5, %v3677_v13  ;;  %v9293_v0 = vld [vmem:[#allocation160_spill] sm:$0xff] }
 0x34d   :  { %v2375_v19 = vsel %vm2330_vm10, %v2372_v63, %v9285_v59  ;;  %4162 = vst.msk [vmem:[%s8524_s8 + $0x98] sm:$0xff] %vm789_vm6, %v4113_v36  ;;  %v2013_v31 = vadd.f32 %v9287_v51, %v1719_v24  ;;  %v9288_v34 = vrot.slane %v6309_v50, 5  ;;  %v9289_v46 = vrot.slane %v6309_v50, 6 }
 0x34e   :  { %v2914_v22 = vsel %vm2867_vm11, %v9286_v18, %v2913_v14  ;;  %v2497_v57 = vadd.f32 %v2375_v19, %v9284_v2  ;;  %v3188_v10 = vmax.f32 %v3085_v28, %v3139_v39  ;;  %v3968_v56 = vmax.f32 %v3726_v20, %v3920_v54  ;;  %v3484_v2 = vpop.permute.xlu1 %3483  ;;  %v9295_v18 = vld [vmem:[#allocation157_spill] sm:$0xff] }
 0x34f   :  { %v3038_v63 = vadd.f32 %v2914_v22, %v9287_v51  ;;  %v3261_v14 = vsel %vm3216_vm12, %v9288_v34, %v3260_v41  ;;  %v3798_v45 = vsel %vm3753_vm13, %v9289_v46, %v3797_v7  ;;  %v4018_v17 = vadd.f32 %v3469_v26, %v2914_v22  ;;  %v9297_v34 = vld [vmem:[#allocation158_spill] sm:$0xff]  ;;  %v9298_v46 = vld [vmem:[#allocation77_spill] sm:$0xff] }
 0x350   :  { %v2062_v49 = vmax.f32 %v9269_v25, %v2013_v31  ;;  %v2791_v15 = vadd.f32 %v9290_v42, %v2497_v57  ;;  %v3627_v12 = vadd.f32 %v3469_v26, %v3261_v14  ;;  %v3919_v5 = vadd.f32 %v3798_v45, %v3469_v26 }
 0x351   :  { %v4066_v1 = vadd.f32 %v4018_v17, %v9274_v29  ;;  %v2917_v28 = vrot.slane %v9291_v58, 7  ;;  %v2919_v35 = vrot.slane %v9292_v60, 7  ;;  %v4116_v52 = vmax.f32 %v3968_v56, %v4067_v32 }
 0x352   :  { %v2304_v41 = vmax.f32 %v2062_v49, %v2255_v43  ;;  %v3676_v50 = vadd.f32 %v3627_v12, %v9270_v11  ;;  %v3191_v7 = vmax.f32 %v8025_v6, %v9293_v0  ;;  %v3264_v25 = vrot.slane %v9291_v58, 5  ;;  %v9294_v11 = vld [vmem:[#allocation76_spill] sm:$0xff]  ;;  %v3479_v49 = vpop.permute.xlu0 %3478  ;;  %v9299_v12 = vld [vmem:[#allocation159_spill] sm:$0xff] }
 0x353   :  { %v2920_v36 = vsel %vm2867_vm11, %v2917_v28, %v2919_v35  ;;  %v3266_v13 = vrot.slane %v9292_v60, 5  ;;  %v3801_v54 = vrot.slane %v9291_v58, 6  ;;  %4165 = vst.msk [vmem:[%s8524_s8 + $0xb0] sm:$0xff] %vm789_vm6, %v4116_v52  ;;  %v3803_v6 = vrot.slane %v9292_v60, 6 }
 0x354   :  { %v2840_v29 = vmax.f32 %v2304_v41, %v2791_v15  ;;  %v3725_v32 = vmax.f32 %v3188_v10, %v3676_v50  ;;  %v3041_v24 = vadd.f32 %v2920_v36, %v9294_v11  ;;  %v4021_v59 = vadd.f32 %v3484_v2, %v2920_v36  ;;  %v3494_v36 = vpop.permute.xlu1 %3493 }
 0x355   :  { %v3267_v43 = vsel %vm3216_vm12, %v3264_v25, %v3266_v13  ;;  %v2918_v19 = vsel %vm2867_vm11, %v2915_v44, %v2917_v28  ;;  %v3141_v22 = vadd.f32 %v9290_v42, %v9295_v18  ;;  %v9296_v26 = vmax.f32 %v6426_v4, %v6429_v30  ;;  %v9300_v4 = vld [vmem:[#allocation29_spill] sm:$0xff] }
 0x356   :  { %v3087_v39 = vmax.f32 %v2840_v29, %v3038_v63  ;;  %v3967_v20 = vmax.f32 %v3725_v32, %v3919_v5  ;;  %v3630_v57 = vadd.f32 %v3484_v2, %v3267_v43  ;;  %v3804_v10 = vsel %vm3753_vm13, %v3801_v54, %v3803_v6  ;;  %v9302_v43 = vld [vmem:[#allocation27_spill] sm:$0xff] }
 0x357   :  { %v3090_v31 = vmax.f32 %v9296_v26, %v3041_v24  ;;  %v4069_v14 = vadd.f32 %v4021_v59, %v9297_v34  ;;  %v3040_v45 = vadd.f32 %v2918_v19, %v9298_v46  ;;  %v3265_v44 = vsel %vm3216_vm12, %v3262_v47, %v3264_v25 }
 0x358   :  { %v4115_v17 = vmax.f32 %v3967_v20, %v4066_v1  ;;  %v3679_v56 = vadd.f32 %v3630_v57, %v9280_v9  ;;  %v3922_v63 = vadd.f32 %v3804_v10, %v3484_v2  ;;  %v3190_v15 = vmax.f32 %v3087_v39, %v3141_v22  ;;  %v9304_v20 = vld [vmem:[#allocation78_spill] sm:$0xff] }
 0x359   :  { %v9301_v30 = vmax.f32 %v9299_v12, %v9300_v4  ;;  %v3629_v58 = vadd.f32 %v3479_v49, %v3265_v44  ;;  %v3802_v28 = vsel %vm3753_vm13, %v3799_v61, %v3801_v54  ;;  %v4020_v60 = vadd.f32 %v3479_v49, %v2918_v19  ;;  %v9307_v44 = vld [vmem:[#allocation162_spill] sm:$0xff] }
 0x35a   :  { %4164 = vst.msk [vmem:[%s8524_s8 + $0xa8] sm:$0xff] %vm789_vm6, %v4115_v17  ;;  %v3728_v47 = vmax.f32 %v3191_v7, %v3679_v56  ;;  %v3921_v9 = vadd.f32 %v3802_v28, %v3479_v49  ;;  %v2921_v1 = vrot.slane %v6342_v62, 7  ;;  %v2923_v52 = vrot.slane %v6371_v16, 7 }
 0x35b   :  { %v3089_v5 = vmax.f32 %v9301_v30, %v3040_v45  ;;  %v3678_v41 = vadd.f32 %v3629_v58, %v9287_v51  ;;  %v4068_v50 = vadd.f32 %v4020_v60, %v9290_v42  ;;  %v3193_v3 = vmax.f32 %v3090_v31, %v6445_v55  ;;  %v3489_v31 = vpop.permute.xlu0 %3488  ;;  %v9306_v45 = vld [vmem:[#allocation161_spill] sm:$0xff]  ;;  %v9310_v30 = vld [vmem:[#allocation167_spill] sm:$0xff] }
 0x35c   :  { %v3268_v61 = vrot.slane %v6342_v62, 5  ;;  %v3970_v0 = vmax.f32 %v3728_v47, %v3922_v63  ;;  %v2924_v25 = vsel %vm2867_vm11, %v2921_v1, %v2923_v52  ;;  %v3270_v54 = vrot.slane %v6371_v16, 5 }
 0x35d   :  { %v3805_v7 = vrot.slane %v6342_v62, 6  ;;  %v3727_v29 = vmax.f32 %v3190_v15, %v3678_v41  ;;  %v3043_v32 = vadd.f32 %v2924_v25, %v9012_v23  ;;  %v3807_v2 = vrot.slane %v6371_v16, 6  ;;  %v3504_v41 = vpop.permute.xlu1 %3503 }
 0x35e   :  { %v4023_v51 = vadd.f32 %v3494_v36, %v2924_v25  ;;  %v4118_v24 = vmax.f32 %v3970_v0, %v4069_v14  ;;  %v3271_v42 = vsel %vm3216_vm12, %v3268_v61, %v3270_v54  ;;  %v2922_v55 = vsel %vm2867_vm11, %v2919_v35, %v2921_v1  ;;  %v9305_v35 = vld [vmem:[#allocation79_spill] sm:$0xff] }
 0x35f   :  { %v3192_v59 = vmax.f32 %v3089_v5, %v9302_v43  ;;  %v3969_v19 = vmax.f32 %v3727_v29, %v3921_v9  ;;  %v9303_v18 = vmax.f32 %v6483_v33, %v6498_v40  ;;  %v3632_v39 = vadd.f32 %v3494_v36, %v3271_v42  ;;  %v9311_v5 = vld [vmem:[#allocation28_spill] sm:$0xff] }
 0x360   :  { %v3808_v62 = vsel %vm3753_vm13, %v3805_v7, %v3807_v2  ;;  %4167 = vst.msk [vmem:[%s8524_s8 + $0xc0] sm:$0xff] %vm789_vm6, %v4118_v24  ;;  %v4071_v26 = vadd.f32 %v4023_v51, %v9304_v20  ;;  %v3042_v57 = vadd.f32 %v2922_v55, %v9305_v35  ;;  %v3269_v10 = vsel %vm3216_vm12, %v3266_v13, %v3268_v61  ;;  %v9314_v24 = vld [vmem:[#allocation174_spill] sm:$0xff] }
 0x361   :  { %v3092_v22 = vmax.f32 %v9303_v18, %v3043_v32  ;;  %v3924_v16 = vadd.f32 %v3808_v62, %v3494_v36  ;;  %v4117_v34 = vmax.f32 %v3969_v19, %v4068_v50  ;;  %v3681_v33 = vadd.f32 %v3632_v39, %v9294_v11  ;;  %v9309_v11 = vld [vmem:[#allocation163_spill] sm:$0xff]  ;;  %v9317_v18 = vld [vmem:[#allocation81_spill] sm:$0xff]  ;;  %v3499_v62 = vpop.permute.xlu0 %3498 }
 0x362   :  { %v3631_v40 = vadd.f32 %v3489_v31, %v3269_v10  ;;  %v3806_v14 = vsel %vm3753_vm13, %v3803_v6, %v3805_v7  ;;  %v9308_v17 = vmax.f32 %v9306_v45, %v9307_v44  ;;  %v4022_v49 = vadd.f32 %v3489_v31, %v2922_v55  ;;  %v9322_v44 = vld [vmem:[#allocation168_spill] sm:$0xff] }
 0x363   :  { %v3923_v63 = vadd.f32 %v3806_v14, %v3489_v31  ;;  %v2925_v15 = vrot.slane %v6433_v48, 7  ;;  %4166 = vst.msk [vmem:[%s8524_s8 + $0xb8] sm:$0xff] %vm789_vm6, %v4117_v34  ;;  %v3730_v13 = vmax.f32 %v3193_v3, %v3681_v33  ;;  %v2927_v4 = vrot.slane %v9309_v11, 7  ;;  %v9319_v31 = vld [vmem:[#allocation32_spill] sm:$0xff] }
 0x364   :  { %v3091_v56 = vmax.f32 %v9308_v17, %v3042_v57  ;;  %v3680_v12 = vadd.f32 %v3631_v40, %v9298_v46  ;;  %v3195_v6 = vmax.f32 %v3092_v22, %v9310_v30  ;;  %v4070_v58 = vadd.f32 %v4022_v49, %v9311_v5  ;;  %v9312_v46 = vld [vmem:[#allocation80_spill] sm:$0xff]  ;;  %v9320_v57 = vld [vmem:[#allocation33_spill] sm:$0xff]  ;;  %v9324_v49 = vld [vmem:[#allocation31_spill] sm:$0xff]  ;;  %v3514_v30 = vpop.permute.xlu1 %3513 }
 0x365   :  { %v3272_v28 = vrot.slane %v6433_v48, 5  ;;  %v3274_v60 = vrot.slane %v9309_v11, 5  ;;  %v3809_v47 = vrot.slane %v6433_v48, 6  ;;  %v3972_v9 = vmax.f32 %v3730_v13, %v3924_v16  ;;  %v9313_v48 = vld [vmem:[#allocation173_spill] sm:$0xff]  ;;  %v9318_v16 = vld [vmem:[#allocation30_spill] sm:$0xff]  ;;  %v9325_v13 = vld [vmem:[#allocation175_spill] sm:$0xff] }
 0x366   :  { %v3729_v1 = vmax.f32 %v3192_v59, %v3680_v12  ;;  %v2928_v50 = vsel %vm2867_vm11, %v2925_v15, %v2927_v4  ;;  %v3811_v3 = vrot.slane %v9309_v11, 6  ;;  %v2926_v25 = vsel %vm2867_vm11, %v2923_v52, %v2925_v15  ;;  %v9316_v59 = vld [vmem:[#allocation166_spill] sm:$0xff] }
 0x367   :  { %v3045_v61 = vadd.f32 %v2928_v50, %v9312_v46  ;;  %v3275_v0 = vsel %vm3216_vm12, %v3272_v28, %v3274_v60  ;;  %v4025_v36 = vadd.f32 %v3504_v41, %v2928_v50  ;;  %v4120_v7 = vmax.f32 %v3972_v9, %v4071_v26 }
 0x368   :  { %v3971_v29 = vmax.f32 %v3729_v1, %v3923_v63  ;;  %v3634_v32 = vadd.f32 %v3504_v41, %v3275_v0  ;;  %v3812_v51 = vsel %vm3753_vm13, %v3809_v47, %v3811_v3  ;;  %v9315_v42 = vmax.f32 %v9313_v48, %v9314_v24  ;;  %v9327_v0 = vld [vmem:[#allocation165_spill] sm:$0xff]  ;;  %v9329_v24 = vld [vmem:[#allocation172_spill] sm:$0xff] }
 0x369   :  { %v3926_v43 = vadd.f32 %v3812_v51, %v3504_v41  ;;  %v4073_v19 = vadd.f32 %v4025_v36, %v9316_v59  ;;  %v3044_v22 = vadd.f32 %v2926_v25, %v9317_v18  ;;  %4169 = vst.msk [vmem:[%s8524_s8 + $0xd0] sm:$0xff] %vm789_vm6, %v4120_v7  ;;  %v3194_v20 = vmax.f32 %v3091_v56, %v9318_v16  ;;  %v9323_v56 = vld [vmem:[#allocation169_spill] sm:$0xff] }
 0x36a   :  { %v3094_v55 = vmax.f32 %v9315_v42, %v3045_v61  ;;  %v4119_v52 = vmax.f32 %v3971_v29, %v4070_v58  ;;  %v3683_v39 = vadd.f32 %v3634_v32, %v9012_v23  ;;  %v3273_v26 = vsel %vm3216_vm12, %v3270_v54, %v3272_v28 }
 0x36b   :  { %v9321_v10 = vmax.f32 %v9319_v31, %v9320_v57  ;;  %v3633_v33 = vadd.f32 %v3499_v62, %v3273_v26  ;;  %v3810_v40 = vsel %vm3753_vm13, %v3807_v2, %v3809_v47  ;;  %v4024_v14 = vadd.f32 %v3499_v62, %v2926_v25  ;;  %v9326_v47 = vld [vmem:[#allocation82_spill] sm:$0xff]  ;;  %v9334_v31 = vld [vmem:[#allocation176_spill] sm:$0xff] }
 0x36c   :  { %4168 = vst.msk [vmem:[%s8524_s8 + $0xc8] sm:$0xff] %vm789_vm6, %v4119_v52  ;;  %v3732_v45 = vmax.f32 %v3195_v6, %v3683_v39  ;;  %v3925_v23 = vadd.f32 %v3810_v40, %v3499_v62  ;;  %v2929_v17 = vrot.slane %v9322_v44, 7  ;;  %v2931_v63 = vrot.slane %v9323_v56, 7  ;;  %v9331_v52 = vld [vmem:[#allocation171_spill] sm:$0xff] }
 0x36d   :  { %v3093_v34 = vmax.f32 %v9321_v10, %v3044_v22  ;;  %v3682_v54 = vadd.f32 %v3633_v33, %v9305_v35  ;;  %v4072_v15 = vadd.f32 %v4024_v14, %v9324_v49  ;;  %v3197_v12 = vmax.f32 %v3094_v55, %v9325_v13  ;;  %v3509_v55 = vpop.permute.xlu0 %3508  ;;  %v9332_v39 = vld [vmem:[#allocation35_spill] sm:$0xff]  ;;  %v9336_v33 = vld [vmem:[#allocation164_spill] sm:$0xff] }
 0x36e   :  { %v3276_v2 = vrot.slane %v9322_v44, 5  ;;  %v3974_v11 = vmax.f32 %v3732_v45, %v3926_v43  ;;  %v2932_v5 = vsel %vm2867_vm11, %v2929_v17, %v2931_v63  ;;  %v3278_v58 = vrot.slane %v9323_v56, 5 }
 0x36f   :  { %v3813_v6 = vrot.slane %v9322_v44, 6  ;;  %v3731_v28 = vmax.f32 %v3194_v20, %v3682_v54  ;;  %v3047_v9 = vadd.f32 %v2932_v5, %v9326_v47  ;;  %v3815_v1 = vrot.slane %v9323_v56, 6  ;;  %v3524_v56 = vpop.permute.xlu1 %3523 }
 0x370   :  { %v4027_v35 = vadd.f32 %v3514_v30, %v2932_v5  ;;  %v4122_v41 = vmax.f32 %v3974_v11, %v4073_v19  ;;  %v3279_v50 = vsel %vm3216_vm12, %v3276_v2, %v3278_v58  ;;  %v2930_v61 = vsel %vm2867_vm11, %v2927_v4, %v2929_v17  ;;  %v9330_v4 = vld [vmem:[#allocation83_spill] sm:$0xff] }
 0x371   :  { %v3196_v36 = vmax.f32 %v3093_v34, %v9327_v0  ;;  %v3973_v25 = vmax.f32 %v3731_v28, %v3925_v23  ;;  %v9328_v7 = vmax.f32 %v6588_v27, %v6612_v38  ;;  %v3636_v32 = vadd.f32 %v3514_v30, %v3279_v50  ;;  %v9335_v34 = vld [vmem:[#allocation180_spill] sm:$0xff] }
 0x372   :  { %v3816_v51 = vsel %vm3753_vm13, %v3813_v6, %v3815_v1  ;;  %4171 = vst.msk [vmem:[%s8524_s8 + $0xe0] sm:$0xff] %vm789_vm6, %v4122_v41  ;;  %v4075_v42 = vadd.f32 %v4027_v35, %v9329_v24  ;;  %v3046_v43 = vadd.f32 %v2930_v61, %v9330_v4  ;;  %v3277_v59 = vsel %vm3216_vm12, %v3274_v60, %v3276_v2  ;;  %v9339_v41 = vld [vmem:[#allocation178_spill] sm:$0xff] }
 0x373   :  { %v3096_v29 = vmax.f32 %v9328_v7, %v3047_v9  ;;  %v3928_v48 = vadd.f32 %v3816_v51, %v3514_v30  ;;  %v4121_v19 = vmax.f32 %v3973_v25, %v4072_v15  ;;  %v3685_v27 = vadd.f32 %v3636_v32, %v9312_v46  ;;  %v9341_v25 = vld [vmem:[#allocation34_spill] sm:$0xff] }
 0x374   :  { %v3635_v38 = vadd.f32 %v3509_v55, %v3277_v59  ;;  %v3814_v22 = vsel %vm3753_vm13, %v3811_v3, %v3813_v6  ;;  %v9333_v62 = vmax.f32 %v9331_v52, %v9332_v39  ;;  %v4026_v26 = vadd.f32 %v3509_v55, %v2930_v61  ;;  %v9348_v52 = vld [vmem:[#allocation185_spill] sm:$0xff] }
 0x375   :  { %v3927_v20 = vadd.f32 %v3814_v22, %v3509_v55  ;;  %v2933_v57 = vrot.slane %v9334_v31, 7  ;;  %4170 = vst.msk [vmem:[%s8524_s8 + $0xd8] sm:$0xff] %vm789_vm6, %v4121_v19  ;;  %v3734_v60 = vmax.f32 %v3197_v12, %v3685_v27  ;;  %v2935_v46 = vrot.slane %v6562_v37, 7  ;;  %v9346_v19 = vld [vmem:[#allocation182_spill] sm:$0xff] }
 0x376   :  { %v3095_v16 = vmax.f32 %v9333_v62, %v3046_v43  ;;  %v3684_v10 = vadd.f32 %v3635_v38, %v9317_v18  ;;  %v3199_v3 = vmax.f32 %v3096_v29, %v9335_v34  ;;  %v4074_v40 = vadd.f32 %v4026_v26, %v9336_v33  ;;  %v9337_v18 = vld [vmem:[#allocation84_spill] sm:$0xff]  ;;  %v9345_v43 = vld [vmem:[#allocation181_spill] sm:$0xff]  ;;  %v9347_v38 = vld [vmem:[#allocation170_spill] sm:$0xff] }
 0x377   :  { %v3280_v14 = vrot.slane %v9334_v31, 5  ;;  %v3282_v45 = vrot.slane %v6562_v37, 5  ;;  %v3817_v23 = vrot.slane %v9334_v31, 6  ;;  %v3976_v44 = vmax.f32 %v3734_v60, %v3928_v48  ;;  %v9349_v60 = vld [vmem:[#allocation86_spill] sm:$0xff] }
 0x378   :  { %v3733_v17 = vmax.f32 %v3196_v36, %v3684_v10  ;;  %v2936_v54 = vsel %vm2867_vm11, %v2933_v57, %v2935_v46  ;;  %v3819_v49 = vrot.slane %v6562_v37, 6  ;;  %v2934_v2 = vsel %vm2867_vm11, %v2931_v63, %v2933_v57  ;;  %v9340_v37 = vld [vmem:[#allocation85_spill] sm:$0xff]  ;;  %v3519_v36 = vpop.permute.xlu0 %3518 }
 0x379   :  { %v3049_v15 = vadd.f32 %v2936_v54, %v9337_v18  ;;  %v3283_v13 = vsel %vm3216_vm12, %v3280_v14, %v3282_v45  ;;  %v4029_v12 = vadd.f32 %v3524_v56, %v2936_v54  ;;  %v4124_v11 = vmax.f32 %v3976_v44, %v4075_v42 }
 0x37a   :  { %v3975_v30 = vmax.f32 %v3733_v17, %v3927_v20  ;;  %v3638_v5 = vadd.f32 %v3524_v56, %v3283_v13  ;;  %v3820_v6 = vsel %vm3753_vm13, %v3817_v23, %v3819_v49  ;;  %v9338_v28 = vmax.f32 %v6659_v8, %v6665_v53  ;;  %v9342_v8 = vld [vmem:[#allocation177_spill] sm:$0xff]  ;;  %v9343_v53 = vld [vmem:[#allocation36_spill] sm:$0xff]  ;;  %v9351_v17 = vld [vmem:[#allocation191_spill] sm:$0xff] }
 0x37b   :  { %v3930_v35 = vadd.f32 %v3820_v6, %v3524_v56  ;;  %v4077_v50 = vadd.f32 %v4029_v12, %v9339_v41  ;;  %v3048_v61 = vadd.f32 %v2934_v2, %v9340_v37  ;;  %4173 = vst.msk [vmem:[%s8524_s8 + $0xf0] sm:$0xff] %vm789_vm6, %v4124_v11  ;;  %v3198_v7 = vmax.f32 %v3095_v16, %v9341_v25  ;;  %v3534_v16 = vpop.permute.xlu1 %3533  ;;  %v9352_v56 = vld [vmem:[#allocation193_spill] sm:$0xff]  ;;  %v9354_v11 = vld [vmem:[#allocation184_spill] sm:$0xff] }
 0x37c   :  { %v3098_v9 = vmax.f32 %v9338_v28, %v3049_v15  ;;  %v4123_v63 = vmax.f32 %v3975_v30, %v4074_v40  ;;  %v3687_v0 = vadd.f32 %v3638_v5, %v9326_v47  ;;  %v3281_v29 = vsel %vm3216_vm12, %v3278_v58, %v3280_v14  ;;  %v9350_v14 = vld [vmem:[#allocation179_spill] sm:$0xff]  ;;  %v3529_v5 = vpop.permute.xlu0 %3528 }
 0x37d   :  { %v9344_v32 = vmax.f32 %v9342_v8, %v9343_v53  ;;  %v3637_v48 = vadd.f32 %v3519_v36, %v3281_v29  ;;  %v3818_v24 = vsel %vm3753_vm13, %v3815_v1, %v3817_v23  ;;  %v4028_v42 = vadd.f32 %v3519_v36, %v2934_v2  ;;  %v9359_v29 = vld [vmem:[#allocation187_spill] sm:$0xff] }
 0x37e   :  { %4172 = vst.msk [vmem:[%s8524_s8 + $0xe8] sm:$0xff] %vm789_vm6, %v4123_v63  ;;  %v3736_v55 = vmax.f32 %v3199_v3, %v3687_v0  ;;  %v3929_v47 = vadd.f32 %v3818_v24, %v3519_v36  ;;  %v2937_v59 = vrot.slane %v9345_v43, 7  ;;  %v2939_v27 = vrot.slane %v9346_v19, 7  ;;  %v9357_v63 = vld [vmem:[#allocation186_spill] sm:$0xff] }
 0x37f   :  { %v3097_v51 = vmax.f32 %v9344_v32, %v3048_v61  ;;  %v3686_v58 = vadd.f32 %v3637_v48, %v9330_v4  ;;  %v4076_v22 = vadd.f32 %v4028_v42, %v9347_v38  ;;  %v3201_v39 = vmax.f32 %v3098_v9, %v9348_v52  ;;  %v9356_v61 = vld [vmem:[#allocation38_spill] sm:$0xff]  ;;  %v9360_v32 = vld [vmem:[#allocation195_spill] sm:$0xff] }
 0x380   :  { %v3284_v1 = vrot.slane %v9345_v43, 5  ;;  %v3978_v62 = vmax.f32 %v3736_v55, %v3930_v35  ;;  %v2940_v20 = vsel %vm2867_vm11, %v2937_v59, %v2939_v27  ;;  %v3286_v26 = vrot.slane %v9346_v19, 5 }
 0x381   :  { %v3821_v31 = vrot.slane %v9345_v43, 6  ;;  %v3735_v57 = vmax.f32 %v3198_v7, %v3686_v58  ;;  %v3051_v10 = vadd.f32 %v2940_v20, %v9349_v60  ;;  %v3823_v34 = vrot.slane %v9346_v19, 6 }
 0x382   :  { %v4031_v4 = vadd.f32 %v3534_v16, %v2940_v20  ;;  %v4126_v3 = vmax.f32 %v3978_v62, %v4077_v50  ;;  %v3287_v33 = vsel %vm3216_vm12, %v3284_v1, %v3286_v26  ;;  %v2938_v40 = vsel %vm2867_vm11, %v2935_v46, %v2937_v59  ;;  %v9355_v46 = vld [vmem:[#allocation87_spill] sm:$0xff]  ;;  %v3544_v59 = vpop.permute.xlu1 %3543 }
 0x383   :  { %v3200_v23 = vmax.f32 %v3097_v51, %v9350_v14  ;;  %v3977_v44 = vmax.f32 %v3735_v57, %v3929_v47  ;;  %v9353_v54 = vmax.f32 %v9351_v17, %v9352_v56  ;;  %v3640_v13 = vadd.f32 %v3534_v16, %v3287_v33  ;;  %v9361_v51 = vld [vmem:[#allocation37_spill] sm:$0xff]  ;;  %v9364_v57 = vld [vmem:[#allocation202_spill] sm:$0xff]  ;;  %v9366_v33 = vld [vmem:[#allocation192_spill] sm:$0xff] }
 0x384   :  { %v3824_v12 = vsel %vm3753_vm13, %v3821_v31, %v3823_v34  ;;  %4175 = vst.msk [vmem:[%s8524_s8 + $0x100] sm:$0xff] %vm789_vm6, %v4126_v3  ;;  %v4079_v30 = vadd.f32 %v4031_v4, %v9354_v11  ;;  %v3050_v6 = vadd.f32 %v2938_v40, %v9355_v46  ;;  %v3285_v28 = vsel %vm3216_vm12, %v3282_v45, %v3284_v1  ;;  %v9368_v17 = vld [vmem:[#allocation39_spill] sm:$0xff] }
 0x385   :  { %v3100_v15 = vmax.f32 %v9353_v54, %v3051_v10  ;;  %v3932_v2 = vadd.f32 %v3824_v12, %v3534_v16  ;;  %v4125_v9 = vmax.f32 %v3977_v44, %v4076_v22  ;;  %v3689_v35 = vadd.f32 %v3640_v13, %v9337_v18  ;;  %v3539_v44 = vpop.permute.xlu0 %3538  ;;  %v9370_v13 = vld [vmem:[#allocation40_spill] sm:$0xff] }
 0x386   :  { %v3639_v41 = vadd.f32 %v3529_v5, %v3285_v28  ;;  %v3822_v50 = vsel %vm3753_vm13, %v3819_v49, %v3821_v31  ;;  %v9358_v0 = vmax.f32 %v9356_v61, %v9357_v63  ;;  %v4030_v7 = vadd.f32 %v3529_v5, %v2938_v40  ;;  %v9363_v31 = vld [vmem:[#allocation200_spill] sm:$0xff]  ;;  %v9372_v28 = vld [vmem:[#allocation194_spill] sm:$0xff]  ;;  %v9375_v63 = vld [vmem:[#allocation201_spill] sm:$0xff] }
 0x387   :  { %v3931_v25 = vadd.f32 %v3822_v50, %v3529_v5  ;;  %v2941_v8 = vrot.slane %v9359_v29, 7  ;;  %4174 = vst.msk [vmem:[%s8524_s8 + $0xf8] sm:$0xff] %vm789_vm6, %v4125_v9  ;;  %v3738_v45 = vmax.f32 %v3201_v39, %v3689_v35  ;;  %v2943_v18 = vrot.slane %v6668_v21, 7  ;;  %v9373_v35 = vld [vmem:[#allocation188_spill] sm:$0xff]  ;;  %v9374_v50 = vld [vmem:[#allocation183_spill] sm:$0xff] }
 0x388   :  { %v3099_v36 = vmax.f32 %v9358_v0, %v3050_v6  ;;  %v3688_v53 = vadd.f32 %v3639_v41, %v9340_v37  ;;  %v3203_v49 = vmax.f32 %v3100_v15, %v9360_v32  ;;  %v4078_v48 = vadd.f32 %v4030_v7, %v9361_v51  ;;  %v9362_v37 = vld [vmem:[#allocation88_spill] sm:$0xff]  ;;  %v9369_v15 = vld [vmem:[#allocation190_spill] sm:$0xff] }
 0x389   :  { %v3288_v24 = vrot.slane %v9359_v29, 5  ;;  %v3290_v42 = vrot.slane %v6668_v21, 5  ;;  %v3825_v55 = vrot.slane %v9359_v29, 6  ;;  %v3980_v47 = vmax.f32 %v3738_v45, %v3932_v2 }
 0x38a   :  { %v3737_v43 = vmax.f32 %v3200_v23, %v3688_v53  ;;  %v2944_v19 = vsel %vm2867_vm11, %v2941_v8, %v2943_v18  ;;  %v3827_v58 = vrot.slane %v6668_v21, 6  ;;  %v2942_v39 = vsel %vm2867_vm11, %v2939_v27, %v2941_v8  ;;  %v9367_v21 = vld [vmem:[#allocation89_spill] sm:$0xff]  ;;  %v9376_v53 = vld [vmem:[#allocation90_spill] sm:$0xff] }
 0x38b   :  { %v3053_v38 = vadd.f32 %v2944_v19, %v9362_v37  ;;  %v3291_v22 = vsel %vm3216_vm12, %v3288_v24, %v3290_v42  ;;  %v4033_v52 = vadd.f32 %v3544_v59, %v2944_v19  ;;  %v4128_v1 = vmax.f32 %v3980_v47, %v4079_v30  ;;  %v9379_v19 = vld [vmem:[#allocation208_spill] sm:$0xff] }
 0x38c   :  { %v3979_v62 = vmax.f32 %v3737_v43, %v3931_v25  ;;  %v3642_v16 = vadd.f32 %v3544_v59, %v3291_v22  ;;  %v3828_v20 = vsel %vm3753_vm13, %v3825_v55, %v3827_v58  ;;  %v9365_v10 = vmax.f32 %v9363_v31, %v9364_v57  ;;  %v3554_v25 = vpop.permute.xlu1 %3553 }
 0x38d   :  { %v3934_v3 = vadd.f32 %v3828_v20, %v3544_v59  ;;  %v4081_v40 = vadd.f32 %v4033_v52, %v9366_v33  ;;  %v3052_v14 = vadd.f32 %v2942_v39, %v9367_v21  ;;  %4177 = vst.msk [vmem:[%s8524_s8 + $0x110] sm:$0xff] %vm789_vm6, %v4128_v1  ;;  %v3202_v56 = vmax.f32 %v3099_v36, %v9368_v17  ;;  %v9378_v59 = vld [vmem:[#allocation206_spill] sm:$0xff]  ;;  %v3549_v20 = vpop.permute.xlu0 %3548 }
 0x38e   :  { %v3102_v4 = vmax.f32 %v9365_v10, %v3053_v38  ;;  %v4127_v27 = vmax.f32 %v3979_v62, %v4078_v48  ;;  %v3691_v23 = vadd.f32 %v3642_v16, %v9349_v60  ;;  %v3289_v54 = vsel %vm3216_vm12, %v3286_v26, %v3288_v24  ;;  %v9381_v62 = vld [vmem:[#allocation198_spill] sm:$0xff] }
 0x38f   :  { %v9371_v12 = vmax.f32 %v9369_v15, %v9370_v13  ;;  %v3641_v11 = vadd.f32 %v3539_v44, %v3289_v54  ;;  %v3826_v30 = vsel %vm3753_vm13, %v3823_v34, %v3825_v55  ;;  %v4032_v5 = vadd.f32 %v3539_v44, %v2942_v39  ;;  %v9377_v55 = vld [vmem:[#allocation41_spill] sm:$0xff] }
 0x390   :  { %4176 = vst.msk [vmem:[%s8524_s8 + $0x108] sm:$0xff] %vm789_vm6, %v4127_v27  ;;  %v3740_v6 = vmax.f32 %v3203_v49, %v3691_v23  ;;  %v3933_v60 = vadd.f32 %v3826_v30, %v3539_v44  ;;  %v2945_v9 = vrot.slane %v9372_v28, 7  ;;  %v2947_v41 = vrot.slane %v9373_v35, 7 }
 0x391   :  { %v3101_v2 = vmax.f32 %v9371_v12, %v3052_v14  ;;  %v3690_v26 = vadd.f32 %v3641_v11, %v9355_v46  ;;  %v4080_v61 = vadd.f32 %v4032_v5, %v9374_v50  ;;  %v3205_v0 = vmax.f32 %v3102_v4, %v9375_v63  ;;  %v9384_v14 = vld [vmem:[#allocation197_spill] sm:$0xff]  ;;  %v9388_v12 = vld [vmem:[#allocation207_spill] sm:$0xff] }
 0x392   :  { %v3292_v34 = vrot.slane %v9372_v28, 5  ;;  %v3982_v36 = vmax.f32 %v3740_v6, %v3934_v3  ;;  %v2948_v7 = vsel %vm2867_vm11, %v2945_v9, %v2947_v41  ;;  %v3294_v29 = vrot.slane %v9373_v35, 5 }
 0x393   :  { %v3829_v8 = vrot.slane %v9372_v28, 6  ;;  %v3739_v45 = vmax.f32 %v3202_v56, %v3690_v26  ;;  %v3055_v32 = vadd.f32 %v2948_v7, %v9376_v53  ;;  %v3831_v49 = vrot.slane %v9373_v35, 6  ;;  %v9386_v56 = vld [vmem:[#allocation199_spill] sm:$0xff] }
 0x394   :  { %v4035_v46 = vadd.f32 %v3554_v25, %v2948_v7  ;;  %v4130_v51 = vmax.f32 %v3982_v36, %v4081_v40  ;;  %v3295_v48 = vsel %vm3216_vm12, %v3292_v34, %v3294_v29  ;;  %v2946_v24 = vsel %vm2867_vm11, %v2943_v18, %v2945_v9  ;;  %v9382_v18 = vld [vmem:[#allocation91_spill] sm:$0xff]  ;;  %v9383_v40 = vld [vmem:[#allocation42_spill] sm:$0xff]  ;;  %v3564_v9 = vpop.permute.xlu1 %3563 }
 0x395   :  { %v3204_v47 = vmax.f32 %v3101_v2, %v9377_v55  ;;  %v3981_v43 = vmax.f32 %v3739_v45, %v3933_v60  ;;  %v9380_v38 = vmax.f32 %v9378_v59, %v9379_v19  ;;  %v3644_v52 = vadd.f32 %v3554_v25, %v3295_v48  ;;  %v9389_v2 = vld [vmem:[#allocation189_spill] sm:$0xff]  ;;  %v9392_v45 = vld [vmem:[#allocation214_spill] sm:$0xff]  ;;  %v3559_v59 = vpop.permute.xlu0 %3558  ;;  %v9396_v19 = vld [vmem:[#allocation43_spill] sm:$0xff] }
 0x396   :  { %v3832_v39 = vsel %vm3753_vm13, %v3829_v8, %v3831_v49  ;;  %4179 = vst.msk [vmem:[%s8524_s8 + $0x120] sm:$0xff] %vm789_vm6, %v4130_v51  ;;  %v4083_v16 = vadd.f32 %v4035_v46, %v9381_v62  ;;  %v3054_v31 = vadd.f32 %v2946_v24, %v9382_v18  ;;  %v3293_v57 = vsel %vm3216_vm12, %v3290_v42, %v3292_v34  ;;  %v9394_v48 = vld [vmem:[#allocation205_spill] sm:$0xff] }
 0x397   :  { %v3104_v22 = vmax.f32 %v9380_v38, %v3055_v32  ;;  %v3936_v1 = vadd.f32 %v3832_v39, %v3554_v25  ;;  %v4129_v10 = vmax.f32 %v3981_v43, %v4080_v61  ;;  %v3693_v4 = vadd.f32 %v3644_v52, %v9362_v37  ;;  %v9387_v37 = vld [vmem:[#allocation142_spill] sm:$0xff]  ;;  %v9395_v55 = vld [vmem:[#allocation93_spill] sm:$0xff]  ;;  %v9397_v52 = vld [vmem:[#allocation44_spill] sm:$0xff] }
 0x398   :  { %v3643_v3 = vadd.f32 %v3549_v20, %v3293_v57  ;;  %v3830_v33 = vsel %vm3753_vm13, %v3827_v58, %v3829_v8  ;;  %v9385_v27 = vmax.f32 %v9383_v40, %v9384_v14  ;;  %v4034_v17 = vadd.f32 %v3549_v20, %v2946_v24  ;;  %v9391_v8 = vld [vmem:[#allocation213_spill] sm:$0xff]  ;;  %v9402_v40 = vld [vmem:[#allocation196_spill] sm:$0xff] }
 0x399   :  { %v3935_v44 = vadd.f32 %v3830_v33, %v3549_v20  ;;  %v2949_v54 = vrot.slane %v9386_v56, 7  ;;  %4178 = vst.msk [vmem:[%s8524_s8 + $0x118] sm:$0xff] %vm789_vm6, %v4129_v10  ;;  %v3742_v42 = vmax.f32 %v3205_v0, %v3693_v4  ;;  %v2951_v13 = vrot.slane %v9387_v37, 7  ;;  %v9398_v39 = vld [vmem:[#allocation45_spill] sm:$0xff]  ;;  %v9400_v10 = vld [vmem:[#allocation144_spill] sm:$0xff] }
 0x39a   :  { %v3103_v23 = vmax.f32 %v9385_v27, %v3054_v31  ;;  %v3692_v15 = vadd.f32 %v3643_v3, %v9367_v21  ;;  %v3207_v58 = vmax.f32 %v3104_v22, %v9388_v12  ;;  %v4082_v11 = vadd.f32 %v4034_v17, %v9389_v2  ;;  %v9390_v21 = vld [vmem:[#allocation92_spill] sm:$0xff]  ;;  %v9401_v3 = vld [vmem:[#allocation145_spill] sm:$0xff]  ;;  %v3574_v17 = vpop.permute.xlu1 %3573 }
 0x39b   :  { %v3296_v30 = vrot.slane %v9386_v56, 5  ;;  %v3298_v5 = vrot.slane %v9387_v37, 5  ;;  %v3833_v6 = vrot.slane %v9386_v56, 6  ;;  %v3984_v60 = vmax.f32 %v3742_v42, %v3936_v1  ;;  %v9403_v27 = vld [vmem:[#allocation212_spill] sm:$0xff] }
 0x39c   :  { %v3741_v28 = vmax.f32 %v3204_v47, %v3692_v15  ;;  %v2952_v35 = vsel %vm2867_vm11, %v2949_v54, %v2951_v13  ;;  %v3835_v26 = vrot.slane %v9387_v37, 6  ;;  %v2950_v0 = vsel %vm2867_vm11, %v2947_v41, %v2949_v54  ;;  %v9404_v37 = vld [vmem:[#allocation94_spill] sm:$0xff] }
 0x39d   :  { %v3057_v50 = vadd.f32 %v2952_v35, %v9390_v21  ;;  %v3299_v61 = vsel %vm3216_vm12, %v3296_v30, %v3298_v5  ;;  %v4037_v63 = vadd.f32 %v3564_v9, %v2952_v35  ;;  %v4132_v34 = vmax.f32 %v3984_v60, %v4083_v16  ;;  %v9407_v35 = vld [vmem:[#allocation220_spill] sm:$0xff] }
 0x39e   :  { %v3983_v36 = vmax.f32 %v3741_v28, %v3935_v44  ;;  %v3646_v25 = vadd.f32 %v3564_v9, %v3299_v61  ;;  %v3836_v7 = vsel %vm3753_vm13, %v3833_v6, %v3835_v26  ;;  %v9393_v32 = vmax.f32 %v9391_v8, %v9392_v45 }
 0x39f   :  { %v3938_v51 = vadd.f32 %v3836_v7, %v3564_v9  ;;  %v4085_v24 = vadd.f32 %v4037_v63, %v9394_v48  ;;  %v3056_v47 = vadd.f32 %v2950_v0, %v9395_v55  ;;  %4181 = vst.msk [vmem:[%s8524_s8 + $0x130] sm:$0xff] %vm789_vm6, %v4132_v34  ;;  %v3206_v38 = vmax.f32 %v3103_v23, %v9396_v19  ;;  %v9406_v9 = vld [vmem:[#allocation219_spill] sm:$0xff]  ;;  %v3569_v7 = vpop.permute.xlu0 %3568 }
 0x3a0   :  { %v3106_v46 = vmax.f32 %v9393_v32, %v3057_v50  ;;  %v4131_v41 = vmax.f32 %v3983_v36, %v4082_v11  ;;  %v3695_v43 = vadd.f32 %v3646_v25, %v9376_v53  ;;  %v3297_v22 = vsel %vm3216_vm12, %v3294_v29, %v3296_v30  ;;  %v9409_v36 = vld [vmem:[#allocation211_spill] sm:$0xff] }
 0x3a1   :  { %v9399_v1 = vmax.f32 %v9397_v52, %v9398_v39  ;;  %v3645_v16 = vadd.f32 %v3559_v59, %v3297_v22  ;;  %v3834_v20 = vsel %vm3753_vm13, %v3831_v49, %v3833_v6  ;;  %v4036_v31 = vadd.f32 %v3559_v59, %v2950_v0  ;;  %v9405_v6 = vld [vmem:[#allocation204_spill] sm:$0xff] }
 0x3a2   :  { %4180 = vst.msk [vmem:[%s8524_s8 + $0x128] sm:$0xff] %vm789_vm6, %v4131_v41  ;;  %v3744_v57 = vmax.f32 %v3207_v58, %v3695_v43  ;;  %v3937_v53 = vadd.f32 %v3834_v20, %v3559_v59  ;;  %v2953_v4 = vrot.slane %v9400_v10, 7  ;;  %v2955_v33 = vrot.slane %v9401_v3, 7 }
 0x3a3   :  { %v3105_v62 = vmax.f32 %v9399_v1, %v3056_v47  ;;  %v3694_v29 = vadd.f32 %v3645_v16, %v9382_v18  ;;  %v4084_v14 = vadd.f32 %v4036_v31, %v9402_v40  ;;  %v3209_v23 = vmax.f32 %v3106_v46, %v9403_v27  ;;  %v9412_v47 = vld [vmem:[#allocation210_spill] sm:$0xff] }
 0x3a4   :  { %v3300_v49 = vrot.slane %v9400_v10, 5  ;;  %v3986_v44 = vmax.f32 %v3744_v57, %v3938_v51  ;;  %v2956_v56 = vsel %vm2867_vm11, %v2953_v4, %v2955_v33  ;;  %v3302_v54 = vrot.slane %v9401_v3, 5  ;;  %v9416_v1 = vld [vmem:[#allocation218_spill] sm:$0xff] }
 0x3a5   :  { %v3837_v42 = vrot.slane %v9400_v10, 6  ;;  %v3743_v15 = vmax.f32 %v3206_v38, %v3694_v29  ;;  %v3059_v12 = vadd.f32 %v2956_v56, %v9404_v37  ;;  %v3839_v58 = vrot.slane %v9401_v3, 6  ;;  %v9414_v38 = vld [vmem:[#allocation146_spill] sm:$0xff] }
 0x3a6   :  { %v4039_v18 = vadd.f32 %v3574_v17, %v2956_v56  ;;  %v4134_v2 = vmax.f32 %v3986_v44, %v4085_v24  ;;  %v3303_v11 = vsel %vm3216_vm12, %v3300_v49, %v3302_v54  ;;  %v2954_v30 = vsel %vm2867_vm11, %v2951_v13, %v2953_v4  ;;  %v9410_v13 = vld [vmem:[#allocation95_spill] sm:$0xff]  ;;  %v9411_v24 = vld [vmem:[#allocation209_spill] sm:$0xff]  ;;  %v3584_v4 = vpop.permute.xlu1 %3583 }
 0x3a7   :  { %v3208_v60 = vmax.f32 %v3105_v62, %v9405_v6  ;;  %v3985_v28 = vmax.f32 %v3743_v15, %v3937_v53  ;;  %v9408_v50 = vmax.f32 %v9406_v9, %v9407_v35  ;;  %v3648_v63 = vadd.f32 %v3574_v17, %v3303_v11  ;;  %v9417_v62 = vld [vmem:[#allocation203_spill] sm:$0xff]  ;;  %v9424_v6 = vld [vmem:[#allocation101_spill] sm:$0xff]  ;;  %v3579_v35 = vpop.permute.xlu0 %3578 }
 0x3a8   :  { %v3840_v0 = vsel %vm3753_vm13, %v3837_v42, %v3839_v58  ;;  %4183 = vst.msk [vmem:[%s8524_s8 + $0x140] sm:$0xff] %vm789_vm6, %v4134_v2  ;;  %v4087_v25 = vadd.f32 %v4039_v18, %v9409_v36  ;;  %v3058_v8 = vadd.f32 %v2954_v30, %v9410_v13  ;;  %v3301_v45 = vsel %vm3216_vm12, %v3298_v5, %v3300_v49  ;;  %v9420_v15 = vld [vmem:[#allocation3_spill] sm:$0xff]  ;;  %v9421_v18 = vld [vmem:[#allocation2_spill] sm:$0xff] }
 0x3a9   :  { %v3108_v61 = vmax.f32 %v9408_v50, %v3059_v12  ;;  %v3940_v34 = vadd.f32 %v3840_v0, %v3574_v17  ;;  %v4133_v32 = vmax.f32 %v3985_v28, %v4084_v14  ;;  %v3697_v46 = vadd.f32 %v3648_v63, %v9390_v21  ;;  %v9415_v21 = vld [vmem:[#allocation147_spill] sm:$0xff]  ;;  %v9422_v2 = vld [vmem:[#allocation226_spill] sm:$0xff] }
 0x3aa   :  { %v3647_v51 = vadd.f32 %v3569_v7, %v3301_v45  ;;  %v3838_v48 = vsel %vm3753_vm13, %v3835_v26, %v3837_v42  ;;  %v9413_v41 = vmax.f32 %v9411_v24, %v9412_v47  ;;  %v4038_v19 = vadd.f32 %v3569_v7, %v2954_v30  ;;  %v9419_v42 = vld [vmem:[#allocation102_spill] sm:$0xff]  ;;  %v9423_v30 = vld [vmem:[#allocation224_spill] sm:$0xff]  ;;  %v9430_v24 = vld [vmem:[#allocation151_spill] sm:$0xff] }
 0x3ab   :  { %v3939_v59 = vadd.f32 %v3838_v48, %v3569_v7  ;;  %v2957_v22 = vrot.slane %v9414_v38, 7  ;;  %4182 = vst.msk [vmem:[%s8524_s8 + $0x138] sm:$0xff] %vm789_vm6, %v4133_v32  ;;  %v3746_v5 = vmax.f32 %v3209_v23, %v3697_v46  ;;  %v2959_v39 = vrot.slane %v9415_v21, 7  ;;  %v9428_v32 = vld [vmem:[#allocation217_spill] sm:$0xff] }
 0x3ac   :  { %v3107_v43 = vmax.f32 %v9413_v41, %v3058_v8  ;;  %v3696_v52 = vadd.f32 %v3647_v51, %v9395_v55  ;;  %v3211_v26 = vmax.f32 %v3108_v61, %v9416_v1  ;;  %v4086_v16 = vadd.f32 %v4038_v19, %v9417_v62  ;;  %v9418_v55 = vld [vmem:[#allocation96_spill] sm:$0xff]  ;;  %v9426_v61 = vld [vmem:[#allocation97_spill] sm:$0xff]  ;;  %v3594_v51 = vpop.permute.xlu1 %3593 }
 0x3ad   :  { %v3304_v20 = vrot.slane %v9414_v38, 5  ;;  %v3306_v31 = vrot.slane %v9415_v21, 5  ;;  %v3841_v57 = vrot.slane %v9414_v38, 6  ;;  %v3988_v53 = vmax.f32 %v3746_v5, %v3940_v34  ;;  %v9427_v34 = vld [vmem:[#allocation47_spill] sm:$0xff]  ;;  %v9432_v41 = vld [vmem:[#allocation216_spill] sm:$0xff] }
 0x3ae   :  { %v3745_v10 = vmax.f32 %v3208_v60, %v3696_v52  ;;  %v2960_v3 = vsel %vm2867_vm11, %v2957_v22, %v2959_v39  ;;  %v3843_v29 = vrot.slane %v9415_v21, 6  ;;  %v2958_v23 = vsel %vm2867_vm11, %v2955_v33, %v2957_v22 }
 0x3af   :  { %v3061_v40 = vadd.f32 %v2960_v3, %v9418_v55  ;;  %v3307_v14 = vsel %vm3216_vm12, %v3304_v20, %v3306_v31  ;;  %v4041_v27 = vadd.f32 %v3584_v4, %v2960_v3  ;;  %v4136_v49 = vmax.f32 %v3988_v53, %v4087_v25  ;;  %v3589_v53 = vpop.permute.xlu0 %3588 }
 0x3b0   :  { %v3987_v44 = vmax.f32 %v3745_v10, %v3939_v59  ;;  %v3650_v17 = vadd.f32 %v3584_v4, %v3307_v14  ;;  %v3844_v56 = vsel %vm3753_vm13, %v3841_v57, %v3843_v29  ;;  %v2865_v12 = vmax.f32 %v9420_v15, %v9419_v42  ;;  %v9438_v42 = vld [vmem:[#allocation49_spill] sm:$0xff] }
 0x3b1   :  { %v8436_v11 = vadd.f32 %v9422_v2, %v9421_v18  ;;  %v9425_v60 = vmax.f32 %v9423_v30, %v9424_v6  ;;  %v3942_v9 = vadd.f32 %v3844_v56, %v3584_v4  ;;  %4185 = vst.msk [vmem:[%s8524_s8 + $0x150] sm:$0xff] %vm789_vm6, %v4136_v49  ;;  %v3060_v63 = vadd.f32 %v2958_v23, %v9426_v61  ;;  %v3604_v30 = vpop.permute.xlu1 %3603 }
 0x3b2   :  { %v4135_v33 = vmax.f32 %v3987_v44, %v4086_v16  ;;  %v3699_v50 = vadd.f32 %v3650_v17, %v9404_v37  ;;  %v3305_v0 = vsel %vm3216_vm12, %v3302_v54, %v3304_v20  ;;  %v3210_v36 = vmax.f32 %v3107_v43, %v9427_v34  ;;  %v9429_v37 = vld [vmem:[#allocation148_spill] sm:$0xff]  ;;  %v9431_v54 = vld [vmem:[#allocation215_spill] sm:$0xff]  ;;  %v9435_v16 = vld [vmem:[#allocation98_spill] sm:$0xff] }
 0x3b3   :  { %v3110_v28 = vmax.f32 %v9425_v60, %v3061_v40  ;;  %v3649_v25 = vadd.f32 %v3579_v35, %v3305_v0  ;;  %v3842_v7 = vsel %vm3753_vm13, %v3839_v58, %v3841_v57  ;;  %v4040_v8 = vadd.f32 %v3579_v35, %v2958_v23  ;;  %v9437_v17 = vld [vmem:[#allocation99_spill] sm:$0xff] }
 0x3b4   :  { %4184 = vst.msk [vmem:[%s8524_s8 + $0x148] sm:$0xff] %vm789_vm6, %v4135_v33  ;;  %v3748_v45 = vmax.f32 %v3211_v26, %v3699_v50  ;;  %v4089_v46 = vadd.f32 %v4041_v27, %v9428_v32  ;;  %v2961_v48 = vrot.slane %v9429_v37, 7  ;;  %v2963_v47 = vrot.slane %v9430_v24, 7  ;;  %v9434_v26 = vld [vmem:[#allocation46_spill] sm:$0xff] }
 0x3b5   :  { %v9433_v43 = vmax.f32 %v9431_v54, %v9432_v41  ;;  %v3698_v58 = vadd.f32 %v3649_v25, %v9410_v13  ;;  %v3941_v19 = vadd.f32 %v3842_v7, %v3579_v35  ;;  %v3308_v38 = vrot.slane %v9429_v37, 5  ;;  %v9436_v13 = vld [vmem:[#allocation225_spill] sm:$0xff]  ;;  %v9440_v35 = vld [vmem:[#allocation100_spill] sm:$0xff]  ;;  %v9442_v25 = vld [vmem:[#allocation223_spill] sm:$0xff] }
 0x3b6   :  { %v3990_v22 = vmax.f32 %v3748_v45, %v3942_v9  ;;  %v2964_v5 = vsel %vm2867_vm11, %v2961_v48, %v2963_v47  ;;  %v3310_v52 = vrot.slane %v9430_v24, 5  ;;  %v3845_v21 = vrot.slane %v9429_v37, 6  ;;  %v9439_v9 = vld [vmem:[#allocation221_spill] sm:$0xff]  ;;  %v9443_v45 = vld [vmem:[#allocation222_spill] sm:$0xff] }
 0x3b7   :  { %v3109_v59 = vmax.f32 %v9433_v43, %v3060_v63  ;;  %v3747_v1 = vmax.f32 %v3210_v36, %v3698_v58  ;;  %v4088_v62 = vadd.f32 %v4040_v8, %v9434_v26  ;;  %v3063_v20 = vadd.f32 %v2964_v5, %v9435_v16  ;;  %v3599_v36 = vpop.permute.xlu0 %3598  ;;  %v9445_v26 = vld [vmem:[#allocation51_spill] sm:$0xff] }
 0x3b8   :  { %v3847_v57 = vrot.slane %v9430_v24, 6  ;;  %v4138_v10 = vmax.f32 %v3990_v22, %v4089_v46  ;;  %v3213_v4 = vmax.f32 %v3110_v28, %v9436_v13  ;;  %v3311_v3 = vsel %vm3216_vm12, %v3308_v38, %v3310_v52  ;;  %v9444_v24 = vld [vmem:[#allocation48_spill] sm:$0xff] }
 0x3b9   :  { %v2962_v40 = vsel %vm2867_vm11, %v2959_v39, %v2961_v48  ;;  %v3989_v14 = vmax.f32 %v3747_v1, %v3941_v19  ;;  %v3112_v27 = vmax.f32 %v2865_v12, %v3063_v20  ;;  %v3652_v23 = vadd.f32 %v3594_v51, %v3311_v3 }
 0x3ba   :  { %v3848_v49 = vsel %vm3753_vm13, %v3845_v21, %v3847_v57  ;;  %4187 = vst.msk [vmem:[%s8524_s8 + $0x160] sm:$0xff] %vm789_vm6, %v4138_v10  ;;  %v4043_v44 = vadd.f32 %v3594_v51, %v2964_v5  ;;  %v3062_v56 = vadd.f32 %v2962_v40, %v9437_v17  ;;  %v3212_v15 = vmax.f32 %v3109_v59, %v9438_v42 }
 0x3bb   :  { %v3309_v2 = vsel %vm3216_vm12, %v3306_v31, %v3308_v38  ;;  %v4137_v6 = vmax.f32 %v3989_v14, %v4088_v62  ;;  %v3701_v39 = vadd.f32 %v3652_v23, %v9418_v55  ;;  %v3846_v60 = vsel %vm3753_vm13, %v3843_v29, %v3845_v21 }
 0x3bc   :  { %v3651_v12 = vadd.f32 %v3589_v53, %v3309_v2  ;;  %v3944_v28 = vadd.f32 %v3848_v49, %v3594_v51  ;;  %v9441_v33 = vmax.f32 %v9439_v9, %v9440_v35  ;;  %v4042_v63 = vadd.f32 %v3589_v53, %v2962_v40 }
 0x3bd   :  { %v3215_v0 = vmax.f32 %v3112_v27, %v8436_v11  ;;  %4186 = vst.msk [vmem:[%s8524_s8 + $0x158] sm:$0xff] %vm789_vm6, %v4137_v6  ;;  %v3750_v31 = vmax.f32 %v3213_v4, %v3701_v39  ;;  %v3654_v55 = vadd.f32 -1e+30, %v3604_v30  ;;  %v3360_v29 = vsel %vm3216_vm12, %v3310_v52, -1e+30 }
 0x3be   :  { %v3111_v50 = vmax.f32 %v9441_v33, %v3062_v56  ;;  %v3700_v34 = vadd.f32 %v3651_v12, %v9426_v61  ;;  %v4091_v7 = vadd.f32 %v4043_v44, %v9442_v25  ;;  %v3943_v8 = vadd.f32 %v3846_v60, %v3589_v53 }
 0x3bf   :  { %v3653_v46 = vadd.f32 %v3599_v36, %v3360_v29  ;;  %v3992_v51 = vmax.f32 %v3750_v31, %v3944_v28  ;;  %v3703_v37 = vadd.f32 %v3654_v55, %v9435_v16  ;;  %v3897_v48 = vsel %vm3753_vm13, %v3847_v57, -1e+30 }
 0x3c0   :  { %v3214_v32 = vmax.f32 %v3111_v50, %v9443_v45  ;;  %v3749_v11 = vmax.f32 %v3212_v15, %v3700_v34  ;;  %v4090_v54 = vadd.f32 %v4042_v63, %v9444_v24  ;;  %v3996_v41 = vsel %vm2867_vm11, %v2963_v47, -1e+30 }
 0x3c1   :  { %v3702_v61 = vadd.f32 %v3653_v46, %v9437_v17  ;;  %v4140_v43 = vmax.f32 %v3992_v51, %v4091_v7  ;;  %v3752_v58 = vmax.f32 %v3215_v0, %v3703_v37  ;;  %v4044_v19 = vadd.f32 %v3996_v41, %v3599_v36 }
 0x3c2   :  { %v3991_v59 = vmax.f32 %v3749_v11, %v3943_v8  ;;  %v3945_v22 = vadd.f32 %v3897_v48, %v3599_v36  ;;  %v4093_v21 = vadd.f32 %v3654_v55, %v9421_v18 }
 0x3c3   :  { %v3751_v38 = vmax.f32 %v3214_v32, %v3702_v61  ;;  %4189 = vst.msk [vmem:[%s8524_s8 + $0x170] sm:$0xff] %vm789_vm6, %v4140_v43  ;;  %v3994_v52 = vmax.f32 %v3752_v58, %v3654_v55  ;;  %v4092_v62 = vadd.f32 %v4044_v19, %v9445_v26 }
 0x3c4   :  { %v4139_v5 = vmax.f32 %v3991_v59, %v4090_v54 }
 0x3c5   :  { %v3993_v1 = vmax.f32 %v3751_v38, %v3945_v22  ;;  %v4142_v47 = vmax.f32 %v3994_v52, %v4093_v21 }
 0x3c6   :  { %4188 = vst.msk [vmem:[%s8524_s8 + $0x168] sm:$0xff] %vm789_vm6, %v4139_v5 }
 0x3c7   :  { %v4141_v16 = vmax.f32 %v3993_v1, %v4092_v62  ;;  %4191 = vst.msk [vmem:[%s8524_s8 + $0x180] sm:$0xff] %vm789_vm6, %v4142_v47 }
 0x3c9   :  { %4190 = vst.msk [vmem:[%s8524_s8 + $0x178] sm:$0xff] %vm789_vm6, %v4141_v16 }

// kernel: mnist_forward.4
= control target key start
LH: loop header
LB: loop body
LE: loop exit
PB: predicated region body
PF: predicated region fallthrough
CT: control target
= control target key end

     0   :  { %v1237_v0 = vmov 0.0   ;;  %vm1238_vm0 = vmmov 0   ;;  %v1239_v2 = vmov 0   ;;  %vm144_vm1 = vcmask 654336   ;;  %s2523_s1 = inlined_call_operand.vmem [shape: bf16[80,64], index: 1, kind: input, shape index: {}]   ;;  %s2524_s4 = inlined_call_operand.vmem [shape: f32[98,1], index: 4, kind: input, shape index: {}]   ;;  %s2525_s0 = inlined_call_operand.vmem [shape: f32[98,80], index: 0, kind: input, shape index: {}]   ;;  %s2526_s6 = inlined_call_operand.vmem [shape: f32[98,1], index: 6, kind: input, shape index: {}]   ;;  %s2527_s7 = inlined_call_operand.vmem [shape: f32[98,1], index: 7, kind: input, shape index: {}]   ;;  %s2528_s5 = inlined_call_operand.vmem [shape: f32[98,1], index: 5, kind: input, shape index: {}]   ;;  %s2529_s2 = inlined_call_operand.vmem [shape: f32[1,64], index: 2, kind: input, shape index: {}]   ;;  %s2530_s3 = inlined_call_operand.vmem [shape: f32[1,64], index: 3, kind: input, shape index: {}]   ;;  %s2531_s8 = inlined_call_operand.vmem [shape: f32[98,64], index: 8, kind: output, shape index: {}]  }
   0x1   :  { %1177 = vmatprep.subr.bf16.mxu0 %v1237_v0  ;;  %v1230_v1 = vld [vmem:[%s2523_s1] sm:$0xff]   ;;  %1215 = vmatprep.subr.bf16.mxu1 %v1237_v0  ;;  %v1231_v3 = vld [vmem:[%s2523_s1 + $0x8] sm:$0xff]   ;;  %v1232_v4 = vld [vmem:[%s2523_s1 + $0x10] sm:$0xff]   ;;  %vm293_vm3 = vcmask 523264  }
   0x2   :  { %1187 = vmatprep.mubr.msk.bf16.mxu0 %vm1238_vm0, %v1237_v0  ;;  %1229 = vset.pattern.permute.xlu1 %v1239_v2  ;;  %v57_v5 = vld [vmem:[%s2524_s4 + $0x10] sm:$0xff]  ;;  %v55_v6 = vld [vmem:[%s2524_s4] sm:$0xff]  ;;  %v58_v7 = vld [vmem:[%s2524_s4 + $0x18] sm:$0xff] }
   0x3   :  { %1178 = vmatpush3.bf16.msra.mxu0 %v1230_v1  ;;  %1220 = vmatpush3.bf16.msra.mxu1 %v1230_v1  ;;  %v56_v8 = vld [vmem:[%s2524_s4 + $0x8] sm:$0xff]  ;;  %v1233_v9 = vld [vmem:[%s2523_s1 + $0x18] sm:$0xff]   ;;  %v1234_v10 = vld [vmem:[%s2523_s1 + $0x20] sm:$0xff]  }
   0x4   :  { %1179 = vmatprep.subr.bf16.mxu0 %v1237_v0  ;;  %1216 = vmatprep.subr.bf16.mxu1 %v1237_v0  ;;  %v30_v11 = vld [vmem:[%s2525_s0] sm:$0xff]  ;;  %v60_v12 = vld [vmem:[%s2524_s4 + $0x28] sm:$0xff]  ;;  %v62_v19 = vld [vmem:[%s2524_s4 + $0x38] sm:$0xff] }
   0x5   :  { %1228 = vset.pattern.permute.xlu0 %v1239_v2  ;;  %1203 = vmatprep.mubr.msk.bf16.mxu1 %vm1238_vm0, %v1237_v0  ;;  %v59_v13 = vld [vmem:[%s2524_s4 + $0x20] sm:$0xff]  ;;  %v31_v14 = vld [vmem:[%s2525_s0 + $0x8] sm:$0xff]  ;;  %v61_v20 = vld [vmem:[%s2524_s4 + $0x30] sm:$0xff] }
   0x6   :  { %451 = vperm.xlu1 %1229, %v57_v5   ;;  %441 = vperm.xlu0 %1228, %v55_v6   ;;  %v38_v15 = vld [vmem:[%s2525_s0 + $0x40] sm:$0xff]  ;;  %v39_v16 = vld [vmem:[%s2525_s0 + $0x48] sm:$0xff]  ;;  %v107_v17 = vpack.c.bf16 %v31_v14, %v30_v11  ;;  %v32_v21 = vld [vmem:[%s2525_s0 + $0x10] sm:$0xff] }
   0x7   :  { %1180 = vmatpush3.bf16.msra.mxu0 %v1231_v3  ;;  %1221 = vmatpush3.bf16.msra.mxu1 %v1231_v3  ;;  %v111_v18 = vpack.c.bf16 %v39_v16, %v38_v15  ;;  %v64_v22 = vld [vmem:[%s2524_s4 + $0x48] sm:$0xff]  ;;  %v63_v23 = vld [vmem:[%s2524_s4 + $0x40] sm:$0xff]  ;;  %v33_v24 = vld [vmem:[%s2525_s0 + $0x18] sm:$0xff] }
   0x8   :  { %1181 = vmatprep.subr.bf16.mxu0 %v1237_v0  ;;  %1217 = vmatprep.subr.bf16.mxu1 %v1237_v0  ;;  %v40_v25 = vld [vmem:[%s2525_s0 + $0x50] sm:$0xff]  ;;  %v41_v26 = vld [vmem:[%s2525_s0 + $0x58] sm:$0xff]  ;;  %v108_v27 = vpack.c.bf16 %v33_v24, %v32_v21  ;;  %v81_v31 = vld [vmem:[%s2526_s6] sm:$0xff] }
   0x9   :  { %v112_v28 = vpack.c.bf16 %v41_v26, %v40_v25  ;;  %v66_v29 = vld [vmem:[%s2524_s4 + $0x58] sm:$0xff]  ;;  %v65_v30 = vld [vmem:[%s2524_s4 + $0x50] sm:$0xff]  ;;  %v67_v32 = vld [vmem:[%s2524_s4 + $0x60] sm:$0x3] }
   0xa   :  { %456 = vperm.xlu1 %1229, %v58_v7   ;;  %446 = vperm.xlu0 %1228, %v56_v8   ;;  %v34_v33 = vld [vmem:[%s2525_s0 + $0x20] sm:$0xff]  ;;  %v35_v34 = vld [vmem:[%s2525_s0 + $0x28] sm:$0xff]  ;;  %v83_v38 = vld [vmem:[%s2526_s6 + $0x10] sm:$0xff] }
   0xb   :  { %1182 = vmatpush3.bf16.msra.mxu0 %v1232_v4  ;;  %1222 = vmatpush3.bf16.msra.mxu1 %v1232_v4  ;;  %v42_v35 = vld [vmem:[%s2525_s0 + $0x60] sm:$0x3]  ;;  %v109_v36 = vpack.c.bf16 %v35_v34, %v34_v33  ;;  %v82_v39 = vld [vmem:[%s2526_s6 + $0x8] sm:$0xff]  ;;  %v84_v41 = vld [vmem:[%s2526_s6 + $0x18] sm:$0xff] }
   0xc   :  { %1183 = vmatprep.subr.bf16.mxu0 %v1237_v0  ;;  %1218 = vmatprep.subr.bf16.mxu1 %v1237_v0  ;;  %v113_v37 = vpack.c.bf16 %v42_v35, %v42_v35  ;;  %v85_v40 = vld [vmem:[%s2526_s6 + $0x20] sm:$0xff]  ;;  %v36_v42 = vld [vmem:[%s2525_s0 + $0x30] sm:$0xff]  ;;  %v37_v43 = vld [vmem:[%s2525_s0 + $0x38] sm:$0xff] }
   0xd   :  { %v110_v44 = vpack.c.bf16 %v37_v43, %v36_v42  ;;  %v87_v45 = vld [vmem:[%s2526_s6 + $0x30] sm:$0xff]  ;;  %v86_v46 = vld [vmem:[%s2526_s6 + $0x28] sm:$0xff]  ;;  %v89_v47 = vld [vmem:[%s2526_s6 + $0x40] sm:$0xff] }
   0xe   :  { %466 = vperm.xlu1 %1229, %v60_v12   ;;  %461 = vperm.xlu0 %1228, %v59_v13   ;;  %v88_v48 = vld [vmem:[%s2526_s6 + $0x38] sm:$0xff]  ;;  %v91_v49 = vld [vmem:[%s2526_s6 + $0x50] sm:$0xff]  ;;  %v90_v50 = vld [vmem:[%s2526_s6 + $0x48] sm:$0xff] }
   0xf   :  { %1184 = vmatpush3.bf16.msra.mxu0 %v1233_v9  ;;  %1223 = vmatpush3.bf16.msra.mxu1 %v1233_v9  ;;  %v93_v51 = vld [vmem:[%s2526_s6 + $0x60] sm:$0x3]  ;;  %v92_v52 = vld [vmem:[%s2526_s6 + $0x58] sm:$0xff]  ;;  %v95_v53 = vld [vmem:[%s2527_s7 + $0x8] sm:$0xff] }
  0x10   :  { %1185 = vmatprep.subr.bf16.mxu0 %v1237_v0  ;;  %1219 = vmatprep.subr.bf16.mxu1 %v1237_v0  ;;  %v94_v54 = vld [vmem:[%s2527_s7] sm:$0xff]  ;;  %v97_v55 = vld [vmem:[%s2527_s7 + $0x18] sm:$0xff]  ;;  %v96_v56 = vld [vmem:[%s2527_s7 + $0x10] sm:$0xff] }
  0x11   :  { %v99_v57 = vld [vmem:[%s2527_s7 + $0x28] sm:$0xff]  ;;  %v98_v58 = vld [vmem:[%s2527_s7 + $0x20] sm:$0xff]  ;;  %v101_v59 = vld [vmem:[%s2527_s7 + $0x38] sm:$0xff] }
  0x12   :  { %476 = vperm.xlu1 %1229, %v62_v19   ;;  %471 = vperm.xlu0 %1228, %v61_v20   ;;  %v100_v60 = vld [vmem:[%s2527_s7 + $0x30] sm:$0xff]  ;;  %v103_v61 = vld [vmem:[%s2527_s7 + $0x48] sm:$0xff]  ;;  %v102_v62 = vld [vmem:[%s2527_s7 + $0x40] sm:$0xff] }
  0x13   :  { %1186 = vmatpush3.bf16.msra.mxu0 %v1234_v10  ;;  %1224 = vmatpush3.bf16.msra.mxu1 %v1234_v10  ;;  %v105_v63 = vld [vmem:[%s2527_s7 + $0x58] sm:$0xff]  ;;  %v68_v1 = vld [vmem:[%s2528_s5] sm:$0xff]  ;;  %v70_v3 = vld [vmem:[%s2528_s5 + $0x10] sm:$0xff] }
  0x14   :  { %v106_v2 = vld [vmem:[%s2527_s7 + $0x60] sm:$0x3]  ;;  %v69_v4 = vld [vmem:[%s2528_s5 + $0x8] sm:$0xff]  ;;  %v71_v6 = vld [vmem:[%s2528_s5 + $0x18] sm:$0xff] }
  0x15   :  { %v72_v5 = vld [vmem:[%s2528_s5 + $0x20] sm:$0xff]  ;;  %v74_v7 = vld [vmem:[%s2528_s5 + $0x30] sm:$0xff]  ;;  %v73_v8 = vld [vmem:[%s2528_s5 + $0x28] sm:$0xff] }
  0x16   :  { %1188 = vmatmul.mubr.msk.bf16.vlgmr.msra.gmra.mrb[0].mxu0 %vm144_vm1, %v107_v17  ;;  %1204 = vmatmul.mubr.msk.bf16.vlgmr.msra.gmra.mrb[0].mxu1 %vm144_vm1, %v111_v18  ;;  %v76_v9 = vld [vmem:[%s2528_s5 + $0x40] sm:$0xff]  ;;  %v75_v10 = vld [vmem:[%s2528_s5 + $0x38] sm:$0xff]  ;;  %v78_v11 = vld [vmem:[%s2528_s5 + $0x50] sm:$0xff] }
  0x17   :  { %1191 = vmatprep.mubr.msk.bf16.mxu0 %vm1238_vm0, %v1237_v0  ;;  %1207 = vmatprep.mubr.msk.bf16.mxu1 %vm1238_vm0, %v1237_v0  ;;  %v77_v12 = vld [vmem:[%s2528_s5 + $0x48] sm:$0xff]  ;;  %v80_v13 = vld [vmem:[%s2528_s5 + $0x60] sm:$0x3]  ;;  %v79_v14 = vld [vmem:[%s2528_s5 + $0x58] sm:$0xff] }
  0x18   :  { %486 = vperm.xlu1 %1229, %v64_v22   ;;  %481 = vperm.xlu0 %1228, %v63_v23  }
  0x1c   :  { %496 = vperm.xlu1 %1229, %v66_v29   ;;  %491 = vperm.xlu0 %1228, %v65_v30  }
  0x1e   :  { %1192 = vmatmul.mubr.msk.bf16.gmra.mrb[4].mxu0 %vm144_vm1, %v108_v27  ;;  %1208 = vmatmul.mubr.msk.bf16.gmra.mrb[4].mxu1 %vm144_vm1, %v112_v28 }
  0x1f   :  { %1195 = vmatprep.mubr.msk.bf16.mxu0 %vm1238_vm0, %v1237_v0  ;;  %1211 = vmatprep.mubr.msk.bf16.mxu1 %vm1238_vm0, %v1237_v0 }
  0x20   :  { %519 = vperm.xlu1 %1229, %v81_v31   ;;  %501 = vperm.xlu0 %1228, %v67_v32  }
  0x24   :  { %529 = vperm.xlu1 %1229, %v83_v38   ;;  %524 = vperm.xlu0 %1228, %v82_v39  }
  0x26   :  { %1196 = vmatmul.mubr.msk.bf16.gmra.mrb[8].mxu0 %vm144_vm1, %v109_v36  ;;  %1212 = vmatmul.mubr.msk.bf16.gmra.mrb[8].mxu1 %vm144_vm1, %v113_v37 }
  0x27   :  { %1199 = vmatprep.mubr.msk.bf16.mxu0 %vm1238_vm0, %v1237_v0  ;;  %v104_v0 = vld [vmem:[%s2527_s7 + $0x50] sm:$0xff]  ;;  %vm317_vm0 = vcmask 517120  }
  0x28   :  { %539 = vperm.xlu1 %1229, %v85_v40   ;;  %534 = vperm.xlu0 %1228, %v84_v41  }
  0x2c   :  { %549 = vperm.xlu1 %1229, %v87_v45   ;;  %544 = vperm.xlu0 %1228, %v86_v46  }
  0x2e   :  { %1200 = vmatmul.mubr.msk.bf16.gmra.mrb[12].mxu0 %vm144_vm1, %v110_v44  ;;  %vm620_vm1 = vcmask 1046528  }
  0x30   :  { %559 = vperm.xlu1 %1229, %v89_v47   ;;  %554 = vperm.xlu0 %1228, %v88_v48  }
  0x34   :  { %569 = vperm.xlu1 %1229, %v91_v49   ;;  %564 = vperm.xlu0 %1228, %v90_v50  }
  0x38   :  { %579 = vperm.xlu1 %1229, %v93_v51   ;;  %574 = vperm.xlu0 %1228, %v92_v52  }
  0x3c   :  { %742 = vperm.xlu1 %1229, %v95_v53   ;;  %737 = vperm.xlu0 %1228, %v94_v54  }
  0x40   :  { %752 = vperm.xlu1 %1229, %v97_v55   ;;  %747 = vperm.xlu0 %1228, %v96_v56  }
  0x44   :  { %762 = vperm.xlu1 %1229, %v99_v57   ;;  %757 = vperm.xlu0 %1228, %v98_v58  }
  0x48   :  { %772 = vperm.xlu1 %1229, %v101_v59   ;;  %767 = vperm.xlu0 %1228, %v100_v60  }
  0x4c   :  { %782 = vperm.xlu1 %1229, %v103_v61   ;;  %777 = vperm.xlu0 %1228, %v102_v62  }
  0x50   :  { %792 = vperm.xlu1 %1229, %v105_v63   ;;  %787 = vperm.xlu0 %1228, %v104_v0  }
  0x54   :  { %966 = vperm.xlu1 %1229, %v68_v1   ;;  %797 = vperm.xlu0 %1228, %v106_v2  }
  0x58   :  { %976 = vperm.xlu1 %1229, %v70_v3   ;;  %971 = vperm.xlu0 %1228, %v69_v4  }
  0x5c   :  { %986 = vperm.xlu1 %1229, %v72_v5   ;;  %981 = vperm.xlu0 %1228, %v71_v6  }
  0x60   :  { %996 = vperm.xlu1 %1229, %v74_v7   ;;  %991 = vperm.xlu0 %1228, %v73_v8  }
  0x64   :  { %1006 = vperm.xlu1 %1229, %v76_v9   ;;  %1001 = vperm.xlu0 %1228, %v75_v10  }
  0x68   :  { %1016 = vperm.xlu1 %1229, %v78_v11   ;;  %1011 = vperm.xlu0 %1228, %v77_v12  }
  0x6c   :  { %1026 = vperm.xlu1 %1229, %v80_v13   ;;  %1021 = vperm.xlu0 %1228, %v79_v14  }
  0x85   :  { %v1526_v15 = vpop.permute.xlu1 %451  ;;  %v1540_v22 = vpop.permute.xlu0 %441 }
  0x89   :  { %v1528_v16 = vpop.permute.xlu1 %456  ;;  %v1544_v24 = vpop.permute.xlu0 %446 }
  0x8d   :  { %v1530_v17 = vpop.permute.xlu1 %466  ;;  %v1560_v40 = vpop.permute.xlu0 %461 }
  0x91   :  { %v1532_v18 = vpop.permute.xlu1 %476  ;;  %v1576_v58 = vpop.permute.xlu0 %471 }
  0x97   :  { %v1534_v19 = vpop.permute.xlu1 %486  ;;  %v1588_v12 = vpop.permute.xlu0 %481 }
  0x9b   :  { %v1536_v20 = vpop.permute.xlu1 %496 }
  0x9f   :  { %v1538_v21 = vpop.permute.xlu1 %519 }
  0xa0   :  { %2632 = vst [vmem:[#allocation2_spill] sm:$0xff] %v1538_v21 }
  0xa3   :  { %v1542_v23 = vpop.permute.xlu1 %529 }
  0xa4   :  { %2633 = vst [vmem:[#allocation3_spill] sm:$0xff] %v1542_v23 }
  0xa7   :  { %v1546_v25 = vpop.permute.xlu1 %539 }
  0xa8   :  { %2634 = vst [vmem:[#allocation4_spill] sm:$0xff] %v1546_v25 }
  0xab   :  { %v1562_v41 = vpop.permute.xlu1 %549 }
  0xac   :  { %2635 = vst [vmem:[#allocation5_spill] sm:$0xff] %v1562_v41 }
  0xaf   :  { %v1578_v59 = vpop.permute.xlu1 %559 }
  0xb0   :  { %2636 = vst [vmem:[#allocation6_spill] sm:$0xff] %v1578_v59 }
  0xb3   :  { %v1590_v13 = vpop.permute.xlu1 %569 }
  0xb4   :  { %2637 = vst [vmem:[#allocation7_spill] sm:$0xff] %v1590_v13 }
  0xe9   :  { %v200_v26 = vpop.f32.mrb[0].mxu0  ;;  %v1548_v27 = vpop.f32.mrb[0].mxu1 }
  0xea   :  { %vm254_vm2 = vcmp.ge.f32.partialorder %v200_v26, 0.0  ;;  %v267_v28 = vmul.f32 0.01, %v200_v26  ;;  %v1189_v29 = vpop.f32.mrb[1].mxu0  ;;  %v1205_v30 = vpop.f32.mrb[1].mxu1  ;;  %vm262_vm10 = vcmp.ge.f32.partialorder %v1548_v27, 0.0 }
  0xeb   :  { %v203_v31 = vpop.f32.mrb[2].mxu0  ;;  %v1550_v32 = vpop.f32.mrb[2].mxu1 }
  0xec   :  { %v1552_v33 = vsel %vm254_vm2, %v200_v26, %v267_v28  ;;  %vm255_vm4 = vcmp.ge.f32.partialorder %v203_v31, 0.0  ;;  %v268_v34 = vmul.f32 0.01, %v203_v31  ;;  %v1190_v35 = vpop.f32.mrb[3].mxu0  ;;  %v1206_v36 = vpop.f32.mrb[3].mxu1  ;;  %vm263_vm12 = vcmp.ge.f32.partialorder %v1550_v32, 0.0 }
  0xed   :  { %v294_v38 = vsel %vm293_vm3, %v1552_v33, 0.0  ;;  %v275_v28 = vmul.f32 0.01, %v1548_v27  ;;  %vm684_vm2 = vcmask 1045504  }
  0xee   :  { %v1554_v37 = vsel %vm255_vm4, %v203_v31, %v268_v34  ;;  %v276_v34 = vmul.f32 0.01, %v1550_v32  ;;  %vm827_vm4 = vcmask 1040384  }
  0xef   :  { %v295_v39 = vsel %vm293_vm3, %v1554_v37, 0.0 }
  0xf0   :  { %v296_v42 = vadd.f32 %v295_v39, %v294_v38 }
  0xf1   :  { %v208_v43 = vpop.f32.mrb[4].mxu0  ;;  %v1564_v44 = vpop.f32.mrb[4].mxu1 }
  0xf2   :  { %vm256_vm5 = vcmp.ge.f32.partialorder %v208_v43, 0.0  ;;  %v269_v45 = vmul.f32 0.01, %v208_v43  ;;  %v1193_v46 = vpop.f32.mrb[5].mxu0  ;;  %v1209_v47 = vpop.f32.mrb[5].mxu1  ;;  %vm264_vm13 = vcmp.ge.f32.partialorder %v1564_v44, 0.0 }
  0xf3   :  { %v211_v48 = vpop.f32.mrb[6].mxu0  ;;  %v1566_v49 = vpop.f32.mrb[6].mxu1  ;;  %v277_v47 = vmul.f32 0.01, %v1564_v44 }
  0xf4   :  { %v1568_v50 = vsel %vm256_vm5, %v208_v43, %v269_v45  ;;  %vm257_vm6 = vcmp.ge.f32.partialorder %v211_v48, 0.0  ;;  %v270_v51 = vmul.f32 0.01, %v211_v48  ;;  %v1194_v52 = vpop.f32.mrb[7].mxu0  ;;  %v1210_v53 = vpop.f32.mrb[7].mxu1  ;;  %v288_v45 = vsel %vm262_vm10, %v1548_v27, %v275_v28 }
  0xf5   :  { %v297_v54 = vsel %vm293_vm3, %v1568_v50, 0.0  ;;  %v1599_v43 = vpop.permute.xlu1 %579  ;;  %v289_v52 = vsel %vm263_vm12, %v1550_v32, %v276_v34  ;;  %vm265_vm14 = vcmp.ge.f32.partialorder %v1566_v49, 0.0  ;;  %vm924_vm5 = vcmask 1041408  }
  0xf6   :  { %v298_v55 = vadd.f32 %v297_v54, %v296_v42  ;;  %v1572_v56 = vsel %vm257_vm6, %v211_v48, %v270_v51  ;;  %v1597_v42 = vpop.permute.xlu0 %491  ;;  %2638 = vst [vmem:[#allocation8_spill] sm:$0xff] %v1599_v43  ;;  %v278_v54 = vmul.f32 0.01, %v1566_v49  ;;  %vm962_vm6 = vcmask 1043456  }
  0xf7   :  { %v299_v57 = vsel %vm293_vm3, %v1572_v56, 0.0 }
  0xf8   :  { %v300_v60 = vadd.f32 %v299_v57, %v298_v55  ;;  %v309_v55 = vsel %vm293_vm3, %v288_v45, 0.0  ;;  %v290_v57 = vsel %vm264_vm13, %v1564_v44, %v277_v47  ;;  %v291_v32 = vsel %vm265_vm14, %v1566_v49, %v278_v54 }
  0xf9   :  { %v216_v61 = vpop.f32.mrb[8].mxu0  ;;  %v248_v62 = vpop.f32.mrb[8].mxu1 }
  0xfa   :  { %vm258_vm7 = vcmp.ge.f32.partialorder %v216_v61, 0.0  ;;  %v271_v63 = vmul.f32 0.01, %v216_v61  ;;  %v1197_v0 = vpop.f32.mrb[9].mxu0  ;;  %v1213_v1 = vpop.f32.mrb[9].mxu1  ;;  %vm266_vm15 = vcmp.ge.f32.partialorder %v248_v62, 0.0 }
  0xfb   :  { %v219_v2 = vpop.f32.mrb[10].mxu0  ;;  %v251_v3 = vpop.f32.mrb[10].mxu1 }
  0xfc   :  { %v1580_v4 = vsel %vm258_vm7, %v216_v61, %v271_v63  ;;  %vm259_vm8 = vcmp.ge.f32.partialorder %v219_v2, 0.0  ;;  %v272_v5 = vmul.f32 0.01, %v219_v2  ;;  %v1198_v6 = vpop.f32.mrb[11].mxu0  ;;  %v1214_v7 = vpop.f32.mrb[11].mxu1  ;;  %v311_v61 = vsel %vm293_vm3, %v289_v52, 0.0 }
  0xfd   :  { %v301_v8 = vsel %vm293_vm3, %v1580_v4, 0.0  ;;  %v1611_v63 = vpop.permute.xlu0 %501  ;;  %v1613_v0 = vpop.permute.xlu1 %742  ;;  %v315_v6 = vsel %vm293_vm3, %v291_v32, 0.0  ;;  %vm1068_vm7 = vcmask 1042432  }
  0xfe   :  { %v302_v9 = vadd.f32 %v301_v8, %v300_v60  ;;  %v1584_v10 = vsel %vm259_vm8, %v219_v2, %v272_v5  ;;  %v279_v60 = vmul.f32 0.01, %v248_v62  ;;  %2639 = vst [vmem:[#allocation9_spill] sm:$0xff] %v1613_v0  ;;  %v313_v2 = vsel %vm293_vm3, %v290_v57, 0.0 }
  0xff   :  { %v303_v11 = vsel %vm293_vm3, %v1584_v10, 0.0 }
 0x100   :  { %v304_v14 = vadd.f32 %v303_v11, %v302_v9  ;;  %v292_v5 = vsel %vm266_vm15, %v248_v62, %v279_v60 }
 0x101   :  { %v224_v26 = vpop.f32.mrb[12].mxu0  ;;  %v318_v7 = vsel %vm317_vm0, %v292_v5, 0.0  ;;  %v1619_v8 = vpop.permute.xlu0 %524 }
 0x102   :  { %vm260_vm9 = vcmp.ge.f32.partialorder %v224_v26, 0.0  ;;  %v273_v29 = vmul.f32 0.01, %v224_v26  ;;  %v1201_v30 = vpop.f32.mrb[13].mxu0  ;;  %2640 = vst [vmem:[#allocation10_spill] sm:$0xff] %v1619_v8  ;;  %v1621_v9 = vpop.permute.xlu1 %752 }
 0x103   :  { %v227_v31 = vpop.f32.mrb[14].mxu0  ;;  %2641 = vst [vmem:[#allocation11_spill] sm:$0xff] %v1621_v9 }
 0x104   :  { %v286_v35 = vsel %vm260_vm9, %v224_v26, %v273_v29  ;;  %vm261_vm11 = vcmp.ge.f32.partialorder %v227_v31, 0.0  ;;  %v274_v36 = vmul.f32 0.01, %v227_v31  ;;  %v1202_v38 = vpop.f32.mrb[15].mxu0 }
 0x105   :  { %v305_v39 = vsel %vm293_vm3, %v286_v35, 0.0  ;;  %v1623_v28 = vpop.permute.xlu0 %534 }
 0x106   :  { %v306_v46 = vadd.f32 %v305_v39, %v304_v14  ;;  %v287_v48 = vsel %vm261_vm11, %v227_v31, %v274_v36  ;;  %2642 = vst [vmem:[#allocation12_spill] sm:$0xff] %v1623_v28  ;;  %v1625_v49 = vpop.permute.xlu1 %762 }
 0x107   :  { %v307_v51 = vsel %vm293_vm3, %v287_v48, 0.0  ;;  %2643 = vst [vmem:[#allocation13_spill] sm:$0xff] %v1625_v49 }
 0x108   :  { %v308_v53 = vadd.f32 %v307_v51, %v306_v46 }
 0x109   :  { %v1627_v31 = vpop.permute.xlu0 %544 }
 0x10a   :  { %v310_v27 = vadd.f32 %v309_v55, %v308_v53  ;;  %2644 = vst [vmem:[#allocation14_spill] sm:$0xff] %v1627_v31  ;;  %v1629_v34 = vpop.permute.xlu1 %772 }
 0x10b   :  { %2645 = vst [vmem:[#allocation15_spill] sm:$0xff] %v1629_v34 }
 0x10c   :  { %v312_v1 = vadd.f32 %v311_v61, %v310_v27 }
 0x10e   :  { %v314_v3 = vadd.f32 %v313_v2, %v312_v1 }
 0x110   :  { %v316_v44 = vadd.f32 %v315_v6, %v314_v3 }
 0x112   :  { %v319_v11 = vadd.f32 %v318_v7, %v316_v44 }
 0x114   :  { %v320_v14 = vrot.slane %v319_v11, 4 }
 0x116   :  { %v321_v26 = vadd.f32 %v320_v14, %v319_v11 }
 0x118   :  { %v322_v29 = vrot.slane %v321_v26, 2 }
 0x11a   :  { %v323_v30 = vadd.f32 %v322_v29, %v321_v26 }
 0x11c   :  { %v324_v62 = vrot.slane %v323_v30, 1 }
 0x11e   :  { %v325_v36 = vadd.f32 %v324_v62, %v323_v30 }
 0x120   :  { %v327_v38 = vmul.f32 0.010204081, %v325_v36 }
 0x122   :  { %v1632_v39 = vsub.f32 %v1552_v33, %v327_v38  ;;  %v1635_v46 = vsub.f32 %v1554_v37, %v327_v38  ;;  %v1638_v47 = vsub.f32 %v1568_v50, %v327_v38  ;;  %v1641_v51 = vsub.f32 %v1572_v56, %v327_v38  ;;  %v1653_v33 = vpop.permute.xlu0 %554  ;;  %v1655_v37 = vpop.permute.xlu1 %782 }
 0x123   :  { %v1644_v53 = vsub.f32 %v1580_v4, %v327_v38  ;;  %v1647_v54 = vsub.f32 %v1584_v10, %v327_v38  ;;  %v1649_v55 = vsub.f32 %v286_v35, %v327_v38  ;;  %v1651_v27 = vsub.f32 %v287_v48, %v327_v38  ;;  %2646 = vst [vmem:[#allocation16_spill] sm:$0xff] %v1653_v33 }
 0x124   :  { %2647 = vst [vmem:[#allocation17_spill] sm:$0xff] %v1655_v37  ;;  %v1657_v60 = vsub.f32 %v288_v45, %v327_v38  ;;  %v1659_v50 = vsub.f32 %v289_v52, %v327_v38  ;;  %v1661_v56 = vsub.f32 %v290_v57, %v327_v38  ;;  %v1663_v61 = vsub.f32 %v291_v32, %v327_v38 }
 0x125   :  { %v1665_v4 = vsub.f32 %v292_v5, %v327_v38  ;;  %v341_v10 = vmul.f32 %v1632_v39, %v1632_v39  ;;  %v342_v35 = vmul.f32 %v1635_v46, %v1635_v46  ;;  %v343_v48 = vmul.f32 %v1638_v47, %v1638_v47 }
 0x126   :  { %v344_v45 = vmul.f32 %v1641_v51, %v1641_v51  ;;  %v1677_v1 = vpop.permute.xlu0 %564  ;;  %v1679_v2 = vpop.permute.xlu1 %792  ;;  %v345_v3 = vmul.f32 %v1644_v53, %v1644_v53  ;;  %v346_v44 = vmul.f32 %v1647_v54, %v1647_v54  ;;  %v347_v14 = vmul.f32 %v1649_v55, %v1649_v55 }
 0x127   :  { %v354_v52 = vsel %vm293_vm3, %v341_v10, 0.0  ;;  %v355_v57 = vsel %vm293_vm3, %v342_v35, 0.0  ;;  %2648 = vst [vmem:[#allocation18_spill] sm:$0xff] %v1677_v1  ;;  %2649 = vst [vmem:[#allocation19_spill] sm:$0xff] %v1679_v2  ;;  %v357_v5 = vsel %vm293_vm3, %v343_v48, 0.0  ;;  %v348_v36 = vmul.f32 %v1651_v27, %v1651_v27 }
 0x128   :  { %v356_v32 = vadd.f32 %v355_v57, %v354_v52  ;;  %v359_v7 = vsel %vm293_vm3, %v344_v45, 0.0  ;;  %v361_v26 = vsel %vm293_vm3, %v345_v3, 0.0  ;;  %v363_v38 = vsel %vm293_vm3, %v346_v44, 0.0 }
 0x129   :  { %v349_v35 = vmul.f32 %v1657_v60, %v1657_v60  ;;  %v365_v48 = vsel %vm293_vm3, %v347_v14, 0.0  ;;  %v350_v52 = vmul.f32 %v1659_v50, %v1659_v50  ;;  %v367_v57 = vsel %vm293_vm3, %v348_v36, 0.0 }
 0x12a   :  { %v358_v6 = vadd.f32 %v357_v5, %v356_v32  ;;  %v1690_v30 = vpop.permute.xlu0 %574  ;;  %v1692_v62 = vpop.permute.xlu1 %966 }
 0x12b   :  { %2650 = vst [vmem:[#allocation20_spill] sm:$0xff] %v1690_v30  ;;  %2651 = vst [vmem:[#allocation21_spill] sm:$0xff] %v1692_v62  ;;  %v369_v44 = vsel %vm293_vm3, %v349_v35, 0.0  ;;  %v371_v14 = vsel %vm293_vm3, %v350_v52, 0.0 }
 0x12c   :  { %v360_v11 = vadd.f32 %v359_v7, %v358_v6  ;;  %v351_v6 = vmul.f32 %v1661_v56, %v1661_v56 }
 0x12e   :  { %v362_v29 = vadd.f32 %v361_v26, %v360_v11  ;;  %v1703_v3 = vpop.permute.xlu0 %737  ;;  %v1705_v5 = vpop.permute.xlu1 %976  ;;  %v352_v11 = vmul.f32 %v1663_v61, %v1663_v61  ;;  %v373_v36 = vsel %vm293_vm3, %v351_v6, 0.0 }
 0x12f   :  { %2652 = vst [vmem:[#allocation22_spill] sm:$0xff] %v1703_v3  ;;  %2653 = vst [vmem:[#allocation23_spill] sm:$0xff] %v1705_v5 }
 0x130   :  { %v364_v10 = vadd.f32 %v363_v38, %v362_v29  ;;  %v353_v29 = vmul.f32 %v1665_v4, %v1665_v4 }
 0x132   :  { %v366_v45 = vadd.f32 %v365_v48, %v364_v10  ;;  %v1716_v10 = vpop.permute.xlu0 %747  ;;  %v1718_v48 = vpop.permute.xlu1 %986 }
 0x133   :  { %2654 = vst [vmem:[#allocation24_spill] sm:$0xff] %v1716_v10  ;;  %2655 = vst [vmem:[#allocation25_spill] sm:$0xff] %v1718_v48 }
 0x134   :  { %v368_v32 = vadd.f32 %v367_v57, %v366_v45  ;;  %v375_v45 = vsel %vm293_vm3, %v352_v11, 0.0  ;;  %v377_v57 = vsel %vm317_vm0, %v353_v29, 0.0 }
 0x136   :  { %v370_v7 = vadd.f32 %v369_v44, %v368_v32  ;;  %v1722_v5 = vpop.permute.xlu0 %757  ;;  %v1724_v52 = vpop.permute.xlu1 %996 }
 0x137   :  { %2656 = vst [vmem:[#allocation26_spill] sm:$0xff] %v1722_v5  ;;  %2657 = vst [vmem:[#allocation27_spill] sm:$0xff] %v1724_v52 }
 0x138   :  { %v372_v26 = vadd.f32 %v371_v14, %v370_v7 }
 0x13a   :  { %v374_v38 = vadd.f32 %v373_v36, %v372_v26  ;;  %v1726_v6 = vpop.permute.xlu0 %767  ;;  %v1728_v26 = vpop.permute.xlu1 %1006 }
 0x13b   :  { %2658 = vst [vmem:[#allocation28_spill] sm:$0xff] %v1726_v6  ;;  %2659 = vst [vmem:[#allocation29_spill] sm:$0xff] %v1728_v26 }
 0x13c   :  { %v376_v35 = vadd.f32 %v375_v45, %v374_v38 }
 0x13e   :  { %v378_v32 = vadd.f32 %v377_v57, %v376_v35  ;;  %v1730_v11 = vpop.permute.xlu0 %777  ;;  %v1732_v38 = vpop.permute.xlu1 %1016  ;;  %v504_v57 = vadd.f32 -1e+30, %v1540_v22 }
 0x13f   :  { %2660 = vst [vmem:[#allocation30_spill] sm:$0xff] %v1730_v11  ;;  %2661 = vst [vmem:[#allocation31_spill] sm:$0xff] %v1732_v38 }
 0x140   :  { %v379_v44 = vrot.slane %v378_v32, 4 }
 0x142   :  { %v380_v7 = vadd.f32 %v379_v44, %v378_v32  ;;  %v1734_v45 = vpop.permute.xlu0 %787  ;;  %v1027_v35 = vpop.permute.xlu1 %1026 }
 0x143   :  { %2662 = vst [vmem:[#allocation32_spill] sm:$0xff] %v1734_v45  ;;  %v1737_v32 = vadd.f32 -1e+30, %v1027_v35 }
 0x144   :  { %v381_v14 = vrot.slane %v380_v7, 2 }
 0x145   :  { %2663 = vst [vmem:[#allocation33_spill] sm:$0xff] %v1737_v32 }
 0x146   :  { %v382_v62 = vadd.f32 %v381_v14, %v380_v7  ;;  %v1739_v44 = vpop.permute.xlu0 %797  ;;  %v1742_v14 = vadd.f32 %v1538_v21, %v504_v57 }
 0x147   :  { %2664 = vst [vmem:[#allocation34_spill] sm:$0xff] %v1739_v44 }
 0x148   :  { %v383_v36 = vrot.slane %v382_v62, 1 }
 0x14a   :  { %v384_v48 = vadd.f32 %v383_v36, %v382_v62  ;;  %v1746_v62 = vadd.f32 %v1737_v32, %v1599_v43 }
 0x14c   :  { %v385_v2 = vmul.f32 0.010204081, %v384_v48  ;;  %2665 = vst [vmem:[#allocation35_spill] sm:$0xff] %v1746_v62  ;;  %v1163_v48 = vld [vmem:[%s2529_s2] ss:$0 sm:$0xff] }
 0x14e   :  { %v386_v29 = vadd.f32 1e-05, %v385_v2  ;;  %v1750_v2 = vadd.f32 %v1737_v32, %v1739_v44 }
 0x150   :  { %1235 = vrsqrt.f32 %v386_v29  ;;  %2666 = vst [vmem:[#allocation36_spill] sm:$0xff] %v1750_v2 }
 0x15a   :  { %v1236_v7 = vpop.eup %1235 }
 0x15b   :  { %v388_v36 = vmul.f32 %v1236_v7, %v1632_v39  ;;  %v389_v29 = vmul.f32 %v1236_v7, %v1635_v46  ;;  %v390_v35 = vmul.f32 %v1236_v7, %v1638_v47  ;;  %v391_v57 = vmul.f32 %v1236_v7, %v1641_v51  ;;  %v1164_v47 = vld [vmem:[%s2530_s3] ss:$0 sm:$0xff] }
 0x15c   :  { %v392_v38 = vmul.f32 %v1236_v7, %v1644_v53  ;;  %v393_v62 = vmul.f32 %v1236_v7, %v1647_v54  ;;  %v394_v26 = vmul.f32 %v1236_v7, %v1649_v55  ;;  %v395_v2 = vmul.f32 %v1236_v7, %v1651_v27 }
 0x15d   :  { %v396_v32 = vmul.f32 %v1236_v7, %v1657_v60  ;;  %v397_v52 = vmul.f32 %v1236_v7, %v1659_v50  ;;  %v398_v39 = vmul.f32 %v1236_v7, %v1661_v56  ;;  %v399_v46 = vmul.f32 %v1236_v7, %v1663_v61 }
 0x15e   :  { %v400_v51 = vmul.f32 %v1236_v7, %v1665_v4  ;;  %v407_v53 = vmul.f32 %v1163_v48, %v388_v36  ;;  %v408_v54 = vmul.f32 %v1163_v48, %v389_v29  ;;  %v409_v21 = vmul.f32 %v1163_v48, %v390_v35 }
 0x15f   :  { %v410_v55 = vmul.f32 %v1163_v48, %v391_v57  ;;  %v411_v44 = vmul.f32 %v1163_v48, %v392_v38  ;;  %v412_v27 = vmul.f32 %v1163_v48, %v393_v62  ;;  %v413_v45 = vmul.f32 %v1163_v48, %v394_v26 }
 0x160   :  { %v414_v60 = vmul.f32 %v1163_v48, %v395_v2  ;;  %v415_v37 = vmul.f32 %v1163_v48, %v396_v32  ;;  %v416_v50 = vmul.f32 %v1163_v48, %v397_v52  ;;  %v417_v11 = vmul.f32 %v1163_v48, %v398_v39 }
 0x161   :  { %v418_v56 = vmul.f32 %v1163_v48, %v399_v46  ;;  %v419_v34 = vmul.f32 %v1163_v48, %v400_v51  ;;  %v1771_v61 = vadd.f32 %v1164_v47, %v407_v53  ;;  %v1773_v6 = vadd.f32 %v1164_v47, %v408_v54 }
 0x162   :  { %v1775_v49 = vadd.f32 %v1164_v47, %v409_v21  ;;  %v1777_v4 = vadd.f32 %v1164_v47, %v410_v55  ;;  %v1779_v7 = vadd.f32 %v1164_v47, %v411_v44  ;;  %v1781_v36 = vadd.f32 %v1164_v47, %v412_v27 }
 0x163   :  { %2667 = vst [vmem:[#allocation37_spill] sm:$0xff] %v1773_v6  ;;  %v1783_v38 = vadd.f32 %v1164_v47, %v413_v45  ;;  %v1785_v26 = vadd.f32 %v1164_v47, %v414_v60  ;;  %v1787_v52 = vadd.f32 %v1164_v47, %v415_v37  ;;  %v1789_v32 = vadd.f32 %v1164_v47, %v416_v50 }
 0x164   :  { %2668 = vst [vmem:[#allocation38_spill] sm:$0xff] %v1775_v49  ;;  %2669 = vst [vmem:[#allocation39_spill] sm:$0xff] %v1777_v4  ;;  %v1791_v62 = vadd.f32 %v1164_v47, %v417_v11  ;;  %v1793_v2 = vadd.f32 %v1164_v47, %v418_v56  ;;  %v1795_v21 = vadd.f32 %v1164_v47, %v419_v34 }
 0x165   :  { %2670 = vst [vmem:[#allocation40_spill] sm:$0xff] %v1779_v7  ;;  %2671 = vst [vmem:[#allocation41_spill] sm:$0xff] %v1781_v36  ;;  %v505_v44 = vadd.f32 %v1544_v24, %v1771_v61  ;;  %v506_v48 = vadd.f32 %v1526_v15, %v1773_v6  ;;  %v507_v45 = vadd.f32 %v1528_v16, %v1775_v49 }
 0x166   :  { %2672 = vst [vmem:[#allocation42_spill] sm:$0xff] %v1783_v38  ;;  %2673 = vst [vmem:[#allocation43_spill] sm:$0xff] %v1785_v26  ;;  %v508_v37 = vadd.f32 %v1560_v40, %v1777_v4  ;;  %v509_v11 = vadd.f32 %v1530_v17, %v1779_v7  ;;  %v510_v34 = vadd.f32 %v1576_v58, %v1781_v36 }
 0x167   :  { %2674 = vst [vmem:[#allocation44_spill] sm:$0xff] %v1787_v52  ;;  %2675 = vst [vmem:[#allocation45_spill] sm:$0xff] %v1789_v32  ;;  %v511_v29 = vadd.f32 %v1532_v18, %v1783_v38  ;;  %v512_v35 = vadd.f32 %v1588_v12, %v1785_v26  ;;  %v513_v57 = vadd.f32 %v1534_v19, %v1787_v52 }
 0x168   :  { %2676 = vst [vmem:[#allocation46_spill] sm:$0xff] %v1791_v62  ;;  %2677 = vst [vmem:[#allocation47_spill] sm:$0xff] %v1793_v2  ;;  %v514_v39 = vadd.f32 %v1597_v42, %v1789_v32  ;;  %v515_v46 = vadd.f32 %v1536_v20, %v1791_v62  ;;  %v516_v47 = vadd.f32 %v1611_v63, %v1793_v2 }
 0x169   :  { %2678 = vst [vmem:[#allocation48_spill] sm:$0xff] %v1795_v21  ;;  %v1822_v51 = vadd.f32 %v1619_v8, %v505_v44  ;;  %v1825_v53 = vadd.f32 %v1542_v23, %v506_v48  ;;  %v1828_v54 = vadd.f32 %v1623_v28, %v507_v45  ;;  %v1831_v55 = vadd.f32 %v1546_v25, %v508_v37 }
 0x16a   :  { %v1834_v27 = vadd.f32 %v1627_v31, %v509_v11  ;;  %v1837_v60 = vadd.f32 %v1562_v41, %v510_v34  ;;  %v1840_v50 = vadd.f32 %v1653_v33, %v511_v29  ;;  %v1843_v56 = vadd.f32 %v1578_v59, %v512_v35 }
 0x16b   :  { %v1846_v44 = vadd.f32 %v1677_v1, %v513_v57  ;;  %v1849_v48 = vadd.f32 %v1590_v13, %v514_v39  ;;  %v1852_v45 = vadd.f32 %v1690_v30, %v515_v46  ;;  %v1855_v37 = vadd.f32 %v1599_v43, %v516_v47 }
 0x16c   :  { %v595_v11 = vmax.f32 %v1771_v61, %v1742_v14  ;;  %v596_v34 = vmax.f32 %v1773_v6, %v1822_v51  ;;  %v597_v29 = vmax.f32 %v1775_v49, %v1825_v53  ;;  %v598_v35 = vmax.f32 %v1777_v4, %v1828_v54 }
 0x16d   :  { %v599_v57 = vmax.f32 %v1779_v7, %v1831_v55  ;;  %v600_v39 = vmax.f32 %v1781_v36, %v1834_v27  ;;  %v601_v46 = vmax.f32 %v1783_v38, %v1837_v60  ;;  %v602_v14 = vmax.f32 %v1785_v26, %v1840_v50 }
 0x16e   :  { %v603_v47 = vmax.f32 %v1787_v52, %v1843_v56  ;;  %v604_v51 = vmax.f32 %v1789_v32, %v1846_v44  ;;  %v605_v53 = vmax.f32 %v1791_v62, %v1849_v48  ;;  %v606_v54 = vmax.f32 %v1793_v2, %v1852_v45 }
 0x16f   :  { %v607_v55 = vmax.f32 %v1795_v21, %v1855_v37  ;;  %v621_v27 = vrot.slane %v1771_v61, 1  ;;  %v622_v60 = vrot.slane %v1773_v6, 1  ;;  %v624_v50 = vrot.slane %v1775_v49, 1 }
 0x170   :  { %v626_v56 = vrot.slane %v1777_v4, 1  ;;  %v628_v43 = vrot.slane %v1779_v7, 1  ;;  %v630_v44 = vrot.slane %v1781_v36, 1  ;;  %v632_v48 = vrot.slane %v1783_v38, 1 }
 0x171   :  { %v634_v30 = vrot.slane %v1785_v26, 1  ;;  %v1892_v45 = vsel %vm620_vm1, %v621_v27, %v622_v60  ;;  %v1895_v37 = vsel %vm620_vm1, %v622_v60, %v624_v50  ;;  %v636_v1 = vrot.slane %v1787_v52, 1 }
 0x172   :  { %2679 = vst [vmem:[#allocation49_spill] sm:$0xff] %v1892_v45  ;;  %2680 = vst [vmem:[#allocation50_spill] sm:$0xff] %v1895_v37  ;;  %v1898_v13 = vsel %vm620_vm1, %v624_v50, %v626_v56  ;;  %v1902_v59 = vsel %vm620_vm1, %v626_v56, %v628_v43  ;;  %v1905_v33 = vsel %vm620_vm1, %v628_v43, %v630_v44  ;;  %v638_v50 = vrot.slane %v1789_v32, 1 }
 0x173   :  { %2681 = vst [vmem:[#allocation51_spill] sm:$0xff] %v1898_v13  ;;  %2682 = vst [vmem:[#allocation52_spill] sm:$0xff] %v1902_v59  ;;  %v1908_v41 = vsel %vm620_vm1, %v630_v44, %v632_v48  ;;  %v1911_v31 = vsel %vm620_vm1, %v632_v48, %v634_v30  ;;  %v1914_v60 = vsel %vm620_vm1, %v634_v30, %v636_v1  ;;  %v640_v25 = vrot.slane %v1791_v62, 1 }
 0x174   :  { %2683 = vst [vmem:[#allocation53_spill] sm:$0xff] %v1905_v33  ;;  %2684 = vst [vmem:[#allocation54_spill] sm:$0xff] %v1908_v41  ;;  %v1919_v56 = vrot.slane %v1793_v2, 1  ;;  %v657_v43 = vsel %vm620_vm1, -1e+30, %v621_v27  ;;  %v659_v44 = vadd.f32 %v1892_v45, %v1544_v24  ;;  %v660_v48 = vadd.f32 %v1895_v37, %v1526_v15 }
 0x175   :  { %2685 = vst [vmem:[#allocation55_spill] sm:$0xff] %v1911_v31  ;;  %2686 = vst [vmem:[#allocation56_spill] sm:$0xff] %v1914_v60  ;;  %v661_v28 = vadd.f32 %v1898_v13, %v1528_v16  ;;  %v1929_v30 = vsel %vm620_vm1, %v636_v1, %v638_v50  ;;  %v1932_v23 = vsel %vm620_vm1, %v638_v50, %v640_v25 }
 0x176   :  { %2687 = vst [vmem:[#allocation57_spill] sm:$0xff] %v1929_v30  ;;  %2688 = vst [vmem:[#allocation58_spill] sm:$0xff] %v1932_v23  ;;  %v1936_v8 = vsel %vm620_vm1, %v640_v25, %v1919_v56  ;;  %v658_v27 = vadd.f32 %v657_v43, %v1540_v22  ;;  %v662_v45 = vadd.f32 %v1902_v59, %v1560_v40 }
 0x177   :  { %2689 = vst [vmem:[#allocation59_spill] sm:$0xff] %v1936_v8  ;;  %v663_v37 = vadd.f32 %v1905_v33, %v1530_v17  ;;  %v664_v13 = vadd.f32 %v1908_v41, %v1576_v58  ;;  %v665_v1 = vadd.f32 %v1911_v31, %v1532_v18  ;;  %v666_v50 = vadd.f32 %v1914_v60, %v1588_v12 }
 0x178   :  { %v667_v25 = vadd.f32 %v1929_v30, %v1534_v19  ;;  %v668_v43 = vadd.f32 %v1932_v23, %v1597_v42  ;;  %v669_v59 = vadd.f32 %v1936_v8, %v1536_v20  ;;  %v670_v33 = vadd.f32 %v1919_v56, %v1611_v63 }
 0x179   :  { %v1957_v21 = vmax.f32 %v595_v11, %v658_v27  ;;  %v1959_v41 = vmax.f32 %v596_v34, %v659_v44  ;;  %v1961_v31 = vmax.f32 %v597_v29, %v660_v48  ;;  %v1963_v5 = vmax.f32 %v598_v35, %v661_v28 }
 0x17a   :  { %v1965_v60 = vmax.f32 %v599_v57, %v662_v45  ;;  %v1967_v30 = vmax.f32 %v600_v39, %v663_v37  ;;  %v1969_v9 = vmax.f32 %v601_v46, %v664_v13  ;;  %v1971_v23 = vmax.f32 %v602_v14, %v665_v1 }
 0x17b   :  { %v1973_v8 = vmax.f32 %v603_v47, %v666_v50  ;;  %v1975_v10 = vmax.f32 %v604_v51, %v667_v25  ;;  %v1977_v11 = vmax.f32 %v605_v53, %v668_v43  ;;  %v1979_v34 = vmax.f32 %v606_v54, %v669_v59 }
 0x17c   :  { %v1981_v29 = vmax.f32 %v607_v55, %v670_v33  ;;  %v685_v28 = vrot.slane %v1771_v61, 2  ;;  %v686_v35 = vrot.slane %v1773_v6, 2  ;;  %v688_v57 = vrot.slane %v1775_v49, 2 }
 0x17d   :  { %v690_v13 = vrot.slane %v1777_v4, 2  ;;  %v692_v39 = vrot.slane %v1779_v7, 2  ;;  %v694_v46 = vrot.slane %v1781_v36, 2  ;;  %v696_v47 = vrot.slane %v1783_v38, 2 }
 0x17e   :  { %v687_v14 = vsel %vm684_vm2, %v685_v28, %v686_v35  ;;  %v698_v59 = vrot.slane %v1785_v26, 2  ;;  %v700_v33 = vrot.slane %v1787_v52, 2  ;;  %v689_v51 = vsel %vm684_vm2, %v686_v35, %v688_v57 }
 0x17f   :  { %v691_v53 = vsel %vm684_vm2, %v688_v57, %v690_v13  ;;  %v693_v54 = vsel %vm684_vm2, %v690_v13, %v692_v39  ;;  %v695_v55 = vsel %vm684_vm2, %v692_v39, %v694_v46  ;;  %v697_v45 = vsel %vm684_vm2, %v694_v46, %v696_v47 }
 0x180   :  { %v699_v37 = vsel %vm684_vm2, %v696_v47, %v698_v59  ;;  %v701_v44 = vsel %vm684_vm2, %v698_v59, %v700_v33  ;;  %v702_v48 = vrot.slane %v1789_v32, 2  ;;  %v704_v27 = vrot.slane %v1791_v62, 2 }
 0x181   :  { %v706_v1 = vrot.slane %v1793_v2, 2  ;;  %v721_v50 = vsel %vm684_vm2, -1e+30, %v685_v28  ;;  %v723_v25 = vadd.f32 %v687_v14, %v1544_v24  ;;  %v724_v57 = vadd.f32 %v689_v51, %v1526_v15 }
 0x182   :  { %v703_v43 = vsel %vm684_vm2, %v700_v33, %v702_v48  ;;  %v722_v35 = vadd.f32 %v721_v50, %v1540_v22  ;;  %v725_v13 = vadd.f32 %v691_v53, %v1528_v16  ;;  %v705_v39 = vsel %vm684_vm2, %v702_v48, %v704_v27  ;;  %v2697_v48 = vld [vmem:[#allocation17_spill] sm:$0xff] }
 0x183   :  { %v707_v46 = vsel %vm684_vm2, %v704_v27, %v706_v1  ;;  %v726_v47 = vadd.f32 %v693_v54, %v1560_v40  ;;  %v727_v59 = vadd.f32 %v695_v55, %v1530_v17  ;;  %v728_v28 = vadd.f32 %v697_v45, %v1576_v58  ;;  %v2690_v40 = vld [vmem:[#allocation24_spill] sm:$0xff]  ;;  %v2695_v55 = vld [vmem:[#allocation15_spill] sm:$0xff] }
 0x184   :  { %v729_v24 = vadd.f32 %v699_v37, %v1532_v18  ;;  %v730_v14 = vadd.f32 %v701_v44, %v1588_v12  ;;  %v731_v22 = vadd.f32 %v703_v43, %v1534_v19  ;;  %v732_v15 = vadd.f32 %v705_v39, %v1597_v42  ;;  %v2691_v18 = vld [vmem:[#allocation11_spill] sm:$0xff]  ;;  %v2692_v12 = vld [vmem:[#allocation26_spill] sm:$0xff]  ;;  %v2693_v42 = vld [vmem:[#allocation13_spill] sm:$0xff] }
 0x185   :  { %v733_v16 = vadd.f32 %v707_v46, %v1536_v20  ;;  %v734_v33 = vadd.f32 %v706_v1, %v1611_v63  ;;  %v2021_v51 = vadd.f32 %v1703_v3, %v722_v35  ;;  %v2024_v17 = vadd.f32 %v1613_v0, %v723_v25  ;;  %v2694_v20 = vld [vmem:[#allocation28_spill] sm:$0xff]  ;;  %v2696_v37 = vld [vmem:[#allocation30_spill] sm:$0xff]  ;;  %v2699_v25 = vld [vmem:[#allocation19_spill] sm:$0xff] }
 0x186   :  { %v2027_v58 = vadd.f32 %v2690_v40, %v724_v57  ;;  %v2030_v53 = vadd.f32 %v2691_v18, %v725_v13  ;;  %v2033_v19 = vadd.f32 %v2692_v12, %v726_v47  ;;  %v2036_v54 = vadd.f32 %v2693_v42, %v727_v59  ;;  %v2698_v1 = vld [vmem:[#allocation32_spill] sm:$0xff]  ;;  %v2700_v35 = vld [vmem:[#allocation34_spill] sm:$0xff]  ;;  %v2067_v59 = vpop.permute.xlu0 %971 }
 0x187   :  { %v2039_v63 = vadd.f32 %v2694_v20, %v728_v28  ;;  %v2042_v45 = vadd.f32 %v2695_v55, %v729_v24  ;;  %v2045_v44 = vadd.f32 %v2696_v37, %v730_v14  ;;  %v2048_v27 = vadd.f32 %v2697_v48, %v731_v22  ;;  %2701 = vst [vmem:[#allocation34_spill] sm:$0xff] %v2067_v59 }
 0x188   :  { %v2051_v50 = vadd.f32 %v2698_v1, %v732_v15  ;;  %v2054_v43 = vadd.f32 %v2699_v25, %v733_v16  ;;  %v2057_v57 = vadd.f32 %v2700_v35, %v734_v33  ;;  %v813_v13 = vmax.f32 %v1957_v21, %v2021_v51 }
 0x189   :  { %v814_v39 = vmax.f32 %v1959_v41, %v2024_v17  ;;  %v815_v46 = vmax.f32 %v1961_v31, %v2027_v58  ;;  %v816_v47 = vmax.f32 %v1963_v5, %v2030_v53  ;;  %v817_v28 = vmax.f32 %v1965_v60, %v2033_v19 }
 0x18a   :  { %v818_v24 = vmax.f32 %v1967_v30, %v2036_v54  ;;  %v819_v21 = vmax.f32 %v1969_v9, %v2039_v63  ;;  %v820_v41 = vmax.f32 %v1971_v23, %v2042_v45  ;;  %v821_v31 = vmax.f32 %v1973_v8, %v2045_v44  ;;  %v2114_v19 = vpop.permute.xlu0 %981 }
 0x18b   :  { %v822_v5 = vmax.f32 %v1975_v10, %v2048_v27  ;;  %v823_v14 = vmax.f32 %v1977_v11, %v2051_v50  ;;  %v824_v60 = vmax.f32 %v1979_v34, %v2054_v43  ;;  %v825_v30 = vmax.f32 %v1981_v29, %v2057_v57  ;;  %2708 = vst [vmem:[#allocation66_spill] sm:$0xff] %v2114_v19  ;;  %v2711_v50 = vld [vmem:[#allocation48_spill] sm:$0xff] }
 0x18c   :  { %v828_v9 = vrot.slane %v1771_v61, 7  ;;  %v829_v22 = vrot.slane %v1773_v6, 7  ;;  %v831_v23 = vrot.slane %v1775_v49, 7  ;;  %v833_v8 = vrot.slane %v1777_v4, 7 }
 0x18d   :  { %v835_v15 = vrot.slane %v1779_v7, 7  ;;  %v837_v10 = vrot.slane %v1781_v36, 7  ;;  %v839_v11 = vrot.slane %v1783_v38, 7  ;;  %v841_v29 = vrot.slane %v1785_v26, 7 }
 0x18e   :  { %v2095_v16 = vsel %vm827_vm4, %v828_v9, %v829_v22  ;;  %v2098_v34 = vsel %vm827_vm4, %v829_v22, %v831_v23  ;;  %v843_v33 = vrot.slane %v1787_v52, 7  ;;  %v2103_v51 = vsel %vm827_vm4, %v831_v23, %v833_v8  ;;  %v2712_v22 = vld [vmem:[#allocation10_spill] sm:$0xff]  ;;  %v2725_v52 = vld [vmem:[#allocation7_spill] sm:$0xff] }
 0x18f   :  { %2702 = vst [vmem:[#allocation60_spill] sm:$0xff] %v2095_v16  ;;  %2703 = vst [vmem:[#allocation61_spill] sm:$0xff] %v2098_v34  ;;  %v2106_v17 = vsel %vm827_vm4, %v833_v8, %v835_v15  ;;  %v2109_v58 = vsel %vm827_vm4, %v835_v15, %v837_v10  ;;  %v2112_v53 = vsel %vm827_vm4, %v837_v10, %v839_v11  ;;  %v845_v45 = vrot.slane %v1789_v32, 7  ;;  %v2715_v10 = vld [vmem:[#allocation2_spill] sm:$0xff]  ;;  %v2721_v32 = vld [vmem:[#allocation5_spill] sm:$0xff] }
 0x190   :  { %2704 = vst [vmem:[#allocation62_spill] sm:$0xff] %v2103_v51  ;;  %2705 = vst [vmem:[#allocation63_spill] sm:$0xff] %v2106_v17  ;;  %v2117_v54 = vsel %vm827_vm4, %v839_v11, %v841_v29  ;;  %v2120_v63 = vsel %vm827_vm4, %v841_v29, %v843_v33  ;;  %v847_v44 = vrot.slane %v1791_v62, 7  ;;  %v849_v27 = vrot.slane %v1793_v2, 7  ;;  %v2716_v29 = vld [vmem:[#allocation3_spill] sm:$0xff]  ;;  %v2720_v62 = vld [vmem:[#allocation14_spill] sm:$0xff] }
 0x191   :  { %2706 = vst [vmem:[#allocation64_spill] sm:$0xff] %v2109_v58  ;;  %2707 = vst [vmem:[#allocation65_spill] sm:$0xff] %v2112_v53  ;;  %v851_v43 = vrot.slane %v2711_v50, 7  ;;  %v866_v57 = vsel %vm827_vm4, -1e+30, %v828_v9  ;;  %v868_v23 = vadd.f32 %v2095_v16, %v2712_v22  ;;  %v2130_v8 = vsel %vm827_vm4, %v843_v33, %v845_v45  ;;  %v2718_v9 = vld [vmem:[#allocation12_spill] sm:$0xff] }
 0x192   :  { %2709 = vst [vmem:[#allocation67_spill] sm:$0xff] %v2117_v54  ;;  %2710 = vst [vmem:[#allocation68_spill] sm:$0xff] %v2120_v63  ;;  %v2133_v15 = vsel %vm827_vm4, %v845_v45, %v847_v44  ;;  %v867_v11 = vadd.f32 %v866_v57, %v2715_v10  ;;  %v869_v19 = vadd.f32 %v2098_v34, %v2716_v29  ;;  %v2719_v22 = vld [vmem:[#allocation4_spill] sm:$0xff] }
 0x193   :  { %2713 = vst [vmem:[#allocation69_spill] sm:$0xff] %v2130_v8  ;;  %2714 = vst [vmem:[#allocation70_spill] sm:$0xff] %v2133_v15  ;;  %v2139_v59 = vsel %vm827_vm4, %v847_v44, %v849_v27  ;;  %v2142_v2 = vsel %vm827_vm4, %v849_v27, %v851_v43  ;;  %v870_v16 = vadd.f32 %v2103_v51, %v2718_v9  ;;  %v2722_v10 = vld [vmem:[#allocation16_spill] sm:$0xff]  ;;  %v2723_v44 = vld [vmem:[#allocation6_spill] sm:$0xff] }
 0x194   :  { %2717 = vst [vmem:[#allocation71_spill] sm:$0xff] %v2139_v59  ;;  %v871_v33 = vadd.f32 %v2106_v17, %v2719_v22  ;;  %v872_v45 = vadd.f32 %v2109_v58, %v2720_v62  ;;  %v873_v57 = vadd.f32 %v2112_v53, %v2721_v32  ;;  %v874_v34 = vadd.f32 %v2117_v54, %v2722_v10  ;;  %v2724_v27 = vld [vmem:[#allocation18_spill] sm:$0xff]  ;;  %v2726_v9 = vld [vmem:[#allocation20_spill] sm:$0xff]  ;;  %v2164_v62 = vpop.permute.xlu0 %991 }
 0x195   :  { %v875_v29 = vadd.f32 %v2120_v63, %v2723_v44  ;;  %v876_v43 = vadd.f32 %v2130_v8, %v2724_v27  ;;  %v877_v51 = vadd.f32 %v2133_v15, %v2725_v52  ;;  %v878_v17 = vadd.f32 %v2139_v59, %v2726_v9  ;;  %v2727_v22 = vld [vmem:[#allocation8_spill] sm:$0xff]  ;;  %2728 = vst [vmem:[#allocation5_spill] sm:$0xff] %v2164_v62 }
 0x196   :  { %v879_v58 = vadd.f32 %v2142_v2, %v2727_v22  ;;  %v2166_v53 = vmax.f32 %v813_v13, %v867_v11  ;;  %v2168_v54 = vmax.f32 %v814_v39, %v868_v23  ;;  %v2170_v10 = vmax.f32 %v815_v46, %v869_v19  ;;  %v2735_v19 = vld [vmem:[#allocation55_spill] sm:$0xff]  ;;  %v2736_v11 = vld [vmem:[#allocation56_spill] sm:$0xff] }
 0x197   :  { %v2172_v63 = vmax.f32 %v816_v47, %v870_v16  ;;  %v2174_v8 = vmax.f32 %v817_v28, %v871_v33  ;;  %v2176_v27 = vmax.f32 %v818_v24, %v872_v45  ;;  %v2178_v15 = vmax.f32 %v819_v21, %v873_v57  ;;  %v2729_v28 = vld [vmem:[#allocation49_spill] sm:$0xff]  ;;  %v2730_v21 = vld [vmem:[#allocation50_spill] sm:$0xff] }
 0x198   :  { %v2180_v59 = vmax.f32 %v820_v41, %v874_v34  ;;  %v2182_v9 = vmax.f32 %v821_v31, %v875_v29  ;;  %v2184_v22 = vmax.f32 %v822_v5, %v876_v43  ;;  %v2186_v13 = vmax.f32 %v823_v14, %v877_v51  ;;  %v2731_v31 = vld [vmem:[#allocation51_spill] sm:$0xff]  ;;  %v2732_v14 = vld [vmem:[#allocation52_spill] sm:$0xff]  ;;  %v2734_v34 = vld [vmem:[#allocation54_spill] sm:$0xff]  ;;  %v2228_v33 = vpop.permute.xlu0 %1001 }
 0x199   :  { %v2188_v39 = vmax.f32 %v824_v60, %v878_v17  ;;  %v2190_v46 = vmax.f32 %v825_v30, %v879_v58  ;;  %v893_v47 = vrot.slane %v2711_v50, 1  ;;  %v2195_v24 = vadd.f32 %v1703_v3, %v2729_v28  ;;  %v2733_v30 = vld [vmem:[#allocation53_spill] sm:$0xff]  ;;  %v2738_v43 = vld [vmem:[#allocation58_spill] sm:$0xff] }
 0x19a   :  { %v2199_v41 = vadd.f32 %v1613_v0, %v2730_v21  ;;  %v2203_v5 = vadd.f32 %v2690_v40, %v2731_v31  ;;  %v2207_v60 = vadd.f32 %v2691_v18, %v2732_v14  ;;  %v2211_v16 = vadd.f32 %v2692_v12, %v2733_v30  ;;  %v2737_v45 = vld [vmem:[#allocation57_spill] sm:$0xff]  ;;  %v2740_v14 = vld [vmem:[#allocation44_spill] sm:$0xff]  ;;  %v2742_v18 = vld [vmem:[#allocation46_spill] sm:$0xff] }
 0x19b   :  { %v2215_v51 = vadd.f32 %v2693_v42, %v2734_v34  ;;  %v894_v17 = vsel %vm620_vm1, %v1919_v56, %v893_v47  ;;  %v897_v58 = vsel %vm827_vm4, %v893_v47, -1e+30  ;;  %v2222_v23 = vadd.f32 %v2694_v20, %v2735_v19  ;;  %v2739_v56 = vld [vmem:[#allocation59_spill] sm:$0xff]  ;;  %v2741_v42 = vld [vmem:[#allocation45_spill] sm:$0xff] }
 0x19c   :  { %v2226_v29 = vadd.f32 %v2695_v55, %v2736_v11  ;;  %v2232_v57 = vadd.f32 %v2696_v37, %v2737_v45  ;;  %v2236_v28 = vadd.f32 %v2697_v48, %v2738_v43  ;;  %v2240_v47 = vadd.f32 %v2698_v1, %v2739_v56  ;;  %v2280_v30 = vpop.permute.xlu0 %1011  ;;  %v2743_v0 = vld [vmem:[#allocation47_spill] sm:$0xff] }
 0x19d   :  { %v2243_v21 = vadd.f32 %v894_v17, %v2699_v25  ;;  %v2246_v31 = vadd.f32 %v897_v58, %v2700_v35  ;;  %v925_v58 = vrot.slane %v1771_v61, 6  ;;  %v926_v19 = vrot.slane %v1773_v6, 6  ;;  %v2750_v6 = vld [vmem:[#allocation29_spill] sm:$0xff] }
 0x19e   :  { %v928_v11 = vrot.slane %v1775_v49, 6  ;;  %v930_v45 = vrot.slane %v1777_v4, 6  ;;  %v932_v34 = vrot.slane %v1779_v7, 6  ;;  %v934_v43 = vrot.slane %v1781_v36, 6  ;;  %v2749_v49 = vld [vmem:[#allocation27_spill] sm:$0xff] }
 0x19f   :  { %v927_v56 = vsel %vm924_vm5, %v925_v58, %v926_v19  ;;  %v936_v17 = vrot.slane %v1783_v38, 6  ;;  %v938_v35 = vrot.slane %v1785_v26, 6  ;;  %v940_v61 = vrot.slane %v2740_v14, 6  ;;  %v2744_v14 = vld [vmem:[#allocation21_spill] sm:$0xff] }
 0x1a0   :  { %v929_v25 = vsel %vm924_vm5, %v926_v19, %v928_v11  ;;  %v931_v1 = vsel %vm924_vm5, %v928_v11, %v930_v45  ;;  %v933_v48 = vsel %vm924_vm5, %v930_v45, %v932_v34  ;;  %v935_v37 = vsel %vm924_vm5, %v932_v34, %v934_v43  ;;  %v2745_v34 = vld [vmem:[#allocation34_spill] sm:$0xff]  ;;  %v2306_v4 = vpop.permute.xlu0 %1021 }
 0x1a1   :  { %v937_v55 = vsel %vm924_vm5, %v934_v43, %v936_v17  ;;  %v939_v20 = vsel %vm924_vm5, %v936_v17, %v938_v35  ;;  %v941_v58 = vsel %vm924_vm5, %v938_v35, %v940_v61  ;;  %v942_v12 = vrot.slane %v2741_v42, 6  ;;  %v2746_v43 = vld [vmem:[#allocation23_spill] sm:$0xff]  ;;  %v2747_v17 = vld [vmem:[#allocation66_spill] sm:$0xff] }
 0x1a2   :  { %v944_v40 = vrot.slane %v2742_v18, 6  ;;  %v946_v3 = vrot.slane %v2743_v0, 6  ;;  %v948_v19 = vrot.slane %v2711_v50, 6  ;;  %v1029_v11 = vadd.f32 %v2744_v14, %v927_v56  ;;  %v2748_v0 = vld [vmem:[#allocation25_spill] sm:$0xff]  ;;  %v2751_v50 = vld [vmem:[#allocation31_spill] sm:$0xff] }
 0x1a3   :  { %v943_v45 = vsel %vm924_vm5, %v940_v61, %v942_v12  ;;  %v1030_v26 = vadd.f32 %v2745_v34, %v929_v25  ;;  %v1031_v38 = vadd.f32 %v2746_v43, %v931_v1  ;;  %v1032_v36 = vadd.f32 %v2747_v17, %v933_v48  ;;  %v2754_v43 = vld [vmem:[#allocation3_spill] sm:$0xff]  ;;  %v2755_v34 = vld [vmem:[#allocation12_spill] sm:$0xff] }
 0x1a4   :  { %v945_v35 = vsel %vm924_vm5, %v942_v12, %v944_v40  ;;  %v947_v42 = vsel %vm924_vm5, %v944_v40, %v946_v3  ;;  %v949_v18 = vsel %vm924_vm5, %v946_v3, %v948_v19  ;;  %v1033_v7 = vadd.f32 %v2748_v0, %v935_v37  ;;  %v2752_v19 = vld [vmem:[#allocation2_spill] sm:$0xff] }
 0x1a5   :  { %v963_v56 = vsel %vm962_vm6, %v949_v18, -1e+30  ;;  %v1034_v61 = vadd.f32 %v2164_v62, %v937_v55  ;;  %v1035_v25 = vadd.f32 %v2749_v49, %v939_v20  ;;  %v1036_v1 = vadd.f32 %v2228_v33, %v941_v58  ;;  %v2753_v0 = vld [vmem:[#allocation10_spill] sm:$0xff]  ;;  %v2756_v62 = vld [vmem:[#allocation4_spill] sm:$0xff] }
 0x1a6   :  { %v1037_v48 = vadd.f32 %v2750_v6, %v943_v45  ;;  %v1038_v12 = vadd.f32 %v2280_v30, %v945_v35  ;;  %v1039_v40 = vadd.f32 %v2751_v50, %v947_v42  ;;  %v1040_v3 = vadd.f32 %v2306_v4, %v963_v56  ;;  %v2757_v49 = vld [vmem:[#allocation14_spill] sm:$0xff]  ;;  %v2758_v6 = vld [vmem:[#allocation16_spill] sm:$0xff] }
 0x1a7   :  { %v1042_v37 = vadd.f32 %v1029_v11, %v2752_v19  ;;  %v1043_v17 = vadd.f32 %v1030_v26, %v2753_v0  ;;  %v1044_v18 = vadd.f32 %v1031_v38, %v2754_v43  ;;  %v1045_v55 = vadd.f32 %v1032_v36, %v2755_v34  ;;  %v2759_v50 = vld [vmem:[#allocation18_spill] sm:$0xff]  ;;  %v2760_v19 = vld [vmem:[#allocation20_spill] sm:$0xff]  ;;  %v2779_v43 = vld [vmem:[#allocation23_spill] sm:$0xff] }
 0x1a8   :  { %v1046_v20 = vadd.f32 %v1033_v7, %v2756_v62  ;;  %v1047_v58 = vadd.f32 %v1034_v61, %v2757_v49  ;;  %v1048_v45 = vadd.f32 %v1035_v25, %v2721_v32  ;;  %v1049_v35 = vadd.f32 %v1036_v1, %v2758_v6  ;;  %v2778_v34 = vld [vmem:[#allocation62_spill] sm:$0xff]  ;;  %v2782_v25 = vld [vmem:[#allocation64_spill] sm:$0xff]  ;;  %v2783_v1 = vld [vmem:[#allocation25_spill] sm:$0xff] }
 0x1a9   :  { %v1050_v42 = vadd.f32 %v1037_v48, %v2723_v44  ;;  %v1051_v56 = vadd.f32 %v1038_v12, %v2759_v50  ;;  %v1052_v11 = vadd.f32 %v1039_v40, %v2725_v52  ;;  %v1053_v0 = vadd.f32 %v1040_v3, %v2760_v19  ;;  %v2785_v48 = vld [vmem:[#allocation5_spill] sm:$0xff]  ;;  %v2786_v40 = vld [vmem:[#allocation67_spill] sm:$0xff] }
 0x1aa   :  { %v2761_v38 = vmax.f32 %v2166_v53, %v2195_v24  ;;  %v2762_v49 = vmax.f32 %v2168_v54, %v2199_v41  ;;  %v2763_v6 = vmax.f32 %v2170_v10, %v2203_v5  ;;  %v2764_v52 = vmax.f32 %v2172_v63, %v2207_v60 }
 0x1ab   :  { %v2765_v62 = vmax.f32 %v2174_v8, %v2211_v16  ;;  %v2766_v54 = vmax.f32 %v2176_v27, %v2215_v51  ;;  %v2767_v10 = vmax.f32 %v2178_v15, %v2222_v23  ;;  %v2768_v63 = vmax.f32 %v2180_v59, %v2226_v29  ;;  %v2773_v51 = vld [vmem:[#allocation35_spill] sm:$0xff]  ;;  %v2775_v29 = vld [vmem:[#allocation60_spill] sm:$0xff] }
 0x1ac   :  { %v2331_v36 = vmax.f32 %v2761_v38, %v1042_v37  ;;  %v2336_v7 = vmax.f32 %v2762_v49, %v1043_v17  ;;  %v2341_v26 = vmax.f32 %v2763_v6, %v1044_v18  ;;  %v2346_v32 = vmax.f32 %v2764_v52, %v1045_v55  ;;  %v2781_v17 = vld [vmem:[#allocation66_spill] sm:$0xff]  ;;  %v2788_v37 = vld [vmem:[#allocation68_spill] sm:$0xff]  ;;  %v2789_v55 = vld [vmem:[#allocation69_spill] sm:$0xff] }
 0x1ad   :  { %v2351_v53 = vmax.f32 %v2765_v62, %v1046_v20  ;;  %v2356_v50 = vmax.f32 %v2766_v54, %v1047_v58  ;;  %v2361_v44 = vmax.f32 %v2767_v10, %v1048_v45  ;;  %v2366_v24 = vmax.f32 %v2768_v63, %v1049_v35  ;;  %v2790_v20 = vld [vmem:[#allocation29_spill] sm:$0xff]  ;;  %v2791_v45 = vld [vmem:[#allocation70_spill] sm:$0xff] }
 0x1ae   :  { %v2769_v8 = vmax.f32 %v2182_v9, %v2232_v57  ;;  %v2770_v27 = vmax.f32 %v2184_v22, %v2236_v28  ;;  %v2771_v15 = vmax.f32 %v2186_v13, %v2240_v47  ;;  %v2772_v59 = vmax.f32 %v2188_v39, %v2243_v21  ;;  %v2776_v13 = vld [vmem:[#allocation61_spill] sm:$0xff]  ;;  %v2777_v28 = vld [vmem:[#allocation34_spill] sm:$0xff]  ;;  %v2780_v21 = vld [vmem:[#allocation63_spill] sm:$0xff] }
 0x1af   :  { %v2774_v9 = vmax.f32 %v2190_v46, %v2246_v31  ;;  %v1069_v22 = vsel %vm1068_vm7, %v2142_v2, -1e+30  ;;  %v1070_v57 = vadd.f32 %v2744_v14, %v2775_v29  ;;  %v1071_v47 = vadd.f32 %v2777_v28, %v2776_v13  ;;  %v2784_v31 = vld [vmem:[#allocation65_spill] sm:$0xff]  ;;  %v2787_v2 = vld [vmem:[#allocation27_spill] sm:$0xff] }
 0x1b0   :  { %v2371_v41 = vmax.f32 %v2769_v8, %v1050_v42  ;;  %v2376_v5 = vmax.f32 %v2770_v27, %v1051_v56  ;;  %v2381_v60 = vmax.f32 %v2771_v15, %v1052_v11  ;;  %v2386_v16 = vmax.f32 %v2772_v59, %v1053_v0  ;;  %v2792_v42 = vld [vmem:[#allocation71_spill] sm:$0xff]  ;;  %v2794_v27 = vld [vmem:[#allocation33_spill] sm:$0xff] }
 0x1b1   :  { %v2392_v23 = vmax.f32 %v2774_v9, %v2773_v51  ;;  %v1072_v39 = vadd.f32 %v2779_v43, %v2778_v34  ;;  %v1073_v61 = vadd.f32 %v2781_v17, %v2780_v21  ;;  %v1074_v46 = vadd.f32 %v2783_v1, %v2782_v25  ;;  %v2793_v56 = vld [vmem:[#allocation31_spill] sm:$0xff]  ;;  %v2796_v15 = vld [vmem:[#allocation37_spill] sm:$0xff]  ;;  %v2801_v9 = vld [vmem:[#allocation42_spill] sm:$0xff] }
 0x1b2   :  { %v1075_v12 = vadd.f32 %v2785_v48, %v2784_v31  ;;  %v1076_v3 = vadd.f32 %v2787_v2, %v2786_v40  ;;  %v1077_v18 = vadd.f32 %v2228_v33, %v2788_v37  ;;  %v1078_v58 = vadd.f32 %v2790_v20, %v2789_v55  ;;  %v2798_v59 = vld [vmem:[#allocation39_spill] sm:$0xff]  ;;  %v2800_v51 = vld [vmem:[#allocation41_spill] sm:$0xff]  ;;  %v2813_v37 = vld [vmem:[#allocation28_spill] sm:$0xff] }
 0x1b3   :  { %v1079_v35 = vadd.f32 %v2280_v30, %v2791_v45  ;;  %v1080_v11 = vadd.f32 %v2793_v56, %v2792_v42  ;;  %v1081_v19 = vadd.f32 %v1069_v22, %v2306_v4  ;;  %v1082_v0 = vmax.f32 %v2331_v36, %v1070_v57  ;;  %v2802_v22 = vld [vmem:[#allocation43_spill] sm:$0xff]  ;;  %v2803_v57 = vld [vmem:[#allocation44_spill] sm:$0xff]  ;;  %v2804_v13 = vld [vmem:[#allocation45_spill] sm:$0xff] }
 0x1b4   :  { %v1083_v38 = vmax.f32 %v2336_v7, %v1071_v47  ;;  %v1084_v49 = vmax.f32 %v2341_v26, %v1072_v39  ;;  %v1085_v6 = vmax.f32 %v2346_v32, %v1073_v61  ;;  %v1086_v52 = vmax.f32 %v2351_v53, %v1074_v46  ;;  %v2795_v32 = vld [vmem:[#allocation48_spill] sm:$0xff]  ;;  %v2805_v47 = vld [vmem:[#allocation46_spill] sm:$0xff]  ;;  %v2808_v25 = vld [vmem:[#allocation9_spill] sm:$0xff] }
 0x1b5   :  { %v1087_v62 = vmax.f32 %v2356_v50, %v1075_v12  ;;  %v1088_v54 = vmax.f32 %v2361_v44, %v1076_v3  ;;  %v1089_v10 = vmax.f32 %v2366_v24, %v1077_v18  ;;  %v1090_v63 = vmax.f32 %v2371_v41, %v1078_v58  ;;  %v2797_v44 = vld [vmem:[#allocation38_spill] sm:$0xff]  ;;  %v2809_v46 = vld [vmem:[#allocation24_spill] sm:$0xff]  ;;  %v2816_v45 = vld [vmem:[#allocation17_spill] sm:$0xff] }
 0x1b6   :  { %v1091_v8 = vmax.f32 %v2376_v5, %v1079_v35  ;;  %v1092_v36 = vmax.f32 %v2381_v60, %v1080_v11  ;;  %v1093_v7 = vmax.f32 %v2386_v16, %v1081_v19  ;;  %v1094_v26 = vmax.f32 %v2392_v23, %v2794_v27  ;;  %v2799_v5 = vld [vmem:[#allocation40_spill] sm:$0xff] }
 0x1b7   :  { %v1095_v53 = vsel %vm924_vm5, %v2795_v32, -1e+30  ;;  %v1096_v50 = vadd.f32 %v2744_v14, %v2796_v15  ;;  %v1097_v24 = vadd.f32 %v2777_v28, %v2797_v44  ;;  %v1098_v41 = vadd.f32 %v2779_v43, %v2798_v59  ;;  %v2806_v43 = vld [vmem:[#allocation47_spill] sm:$0xff]  ;;  %v2817_v35 = vld [vmem:[#allocation32_spill] sm:$0xff] }
 0x1b8   :  { %v1099_v60 = vadd.f32 %v2781_v17, %v2799_v5  ;;  %v1100_v16 = vadd.f32 %v2783_v1, %v2800_v51  ;;  %v1101_v23 = vadd.f32 %v2785_v48, %v2801_v9  ;;  %v1102_v29 = vadd.f32 %v2787_v2, %v2802_v22  ;;  %v2807_v17 = vld [vmem:[#allocation22_spill] sm:$0xff]  ;;  %v2810_v48 = vld [vmem:[#allocation11_spill] sm:$0xff]  ;;  %v2812_v2 = vld [vmem:[#allocation13_spill] sm:$0xff] }
 0x1b9   :  { %v1103_v14 = vadd.f32 %v2228_v33, %v2803_v57  ;;  %v1104_v28 = vadd.f32 %v2790_v20, %v2804_v13  ;;  %v1105_v34 = vadd.f32 %v2280_v30, %v2805_v47  ;;  %v1106_v39 = vadd.f32 %v2793_v56, %v2806_v43  ;;  %v2811_v33 = vld [vmem:[#allocation26_spill] sm:$0xff]  ;;  %v2814_v30 = vld [vmem:[#allocation15_spill] sm:$0xff] }
 0x1ba   :  { %v1107_v21 = vadd.f32 %v1095_v53, %v2306_v4  ;;  %v1108_v61 = vadd.f32 %v1096_v50, %v2807_v17  ;;  %v1109_v1 = vadd.f32 %v1097_v24, %v2808_v25  ;;  %v1110_v31 = vadd.f32 %v1098_v41, %v2809_v46  ;;  %v2815_v20 = vld [vmem:[#allocation30_spill] sm:$0xff]  ;;  %v2818_v56 = vld [vmem:[#allocation19_spill] sm:$0xff] }
 0x1bb   :  { %v1111_v12 = vadd.f32 %v1099_v60, %v2810_v48  ;;  %v1112_v40 = vadd.f32 %v1100_v16, %v2811_v33  ;;  %v1113_v3 = vadd.f32 %v1101_v23, %v2812_v2  ;;  %v1114_v18 = vadd.f32 %v1102_v29, %v2813_v37 }
 0x1bc   :  { %v1115_v55 = vadd.f32 %v1103_v14, %v2814_v30  ;;  %v1116_v58 = vadd.f32 %v1104_v28, %v2815_v20  ;;  %v1117_v4 = vadd.f32 %v1105_v34, %v2816_v45  ;;  %v1118_v42 = vadd.f32 %v1106_v39, %v2817_v35 }
 0x1bd   :  { %v1119_v11 = vadd.f32 %v1107_v21, %v2818_v56  ;;  %v1121_v19 = vmax.f32 %v1082_v0, %v1108_v61  ;;  %v1122_v27 = vmax.f32 %v1083_v38, %v1109_v1  ;;  %v1123_v32 = vmax.f32 %v1084_v49, %v1110_v31  ;;  %v2819_v0 = vld [vmem:[#allocation36_spill] sm:$0xff] }
 0x1be   :  { %v1124_v53 = vmax.f32 %v1085_v6, %v1111_v12  ;;  %v1125_v15 = vmax.f32 %v1086_v52, %v1112_v40  ;;  %v1126_v50 = vmax.f32 %v1087_v62, %v1113_v3  ;;  %v1127_v44 = vmax.f32 %v1088_v54, %v1114_v18 }
 0x1bf   :  { %v1128_v24 = vmax.f32 %v1089_v10, %v1115_v55  ;;  %v1129_v59 = vmax.f32 %v1090_v63, %v1116_v58  ;;  %v1130_v41 = vmax.f32 %v1091_v8, %v1117_v4  ;;  %v1131_v5 = vmax.f32 %v1092_v36, %v1118_v42  ;;  %1134 = vst.msk [vmem:[%s2531_s8] sm:$0xff] %vm293_vm3, %v1121_v19 }
 0x1c0   :  { %v1132_v60 = vmax.f32 %v1093_v7, %v1119_v11  ;;  %1135 = vst.msk [vmem:[%s2531_s8 + $0x8] sm:$0xff] %vm293_vm3, %v1122_v27  ;;  %1136 = vst.msk [vmem:[%s2531_s8 + $0x10] sm:$0xff] %vm293_vm3, %v1123_v32  ;;  %v1133_v38 = vmax.f32 %v1094_v26, %v2819_v0 }
 0x1c1   :  { %1137 = vst.msk [vmem:[%s2531_s8 + $0x18] sm:$0xff] %vm293_vm3, %v1124_v53  ;;  %1138 = vst.msk [vmem:[%s2531_s8 + $0x20] sm:$0xff] %vm293_vm3, %v1125_v15 }
 0x1c2   :  { %1139 = vst.msk [vmem:[%s2531_s8 + $0x28] sm:$0xff] %vm293_vm3, %v1126_v50  ;;  %1140 = vst.msk [vmem:[%s2531_s8 + $0x30] sm:$0xff] %vm293_vm3, %v1127_v44 }
 0x1c3   :  { %1141 = vst.msk [vmem:[%s2531_s8 + $0x38] sm:$0xff] %vm293_vm3, %v1128_v24  ;;  %1142 = vst.msk [vmem:[%s2531_s8 + $0x40] sm:$0xff] %vm293_vm3, %v1129_v59 }
 0x1c4   :  { %1143 = vst.msk [vmem:[%s2531_s8 + $0x48] sm:$0xff] %vm293_vm3, %v1130_v41  ;;  %1144 = vst.msk [vmem:[%s2531_s8 + $0x50] sm:$0xff] %vm293_vm3, %v1131_v5 }
 0x1c5   :  { %1145 = vst.msk [vmem:[%s2531_s8 + $0x58] sm:$0xff] %vm293_vm3, %v1132_v60 }
 0x1c6   :  { %1146 = vst.msk [vmem:[%s2531_s8 + $0x60] sm:$0x3] %vm317_vm0, %v1133_v38 }

// kernel: mnist_forward.5
= control target key start
LH: loop header
LB: loop body
LE: loop exit
PB: predicated region body
PF: predicated region fallthrough
CT: control target
= control target key end

     0   :  { %v5841_v11 = vmov 0   ;;  %vm523_vm0 = vcmask 523264   ;;  %s7626_s0 = inlined_call_operand.vmem [shape: f32[32,576], index: 0, kind: input, shape index: {}]   ;;  %s7627_s1 = inlined_call_operand.vmem [shape: bf16[576,256], index: 1, kind: input, shape index: {}]   ;;  %s7628_s2 = inlined_call_operand.vmem [shape: f32[1,256], index: 2, kind: input, shape index: {}]   ;;  %s7629_s3 = inlined_call_operand.vmem [shape: f32[1,256], index: 3, kind: input, shape index: {}]   ;;  %s7630_s4 = inlined_call_operand.vmem [shape: f32[32,1], index: 4, kind: input, shape index: {}]   ;;  %s7631_s5 = inlined_call_operand.vmem [shape: f32[32,1], index: 5, kind: input, shape index: {}]   ;;  %s7632_s6 = inlined_call_operand.vmem [shape: f32[32,1], index: 6, kind: input, shape index: {}]   ;;  %s7633_s7 = inlined_call_operand.vmem [shape: f32[32,1], index: 7, kind: input, shape index: {}]   ;;  %s7634_s8 = inlined_call_operand.vmem [shape: bf16[16,256,64], index: 8, kind: input, shape index: {}]   ;;  %s7635_s9 = inlined_call_operand.vmem [shape: f32[1,64], index: 9, kind: input, shape index: {}]   ;;  %s7636_s10 = inlined_call_operand.vmem [shape: f32[64,10], index: 10, kind: input, shape index: {}]   ;;  %s7637_s11 = inlined_call_operand.vmem [shape: f32[1,10], index: 11, kind: input, shape index: {}]   ;;  %s7638_s12 = inlined_call_operand.hbm [shape: f32[2,10], index: 12, kind: output, shape index: {}]  }
   0x1   :  { %v5449_v0 = vld [vmem:[%s7627_s1 + $0x4] ss:$8 sps:$4 sm:$0xff]   ;;  %v5451_v1 = vld [vmem:[%s7627_s1] ss:$8 sps:$4 sm:$0xff]   ;;  %v5452_v2 = vld [vmem:[%s7627_s1 + $0x14] ss:$8 sps:$4 sm:$0xff]   ;;  %5448 = vset.pattern.permute.xlu1 %v5841_v11  ;;  %5447 = vset.pattern.permute.xlu0 %v5841_v11 }
   0x2   :  { %530 = vmatprep.subr.bf16.mxu0 %v5449_v0  ;;  %v5454_v3 = vld [vmem:[%s7627_s1 + $0x10] ss:$8 sps:$4 sm:$0xff]   ;;  %v5455_v4 = vld [vmem:[%s7627_s1 + $0x24] ss:$8 sps:$4 sm:$0xff]   ;;  %v5457_v5 = vld [vmem:[%s7627_s1 + $0x20] ss:$8 sps:$4 sm:$0xff]  }
   0x3   :  { %531 = vmatpush1.bf16.msra.mxu0 %v5451_v1  ;;  %v5458_v6 = vld [vmem:[%s7627_s1 + $0x34] ss:$8 sps:$4 sm:$0xff]   ;;  %v5460_v7 = vld [vmem:[%s7627_s1 + $0x30] ss:$8 sps:$4 sm:$0xff]   ;;  %v5461_v8 = vld [vmem:[%s7627_s1 + $0x44] ss:$8 sps:$4 sm:$0xff]  }
   0x4   :  { %532 = vmatprep.subr.bf16.mxu0 %v5452_v2  ;;  %v5463_v9 = vld [vmem:[%s7627_s1 + $0x40] ss:$8 sps:$4 sm:$0xff]   ;;  %v5464_v10 = vld [vmem:[%s7627_s1 + $0x54] ss:$8 sps:$4 sm:$0xff]   ;;  %v5466_v12 = vld [vmem:[%s7627_s1 + $0x50] ss:$8 sps:$4 sm:$0xff]  }
   0x5   :  { %v5467_v13 = vld [vmem:[%s7627_s1 + $0x64] ss:$8 sps:$4 sm:$0xff]   ;;  %v49_v15 = vld [vmem:[%s7626_s0 + $0x30] sm:$0xff]  ;;  %v5469_v17 = vld [vmem:[%s7627_s1 + $0x60] ss:$8 sps:$4 sm:$0xff]  }
   0x6   :  { %v44_v14 = vld [vmem:[%s7626_s0 + $0x8] sm:$0xff]  ;;  %v5470_v18 = vld [vmem:[%s7627_s1 + $0x74] ss:$8 sps:$4 sm:$0xff]   ;;  %v5472_v19 = vld [vmem:[%s7627_s1 + $0x70] ss:$8 sps:$4 sm:$0xff]  }
   0x7   :  { %533 = vmatpush1.bf16.msra.mxu0 %v5454_v3  ;;  %v154_v16 = vpack.c.bf16 %v49_v15, %v44_v14  ;;  %v5473_v20 = vld [vmem:[%s7627_s1 + $0x84] ss:$8 sps:$4 sm:$0xff]   ;;  %v5475_v21 = vld [vmem:[%s7627_s1 + $0x80] ss:$8 sps:$4 sm:$0xff]   ;;  %v5476_v22 = vld [vmem:[%s7627_s1 + $0x94] ss:$8 sps:$4 sm:$0xff]  }
   0x8   :  { %534 = vmatprep.subr.bf16.mxu0 %v5455_v4  ;;  %v5478_v23 = vld [vmem:[%s7627_s1 + $0x90] ss:$8 sps:$4 sm:$0xff]   ;;  %v5479_v24 = vld [vmem:[%s7627_s1 + $0xa4] ss:$8 sps:$4 sm:$0xff]   ;;  %v5481_v25 = vld [vmem:[%s7627_s1 + $0xa0] ss:$8 sps:$4 sm:$0xff]  }
   0x9   :  { %562 = vmatprep.mubr.bf16.mxu0 %v154_v16  ;;  %v5482_v26 = vld [vmem:[%s7627_s1 + $0xb4] ss:$8 sps:$4 sm:$0xff]   ;;  %v5484_v27 = vld [vmem:[%s7627_s1 + $0xb0] ss:$8 sps:$4 sm:$0xff]   ;;  %v5485_v28 = vld [vmem:[%s7627_s1 + $0xc4] ss:$8 sps:$4 sm:$0xff]  }
   0xa   :  { %v5487_v29 = vld [vmem:[%s7627_s1 + $0xc0] ss:$8 sps:$4 sm:$0xff]   ;;  %v5488_v30 = vld [vmem:[%s7627_s1 + $0xd4] ss:$8 sps:$4 sm:$0xff]   ;;  %v5490_v31 = vld [vmem:[%s7627_s1 + $0xd0] ss:$8 sps:$4 sm:$0xff]  }
   0xb   :  { %535 = vmatpush1.bf16.msra.mxu0 %v5457_v5  ;;  %v5491_v32 = vld [vmem:[%s7627_s1 + $0xe4] ss:$8 sps:$4 sm:$0xff]   ;;  %v5493_v34 = vld [vmem:[%s7627_s1 + $0xe0] ss:$8 sps:$4 sm:$0xff]   ;;  %v5494_v36 = vld [vmem:[%s7627_s1 + $0xf4] ss:$8 sps:$4 sm:$0xff]  }
   0xc   :  { %536 = vmatprep.subr.bf16.mxu0 %v5458_v6  ;;  %v145_v33 = vld [vmem:[%s7632_s6] sm:$0xff]  ;;  %v147_v37 = vld [vmem:[%s7632_s6 + $0x10] sm:$0xff]  ;;  %v48_v42 = vld [vmem:[%s7626_s0 + $0x28] sm:$0xff] }
   0xd   :  { %883 = vperm.xlu1 %5448, %v145_v33   ;;  %v137_v35 = vld [vmem:[%s7630_s4] sm:$0xff]  ;;  %v5496_v38 = vld [vmem:[%s7627_s1 + $0xf0] ss:$8 sps:$4 sm:$0xff]   ;;  %v5502_v49 = vld [vmem:[%s7627_s1 + $0x114] ss:$8 sps:$4 sm:$0xff]  }
   0xe   :  { %855 = vperm.xlu0 %5447, %v137_v35   ;;  %v139_v39 = vld [vmem:[%s7630_s4 + $0x10] sm:$0xff]  ;;  %v5499_v40 = vld [vmem:[%s7627_s1 + $0x104] ss:$8 sps:$4 sm:$0xff]   ;;  %v54_v43 = vld [vmem:[%s7626_s0 + $0x58] sm:$0xff] }
   0xf   :  { %537 = vmatpush1.bf16.msra.mxu0 %v5460_v7  ;;  %v43_v41 = vld [vmem:[%s7626_s0] sm:$0xff]  ;;  %v151_v45 = vld [vmem:[%s7633_s7 + $0x10] sm:$0xff]  ;;  %v58_v55 = vld [vmem:[%s7626_s0 + $0x78] sm:$0xff] }
  0x10   :  { %538 = vmatprep.subr.bf16.mxu0 %v5461_v8  ;;  %v59_v44 = vld [vmem:[%s7626_s0 + $0x80] sm:$0xff]  ;;  %v153_v48 = vpack.c.bf16 %v48_v42, %v43_v41  ;;  %v143_v51 = vld [vmem:[%s7631_s5 + $0x10] sm:$0xff]  ;;  %v46_v57 = vld [vmem:[%s7626_s0 + $0x18] sm:$0xff] }
  0x11   :  { %893 = vperm.xlu1 %5448, %v147_v37   ;;  %v149_v46 = vld [vmem:[%s7633_s7] sm:$0xff]  ;;  %v159_v50 = vpack.c.bf16 %v59_v44, %v54_v43  ;;  %v5500_v53 = vld [vmem:[%s7627_s1 + $0x110] ss:$8 sps:$4 sm:$0xff]   ;;  %v138_v59 = vld [vmem:[%s7630_s4 + $0x8] sm:$0xff] }
  0x12   :  { %865 = vperm.xlu0 %5447, %v139_v39   ;;  %v5497_v47 = vld [vmem:[%s7627_s1 + $0x100] ss:$8 sps:$4 sm:$0xff]   ;;  %v53_v54 = vld [vmem:[%s7626_s0 + $0x50] sm:$0xff]  ;;  %v5505_v56 = vld [vmem:[%s7627_s1 + $0x124] ss:$8 sps:$4 sm:$0xff]  }
  0x13   :  { %539 = vmatpush1.bf16.msra.mxu0 %v5463_v9  ;;  %v141_v52 = vld [vmem:[%s7631_s5] sm:$0xff]  ;;  %v140_v60 = vld [vmem:[%s7630_s4 + $0x18] sm:$0xff]  ;;  %v158_v63 = vpack.c.bf16 %v58_v55, %v53_v54  ;;  %v146_v1 = vld [vmem:[%s7632_s6 + $0x8] sm:$0xff] }
  0x14   :  { %540 = vmatprep.subr.bf16.mxu0 %v5464_v10  ;;  %v51_v58 = vld [vmem:[%s7626_s0 + $0x40] sm:$0xff]  ;;  %v5508_v62 = vld [vmem:[%s7627_s1 + $0x134] ss:$8 sps:$4 sm:$0xff]   ;;  %v5506_v3 = vld [vmem:[%s7627_s1 + $0x130] ss:$8 sps:$4 sm:$0xff]  }
  0x15   :  { %1003 = vperm.xlu1 %5448, %v151_v45   ;;  %v5503_v61 = vld [vmem:[%s7627_s1 + $0x120] ss:$8 sps:$4 sm:$0xff]   ;;  %v156_v0 = vpack.c.bf16 %v51_v58, %v46_v57  ;;  %v148_v2 = vld [vmem:[%s7632_s6 + $0x18] sm:$0xff]  ;;  %v5511_v4 = vld [vmem:[%s7627_s1 + $0x144] ss:$8 sps:$4 sm:$0xff]  }
  0x16   :  { %993 = vperm.xlu0 %5447, %v149_v46   ;;  %v150_v5 = vld [vmem:[%s7633_s7 + $0x8] sm:$0xff]  ;;  %v152_v6 = vld [vmem:[%s7633_s7 + $0x18] sm:$0xff]  ;;  %v45_v33 = vld [vmem:[%s7626_s0 + $0x10] sm:$0xff] }
  0x17   :  { %541 = vmatpush1.bf16.msra.mxu0 %v5466_v12  ;;  %v5509_v7 = vld [vmem:[%s7627_s1 + $0x140] ss:$8 sps:$4 sm:$0xff]   ;;  %v5514_v8 = vld [vmem:[%s7627_s1 + $0x154] ss:$8 sps:$4 sm:$0xff]   ;;  %v5512_v12 = vld [vmem:[%s7627_s1 + $0x150] ss:$8 sps:$4 sm:$0xff]  }
  0x18   :  { %542 = vmatprep.subr.bf16.mxu0 %v5467_v13  ;;  %v142_v9 = vld [vmem:[%s7631_s5 + $0x8] sm:$0xff]  ;;  %v144_v10 = vld [vmem:[%s7631_s5 + $0x18] sm:$0xff]  ;;  %v61_v37 = vld [vmem:[%s7626_s0 + $0x90] sm:$0xff] }
  0x19   :  { %1125 = vperm.xlu1 %5448, %v143_v51   ;;  %v5517_v13 = vld [vmem:[%s7627_s1 + $0x164] ss:$8 sps:$4 sm:$0xff]   ;;  %v5515_v14 = vld [vmem:[%s7627_s1 + $0x160] ss:$8 sps:$4 sm:$0xff]   ;;  %v5520_v15 = vld [vmem:[%s7627_s1 + $0x174] ss:$8 sps:$4 sm:$0xff]  }
  0x1a   :  { %1115 = vperm.xlu0 %5447, %v141_v52   ;;  %v5518_v16 = vld [vmem:[%s7627_s1 + $0x170] ss:$8 sps:$4 sm:$0xff]   ;;  %v5547_v35 = vld [vmem:[%s7627_s1 + $0x204] ss:$8 sps:$4 sm:$0xff]   ;;  %v5551_v46 = vld [vmem:[%s7627_s1 + $0x220] ss:$8 sps:$4 sm:$0xff]  }
  0x1b   :  { %543 = vmatpush1.bf16.msra.mxu0 %v5469_v17  ;;  %v5523_v17 = vld [vmem:[%s7627_s1 + $0x184] ss:$8 sps:$4 sm:$0xff]   ;;  %v5548_v42 = vld [vmem:[%s7627_s1 + $0x210] ss:$8 sps:$4 sm:$0xff]  }
  0x1c   :  { %544 = vmatprep.subr.bf16.mxu0 %v5470_v18  ;;  %v5521_v18 = vld [vmem:[%s7627_s1 + $0x180] ss:$8 sps:$4 sm:$0xff]   ;;  %v5553_v45 = vld [vmem:[%s7627_s1 + $0x224] ss:$8 sps:$4 sm:$0xff]   ;;  %v62_v54 = vld [vmem:[%s7626_s0 + $0x98] sm:$0xff] }
  0x1d   :  { %860 = vperm.xlu1 %5448, %v138_v59   ;;  %v55_v43 = vld [vmem:[%s7626_s0 + $0x60] sm:$0xff]  ;;  %v60_v44 = vld [vmem:[%s7626_s0 + $0x88] sm:$0xff] }
  0x1e   :  { %870 = vperm.xlu0 %5447, %v140_v60   ;;  %v52_v51 = vld [vmem:[%s7626_s0 + $0x48] sm:$0xff] }
  0x1f   :  { %545 = vmatpush1.bf16.msra.mxu0 %v5472_v19  ;;  %v5526_v19 = vld [vmem:[%s7627_s1 + $0x194] ss:$8 sps:$4 sm:$0xff]  }
  0x20   :  { %546 = vmatprep.subr.bf16.mxu0 %v5473_v20  ;;  %v5524_v20 = vld [vmem:[%s7627_s1 + $0x190] ss:$8 sps:$4 sm:$0xff]  }
  0x21   :  { %888 = vperm.xlu1 %5448, %v146_v1  }
  0x22   :  { %898 = vperm.xlu0 %5447, %v148_v2  }
  0x23   :  { %547 = vmatpush1.bf16.msra.mxu0 %v5475_v21  ;;  %v5529_v21 = vld [vmem:[%s7627_s1 + $0x1a4] ss:$8 sps:$4 sm:$0xff]  }
  0x24   :  { %548 = vmatprep.subr.bf16.mxu0 %v5476_v22  ;;  %v5527_v22 = vld [vmem:[%s7627_s1 + $0x1a0] ss:$8 sps:$4 sm:$0xff]  }
  0x25   :  { %998 = vperm.xlu1 %5448, %v150_v5  }
  0x26   :  { %1008 = vperm.xlu0 %5447, %v152_v6  }
  0x27   :  { %549 = vmatpush1.bf16.msra.mxu0 %v5478_v23  ;;  %v5532_v23 = vld [vmem:[%s7627_s1 + $0x1b4] ss:$8 sps:$4 sm:$0xff]  }
  0x28   :  { %550 = vmatprep.subr.bf16.mxu0 %v5479_v24  ;;  %v5530_v24 = vld [vmem:[%s7627_s1 + $0x1b0] ss:$8 sps:$4 sm:$0xff]  }
  0x29   :  { %1120 = vperm.xlu1 %5448, %v142_v9  }
  0x2a   :  { %1130 = vperm.xlu0 %5447, %v144_v10  }
  0x2b   :  { %551 = vmatpush1.bf16.msra.mxu0 %v5481_v25  ;;  %v5535_v25 = vld [vmem:[%s7627_s1 + $0x1c4] ss:$8 sps:$4 sm:$0xff]  }
  0x2c   :  { %552 = vmatprep.subr.bf16.mxu0 %v5482_v26  ;;  %v5533_v26 = vld [vmem:[%s7627_s1 + $0x1c0] ss:$8 sps:$4 sm:$0xff]  }
  0x2f   :  { %553 = vmatpush1.bf16.msra.mxu0 %v5484_v27  ;;  %v5538_v27 = vld [vmem:[%s7627_s1 + $0x1d4] ss:$8 sps:$4 sm:$0xff]  }
  0x30   :  { %554 = vmatprep.subr.bf16.mxu0 %v5485_v28  ;;  %v5536_v28 = vld [vmem:[%s7627_s1 + $0x1d0] ss:$8 sps:$4 sm:$0xff]  }
  0x33   :  { %555 = vmatpush1.bf16.msra.mxu0 %v5487_v29  ;;  %v5541_v29 = vld [vmem:[%s7627_s1 + $0x1e4] ss:$8 sps:$4 sm:$0xff]  }
  0x34   :  { %556 = vmatprep.subr.bf16.mxu0 %v5488_v30  ;;  %v5539_v30 = vld [vmem:[%s7627_s1 + $0x1e0] ss:$8 sps:$4 sm:$0xff]  }
  0x37   :  { %557 = vmatpush1.bf16.msra.mxu0 %v5490_v31  ;;  %v5544_v31 = vld [vmem:[%s7627_s1 + $0x1f4] ss:$8 sps:$4 sm:$0xff]  }
  0x38   :  { %558 = vmatprep.subr.bf16.mxu0 %v5491_v32  ;;  %v5542_v32 = vld [vmem:[%s7627_s1 + $0x1f0] ss:$8 sps:$4 sm:$0xff]  }
  0x3b   :  { %559 = vmatpush1.bf16.msra.mxu0 %v5493_v34  ;;  %v50_v34 = vld [vmem:[%s7626_s0 + $0x38] sm:$0xff] }
  0x3c   :  { %560 = vmatprep.subr.bf16.mxu0 %v5494_v36  ;;  %v56_v36 = vld [vmem:[%s7626_s0 + $0x68] sm:$0xff]  ;;  %v155_v39 = vpack.c.bf16 %v50_v34, %v45_v33 }
  0x3d   :  { %v161_v41 = vpack.c.bf16 %v61_v37, %v56_v36 }
  0x3f   :  { %561 = vmatpush1.bf16.msra.mxu0 %v5496_v38  ;;  %v5545_v38 = vld [vmem:[%s7627_s1 + $0x200] ss:$8 sps:$4 sm:$0xff]  }
  0x40   :  { %583 = vmatprep.subr.bf16.mxu0 %v5499_v40  ;;  %v5550_v40 = vld [vmem:[%s7627_s1 + $0x214] ss:$8 sps:$4 sm:$0xff]  }
  0x42   :  { %563 = vmatmul.mubr.bf16.vlgmr.msra.gmra.mrb[0].mxu0 %v153_v48  ;;  %v5556_v48 = vld [vmem:[%s7627_s1 + $0x234] ss:$8 sps:$4 sm:$0xff]  }
  0x43   :  { %584 = vmatpush1.bf16.msra.mxu0 %v5497_v47  ;;  %572 = vmatprep.mubr.bf16.mxu0 %v159_v50  ;;  %v160_v47 = vpack.c.bf16 %v60_v44, %v55_v43  ;;  %v47_v50 = vld [vmem:[%s7626_s0 + $0x20] sm:$0xff] }
  0x44   :  { %585 = vmatprep.subr.bf16.mxu0 %v5502_v49  ;;  %v5554_v49 = vld [vmem:[%s7627_s1 + $0x230] ss:$8 sps:$4 sm:$0xff]   ;;  %v157_v52 = vpack.c.bf16 %v52_v51, %v47_v50 }
  0x47   :  { %586 = vmatpush1.bf16.msra.mxu0 %v5500_v53  ;;  %v57_v53 = vld [vmem:[%s7626_s0 + $0x70] sm:$0xff] }
  0x48   :  { %587 = vmatprep.subr.bf16.mxu0 %v5505_v56  ;;  %v162_v55 = vpack.c.bf16 %v62_v54, %v57_v53 }
  0x4a   :  { %573 = vmatmul.mubr.bf16.gmra.mrb[4].mxu0 %v158_v63 }
  0x4b   :  { %588 = vmatpush1.bf16.msra.mxu0 %v5503_v61  ;;  %615 = vmatprep.mubr.bf16.mxu0 %v156_v0 }
  0x4c   :  { %589 = vmatprep.subr.bf16.mxu0 %v5508_v62 }
  0x4f   :  { %590 = vmatpush1.bf16.msra.mxu0 %v5506_v3 }
  0x50   :  { %591 = vmatprep.subr.bf16.mxu0 %v5511_v4 }
  0x53   :  { %592 = vmatpush1.bf16.msra.mxu0 %v5509_v7 }
  0x54   :  { %593 = vmatprep.subr.bf16.mxu0 %v5514_v8 }
  0x57   :  { %594 = vmatpush1.bf16.msra.mxu0 %v5512_v12 }
  0x58   :  { %595 = vmatprep.subr.bf16.mxu0 %v5517_v13 }
  0x5b   :  { %596 = vmatpush1.bf16.msra.mxu0 %v5515_v14 }
  0x5c   :  { %597 = vmatprep.subr.bf16.mxu0 %v5520_v15 }
  0x5f   :  { %598 = vmatpush1.bf16.msra.mxu0 %v5518_v16 }
  0x60   :  { %599 = vmatprep.subr.bf16.mxu0 %v5523_v17 }
  0x63   :  { %600 = vmatpush1.bf16.msra.mxu0 %v5521_v18 }
  0x64   :  { %601 = vmatprep.subr.bf16.mxu0 %v5526_v19 }
  0x67   :  { %602 = vmatpush1.bf16.msra.mxu0 %v5524_v20 }
  0x68   :  { %603 = vmatprep.subr.bf16.mxu0 %v5529_v21 }
  0x6b   :  { %604 = vmatpush1.bf16.msra.mxu0 %v5527_v22 }
  0x6c   :  { %605 = vmatprep.subr.bf16.mxu0 %v5532_v23 }
  0x6f   :  { %606 = vmatpush1.bf16.msra.mxu0 %v5530_v24 }
  0x70   :  { %607 = vmatprep.subr.bf16.mxu0 %v5535_v25 }
  0x73   :  { %608 = vmatpush1.bf16.msra.mxu0 %v5533_v26 }
  0x74   :  { %609 = vmatprep.subr.bf16.mxu0 %v5538_v27 }
  0x77   :  { %610 = vmatpush1.bf16.msra.mxu0 %v5536_v28 }
  0x78   :  { %611 = vmatprep.subr.bf16.mxu0 %v5541_v29 }
  0x7b   :  { %612 = vmatpush1.bf16.msra.mxu0 %v5539_v30 }
  0x7c   :  { %613 = vmatprep.subr.bf16.mxu0 %v5544_v31 }
  0x7f   :  { %614 = vmatpush1.bf16.msra.mxu0 %v5542_v32 }
  0x80   :  { %636 = vmatprep.subr.bf16.mxu0 %v5547_v35 }
  0x82   :  { %616 = vmatmul.mubr.bf16.vlgmr.msra.gmra.mrb[0].mxu0 %v155_v39 }
  0x83   :  { %637 = vmatpush1.bf16.msra.mxu0 %v5545_v38  ;;  %625 = vmatprep.mubr.bf16.mxu0 %v161_v41 }
  0x84   :  { %638 = vmatprep.subr.bf16.mxu0 %v5550_v40 }
  0x87   :  { %639 = vmatpush1.bf16.msra.mxu0 %v5548_v42 }
  0x88   :  { %640 = vmatprep.subr.bf16.mxu0 %v5553_v45 }
  0x8a   :  { %626 = vmatmul.mubr.bf16.gmra.mrb[4].mxu0 %v160_v47 }
  0x8b   :  { %641 = vmatpush1.bf16.msra.mxu0 %v5551_v46  ;;  %668 = vmatprep.mubr.bf16.mxu0 %v5841_v11 }
  0x8c   :  { %642 = vmatprep.subr.bf16.mxu0 %v5556_v48 }
  0x8f   :  { %643 = vmatpush1.bf16.msra.mxu0 %v5554_v49 }
  0x92   :  { %4293 = vmatmul.mubr.msk.bf16.vlgmr.msra.gmra.mrb[0].mxu0 %vm523_vm0, %v157_v52 }
  0x93   :  { %678 = vmatprep.mubr.bf16.mxu0 %v5841_v11 }
  0x9a   :  { %4294 = vmatmul.mubr.msk.bf16.gmra.mrb[4].mxu0 %vm523_vm0, %v162_v55 }
  0x9b   :  { %17 = vsyncpa [#allocation3], 0  ;;  %v5557_v56 = vld [vmem:[%s7634_s8 + $0xc0] sm:$0xff]   ;;  %v5561_v59 = vld [vmem:[%s7634_s8 + $0xc8] sm:$0xff]   ;;  %vm1027_vm9 = vcmask 1040384   ;;  %vm828_vm10 = vcmask 1044480  }
  0x9c   :  { %v5558_v57 = vld [vmem:[%s7634_s8 + $0x2c0] sm:$0xff]   ;;  %5034 = vmatprep.subr.bf16.mxu1 %v5557_v56  ;;  %v5562_v60 = vld [vmem:[%s7634_s8 + $0x2c8] sm:$0xff]   ;;  %v5565_v4 = vld [vmem:[%s7634_s8 + $0xd0] sm:$0xff]   ;;  %vm917_vm11 = vcmask 1043456   ;;  %vm958_vm12 = vcmask 1042432   ;;  %vm1068_vm13 = vcmask 1046528  }
  0x9d   :  { %v5559_v58 = vld [vmem:[%s7634_s8 + $0x80] sm:$0xff]   ;;  %5144 = vmatprep.subr.bf16.mxu0 %v5558_v57  ;;  %v5563_v61 = vld [vmem:[%s7634_s8 + $0x88] sm:$0xff]   ;;  %v5566_v5 = vld [vmem:[%s7634_s8 + $0x2d0] sm:$0xff]   ;;  %vm5843_vm14 = vmmov 0   ;;  %s5845_s17 = smov [#allocation2]  }
  0x9e   :  { %5035 = vmatpush3.bf16.msra.mxu1 %v5559_v58  ;;  %v5560_v11 = vld [vmem:[%s7634_s8 + $0x280] sm:$0xff]   ;;  %v5564_v62 = vld [vmem:[%s7634_s8 + $0x288] sm:$0xff]   ;;  %v5567_v8 = vld [vmem:[%s7634_s8 + $0x90] sm:$0xff]   ;;  %s4213_s18 = sshll.u32 %s5845_s17, 4  ;;  %s4214_s18 = int_to_ptr.vmem [resolvable:$true] %s4213_s18 }
  0x9f   :  { %5145 = vmatpush3.bf16.msra.mxu0 %v5560_v11  ;;  %5036 = vmatprep.subr.bf16.mxu1 %v5561_v59  ;;  %v5568_v9 = vld [vmem:[%s7634_s8 + $0x290] sm:$0xff]   ;;  %v5569_v17 = vld [vmem:[%s7634_s8 + $0xd8] sm:$0xff]   ;;  %v5573_v25 = vld [vmem:[%s7634_s8 + $0xe0] sm:$0xff]   ;;  %p5822_p1 = scmp.lt.s32.totalorder %s4214_s18, %s4214_s18 }
  0xa0   :  { %5146 = vmatprep.subr.bf16.mxu0 %v5562_v60  ;;  %v5570_v18 = vld [vmem:[%s7634_s8 + $0x2d8] sm:$0xff]   ;;  %v5574_v26 = vld [vmem:[%s7634_s8 + $0x2e0] sm:$0xff]   ;;  %v5577_v34 = vld [vmem:[%s7634_s8 + $0xe8] sm:$0xff]  }
  0xa1   :  { %v5571_v20 = vld [vmem:[%s7634_s8 + $0x98] sm:$0xff]   ;;  %v5575_v29 = vld [vmem:[%s7634_s8 + $0xa0] sm:$0xff]   ;;  %v5578_v35 = vld [vmem:[%s7634_s8 + $0x2e8] sm:$0xff]  }
  0xa2   :  { %5037 = vmatpush3.bf16.msra.mxu1 %v5563_v61  ;;  %v5572_v21 = vld [vmem:[%s7634_s8 + $0x298] sm:$0xff]   ;;  %v5576_v30 = vld [vmem:[%s7634_s8 + $0x2a0] sm:$0xff]   ;;  %v5579_v41 = vld [vmem:[%s7634_s8 + $0xa8] sm:$0xff]  }
  0xa3   :  { %5147 = vmatpush3.bf16.msra.mxu0 %v5564_v62  ;;  %5038 = vmatprep.subr.bf16.mxu1 %v5565_v4  ;;  %v5580_v42 = vld [vmem:[%s7634_s8 + $0x2a8] sm:$0xff]   ;;  %v5581_v45 = vld [vmem:[%s7634_s8 + $0xf0] sm:$0xff]   ;;  %v5585_v53 = vld [vmem:[%s7634_s8 + $0xf8] sm:$0xff]  }
  0xa4   :  { %5148 = vmatprep.subr.bf16.mxu0 %v5566_v5  ;;  %v5582_v46 = vld [vmem:[%s7634_s8 + $0x2f0] sm:$0xff]   ;;  %v5586_v54 = vld [vmem:[%s7634_s8 + $0x2f8] sm:$0xff]   ;;  %v5589_v60 = vld [vmem:[%s7634_s8 + $0x40] sm:$0xff]  }
  0xa5   :  { %v5583_v50 = vld [vmem:[%s7634_s8 + $0xb0] sm:$0xff]   ;;  %v5587_v58 = vld [vmem:[%s7634_s8 + $0xb8] sm:$0xff]   ;;  %v5590_v61 = vld [vmem:[%s7634_s8 + $0x3c0] sm:$0xff]  }
  0xa6   :  { %5039 = vmatpush3.bf16.msra.mxu1 %v5567_v8  ;;  %v5584_v51 = vld [vmem:[%s7634_s8 + $0x2b0] sm:$0xff]   ;;  %v5588_v11 = vld [vmem:[%s7634_s8 + $0x2b8] sm:$0xff]  }
  0xa7   :  { %5149 = vmatpush3.bf16.msra.mxu0 %v5568_v9  ;;  %5040 = vmatprep.subr.bf16.mxu1 %v5569_v17 }
  0xa8   :  { %5150 = vmatprep.subr.bf16.mxu0 %v5570_v18 }
  0xaa   :  { %5041 = vmatpush3.bf16.msra.mxu1 %v5571_v20 }
  0xab   :  { %5151 = vmatpush3.bf16.msra.mxu0 %v5572_v21  ;;  %5042 = vmatprep.subr.bf16.mxu1 %v5573_v25 }
  0xac   :  { %5152 = vmatprep.subr.bf16.mxu0 %v5574_v26 }
  0xae   :  { %5043 = vmatpush3.bf16.msra.mxu1 %v5575_v29 }
  0xaf   :  { %5153 = vmatpush3.bf16.msra.mxu0 %v5576_v30  ;;  %5044 = vmatprep.subr.bf16.mxu1 %v5577_v34 }
  0xb0   :  { %5154 = vmatprep.subr.bf16.mxu0 %v5578_v35 }
  0xb2   :  { %5045 = vmatpush3.bf16.msra.mxu1 %v5579_v41  ;;  %v783_v41 = vlaneseq }
  0xb3   :  { %5155 = vmatpush3.bf16.msra.mxu0 %v5580_v42  ;;  %5046 = vmatprep.subr.bf16.mxu1 %v5581_v45 }
  0xb4   :  { %5156 = vmatprep.subr.bf16.mxu0 %v5582_v46  ;;  %v784_v45 = vshrl.u32 %v783_v41, 7 }
  0xb6   :  { %5047 = vmatpush3.bf16.msra.mxu1 %v5583_v50  ;;  %v785_v46 = vsub.s32 0, %v784_v45  ;;  %v6367_v50 = vpop.permute.xlu1 %883 }
  0xb7   :  { %5157 = vmatpush3.bf16.msra.mxu0 %v5584_v51  ;;  %5048 = vmatprep.subr.bf16.mxu1 %v5585_v53 }
  0xb8   :  { %5158 = vmatprep.subr.bf16.mxu0 %v5586_v54 }
  0xba   :  { %5049 = vmatpush3.bf16.msra.mxu1 %v5587_v58 }
  0xbb   :  { %5159 = vmatpush3.bf16.msra.mxu0 %v5588_v11  ;;  %5056 = vmatprep.subr.bf16.mxu1 %v5589_v60  ;;  %v856_v60 = vpop.permute.xlu0 %855 }
  0xbc   :  { %5188 = vmatprep.subr.bf16.mxu0 %v5590_v61 }
 0x165   :  { %v670_v63 = vpop.f32.mrb[0].mxu0 }
 0x166   :  { %vm689_vm1 = vcmp.ge.f32.partialorder %v670_v63, 0.0  ;;  %v697_v0 = vmul.f32 0.01, %v670_v63  ;;  %v672_v1 = vpop.f32.mrb[1].mxu0 }
 0x167   :  { %vm690_vm2 = vcmp.ge.f32.partialorder %v672_v1, 0.0  ;;  %v698_v2 = vmul.f32 0.01, %v672_v1  ;;  %v674_v3 = vpop.f32.mrb[2].mxu0 }
 0x168   :  { %vm691_vm3 = vcmp.ge.f32.partialorder %v674_v3, 0.0  ;;  %v699_v6 = vmul.f32 0.01, %v674_v3  ;;  %v676_v7 = vpop.f32.mrb[3].mxu0  ;;  %v6278_v12 = vsel %vm689_vm1, %v670_v63, %v697_v0  ;;  %vm4205_vm1 = vcmask 74752  }
 0x169   :  { %vm692_vm4 = vcmp.ge.f32.partialorder %v676_v7, 0.0  ;;  %v700_v10 = vmul.f32 0.01, %v676_v7  ;;  %v6283_v14 = vsel %vm690_vm2, %v672_v1, %v698_v2 }
 0x16a   :  { %v6280_v13 = vsel %vm691_vm3, %v674_v3, %v699_v6 }
 0x16b   :  { %v713_v15 = vadd.f32 %v6280_v13, %v6278_v12  ;;  %v6287_v16 = vsel %vm692_vm4, %v676_v7, %v700_v10 }
 0x16c   :  { %v722_v19 = vadd.f32 %v6287_v16, %v6283_v14 }
 0x16d   :  { %v680_v22 = vpop.f32.mrb[4].mxu0 }
 0x16e   :  { %vm693_vm5 = vcmp.ge.f32.partialorder %v680_v22, 0.0  ;;  %v701_v23 = vmul.f32 0.01, %v680_v22  ;;  %v682_v24 = vpop.f32.mrb[5].mxu0 }
 0x16f   :  { %vm694_vm6 = vcmp.ge.f32.partialorder %v682_v24, 0.0  ;;  %v702_v27 = vmul.f32 0.01, %v682_v24  ;;  %v684_v28 = vpop.f32.mrb[6].mxu0 }
 0x170   :  { %v709_v31 = vsel %vm693_vm5, %v680_v22, %v701_v23  ;;  %vm695_vm7 = vcmp.ge.f32.partialorder %v684_v28, 0.0  ;;  %v703_v32 = vmul.f32 0.01, %v684_v28  ;;  %v686_v33 = vpop.f32.mrb[7].mxu0 }
 0x171   :  { %v714_v36 = vadd.f32 %v713_v15, %v709_v31  ;;  %v710_v37 = vsel %vm694_vm6, %v682_v24, %v702_v27  ;;  %vm696_vm8 = vcmp.ge.f32.partialorder %v686_v33, 0.0  ;;  %v704_v38 = vmul.f32 0.01, %v686_v33 }
 0x172   :  { %v723_v39 = vadd.f32 %v722_v19, %v710_v37  ;;  %v711_v40 = vsel %vm695_vm7, %v684_v28, %v703_v32 }
 0x173   :  { %v715_v43 = vadd.f32 %v714_v36, %v711_v40  ;;  %v712_v44 = vsel %vm696_vm8, %v686_v33, %v704_v38 }
 0x174   :  { %v724_v47 = vadd.f32 %v723_v39, %v712_v44 }
 0x175   :  { %v716_v48 = vrot.slane %v715_v43, 4 }
 0x176   :  { %v725_v49 = vrot.slane %v724_v47, 4 }
 0x177   :  { %v717_v52 = vadd.f32 %v716_v48, %v715_v43  ;;  %v135_v48 = vld [vmem:[%s7628_s2] sm:$0x3] }
 0x178   :  { %v726_v55 = vadd.f32 %v725_v49, %v724_v47  ;;  %v789_v47 = vsub.s32 1, %v784_v45  ;;  %v136_v49 = vld [vmem:[%s7629_s3] sm:$0x3]  ;;  %v786_v51 = vrot.slane %v135_v48, %v785_v46 }
 0x179   :  { %v718_v56 = vrot.slane %v717_v52, 2 }
 0x17a   :  { %v727_v57 = vrot.slane %v726_v55, 2  ;;  %v790_v53 = vrot.slane %v135_v48, %v789_v47 }
 0x17b   :  { %v719_v59 = vadd.f32 %v718_v56, %v717_v52  ;;  %v805_v52 = vrot.slane %v136_v49, %v785_v46 }
 0x17c   :  { %v728_v62 = vadd.f32 %v727_v57, %v726_v55  ;;  %v809_v55 = vrot.slane %v136_v49, %v789_v47 }
 0x17d   :  { %v720_v63 = vrot.slane %v719_v59, 1 }
 0x17e   :  { %v729_v0 = vrot.slane %v728_v62, 1 }
 0x17f   :  { %v721_v1 = vadd.f32 %v720_v63, %v719_v59 }
 0x180   :  { %v730_v2 = vadd.f32 %v729_v0, %v728_v62 }
 0x181   :  { %v732_v3 = vmul.f32 0.03125, %v721_v1  ;;  %v6369_v1 = vpop.permute.xlu1 %893 }
 0x182   :  { %v733_v4 = vmul.f32 0.03125, %v730_v2 }
 0x183   :  { %v734_v5 = vsub.f32 %v6278_v12, %v732_v3  ;;  %v736_v6 = vsub.f32 %v6280_v13, %v732_v3  ;;  %v738_v7 = vsub.f32 %v709_v31, %v732_v3  ;;  %v740_v8 = vsub.f32 %v711_v40, %v732_v3 }
 0x184   :  { %v735_v9 = vsub.f32 %v6283_v14, %v733_v4  ;;  %v737_v10 = vsub.f32 %v6287_v16, %v733_v4  ;;  %v739_v15 = vsub.f32 %v710_v37, %v733_v4  ;;  %v741_v17 = vsub.f32 %v712_v44, %v733_v4 }
 0x185   :  { %v742_v18 = vmul.f32 %v734_v5, %v734_v5  ;;  %v744_v19 = vmul.f32 %v736_v6, %v736_v6  ;;  %v746_v22 = vmul.f32 %v738_v7, %v738_v7  ;;  %v748_v26 = vmul.f32 %v740_v8, %v740_v8 }
 0x186   :  { %v743_v20 = vmul.f32 %v735_v9, %v735_v9  ;;  %v745_v21 = vmul.f32 %v737_v10, %v737_v10  ;;  %v747_v24 = vmul.f32 %v739_v15, %v739_v15  ;;  %v749_v27 = vmul.f32 %v741_v17, %v741_v17 }
 0x187   :  { %v750_v23 = vadd.f32 %v744_v19, %v742_v18 }
 0x188   :  { %v759_v25 = vadd.f32 %v745_v21, %v743_v20 }
 0x189   :  { %v751_v12 = vadd.f32 %v750_v23, %v746_v22 }
 0x18a   :  { %v760_v13 = vadd.f32 %v759_v25, %v747_v24 }
 0x18b   :  { %v752_v28 = vadd.f32 %v751_v12, %v748_v26  ;;  %v6389_v26 = vpop.permute.xlu0 %865 }
 0x18c   :  { %v761_v29 = vadd.f32 %v760_v13, %v749_v27 }
 0x18d   :  { %v753_v30 = vrot.slane %v752_v28, 4 }
 0x18e   :  { %v762_v14 = vrot.slane %v761_v29, 4 }
 0x18f   :  { %v754_v31 = vadd.f32 %v753_v30, %v752_v28  ;;  %v6428_v48 = vpop.permute.xlu0 %993 }
 0x190   :  { %v763_v16 = vadd.f32 %v762_v14, %v761_v29  ;;  %v6395_v29 = vpop.permute.xlu1 %1003 }
 0x191   :  { %v755_v32 = vrot.slane %v754_v31, 2 }
 0x192   :  { %v764_v33 = vrot.slane %v763_v16, 2 }
 0x193   :  { %v756_v34 = vadd.f32 %v755_v32, %v754_v31 }
 0x194   :  { %v765_v35 = vadd.f32 %v764_v33, %v763_v16 }
 0x195   :  { %v757_v36 = vrot.slane %v756_v34, 1 }
 0x196   :  { %v766_v37 = vrot.slane %v765_v35, 1 }
 0x197   :  { %v758_v38 = vadd.f32 %v757_v36, %v756_v34 }
 0x198   :  { %v767_v39 = vadd.f32 %v766_v37, %v765_v35 }
 0x199   :  { %v768_v40 = vmul.f32 0.03125, %v758_v38 }
 0x19a   :  { %v769_v42 = vmul.f32 0.03125, %v767_v39 }
 0x19b   :  { %v770_v43 = vadd.f32 1e-05, %v768_v40 }
 0x19c   :  { %v771_v44 = vadd.f32 1e-05, %v769_v42 }
 0x19d   :  { %5813 = vrsqrt.f32 %v770_v43 }
 0x19e   :  { %5815 = vrsqrt.f32 %v771_v44 }
 0x1a7   :  { %v5814_v54 = vpop.eup %5813 }
 0x1a8   :  { %v5816_v56 = vpop.eup %5815  ;;  %v774_v57 = vmul.f32 %v5814_v54, %v734_v5  ;;  %v776_v58 = vmul.f32 %v5814_v54, %v736_v6  ;;  %v778_v11 = vmul.f32 %v5814_v54, %v738_v7  ;;  %v780_v59 = vmul.f32 %v5814_v54, %v740_v8  ;;  %v6434_v54 = vpop.permute.xlu1 %1125 }
 0x1a9   :  { %v775_v61 = vmul.f32 %v5816_v56, %v735_v9  ;;  %v777_v62 = vmul.f32 %v5816_v56, %v737_v10  ;;  %v779_v63 = vmul.f32 %v5816_v56, %v739_v15  ;;  %v781_v0 = vmul.f32 %v5816_v56, %v741_v17 }
 0x1aa   :  { %v793_v2 = vmul.f32 %v786_v51, %v774_v57  ;;  %v795_v3 = vmul.f32 %v786_v51, %v776_v58  ;;  %v797_v4 = vmul.f32 %v786_v51, %v778_v11  ;;  %v799_v18 = vmul.f32 %v786_v51, %v780_v59 }
 0x1ab   :  { %v794_v19 = vmul.f32 %v790_v53, %v775_v61  ;;  %v796_v20 = vmul.f32 %v790_v53, %v777_v62  ;;  %v798_v21 = vmul.f32 %v790_v53, %v779_v63  ;;  %v800_v7 = vmul.f32 %v790_v53, %v781_v0 }
 0x1ac   :  { %v6371_v22 = vadd.f32 %v805_v52, %v793_v2  ;;  %v6373_v5 = vadd.f32 %v805_v52, %v795_v3  ;;  %v6375_v6 = vadd.f32 %v805_v52, %v797_v4  ;;  %v6377_v8 = vadd.f32 %v805_v52, %v799_v18 }
 0x1ad   :  { %v6379_v9 = vadd.f32 %v809_v55, %v794_v19  ;;  %v6381_v10 = vadd.f32 %v809_v55, %v796_v20  ;;  %v6383_v15 = vadd.f32 %v809_v55, %v798_v21  ;;  %v6397_v30 = vadd.f32 %v809_v55, %v800_v7 }
 0x1ae   :  { %v1028_v17 = vrot.slane %v6371_v22, 7  ;;  %v829_v23 = vrot.slane %v6371_v22, 3  ;;  %v918_v24 = vrot.slane %v6371_v22, 4  ;;  %v959_v25 = vrot.slane %v6371_v22, 5 }
 0x1af   :  { %v1029_v12 = vrot.slane %v6379_v9, 7  ;;  %v830_v27 = vrot.slane %v6379_v9, 3  ;;  %v919_v13 = vrot.slane %v6379_v9, 4  ;;  %v960_v28 = vrot.slane %v6379_v9, 5 }
 0x1b0   :  { %v1050_v14 = vsel %vm1027_vm9, -1e+30, %v1028_v17  ;;  %v851_v31 = vsel %vm828_vm10, -1e+30, %v829_v23  ;;  %v940_v16 = vsel %vm917_vm11, -1e+30, %v918_v24 }
 0x1b1   :  { %v1051_v32 = vsel %vm1027_vm9, -1e+30, %v1029_v12  ;;  %v1052_v33 = vadd.f32 %v1050_v14, %v6367_v50  ;;  %v852_v34 = vsel %vm828_vm10, -1e+30, %v830_v27  ;;  %v873_v35 = vadd.f32 %v856_v60, %v851_v31  ;;  %v1116_v31 = vpop.permute.xlu0 %1115 }
 0x1b2   :  { %v1053_v36 = vadd.f32 %v1051_v32, %v6367_v50  ;;  %v874_v37 = vadd.f32 %v856_v60, %v852_v34  ;;  %v941_v38 = vsel %vm917_vm11, -1e+30, %v919_v13  ;;  %v942_v39 = vadd.f32 %v940_v16, %v856_v60 }
 0x1b3   :  { %v901_v40 = vadd.f32 %v6367_v50, %v873_v35  ;;  %v943_v41 = vadd.f32 %v941_v38, %v856_v60  ;;  %v981_v42 = vsel %vm958_vm12, -1e+30, %v959_v25  ;;  %v982_v43 = vsel %vm958_vm12, -1e+30, %v960_v28 }
 0x1b4   :  { %v902_v44 = vadd.f32 %v6367_v50, %v874_v37  ;;  %v983_v45 = vadd.f32 %v981_v42, %v856_v60  ;;  %v984_v46 = vadd.f32 %v982_v43, %v856_v60  ;;  %v1030_v47 = vrot.slane %v6373_v5, 7  ;;  %v861_v37 = vpop.permute.xlu1 %860 }
 0x1b5   :  { %v909_v49 = vmax.f32 %v6371_v22, %v901_v40  ;;  %v1032_v51 = vrot.slane %v6381_v10, 7  ;;  %v1034_v52 = vrot.slane %v6375_v6, 7  ;;  %v1036_v53 = vrot.slane %v6383_v15, 7 }
 0x1b6   :  { %v910_v55 = vmax.f32 %v6379_v9, %v902_v44  ;;  %v1075_v56 = vrot.slane %v6375_v6, 1  ;;  %v1077_v57 = vrot.slane %v6383_v15, 1  ;;  %v1079_v58 = vrot.slane %v6377_v8, 1 }
 0x1b7   :  { %v950_v11 = vmax.f32 %v909_v49, %v942_v39  ;;  %v1035_v59 = vsel %vm1027_vm9, %v1030_v47, %v1034_v52  ;;  %v1037_v60 = vsel %vm1027_vm9, %v1032_v51, %v1036_v53  ;;  %v1081_v61 = vrot.slane %v6397_v30, 1 }
 0x1b8   :  { %v951_v62 = vmax.f32 %v910_v55, %v943_v41  ;;  %v6452_v63 = vadd.f32 %v1035_v59, %v6369_v1  ;;  %v6455_v0 = vadd.f32 %v1037_v60, %v6369_v1  ;;  %v1080_v2 = vsel %vm1068_vm13, %v1075_v56, %v1079_v58 }
 0x1b9   :  { %v1082_v3 = vsel %vm1068_vm13, %v1077_v57, %v1081_v61  ;;  %v6468_v4 = vadd.f32 %v1080_v2, %v6395_v29  ;;  %v1011_v18 = vadd.f32 %v6428_v48, %v983_v45  ;;  %v1012_v19 = vadd.f32 %v6428_v48, %v984_v46 }
 0x1ba   :  { %v6473_v20 = vadd.f32 %v1082_v3, %v6395_v29  ;;  %v1069_v21 = vrot.slane %v6371_v22, 1  ;;  %v1070_v7 = vrot.slane %v6373_v5, 1  ;;  %v1072_v14 = vrot.slane %v6379_v9, 1  ;;  %v6513_v3 = vpop.permute.xlu0 %870 }
 0x1bb   :  { %v1019_v16 = vmax.f32 %v950_v11, %v1011_v18  ;;  %v1020_v32 = vmax.f32 %v951_v62, %v1012_v19  ;;  %v1073_v34 = vrot.slane %v6381_v10, 1  ;;  %v831_v35 = vrot.slane %v6373_v5, 3 }
 0x1bc   :  { %v1071_v38 = vsel %vm1068_vm13, %v1069_v21, %v1070_v7  ;;  %v833_v39 = vrot.slane %v6381_v10, 3  ;;  %v920_v40 = vrot.slane %v6373_v5, 4  ;;  %v7641_v41 = vrot.slane %v6381_v10, 4  ;;  %v6525_v21 = vpop.permute.xlu1 %888 }
 0x1bd   :  { %v1060_v42 = vmax.f32 %v1019_v16, %v1052_v33  ;;  %v1061_v43 = vmax.f32 %v1020_v32, %v1053_v36  ;;  %v1074_v44 = vsel %vm1068_vm13, %v1072_v14, %v1073_v34  ;;  %v1093_v45 = vadd.f32 %v1071_v38, %v6428_v48 }
 0x1be   :  { %v1094_v46 = vadd.f32 %v1074_v44, %v6428_v48  ;;  %v832_v49 = vsel %vm828_vm10, %v829_v23, %v831_v35  ;;  %v834_v33 = vsel %vm828_vm10, %v830_v27, %v833_v39  ;;  %v921_v36 = vsel %vm917_vm11, %v918_v24, %v920_v40 }
 0x1bf   :  { %v1101_v55 = vmax.f32 %v1060_v42, %v1093_v45  ;;  %v923_v11 = vsel %vm917_vm11, %v919_v13, %v7641_v41  ;;  %v7639_v23 = vrot.slane %v6373_v5, 5  ;;  %v7640_v59 = vrot.slane %v6381_v10, 5 }
 0x1c0   :  { %v1102_v60 = vmax.f32 %v1061_v43, %v1094_v46  ;;  %v1133_v62 = vadd.f32 %v1116_v31, %v832_v49  ;;  %v1134_v27 = vadd.f32 %v1116_v31, %v834_v33  ;;  %v1161_v2 = vadd.f32 %v1116_v31, %v921_v36 }
 0x1c1   :  { %v962_v24 = vsel %vm958_vm12, %v959_v25, %v7639_v23  ;;  %v964_v13 = vsel %vm958_vm12, %v960_v28, %v7640_v59  ;;  %v1162_v18 = vadd.f32 %v1116_v31, %v923_v11  ;;  %v875_v19 = vadd.f32 %v861_v37, %v832_v49 }
 0x1c2   :  { %v1141_v14 = vadd.f32 %v1133_v62, %v6367_v50  ;;  %v1142_v16 = vadd.f32 %v1134_v27, %v6367_v50  ;;  %v1181_v32 = vadd.f32 %v1116_v31, %v962_v24  ;;  %v1182_v38 = vadd.f32 %v1116_v31, %v964_v13 }
 0x1c3   :  { %v876_v42 = vadd.f32 %v861_v37, %v834_v33  ;;  %v944_v43 = vadd.f32 %v921_v36, %v861_v37  ;;  %v945_v44 = vadd.f32 %v923_v11, %v861_v37  ;;  %v985_v25 = vadd.f32 %v962_v24, %v861_v37 }
 0x1c4   :  { %v1149_v45 = vmax.f32 %v1101_v55, %v1141_v14  ;;  %v1150_v46 = vmax.f32 %v1102_v60, %v1142_v16  ;;  %v1189_v23 = vadd.f32 %v1181_v32, %v6428_v48  ;;  %v1190_v28 = vadd.f32 %v1182_v38, %v6428_v48 }
 0x1c5   :  { %v986_v59 = vadd.f32 %v964_v13, %v861_v37  ;;  %v903_v49 = vadd.f32 %v6525_v21, %v875_v19  ;;  %v904_v41 = vadd.f32 %v6525_v21, %v876_v42  ;;  %v1031_v50 = vsel %vm1027_vm9, %v1028_v17, %v1030_v47  ;;  %v6544_v37 = vpop.permute.xlu0 %898  ;;  %v6550_v47 = vpop.permute.xlu1 %998 }
 0x1c6   :  { %v1169_v31 = vmax.f32 %v1149_v45, %v1161_v2  ;;  %v1170_v33 = vmax.f32 %v1150_v46, %v1162_v18  ;;  %v1033_v36 = vsel %vm1027_vm9, %v1029_v12, %v1032_v51  ;;  %v1054_v48 = vadd.f32 %v1031_v50, %v6525_v21 }
 0x1c7   :  { %v911_v55 = vmax.f32 %v6373_v5, %v903_v49  ;;  %v912_v11 = vmax.f32 %v6381_v10, %v904_v41  ;;  %v1055_v22 = vadd.f32 %v1033_v36, %v6525_v21  ;;  %v1038_v17 = vrot.slane %v6377_v8, 7 }
 0x1c8   :  { %v6552_v60 = vmax.f32 %v1169_v31, %v1189_v23  ;;  %v6554_v62 = vmax.f32 %v1170_v33, %v1190_v28  ;;  %v1040_v9 = vrot.slane %v6397_v30, 7  ;;  %v1013_v12 = vadd.f32 %v6550_v47, %v985_v25 }
 0x1c9   :  { %v1039_v51 = vsel %vm1027_vm9, %v1034_v52, %v1038_v17  ;;  %v952_v27 = vmax.f32 %v911_v55, %v944_v43  ;;  %v953_v41 = vmax.f32 %v912_v11, %v945_v44  ;;  %v1014_v2 = vadd.f32 %v6550_v47, %v986_v59  ;;  %v6583_v16 = vpop.permute.xlu0 %1008  ;;  %v1121_v46 = vpop.permute.xlu1 %1120 }
 0x1ca   :  { %v1041_v24 = vsel %vm1027_vm9, %v1036_v53, %v1040_v9  ;;  %v6566_v23 = vadd.f32 %v1039_v51, %v6544_v37  ;;  %v1076_v13 = vsel %vm1068_vm13, %v1070_v7, %v1075_v56  ;;  %v1078_v52 = vsel %vm1068_vm13, %v1073_v34, %v1077_v57 }
 0x1cb   :  { %v6579_v59 = vadd.f32 %v1041_v24, %v6544_v37  ;;  %v1021_v18 = vmax.f32 %v952_v27, %v1013_v12  ;;  %v1022_v53 = vmax.f32 %v953_v41, %v1014_v2  ;;  %v1095_v19 = vadd.f32 %v1076_v13, %v6550_v47 }
 0x1cc   :  { %v1096_v14 = vadd.f32 %v1078_v52, %v6550_v47  ;;  %v1091_v56 = vsel %vm1068_vm13, %v1079_v58, -1e+30  ;;  %v1092_v7 = vsel %vm1068_vm13, %v1081_v61, -1e+30  ;;  %v835_v57 = vrot.slane %v6375_v6, 3 }
 0x1cd   :  { %v1062_v34 = vmax.f32 %v1021_v18, %v1054_v48  ;;  %v1063_v32 = vmax.f32 %v1022_v53, %v1055_v22  ;;  %v6593_v38 = vadd.f32 %v1091_v56, %v6583_v16  ;;  %v6596_v42 = vadd.f32 %v1092_v7, %v6583_v16 }
 0x1ce   :  { %v836_v43 = vsel %vm828_vm10, %v831_v35, %v835_v57  ;;  %v837_v58 = vrot.slane %v6383_v15, 3  ;;  %v924_v44 = vrot.slane %v6375_v6, 4  ;;  %v926_v61 = vrot.slane %v6383_v15, 4 }
 0x1cf   :  { %v1103_v25 = vmax.f32 %v1062_v34, %v1095_v19  ;;  %v1104_v45 = vmax.f32 %v1063_v32, %v1096_v14  ;;  %v877_v28 = vadd.f32 %v6389_v26, %v836_v43  ;;  %v965_v49 = vrot.slane %v6375_v6, 5 }
 0x1d0   :  { %v838_v50 = vsel %vm828_vm10, %v833_v39, %v837_v58  ;;  %v925_v35 = vsel %vm917_vm11, %v920_v40, %v924_v44  ;;  %v7642_v31 = vrot.slane %v6381_v10, 4  ;;  %v967_v36 = vrot.slane %v6383_v15, 5 }
 0x1d1   :  { %v878_v48 = vadd.f32 %v6389_v26, %v838_v50  ;;  %v905_v55 = vadd.f32 %v6369_v1, %v877_v28  ;;  %v946_v11 = vadd.f32 %v925_v35, %v6389_v26  ;;  %v7643_v39 = vrot.slane %v6373_v5, 5 }
 0x1d2   :  { %v927_v33 = vsel %vm917_vm11, %v7642_v31, %v926_v61  ;;  %v7644_v17 = vrot.slane %v6381_v10, 5  ;;  %v1135_v12 = vadd.f32 %v1121_v46, %v836_v43  ;;  %v1136_v51 = vadd.f32 %v1121_v46, %v838_v50 }
 0x1d3   :  { %v947_v22 = vadd.f32 %v927_v33, %v6389_v26  ;;  %v966_v40 = vsel %vm958_vm12, %v7643_v39, %v965_v49  ;;  %v906_v27 = vadd.f32 %v6369_v1, %v878_v48  ;;  %v913_v41 = vmax.f32 %v6375_v6, %v905_v55 }
 0x1d4   :  { %v968_v9 = vsel %vm958_vm12, %v7644_v17, %v967_v36  ;;  %v987_v2 = vadd.f32 %v966_v40, %v6389_v26  ;;  %v1143_v13 = vadd.f32 %v1135_v12, %v6525_v21  ;;  %v1144_v5 = vadd.f32 %v1136_v51, %v6525_v21 }
 0x1d5   :  { %v988_v24 = vadd.f32 %v968_v9, %v6389_v26  ;;  %v1163_v52 = vadd.f32 %v1121_v46, %v925_v35  ;;  %v1164_v18 = vadd.f32 %v1121_v46, %v927_v33  ;;  %v914_v10 = vmax.f32 %v6383_v15, %v906_v27  ;;  %v1131_v27 = vpop.permute.xlu0 %1130 }
 0x1d6   :  { %v954_v53 = vmax.f32 %v913_v41, %v946_v11  ;;  %v1015_v19 = vadd.f32 %v6395_v29, %v987_v2  ;;  %v1151_v56 = vmax.f32 %v1103_v25, %v1143_v13  ;;  %v1152_v7 = vmax.f32 %v1104_v45, %v1144_v5 }
 0x1d7   :  { %v1016_v14 = vadd.f32 %v6395_v29, %v988_v24  ;;  %v1183_v34 = vadd.f32 %v1121_v46, %v966_v40  ;;  %v1184_v32 = vadd.f32 %v1121_v46, %v968_v9  ;;  %v955_v43 = vmax.f32 %v914_v10, %v947_v22 }
 0x1d8   :  { %v1023_v28 = vmax.f32 %v954_v53, %v1015_v19  ;;  %v839_v26 = vrot.slane %v6377_v8, 3  ;;  %v841_v50 = vrot.slane %v6397_v30, 3  ;;  %v1171_v21 = vmax.f32 %v1151_v56, %v1163_v52 }
 0x1d9   :  { %v1172_v35 = vmax.f32 %v1152_v7, %v1164_v18  ;;  %v1191_v31 = vadd.f32 %v1183_v34, %v6550_v47  ;;  %v1192_v15 = vadd.f32 %v1184_v32, %v6550_v47  ;;  %v1024_v33 = vmax.f32 %v955_v43, %v1016_v14 }
 0x1da   :  { %v1064_v48 = vmax.f32 %v1023_v28, %v6452_v63  ;;  %v840_v25 = vsel %vm828_vm10, %v835_v57, %v839_v26  ;;  %v842_v45 = vsel %vm828_vm10, %v837_v58, %v841_v50  ;;  %v928_v47 = vrot.slane %v6377_v8, 4 }
 0x1db   :  { %v6644_v46 = vmax.f32 %v1171_v21, %v1191_v31  ;;  %v6646_v55 = vmax.f32 %v1172_v35, %v1192_v15  ;;  %v879_v11 = vadd.f32 %v6513_v3, %v840_v25  ;;  %v880_v22 = vadd.f32 %v6513_v3, %v842_v45 }
 0x1dc   :  { %v1065_v39 = vmax.f32 %v1024_v33, %v6455_v0  ;;  %v1105_v40 = vmax.f32 %v1064_v48, %v6468_v4  ;;  %v930_v63 = vrot.slane %v6397_v30, 4  ;;  %v969_v17 = vrot.slane %v6377_v8, 5 }
 0x1dd   :  { %v907_v57 = vadd.f32 %v6544_v37, %v879_v11  ;;  %v908_v58 = vadd.f32 %v6544_v37, %v880_v22  ;;  %v971_v9 = vrot.slane %v6397_v30, 5  ;;  %v929_v51 = vsel %vm917_vm11, %v924_v44, %v928_v47 }
 0x1de   :  { %v1106_v12 = vmax.f32 %v1065_v39, %v6473_v20  ;;  %v931_v0 = vsel %vm917_vm11, %v926_v61, %v930_v63  ;;  %v1111_v4 = vsel %vm828_vm10, %v839_v26, -1e+30  ;;  %v948_v24 = vadd.f32 %v929_v51, %v6513_v3 }
 0x1df   :  { %v915_v41 = vmax.f32 %v6377_v8, %v907_v57  ;;  %v916_v2 = vmax.f32 %v6397_v30, %v908_v58  ;;  %v949_v13 = vadd.f32 %v931_v0, %v6513_v3  ;;  %v970_v5 = vsel %vm958_vm12, %v965_v49, %v969_v17 }
 0x1e0   :  { %v972_v20 = vsel %vm958_vm12, %v967_v36, %v971_v9  ;;  %v1112_v44 = vsel %vm828_vm10, %v841_v50, -1e+30  ;;  %v1137_v61 = vadd.f32 %v6434_v54, %v840_v25  ;;  %v989_v8 = vadd.f32 %v970_v5, %v6513_v3 }
 0x1e1   :  { %v956_v52 = vmax.f32 %v915_v41, %v948_v24  ;;  %v957_v18 = vmax.f32 %v916_v2, %v949_v13  ;;  %v990_v30 = vadd.f32 %v972_v20, %v6513_v3  ;;  %v1138_v10 = vadd.f32 %v6434_v54, %v842_v45 }
 0x1e2   :  { %v1139_v53 = vadd.f32 %v1131_v27, %v1111_v4  ;;  %v1140_v19 = vadd.f32 %v1131_v27, %v1112_v44  ;;  %v1145_v6 = vadd.f32 %v1137_v61, %v6369_v1  ;;  %v1017_v49 = vadd.f32 %v6583_v16, %v989_v8 }
 0x1e3   :  { %v1018_v36 = vadd.f32 %v6583_v16, %v990_v30  ;;  %v1159_v14 = vsel %vm917_vm11, %v928_v47, -1e+30  ;;  %v1160_v56 = vsel %vm917_vm11, %v930_v63, -1e+30  ;;  %v1146_v7 = vadd.f32 %v1138_v10, %v6369_v1 }
 0x1e4   :  { %v1147_v34 = vadd.f32 %v1139_v53, %v6544_v37  ;;  %v1148_v3 = vadd.f32 %v1140_v19, %v6544_v37  ;;  %v1153_v32 = vmax.f32 %v1105_v40, %v1145_v6  ;;  %v1025_v43 = vmax.f32 %v956_v52, %v1017_v49  ;;  %v5591_v52 = vld [vmem:[%s7634_s8] sm:$0xff]   ;;  %v5593_v53 = vld [vmem:[%s7634_s8 + $0x48] sm:$0xff]  }
 0x1e5   :  { %v1026_v28 = vmax.f32 %v957_v18, %v1018_v36  ;;  %v1165_v26 = vadd.f32 %v6434_v54, %v929_v51  ;;  %v1166_v50 = vadd.f32 %v6434_v54, %v931_v0  ;;  %v1154_v21 = vmax.f32 %v1106_v12, %v1146_v7  ;;  %v5592_v49 = vld [vmem:[%s7634_s8 + $0x380] sm:$0xff]  }
 0x1e6   :  { %v1167_v35 = vadd.f32 %v1159_v14, %v1131_v27  ;;  %v1168_v31 = vadd.f32 %v1160_v56, %v1131_v27  ;;  %v1179_v15 = vsel %vm958_vm12, %v969_v17, -1e+30  ;;  %v1066_v33 = vmax.f32 %v1025_v43, %v6566_v23 }
 0x1e7   :  { %v1067_v1 = vmax.f32 %v1026_v28, %v6579_v59  ;;  %v1173_v48 = vmax.f32 %v1153_v32, %v1165_v26  ;;  %v1180_v25 = vsel %vm958_vm12, %v971_v9, -1e+30  ;;  %v1174_v37 = vmax.f32 %v1154_v21, %v1166_v50  ;;  %v5595_v28 = vld [vmem:[%s7634_s8 + $0x8] sm:$0xff]  }
 0x1e8   :  { %v1185_v45 = vadd.f32 %v6434_v54, %v970_v5  ;;  %v1186_v11 = vadd.f32 %v6434_v54, %v972_v20  ;;  %v1187_v22 = vadd.f32 %v1179_v15, %v1131_v27  ;;  %v1107_v39 = vmax.f32 %v1066_v33, %v6593_v38 }
 0x1e9   :  { %v1108_v40 = vmax.f32 %v1067_v1, %v6596_v42  ;;  %v1188_v47 = vadd.f32 %v1180_v25, %v1131_v27  ;;  %v1250_v63 = vrot.slane %v6554_v62, 1  ;;  %v2109_v58 = vrot.slane %v6554_v62, 5  ;;  %v5596_v1 = vld [vmem:[%s7634_s8 + $0x388] sm:$0xff]  }
 0x1ea   :  { %v1193_v23 = vadd.f32 %v1185_v45, %v6395_v29  ;;  %v1194_v59 = vadd.f32 %v1186_v11, %v6395_v29  ;;  %v1195_v57 = vadd.f32 %v1187_v22, %v6583_v16  ;;  %v1155_v17 = vmax.f32 %v1107_v39, %v1147_v34  ;;  %v5594_v34 = vld [vmem:[%s7634_s8 + $0x3c8] sm:$0xff]   ;;  %v5599_v39 = vld [vmem:[%s7634_s8 + $0x10] sm:$0xff]  }
 0x1eb   :  { %v1156_v9 = vmax.f32 %v1108_v40, %v1148_v3  ;;  %v1196_v54 = vadd.f32 %v1188_v47, %v6583_v16  ;;  %v1249_v12 = vrot.slane %v6552_v60, 1  ;;  %v2108_v51 = vrot.slane %v6552_v60, 5 }
 0x1ec   :  { %v6700_v38 = vmax.f32 %v1173_v48, %v1193_v23  ;;  %v6702_v42 = vmax.f32 %v1174_v37, %v1194_v59  ;;  %v2473_v0 = vrot.slane %v6554_v62, 7  ;;  %v1175_v4 = vmax.f32 %v1155_v17, %v1167_v35  ;;  %v5597_v35 = vld [vmem:[%s7634_s8 + $0x50] sm:$0xff]   ;;  %v5601_v23 = vld [vmem:[%s7634_s8 + $0x58] sm:$0xff]  }
 0x1ed   :  { %v1176_v29 = vmax.f32 %v1156_v9, %v1168_v31  ;;  %v2472_v27 = vrot.slane %v6552_v60, 7  ;;  %v1563_v41 = vrot.slane %v6554_v62, 2  ;;  %v2837_v32 = vrot.slane %v6646_v55, 1  ;;  %v5598_v37 = vld [vmem:[%s7634_s8 + $0x3d0] sm:$0xff]  }
 0x1ee   :  { %v1254_v2 = vsel %vm1027_vm9, %v1250_v63, %v6702_v42  ;;  %v2113_v16 = vrot.slane %v6702_v42, 4  ;;  %v1253_v24 = vsel %vm1027_vm9, %v1249_v12, %v6700_v38  ;;  %v2112_v13 = vrot.slane %v6700_v38, 4  ;;  %v5600_v17 = vld [vmem:[%s7634_s8 + $0x390] sm:$0xff]  }
 0x1ef   :  { %v6714_v5 = vmax.f32 %v1175_v4, %v1195_v57  ;;  %v6716_v20 = vmax.f32 %v1176_v29, %v1196_v54  ;;  %v1256_v44 = vpack.c.bf16 %v1254_v2, %v1254_v2  ;;  %v1255_v61 = vpack.c.bf16 %v1253_v24, %v1253_v24  ;;  %v5605_v24 = vld [vmem:[%s7634_s8 + $0x60] sm:$0xff]  }
 0x1f0   :  { %v2117_v18 = vsel %vm1027_vm9, %v2109_v58, %v2113_v16  ;;  %v2116_v8 = vsel %vm1027_vm9, %v2108_v51, %v2112_v13  ;;  %v1208_v30 = vrot.slane %v6702_v42, 7  ;;  %v2477_v10 = vrot.slane %v6702_v42, 6  ;;  %v5602_v51 = vld [vmem:[%s7634_s8 + $0x3d8] sm:$0xff]  }
 0x1f1   :  { %1418 = vmatprep.mubr.bf16.mxu1 %v1256_v44  ;;  %v2119_v19 = vpack.c.bf16 %v2117_v18, %v2117_v18  ;;  %v2118_v6 = vpack.c.bf16 %v2116_v8, %v2116_v8  ;;  %v1207_v36 = vrot.slane %v6700_v38, 7  ;;  %v2476_v14 = vrot.slane %v6700_v38, 6 }
 0x1f2   :  { %1419 = vmatmul.mubr.bf16.vlgmr.msra.gmra.mrb[0].mxu1 %v1255_v61  ;;  %v1212_v56 = vsel %vm1027_vm9, %v6554_v62, %v1208_v30  ;;  %v2481_v7 = vsel %vm1027_vm9, %v2473_v0, %v2477_v10  ;;  %v1567_v3 = vrot.slane %v6702_v42, 1  ;;  %v1562_v50 = vrot.slane %v6552_v60, 2  ;;  %v5606_v10 = vld [vmem:[%s7634_s8 + $0x3e0] sm:$0xff]  }
 0x1f3   :  { %2281 = vmatprep.mubr.bf16.mxu0 %v2119_v19  ;;  %5057 = vmatpush3.bf16.msra.mxu1 %v5591_v52  ;;  %v1214_v43 = vpack.c.bf16 %v1212_v56, %v1212_v56  ;;  %v6746_v26 = vsel %vm1027_vm9, %v6552_v60, %v1207_v36  ;;  %v2483_v21 = vpack.c.bf16 %v2481_v7, %v2481_v7  ;;  %v1566_v33 = vrot.slane %v6700_v38, 1  ;;  %v5604_v52 = vld [vmem:[%s7634_s8 + $0x398] sm:$0xff]   ;;  %v5609_v7 = vld [vmem:[%s7634_s8 + $0x68] sm:$0xff]  }
 0x1f4   :  { %2282 = vmatmul.mubr.bf16.vlgmr.msra.gmra.mrb[8].mxu0 %v2118_v6  ;;  %5058 = vmatprep.subr.bf16.mxu1 %v5593_v53  ;;  %v6753_v31 = vsel %vm1027_vm9, %v2472_v27, %v2476_v14  ;;  %v6756_v15 = vsel %vm1027_vm9, %v1563_v41, %v1567_v3  ;;  %v6764_v48 = vsel %vm1027_vm9, %v2837_v32, %v6716_v20  ;;  %v2836_v25 = vrot.slane %v6644_v46, 1  ;;  %v5603_v27 = vld [vmem:[%s7634_s8 + $0x18] sm:$0xff]   ;;  %v5608_v3 = vld [vmem:[%s7634_s8 + $0x3a0] sm:$0xff]  }
 0x1f5   :  { %5189 = vmatpush3.bf16.msra.mxu0 %v5592_v49  ;;  %1554 = vmatprep.mubr.bf16.mxu1 %v1214_v43  ;;  %v6771_v45 = vsel %vm1027_vm9, %v1562_v50, %v1566_v33  ;;  %v1745_v11 = vrot.slane %v6554_v62, 3  ;;  %v1749_v22 = vrot.slane %v6702_v42, 2  ;;  %v3197_v47 = vrot.slane %v6646_v55, 3  ;;  %v5607_v49 = vld [vmem:[%s7634_s8 + $0x20] sm:$0xff]   ;;  %v5610_v50 = vld [vmem:[%s7634_s8 + $0x3e8] sm:$0xff]  }
 0x1f6   :  { %2645 = vmatprep.mubr.bf16.mxu0 %v2483_v21  ;;  %5190 = vmatprep.subr.bf16.mxu0 %v5594_v34  ;;  %v6780_v40 = vsel %vm1027_vm9, %v2836_v25, %v6714_v5  ;;  %v3201_v63 = vrot.slane %v6716_v20, 2  ;;  %v1744_v57 = vrot.slane %v6552_v60, 3  ;;  %v1748_v58 = vrot.slane %v6700_v38, 2 }
 0x1f7   :  { %5059 = vmatpush3.bf16.msra.mxu1 %v5595_v28  ;;  %v6788_v59 = vsel %vm1027_vm9, %v1745_v11, %v1749_v22  ;;  %v3196_v54 = vrot.slane %v6644_v46, 3  ;;  %v3200_v12 = vrot.slane %v6714_v5, 2  ;;  %v1927_v4 = vrot.slane %v6554_v62, 4 }
 0x1f8   :  { %5060 = vmatprep.subr.bf16.mxu1 %v5597_v35  ;;  %v6796_v9 = vsel %vm1027_vm9, %v3197_v47, %v3201_v63  ;;  %v6804_v0 = vsel %vm1027_vm9, %v1744_v57, %v1748_v58  ;;  %v1931_v29 = vrot.slane %v6702_v42, 3  ;;  %v3561_v2 = vrot.slane %v6646_v55, 5  ;;  %v5611_v35 = vld [vmem:[%s7634_s8 + $0x28] sm:$0xff]   ;;  %v5614_v57 = vld [vmem:[%s7634_s8 + $0x3f0] sm:$0xff]  }
 0x1f9   :  { %5191 = vmatpush3.bf16.msra.mxu0 %v5596_v1  ;;  %v6812_v41 = vsel %vm1027_vm9, %v3196_v54, %v3200_v12  ;;  %v3565_v16 = vrot.slane %v6716_v20, 4  ;;  %v1926_v44 = vrot.slane %v6552_v60, 4  ;;  %v1930_v61 = vrot.slane %v6700_v38, 3  ;;  %v5612_v47 = vld [vmem:[%s7634_s8 + $0x3a8] sm:$0xff]   ;;  %v5615_v12 = vld [vmem:[%s7634_s8 + $0x30] sm:$0xff]  }
 0x1fa   :  { %5192 = vmatprep.subr.bf16.mxu0 %v5598_v37  ;;  %v6820_v13 = vsel %vm1027_vm9, %v1927_v4, %v1931_v29  ;;  %v3560_v8 = vrot.slane %v6644_v46, 5  ;;  %v3564_v30 = vrot.slane %v6714_v5, 4  ;;  %v2291_v19 = vrot.slane %v6554_v62, 6  ;;  %v5613_v37 = vld [vmem:[%s7634_s8 + $0x70] sm:$0xff]  }
 0x1fb   :  { %5061 = vmatpush3.bf16.msra.mxu1 %v5599_v39  ;;  %v6828_v18 = vsel %vm1027_vm9, %v3561_v2, %v3565_v16  ;;  %v6836_v53 = vsel %vm1027_vm9, %v1926_v44, %v1930_v61  ;;  %v2295_v6 = vrot.slane %v6702_v42, 5  ;;  %v3925_v14 = vrot.slane %v6646_v55, 7  ;;  %v5617_v2 = vld [vmem:[%s7634_s8 + $0x78] sm:$0xff]   ;;  %v5616_v61 = vld [vmem:[%s7634_s8 + $0x3b0] sm:$0xff]  }
 0x1fc   :  { %5062 = vmatprep.subr.bf16.mxu1 %v5601_v23  ;;  %v6844_v36 = vsel %vm1027_vm9, %v3560_v8, %v3564_v30  ;;  %v3929_v56 = vrot.slane %v6716_v20, 6  ;;  %v2290_v42 = vrot.slane %v6552_v60, 6  ;;  %v2294_v34 = vrot.slane %v6700_v38, 5  ;;  %v5621_v8 = vld [vmem:[%s7634_s8 + $0x140] sm:$0xff]   ;;  %v5620_v30 = vld [vmem:[%s7634_s8 + $0x3b8] sm:$0xff]  }
 0x1fd   :  { %5193 = vmatpush3.bf16.msra.mxu0 %v5600_v17  ;;  %v6852_v62 = vsel %vm1027_vm9, %v2291_v19, %v2295_v6  ;;  %v3924_v43 = vrot.slane %v6644_v46, 7  ;;  %v3928_v28 = vrot.slane %v6714_v5, 6  ;;  %v2657_v38 = vrot.slane %v6716_v20, 7  ;;  %v5623_v19 = vld [vmem:[%s7634_s8 + $0x100] sm:$0xff]  }
 0x1fe   :  { %5194 = vmatprep.subr.bf16.mxu0 %v5602_v51  ;;  %v6860_v32 = vsel %vm1027_vm9, %v3925_v14, %v3929_v56  ;;  %v6868_v60 = vsel %vm1027_vm9, %v2290_v42, %v2294_v34  ;;  %v2656_v21 = vrot.slane %v6714_v5, 7  ;;  %v3015_v1 = vrot.slane %v6646_v55, 2  ;;  %v5624_v56 = vld [vmem:[%s7634_s8 + $0x480] sm:$0xff]   ;;  %v5628_v34 = vld [vmem:[%s7634_s8 + $0x488] sm:$0xff]  }
 0x1ff   :  { %5063 = vmatpush3.bf16.msra.mxu1 %v5603_v27  ;;  %v6876_v33 = vsel %vm1027_vm9, %v3924_v43, %v3928_v28  ;;  %v3019_v25 = vrot.slane %v6716_v20, 1  ;;  %v6885_v11 = vsel %vm1027_vm9, %v6646_v55, %v2657_v38  ;;  %v3014_v39 = vrot.slane %v6644_v46, 2  ;;  %v5633_v43 = vld [vmem:[%s7634_s8 + $0x158] sm:$0xff]   ;;  %v5632_v28 = vld [vmem:[%s7634_s8 + $0x490] sm:$0xff]  }
 0x200   :  { %5064 = vmatprep.subr.bf16.mxu1 %v5605_v24  ;;  %v6889_v22 = vsel %vm1027_vm9, %v6644_v46, %v2656_v21  ;;  %v3018_v23 = vrot.slane %v6714_v5, 1  ;;  %v3379_v58 = vrot.slane %v6646_v55, 4  ;;  %v3383_v17 = vrot.slane %v6716_v20, 3  ;;  %v5635_v38 = vld [vmem:[%s7634_s8 + $0x118] sm:$0xff]   ;;  %v5637_v21 = vld [vmem:[%s7634_s8 + $0x160] sm:$0xff]  }
 0x201   :  { %5195 = vmatpush3.bf16.msra.mxu0 %v5604_v52  ;;  %v6896_v63 = vsel %vm1027_vm9, %v3015_v1, %v3019_v25  ;;  %v3378_v54 = vrot.slane %v6644_v46, 4  ;;  %v3382_v4 = vrot.slane %v6714_v5, 3  ;;  %v3743_v29 = vrot.slane %v6646_v55, 6  ;;  %v5618_v52 = vld [vmem:[%s7634_s8 + $0x3f8] sm:$0xff]   ;;  %v5638_v1 = vld [vmem:[%s7634_s8 + $0x4e0] sm:$0xff]  }
 0x202   :  { %5196 = vmatprep.subr.bf16.mxu0 %v5606_v10  ;;  %v6909_v51 = vsel %vm1027_vm9, %v3014_v39, %v3018_v23  ;;  %v3747_v27 = vrot.slane %v6716_v20, 5  ;;  %v6918_v16 = vsel %vm1027_vm9, %v3379_v58, %v3383_v17  ;;  %v3742_v24 = vrot.slane %v6644_v46, 6  ;;  %v5622_v10 = vld [vmem:[%s7634_s8 + $0x4c0] sm:$0xff]   ;;  %v5643_v23 = vld [vmem:[%s7634_s8 + $0x128] sm:$0xff]   ;;  %v5646_v17 = vld [vmem:[%s7634_s8 + $0x4f0] sm:$0xff]  }
 0x203   :  { %5065 = vmatpush3.bf16.msra.mxu1 %v5607_v49  ;;  %v3746_v44 = vrot.slane %v6714_v5, 5  ;;  %v6926_v55 = vsel %vm1027_vm9, %v3378_v54, %v3382_v4  ;;  %v5619_v5 = vld [vmem:[%s7634_s8 + $0x38] sm:$0xff]   ;;  %v1213_v6 = vpack.c.bf16 %v6746_v26, %v6746_v26  ;;  %v5625_v49 = vld [vmem:[%s7634_s8 + $0x148] sm:$0xff]   ;;  %v1573_v14 = vpack.c.bf16 %v6756_v15, %v6756_v15  ;;  %v5639_v25 = vld [vmem:[%s7634_s8 + $0x120] sm:$0xff]  }
 0x204   :  { %5066 = vmatprep.subr.bf16.mxu1 %v5609_v7  ;;  %v6929_v20 = vsel %vm1027_vm9, %v3743_v29, %v3747_v27  ;;  %v2482_v7 = vpack.c.bf16 %v6753_v31, %v6753_v31  ;;  %v5626_v26 = vld [vmem:[%s7634_s8 + $0x4c8] sm:$0xff]   ;;  %v2843_v42 = vpack.c.bf16 %v6764_v48, %v6764_v48  ;;  %v5629_v31 = vld [vmem:[%s7634_s8 + $0x150] sm:$0xff]   ;;  %v5640_v39 = vld [vmem:[%s7634_s8 + $0x4a0] sm:$0xff]  }
 0x205   :  { %5197 = vmatpush3.bf16.msra.mxu0 %v5608_v3  ;;  %v6935_v46 = vsel %vm1027_vm9, %v3742_v24, %v3746_v44  ;;  %v5627_v15 = vld [vmem:[%s7634_s8 + $0x108] sm:$0xff]   ;;  %v5630_v48 = vld [vmem:[%s7634_s8 + $0x4d0] sm:$0xff]   ;;  %v5650_v29 = vld [vmem:[%s7634_s8 + $0x4f8] sm:$0xff]  }
 0x206   :  { %5198 = vmatprep.subr.bf16.mxu0 %v5610_v50  ;;  %v5631_v3 = vld [vmem:[%s7634_s8 + $0x110] sm:$0xff]   ;;  %v5634_v50 = vld [vmem:[%s7634_s8 + $0x4d8] sm:$0xff]   ;;  %v5644_v58 = vld [vmem:[%s7634_s8 + $0x4a8] sm:$0xff]  }
 0x207   :  { %5067 = vmatpush3.bf16.msra.mxu1 %v5611_v35  ;;  %v5636_v35 = vld [vmem:[%s7634_s8 + $0x498] sm:$0xff]   ;;  %v5647_v54 = vld [vmem:[%s7634_s8 + $0x130] sm:$0xff]   ;;  %v5654_v44 = vld [vmem:[%s7634_s8 + $0x5c0] sm:$0xff]  }
 0x208   :  { %5068 = vmatprep.subr.bf16.mxu1 %v5613_v37  ;;  %v5641_v37 = vld [vmem:[%s7634_s8 + $0x168] sm:$0xff]   ;;  %v5648_v4 = vld [vmem:[%s7634_s8 + $0x4b0] sm:$0xff]   ;;  %v5651_v27 = vld [vmem:[%s7634_s8 + $0x138] sm:$0xff]  }
 0x209   :  { %5199 = vmatpush3.bf16.msra.mxu0 %v5612_v47  ;;  %v5642_v47 = vld [vmem:[%s7634_s8 + $0x4e8] sm:$0xff]   ;;  %v5652_v24 = vld [vmem:[%s7634_s8 + $0x4b8] sm:$0xff]  }
 0x20a   :  { %5200 = vmatprep.subr.bf16.mxu0 %v5614_v57  ;;  %v5645_v57 = vld [vmem:[%s7634_s8 + $0x170] sm:$0xff]  }
 0x20b   :  { %5069 = vmatpush3.bf16.msra.mxu1 %v5615_v12  ;;  %v5649_v12 = vld [vmem:[%s7634_s8 + $0x178] sm:$0xff]  }
 0x20c   :  { %5070 = vmatprep.subr.bf16.mxu1 %v5617_v2  ;;  %v5653_v2 = vld [vmem:[%s7634_s8 + $0x1c0] sm:$0xff]  }
 0x20d   :  { %5201 = vmatpush3.bf16.msra.mxu0 %v5616_v61  ;;  %v5655_v61 = vld [vmem:[%s7634_s8 + $0x180] sm:$0xff]  }
 0x20e   :  { %5202 = vmatprep.subr.bf16.mxu0 %v5618_v52  ;;  %v1572_v52 = vpack.c.bf16 %v6771_v45, %v6771_v45  ;;  %v5658_v45 = vld [vmem:[%s7634_s8 + $0x5c8] sm:$0xff]  }
 0x20f   :  { %5071 = vmatpush3.bf16.msra.mxu1 %v5619_v5  ;;  %v5657_v5 = vld [vmem:[%s7634_s8 + $0x1c8] sm:$0xff]  }
 0x210   :  { %5078 = vmatprep.subr.bf16.mxu1 %v5621_v8  ;;  %v1755_v8 = vpack.c.bf16 %v6788_v59, %v6788_v59  ;;  %v5659_v59 = vld [vmem:[%s7634_s8 + $0x188] sm:$0xff]  }
 0x211   :  { %5203 = vmatpush3.bf16.msra.mxu0 %v5620_v30  ;;  %v5656_v30 = vld [vmem:[%s7634_s8 + $0x580] sm:$0xff]  }
 0x212   :  { %1555 = vmatmul.mubr.bf16.vlgmr.msra.gmra.mrb[4].mxu1 %v1213_v6  ;;  %5232 = vmatprep.subr.bf16.mxu0 %v5622_v10  ;;  %v2842_v10 = vpack.c.bf16 %v6780_v40, %v6780_v40  ;;  %v5661_v40 = vld [vmem:[%s7634_s8 + $0x1d0] sm:$0xff]   ;;  %v5660_v6 = vld [vmem:[%s7634_s8 + $0x588] sm:$0xff]  }
 0x213   :  { %5079 = vmatpush3.bf16.msra.mxu1 %v5623_v19  ;;  %1735 = vmatprep.mubr.bf16.mxu1 %v1573_v14  ;;  %v3207_v19 = vpack.c.bf16 %v6796_v9, %v6796_v9  ;;  %v5662_v9 = vld [vmem:[%s7634_s8 + $0x5d0] sm:$0xff]   ;;  %v5665_v14 = vld [vmem:[%s7634_s8 + $0x1d8] sm:$0xff]  }
 0x214   :  { %2646 = vmatmul.mubr.bf16.vlgmr.msra.gmra.mrb[12].mxu0 %v2482_v7  ;;  %5080 = vmatprep.subr.bf16.mxu1 %v5625_v49  ;;  %v5663_v49 = vld [vmem:[%s7634_s8 + $0x190] sm:$0xff]   ;;  %v5666_v7 = vld [vmem:[%s7634_s8 + $0x5d8] sm:$0xff]  }
 0x215   :  { %5233 = vmatpush3.bf16.msra.mxu0 %v5624_v56  ;;  %3005 = vmatprep.mubr.bf16.mxu0 %v2843_v42  ;;  %v5664_v56 = vld [vmem:[%s7634_s8 + $0x590] sm:$0xff]   ;;  %v5669_v42 = vld [vmem:[%s7634_s8 + $0x1e0] sm:$0xff]  }
 0x216   :  { %5234 = vmatprep.subr.bf16.mxu0 %v5626_v26  ;;  %v5667_v26 = vld [vmem:[%s7634_s8 + $0x198] sm:$0xff]  }
 0x217   :  { %5081 = vmatpush3.bf16.msra.mxu1 %v5627_v15  ;;  %v5668_v15 = vld [vmem:[%s7634_s8 + $0x598] sm:$0xff]  }
 0x218   :  { %5082 = vmatprep.subr.bf16.mxu1 %v5629_v31  ;;  %v5670_v31 = vld [vmem:[%s7634_s8 + $0x5e0] sm:$0xff]  }
 0x219   :  { %5235 = vmatpush3.bf16.msra.mxu0 %v5628_v34  ;;  %v5671_v34 = vld [vmem:[%s7634_s8 + $0x1a0] sm:$0xff]  }
 0x21a   :  { %5236 = vmatprep.subr.bf16.mxu0 %v5630_v48  ;;  %v5673_v48 = vld [vmem:[%s7634_s8 + $0x1e8] sm:$0xff]  }
 0x21b   :  { %5083 = vmatpush3.bf16.msra.mxu1 %v5631_v3  ;;  %v5672_v3 = vld [vmem:[%s7634_s8 + $0x5a0] sm:$0xff]  }
 0x21c   :  { %5084 = vmatprep.subr.bf16.mxu1 %v5633_v43  ;;  %v5674_v43 = vld [vmem:[%s7634_s8 + $0x5e8] sm:$0xff]  }
 0x21d   :  { %5237 = vmatpush3.bf16.msra.mxu0 %v5632_v28  ;;  %v5675_v28 = vld [vmem:[%s7634_s8 + $0x1a8] sm:$0xff]  }
 0x21e   :  { %5238 = vmatprep.subr.bf16.mxu0 %v5634_v50  ;;  %v5677_v50 = vld [vmem:[%s7634_s8 + $0x1f0] sm:$0xff]  }
 0x21f   :  { %5085 = vmatpush3.bf16.msra.mxu1 %v5635_v38  ;;  %v5676_v38 = vld [vmem:[%s7634_s8 + $0x5a8] sm:$0xff]  }
 0x220   :  { %5086 = vmatprep.subr.bf16.mxu1 %v5637_v21  ;;  %v5678_v21 = vld [vmem:[%s7634_s8 + $0x5f0] sm:$0xff]  }
 0x221   :  { %5239 = vmatpush3.bf16.msra.mxu0 %v5636_v35  ;;  %v5679_v35 = vld [vmem:[%s7634_s8 + $0x1b0] sm:$0xff]  }
 0x222   :  { %5240 = vmatprep.subr.bf16.mxu0 %v5638_v1  ;;  %v5681_v1 = vld [vmem:[%s7634_s8 + $0x1f8] sm:$0xff]  }
 0x223   :  { %5087 = vmatpush3.bf16.msra.mxu1 %v5639_v25  ;;  %v5680_v25 = vld [vmem:[%s7634_s8 + $0x5b0] sm:$0xff]  }
 0x224   :  { %5088 = vmatprep.subr.bf16.mxu1 %v5641_v37  ;;  %v5682_v37 = vld [vmem:[%s7634_s8 + $0x5f8] sm:$0xff]  }
 0x225   :  { %5241 = vmatpush3.bf16.msra.mxu0 %v5640_v39  ;;  %v5683_v39 = vld [vmem:[%s7634_s8 + $0x1b8] sm:$0xff]  }
 0x226   :  { %5242 = vmatprep.subr.bf16.mxu0 %v5642_v47  ;;  %v5685_v47 = vld [vmem:[%s7634_s8 + $0x240] sm:$0xff]  }
 0x227   :  { %5089 = vmatpush3.bf16.msra.mxu1 %v5643_v23  ;;  %v5684_v23 = vld [vmem:[%s7634_s8 + $0x5b8] sm:$0xff]  }
 0x228   :  { %5090 = vmatprep.subr.bf16.mxu1 %v5645_v57  ;;  %v5686_v57 = vld [vmem:[%s7634_s8 + $0x6c0] sm:$0xff]  }
 0x229   :  { %5243 = vmatpush3.bf16.msra.mxu0 %v5644_v58  ;;  %v5687_v58 = vld [vmem:[%s7634_s8 + $0x200] sm:$0xff]  }
 0x22a   :  { %5244 = vmatprep.subr.bf16.mxu0 %v5646_v17  ;;  %v1754_v17 = vpack.c.bf16 %v6804_v0, %v6804_v0  ;;  %v5690_v0 = vld [vmem:[%s7634_s8 + $0x6c8] sm:$0xff]  }
 0x22b   :  { %5091 = vmatpush3.bf16.msra.mxu1 %v5647_v54  ;;  %v5689_v54 = vld [vmem:[%s7634_s8 + $0x248] sm:$0xff]  }
 0x22c   :  { %5092 = vmatprep.subr.bf16.mxu1 %v5649_v12  ;;  %v1937_v12 = vpack.c.bf16 %v6820_v13, %v6820_v13  ;;  %v5691_v13 = vld [vmem:[%s7634_s8 + $0x208] sm:$0xff]  }
 0x22d   :  { %5245 = vmatpush3.bf16.msra.mxu0 %v5648_v4  ;;  %v5688_v4 = vld [vmem:[%s7634_s8 + $0x680] sm:$0xff]  }
 0x22e   :  { %5246 = vmatprep.subr.bf16.mxu0 %v5650_v29  ;;  %v3206_v29 = vpack.c.bf16 %v6812_v41, %v6812_v41  ;;  %v5693_v41 = vld [vmem:[%s7634_s8 + $0x250] sm:$0xff]  }
 0x22f   :  { %5093 = vmatpush3.bf16.msra.mxu1 %v5651_v27  ;;  %v3571_v27 = vpack.c.bf16 %v6828_v18, %v6828_v18  ;;  %v5694_v18 = vld [vmem:[%s7634_s8 + $0x6d0] sm:$0xff]  }
 0x230   :  { %5100 = vmatprep.subr.bf16.mxu1 %v5653_v2  ;;  %v5692_v2 = vld [vmem:[%s7634_s8 + $0x688] sm:$0xff]  }
 0x231   :  { %5247 = vmatpush3.bf16.msra.mxu0 %v5652_v24  ;;  %v5695_v24 = vld [vmem:[%s7634_s8 + $0x210] sm:$0xff]  }
 0x232   :  { %1736 = vmatmul.mubr.bf16.vlgmr.msra.gmra.mrb[8].mxu1 %v1572_v52  ;;  %5276 = vmatprep.subr.bf16.mxu0 %v5654_v44  ;;  %v5697_v44 = vld [vmem:[%s7634_s8 + $0x258] sm:$0xff]  }
 0x233   :  { %5101 = vmatpush3.bf16.msra.mxu1 %v5655_v61  ;;  %1917 = vmatprep.mubr.bf16.mxu1 %v1755_v8  ;;  %v5696_v61 = vld [vmem:[%s7634_s8 + $0x690] sm:$0xff]   ;;  %v5698_v52 = vld [vmem:[%s7634_s8 + $0x6d8] sm:$0xff]   ;;  %v5701_v8 = vld [vmem:[%s7634_s8 + $0x260] sm:$0xff]  }
 0x234   :  { %3006 = vmatmul.mubr.bf16.vlgmr.msra.gmra.mrb[16].mxu0 %v2842_v10  ;;  %5102 = vmatprep.subr.bf16.mxu1 %v5657_v5  ;;  %v5699_v5 = vld [vmem:[%s7634_s8 + $0x218] sm:$0xff]   ;;  %v5702_v10 = vld [vmem:[%s7634_s8 + $0x6e0] sm:$0xff]  }
 0x235   :  { %5277 = vmatpush3.bf16.msra.mxu0 %v5656_v30  ;;  %3369 = vmatprep.mubr.bf16.mxu0 %v3207_v19  ;;  %v5700_v30 = vld [vmem:[%s7634_s8 + $0x698] sm:$0xff]   ;;  %v5705_v19 = vld [vmem:[%s7634_s8 + $0x268] sm:$0xff]  }
 0x236   :  { %5278 = vmatprep.subr.bf16.mxu0 %v5658_v45  ;;  %v5703_v45 = vld [vmem:[%s7634_s8 + $0x220] sm:$0xff]  }
 0x237   :  { %5103 = vmatpush3.bf16.msra.mxu1 %v5659_v59  ;;  %v5704_v59 = vld [vmem:[%s7634_s8 + $0x6a0] sm:$0xff]  }
 0x238   :  { %5104 = vmatprep.subr.bf16.mxu1 %v5661_v40  ;;  %v5706_v40 = vld [vmem:[%s7634_s8 + $0x6e8] sm:$0xff]  }
 0x239   :  { %5279 = vmatpush3.bf16.msra.mxu0 %v5660_v6  ;;  %v5707_v6 = vld [vmem:[%s7634_s8 + $0x228] sm:$0xff]  }
 0x23a   :  { %5280 = vmatprep.subr.bf16.mxu0 %v5662_v9  ;;  %v5709_v9 = vld [vmem:[%s7634_s8 + $0x270] sm:$0xff]  }
 0x23b   :  { %5105 = vmatpush3.bf16.msra.mxu1 %v5663_v49  ;;  %v5708_v49 = vld [vmem:[%s7634_s8 + $0x6a8] sm:$0xff]  }
 0x23c   :  { %5106 = vmatprep.subr.bf16.mxu1 %v5665_v14  ;;  %v5710_v14 = vld [vmem:[%s7634_s8 + $0x6f0] sm:$0xff]  }
 0x23d   :  { %5281 = vmatpush3.bf16.msra.mxu0 %v5664_v56  ;;  %v5711_v56 = vld [vmem:[%s7634_s8 + $0x230] sm:$0xff]  }
 0x23e   :  { %5282 = vmatprep.subr.bf16.mxu0 %v5666_v7  ;;  %v5713_v7 = vld [vmem:[%s7634_s8 + $0x278] sm:$0xff]  }
 0x23f   :  { %5107 = vmatpush3.bf16.msra.mxu1 %v5667_v26  ;;  %v5712_v26 = vld [vmem:[%s7634_s8 + $0x6b0] sm:$0xff]  }
 0x240   :  { %5108 = vmatprep.subr.bf16.mxu1 %v5669_v42  ;;  %v5714_v42 = vld [vmem:[%s7634_s8 + $0x6f8] sm:$0xff]  }
 0x241   :  { %5283 = vmatpush3.bf16.msra.mxu0 %v5668_v15  ;;  %v5715_v15 = vld [vmem:[%s7634_s8 + $0x238] sm:$0xff]  }
 0x242   :  { %5284 = vmatprep.subr.bf16.mxu0 %v5670_v31  ;;  %v5717_v31 = vld [vmem:[%s7634_s8 + $0x340] sm:$0xff]  }
 0x243   :  { %5109 = vmatpush3.bf16.msra.mxu1 %v5671_v34  ;;  %v5716_v34 = vld [vmem:[%s7634_s8 + $0x6b8] sm:$0xff]  }
 0x244   :  { %5110 = vmatprep.subr.bf16.mxu1 %v5673_v48  ;;  %v5718_v48 = vld [vmem:[%s7634_s8 + $0x7c0] sm:$0xff]  }
 0x245   :  { %5285 = vmatpush3.bf16.msra.mxu0 %v5672_v3  ;;  %v5719_v3 = vld [vmem:[%s7634_s8 + $0x300] sm:$0xff]  }
 0x246   :  { %5286 = vmatprep.subr.bf16.mxu0 %v5674_v43  ;;  %v1936_v43 = vpack.c.bf16 %v6836_v53, %v6836_v53  ;;  %v5722_v53 = vld [vmem:[%s7634_s8 + $0x7c8] sm:$0xff]  }
 0x247   :  { %5111 = vmatpush3.bf16.msra.mxu1 %v5675_v28  ;;  %v5721_v28 = vld [vmem:[%s7634_s8 + $0x348] sm:$0xff]  }
 0x248   :  { %5112 = vmatprep.subr.bf16.mxu1 %v5677_v50  ;;  %v2301_v50 = vpack.c.bf16 %v6852_v62, %v6852_v62  ;;  %v5723_v62 = vld [vmem:[%s7634_s8 + $0x308] sm:$0xff]  }
 0x249   :  { %5287 = vmatpush3.bf16.msra.mxu0 %v5676_v38  ;;  %v5720_v38 = vld [vmem:[%s7634_s8 + $0x780] sm:$0xff]  }
 0x24a   :  { %5288 = vmatprep.subr.bf16.mxu0 %v5678_v21  ;;  %v3570_v21 = vpack.c.bf16 %v6844_v36, %v6844_v36  ;;  %v5725_v36 = vld [vmem:[%s7634_s8 + $0x350] sm:$0xff]  }
 0x24b   :  { %5113 = vmatpush3.bf16.msra.mxu1 %v5679_v35  ;;  %v3935_v35 = vpack.c.bf16 %v6860_v32, %v6860_v32  ;;  %v5726_v32 = vld [vmem:[%s7634_s8 + $0x7d0] sm:$0xff]  }
 0x24c   :  { %5114 = vmatprep.subr.bf16.mxu1 %v5681_v1  ;;  %v5724_v1 = vld [vmem:[%s7634_s8 + $0x788] sm:$0xff]  }
 0x24d   :  { %5289 = vmatpush3.bf16.msra.mxu0 %v5680_v25  ;;  %v5727_v25 = vld [vmem:[%s7634_s8 + $0x310] sm:$0xff]  }
 0x24e   :  { %5290 = vmatprep.subr.bf16.mxu0 %v5682_v37  ;;  %v5729_v37 = vld [vmem:[%s7634_s8 + $0x358] sm:$0xff]  }
 0x24f   :  { %5115 = vmatpush3.bf16.msra.mxu1 %v5683_v39  ;;  %v5728_v39 = vld [vmem:[%s7634_s8 + $0x790] sm:$0xff]  }
 0x250   :  { %5122 = vmatprep.subr.bf16.mxu1 %v5685_v47  ;;  %v5730_v47 = vld [vmem:[%s7634_s8 + $0x7d8] sm:$0xff]  }
 0x251   :  { %5291 = vmatpush3.bf16.msra.mxu0 %v5684_v23  ;;  %v5731_v23 = vld [vmem:[%s7634_s8 + $0x318] sm:$0xff]  }
 0x252   :  { %1918 = vmatmul.mubr.bf16.vlgmr.msra.gmra.mrb[12].mxu1 %v1754_v17  ;;  %5320 = vmatprep.subr.bf16.mxu0 %v5686_v57  ;;  %v5733_v57 = vld [vmem:[%s7634_s8 + $0x360] sm:$0xff]  }
 0x253   :  { %5123 = vmatpush3.bf16.msra.mxu1 %v5687_v58  ;;  %2099 = vmatprep.mubr.bf16.mxu1 %v1937_v12  ;;  %v5732_v58 = vld [vmem:[%s7634_s8 + $0x798] sm:$0xff]   ;;  %v5734_v17 = vld [vmem:[%s7634_s8 + $0x7e0] sm:$0xff]   ;;  %v5737_v12 = vld [vmem:[%s7634_s8 + $0x368] sm:$0xff]  }
 0x254   :  { %3370 = vmatmul.mubr.bf16.vlgmr.msra.gmra.mrb[20].mxu0 %v3206_v29  ;;  %5124 = vmatprep.subr.bf16.mxu1 %v5689_v54  ;;  %v5735_v54 = vld [vmem:[%s7634_s8 + $0x320] sm:$0xff]   ;;  %v5738_v29 = vld [vmem:[%s7634_s8 + $0x7e8] sm:$0xff]  }
 0x255   :  { %5321 = vmatpush3.bf16.msra.mxu0 %v5688_v4  ;;  %3733 = vmatprep.mubr.bf16.mxu0 %v3571_v27  ;;  %v5736_v4 = vld [vmem:[%s7634_s8 + $0x7a0] sm:$0xff]   ;;  %v5741_v27 = vld [vmem:[%s7634_s8 + $0x370] sm:$0xff]  }
 0x256   :  { %5322 = vmatprep.subr.bf16.mxu0 %v5690_v0  ;;  %v5739_v0 = vld [vmem:[%s7634_s8 + $0x328] sm:$0xff]  }
 0x257   :  { %5125 = vmatpush3.bf16.msra.mxu1 %v5691_v13  ;;  %v5740_v13 = vld [vmem:[%s7634_s8 + $0x7a8] sm:$0xff]  }
 0x258   :  { %5126 = vmatprep.subr.bf16.mxu1 %v5693_v41  ;;  %v5742_v41 = vld [vmem:[%s7634_s8 + $0x7f0] sm:$0xff]  }
 0x259   :  { %5323 = vmatpush3.bf16.msra.mxu0 %v5692_v2  ;;  %v5743_v2 = vld [vmem:[%s7634_s8 + $0x330] sm:$0xff]  }
 0x25a   :  { %5324 = vmatprep.subr.bf16.mxu0 %v5694_v18  ;;  %v5745_v18 = vld [vmem:[%s7634_s8 + $0x378] sm:$0xff]  }
 0x25b   :  { %5127 = vmatpush3.bf16.msra.mxu1 %v5695_v24  ;;  %v5744_v24 = vld [vmem:[%s7634_s8 + $0x7b0] sm:$0xff]  }
 0x25c   :  { %5128 = vmatprep.subr.bf16.mxu1 %v5697_v44  ;;  %v5746_v44 = vld [vmem:[%s7634_s8 + $0x7f8] sm:$0xff]  }
 0x25d   :  { %5325 = vmatpush3.bf16.msra.mxu0 %v5696_v61  ;;  %v5747_v61 = vld [vmem:[%s7634_s8 + $0x338] sm:$0xff]  }
 0x25e   :  { %5326 = vmatprep.subr.bf16.mxu0 %v5698_v52  ;;  %v5749_v52 = vld [vmem:[%s7634_s8 + $0x440] sm:$0xff]  }
 0x25f   :  { %5129 = vmatpush3.bf16.msra.mxu1 %v5699_v5  ;;  %v5748_v5 = vld [vmem:[%s7634_s8 + $0x7b8] sm:$0xff]  }
 0x260   :  { %5130 = vmatprep.subr.bf16.mxu1 %v5701_v8  ;;  %v5750_v8 = vld [vmem:[%s7634_s8 + $0x400] sm:$0xff]  }
 0x261   :  { %5327 = vmatpush3.bf16.msra.mxu0 %v5700_v30  ;;  %v2300_v30 = vpack.c.bf16 %v6868_v60, %v6868_v60  ;;  %v5753_v60 = vld [vmem:[%s7634_s8 + $0x450] sm:$0xff]  }
 0x262   :  { %5328 = vmatprep.subr.bf16.mxu0 %v5702_v10  ;;  %v5751_v10 = vld [vmem:[%s7634_s8 + $0x448] sm:$0xff]  }
 0x263   :  { %5131 = vmatpush3.bf16.msra.mxu1 %v5703_v45  ;;  %v2663_v45 = vpack.c.bf16 %v6885_v11, %v6885_v11  ;;  %v5754_v11 = vld [vmem:[%s7634_s8 + $0x410] sm:$0xff]  }
 0x264   :  { %5132 = vmatprep.subr.bf16.mxu1 %v5705_v19  ;;  %v3934_v19 = vpack.c.bf16 %v6876_v33, %v6876_v33  ;;  %v5755_v33 = vld [vmem:[%s7634_s8 + $0x458] sm:$0xff]  }
 0x265   :  { %5329 = vmatpush3.bf16.msra.mxu0 %v5704_v59  ;;  %v5752_v59 = vld [vmem:[%s7634_s8 + $0x408] sm:$0xff]  }
 0x266   :  { %5330 = vmatprep.subr.bf16.mxu0 %v5706_v40  ;;  %v5756_v40 = vld [vmem:[%s7634_s8 + $0x418] sm:$0xff]  }
 0x267   :  { %5133 = vmatpush3.bf16.msra.mxu1 %v5707_v6  ;;  %v5757_v6 = vld [vmem:[%s7634_s8 + $0x460] sm:$0xff]  }
 0x268   :  { %5134 = vmatprep.subr.bf16.mxu1 %v5709_v9  ;;  %v5758_v9 = vld [vmem:[%s7634_s8 + $0x420] sm:$0xff]  }
 0x269   :  { %5331 = vmatpush3.bf16.msra.mxu0 %v5708_v49  ;;  %v5759_v49 = vld [vmem:[%s7634_s8 + $0x468] sm:$0xff]  }
 0x26a   :  { %5332 = vmatprep.subr.bf16.mxu0 %v5710_v14  ;;  %v5760_v14 = vld [vmem:[%s7634_s8 + $0x428] sm:$0xff]  }
 0x26b   :  { %5135 = vmatpush3.bf16.msra.mxu1 %v5711_v56  ;;  %v5761_v56 = vld [vmem:[%s7634_s8 + $0x470] sm:$0xff]  }
 0x26c   :  { %5136 = vmatprep.subr.bf16.mxu1 %v5713_v7  ;;  %v5762_v7 = vld [vmem:[%s7634_s8 + $0x430] sm:$0xff]  }
 0x26d   :  { %5333 = vmatpush3.bf16.msra.mxu0 %v5712_v26  ;;  %v5763_v26 = vld [vmem:[%s7634_s8 + $0x478] sm:$0xff]  }
 0x26e   :  { %5334 = vmatprep.subr.bf16.mxu0 %v5714_v42  ;;  %v5764_v42 = vld [vmem:[%s7634_s8 + $0x438] sm:$0xff]  }
 0x26f   :  { %5137 = vmatpush3.bf16.msra.mxu1 %v5715_v15  ;;  %v5765_v15 = vld [vmem:[%s7634_s8 + $0x540] sm:$0xff]  }
 0x270   :  { %5166 = vmatprep.subr.bf16.mxu1 %v5717_v31  ;;  %v5766_v31 = vld [vmem:[%s7634_s8 + $0x500] sm:$0xff]  }
 0x271   :  { %5335 = vmatpush3.bf16.msra.mxu0 %v5716_v34  ;;  %v2662_v34 = vpack.c.bf16 %v6889_v22, %v6889_v22  ;;  %v5769_v22 = vld [vmem:[%s7634_s8 + $0x550] sm:$0xff]  }
 0x272   :  { %2100 = vmatmul.mubr.bf16.vlgmr.msra.gmra.mrb[16].mxu1 %v1936_v43  ;;  %5364 = vmatprep.subr.bf16.mxu0 %v5718_v48  ;;  %v5767_v48 = vld [vmem:[%s7634_s8 + $0x548] sm:$0xff]  }
 0x273   :  { %5167 = vmatpush3.bf16.msra.mxu1 %v5719_v3  ;;  %2463 = vmatprep.mubr.bf16.mxu1 %v2301_v50  ;;  %v3025_v3 = vpack.c.bf16 %v6896_v63, %v6896_v63  ;;  %v5768_v43 = vld [vmem:[%s7634_s8 + $0x508] sm:$0xff]   ;;  %v5771_v63 = vld [vmem:[%s7634_s8 + $0x558] sm:$0xff]  }
 0x274   :  { %3734 = vmatmul.mubr.bf16.vlgmr.msra.gmra.mrb[24].mxu0 %v3570_v21  ;;  %5168 = vmatprep.subr.bf16.mxu1 %v5721_v28  ;;  %v5770_v28 = vld [vmem:[%s7634_s8 + $0x510] sm:$0xff]   ;;  %v5772_v50 = vld [vmem:[%s7634_s8 + $0x518] sm:$0xff]   ;;  %v5774_v21 = vld [vmem:[%s7634_s8 + $0x520] sm:$0xff]  }
 0x275   :  { %5365 = vmatpush3.bf16.msra.mxu0 %v5720_v38  ;;  %4097 = vmatprep.mubr.bf16.mxu0 %v3935_v35  ;;  %v5773_v38 = vld [vmem:[%s7634_s8 + $0x560] sm:$0xff]   ;;  %v5776_v35 = vld [vmem:[%s7634_s8 + $0x528] sm:$0xff]  }
 0x276   :  { %5366 = vmatprep.subr.bf16.mxu0 %v5722_v53  ;;  %v5775_v53 = vld [vmem:[%s7634_s8 + $0x568] sm:$0xff]  }
 0x277   :  { %5169 = vmatpush3.bf16.msra.mxu1 %v5723_v62  ;;  %v5777_v62 = vld [vmem:[%s7634_s8 + $0x570] sm:$0xff]  }
 0x278   :  { %5170 = vmatprep.subr.bf16.mxu1 %v5725_v36 }
 0x279   :  { %5367 = vmatpush3.bf16.msra.mxu0 %v5724_v1 }
 0x27a   :  { %5368 = vmatprep.subr.bf16.mxu0 %v5726_v32 }
 0x27b   :  { %5171 = vmatpush3.bf16.msra.mxu1 %v5727_v25 }
 0x27c   :  { %5172 = vmatprep.subr.bf16.mxu1 %v5729_v37 }
 0x27d   :  { %5369 = vmatpush3.bf16.msra.mxu0 %v5728_v39  ;;  %v5778_v39 = vld [vmem:[%s7634_s8 + $0x530] sm:$0xff]  }
 0x27e   :  { %5370 = vmatprep.subr.bf16.mxu0 %v5730_v47 }
 0x27f   :  { %5173 = vmatpush3.bf16.msra.mxu1 %v5731_v23 }
 0x280   :  { %5174 = vmatprep.subr.bf16.mxu1 %v5733_v57  ;;  %v5779_v57 = vld [vmem:[%s7634_s8 + $0x578] sm:$0xff]  }
 0x281   :  { %5371 = vmatpush3.bf16.msra.mxu0 %v5732_v58 }
 0x282   :  { %5372 = vmatprep.subr.bf16.mxu0 %v5734_v17 }
 0x283   :  { %5175 = vmatpush3.bf16.msra.mxu1 %v5735_v54 }
 0x284   :  { %5176 = vmatprep.subr.bf16.mxu1 %v5737_v12  ;;  %v5780_v12 = vld [vmem:[%s7634_s8 + $0x538] sm:$0xff]  }
 0x285   :  { %5373 = vmatpush3.bf16.msra.mxu0 %v5736_v4  ;;  %v5781_v4 = vld [vmem:[%s7634_s8 + $0x640] sm:$0xff]  }
 0x286   :  { %5374 = vmatprep.subr.bf16.mxu0 %v5738_v29  ;;  %v5782_v29 = vld [vmem:[%s7634_s8 + $0x600] sm:$0xff]  }
 0x287   :  { %5177 = vmatpush3.bf16.msra.mxu1 %v5739_v0  ;;  %v3024_v0 = vpack.c.bf16 %v6909_v51, %v6909_v51  ;;  %v5785_v51 = vld [vmem:[%s7634_s8 + $0x650] sm:$0xff]  }
 0x288   :  { %5178 = vmatprep.subr.bf16.mxu1 %v5741_v27  ;;  %v5783_v27 = vld [vmem:[%s7634_s8 + $0x648] sm:$0xff]  }
 0x289   :  { %5375 = vmatpush3.bf16.msra.mxu0 %v5740_v13  ;;  %v3389_v13 = vpack.c.bf16 %v6918_v16, %v6918_v16  ;;  %v5787_v16 = vld [vmem:[%s7634_s8 + $0x658] sm:$0xff]  }
 0x28a   :  { %5376 = vmatprep.subr.bf16.mxu0 %v5742_v41  ;;  %v5784_v41 = vld [vmem:[%s7634_s8 + $0x608] sm:$0xff]  }
 0x28b   :  { %5179 = vmatpush3.bf16.msra.mxu1 %v5743_v2  ;;  %v5786_v2 = vld [vmem:[%s7634_s8 + $0x610] sm:$0xff]  }
 0x28c   :  { %5180 = vmatprep.subr.bf16.mxu1 %v5745_v18  ;;  %v5788_v18 = vld [vmem:[%s7634_s8 + $0x618] sm:$0xff]  }
 0x28d   :  { %5377 = vmatpush3.bf16.msra.mxu0 %v5744_v24  ;;  %v5789_v24 = vld [vmem:[%s7634_s8 + $0x660] sm:$0xff]  }
 0x28e   :  { %5378 = vmatprep.subr.bf16.mxu0 %v5746_v44  ;;  %v5790_v44 = vld [vmem:[%s7634_s8 + $0x620] sm:$0xff]  }
 0x28f   :  { %5181 = vmatpush3.bf16.msra.mxu1 %v5747_v61  ;;  %v5791_v61 = vld [vmem:[%s7634_s8 + $0x668] sm:$0xff]  }
 0x290   :  { %5210 = vmatprep.subr.bf16.mxu1 %v5749_v52  ;;  %v5792_v52 = vld [vmem:[%s7634_s8 + $0x628] sm:$0xff]  }
 0x291   :  { %5379 = vmatpush3.bf16.msra.mxu0 %v5748_v5  ;;  %v5793_v5 = vld [vmem:[%s7634_s8 + $0x670] sm:$0xff]  }
 0x292   :  { %2464 = vmatmul.mubr.bf16.vlgmr.msra.gmra.mrb[20].mxu1 %v2300_v30 }
 0x293   :  { %5211 = vmatpush3.bf16.msra.mxu1 %v5750_v8  ;;  %2825 = vmatprep.mubr.bf16.mxu1 %v2663_v45 }
 0x294   :  { %4098 = vmatmul.mubr.bf16.vlgmr.msra.gmra.mrb[28].mxu0 %v3934_v19  ;;  %5212 = vmatprep.subr.bf16.mxu1 %v5751_v10 }
 0x297   :  { %5213 = vmatpush3.bf16.msra.mxu1 %v5752_v59  ;;  %v5794_v59 = vld [vmem:[%s7634_s8 + $0x630] sm:$0xff]  }
 0x298   :  { %5214 = vmatprep.subr.bf16.mxu1 %v5753_v60 }
 0x29b   :  { %5215 = vmatpush3.bf16.msra.mxu1 %v5754_v11 }
 0x29c   :  { %5216 = vmatprep.subr.bf16.mxu1 %v5755_v33  ;;  %v5795_v33 = vld [vmem:[%s7634_s8 + $0x678] sm:$0xff]  }
 0x29f   :  { %5217 = vmatpush3.bf16.msra.mxu1 %v5756_v40 }
 0x2a0   :  { %5218 = vmatprep.subr.bf16.mxu1 %v5757_v6 }
 0x2a3   :  { %5219 = vmatpush3.bf16.msra.mxu1 %v5758_v9 }
 0x2a4   :  { %5220 = vmatprep.subr.bf16.mxu1 %v5759_v49 }
 0x2a7   :  { %5221 = vmatpush3.bf16.msra.mxu1 %v5760_v14  ;;  %v5796_v14 = vld [vmem:[%s7634_s8 + $0x638] sm:$0xff]  }
 0x2a8   :  { %5222 = vmatprep.subr.bf16.mxu1 %v5761_v56  ;;  %v5797_v56 = vld [vmem:[%s7634_s8 + $0x740] sm:$0xff]  }
 0x2ab   :  { %5223 = vmatpush3.bf16.msra.mxu1 %v5762_v7  ;;  %v5798_v7 = vld [vmem:[%s7634_s8 + $0x700] sm:$0xff]  }
 0x2ac   :  { %5224 = vmatprep.subr.bf16.mxu1 %v5763_v26  ;;  %v3388_v26 = vpack.c.bf16 %v6926_v55, %v6926_v55  ;;  %v5801_v55 = vld [vmem:[%s7634_s8 + $0x750] sm:$0xff]  }
 0x2af   :  { %5225 = vmatpush3.bf16.msra.mxu1 %v5764_v42  ;;  %v5799_v42 = vld [vmem:[%s7634_s8 + $0x748] sm:$0xff]  }
 0x2b0   :  { %5254 = vmatprep.subr.bf16.mxu1 %v5765_v15  ;;  %v3753_v15 = vpack.c.bf16 %v6929_v20, %v6929_v20  ;;  %v5803_v20 = vld [vmem:[%s7634_s8 + $0x758] sm:$0xff]  }
 0x2b2   :  { %2826 = vmatmul.mubr.bf16.vlgmr.msra.gmra.mrb[24].mxu1 %v2662_v34  ;;  %v5802_v34 = vld [vmem:[%s7634_s8 + $0x710] sm:$0xff]  }
 0x2b3   :  { %5255 = vmatpush3.bf16.msra.mxu1 %v5766_v31  ;;  %3187 = vmatprep.mubr.bf16.mxu1 %v3025_v3  ;;  %v5800_v31 = vld [vmem:[%s7634_s8 + $0x708] sm:$0xff]   ;;  %v5805_v3 = vld [vmem:[%s7634_s8 + $0x760] sm:$0xff]  }
 0x2b4   :  { %5256 = vmatprep.subr.bf16.mxu1 %v5767_v48  ;;  %v5804_v48 = vld [vmem:[%s7634_s8 + $0x718] sm:$0xff]  }
 0x2b7   :  { %5257 = vmatpush3.bf16.msra.mxu1 %v5768_v43  ;;  %v5806_v43 = vld [vmem:[%s7634_s8 + $0x720] sm:$0xff]  }
 0x2b8   :  { %5258 = vmatprep.subr.bf16.mxu1 %v5769_v22  ;;  %v5807_v22 = vld [vmem:[%s7634_s8 + $0x768] sm:$0xff]  }
 0x2bb   :  { %5259 = vmatpush3.bf16.msra.mxu1 %v5770_v28  ;;  %v5808_v28 = vld [vmem:[%s7634_s8 + $0x728] sm:$0xff]  }
 0x2bc   :  { %5260 = vmatprep.subr.bf16.mxu1 %v5771_v63  ;;  %v5809_v63 = vld [vmem:[%s7634_s8 + $0x770] sm:$0xff]  }
 0x2bf   :  { %5261 = vmatpush3.bf16.msra.mxu1 %v5772_v50 }
 0x2c0   :  { %5262 = vmatprep.subr.bf16.mxu1 %v5773_v38 }
 0x2c3   :  { %5263 = vmatpush3.bf16.msra.mxu1 %v5774_v21 }
 0x2c4   :  { %5264 = vmatprep.subr.bf16.mxu1 %v5775_v53 }
 0x2c5   :  { %v5050_v36 = vpop.f32.mrb[0].mxu1 }
 0x2c6   :  { %v5051_v1 = vpop.f32.mrb[1].mxu1 }
 0x2c7   :  { %v5160_v32 = vpop.f32.mrb[8].mxu0  ;;  %v5052_v25 = vadd.f32 %v5051_v1, %v5050_v36  ;;  %5265 = vmatpush3.bf16.msra.mxu1 %v5776_v35  ;;  %v5053_v37 = vpop.f32.mrb[2].mxu1 }
 0x2c8   :  { %v5161_v47 = vpop.f32.mrb[9].mxu0  ;;  %v5054_v23 = vpop.f32.mrb[3].mxu1  ;;  %5266 = vmatprep.subr.bf16.mxu1 %v5777_v62  ;;  %v5810_v62 = vld [vmem:[%s7634_s8 + $0x730] sm:$0xff]  }
 0x2c9   :  { %v7462_v58 = vadd.f32 %v5161_v47, %v5160_v32  ;;  %v5163_v17 = vpop.f32.mrb[10].mxu0  ;;  %v5811_v32 = vld [vmem:[%s7634_s8 + $0x778] sm:$0xff]  }
 0x2ca   :  { %v5164_v54 = vpop.f32.mrb[11].mxu0  ;;  %v5812_v23 = vld [vmem:[%s7634_s8 + $0x738] sm:$0xff]  }
 0x2cb   :  { %5267 = vmatpush3.bf16.msra.mxu1 %v5778_v39 }
 0x2cc   :  { %5268 = vmatprep.subr.bf16.mxu1 %v5779_v57  ;;  %v3752_v57 = vpack.c.bf16 %v6935_v46, %v6935_v46 }
 0x2cf   :  { %5269 = vmatpush3.bf16.msra.mxu1 %v5780_v12 }
 0x2d0   :  { %5298 = vmatprep.subr.bf16.mxu1 %v5781_v4 }
 0x2d2   :  { %3188 = vmatmul.mubr.bf16.vlgmr.msra.gmra.mrb[28].mxu1 %v3024_v0 }
 0x2d3   :  { %5299 = vmatpush3.bf16.msra.mxu1 %v5782_v29  ;;  %3551 = vmatprep.mubr.bf16.mxu1 %v3389_v13 }
 0x2d4   :  { %5300 = vmatprep.subr.bf16.mxu1 %v5783_v27 }
 0x2d7   :  { %5301 = vmatpush3.bf16.msra.mxu1 %v5784_v41 }
 0x2d8   :  { %5302 = vmatprep.subr.bf16.mxu1 %v5785_v51 }
 0x2db   :  { %5303 = vmatpush3.bf16.msra.mxu1 %v5786_v2 }
 0x2dc   :  { %5304 = vmatprep.subr.bf16.mxu1 %v5787_v16 }
 0x2df   :  { %5305 = vmatpush3.bf16.msra.mxu1 %v5788_v18 }
 0x2e0   :  { %5306 = vmatprep.subr.bf16.mxu1 %v5789_v24 }
 0x2e3   :  { %5307 = vmatpush3.bf16.msra.mxu1 %v5790_v44 }
 0x2e4   :  { %5308 = vmatprep.subr.bf16.mxu1 %v5791_v61 }
 0x2e5   :  { %v5072_v8 = vpop.f32.mrb[4].mxu1 }
 0x2e6   :  { %v5073_v30 = vpop.f32.mrb[5].mxu1 }
 0x2e7   :  { %v5204_v10 = vpop.f32.mrb[12].mxu0  ;;  %v5074_v45 = vadd.f32 %v5073_v30, %v5072_v8  ;;  %v5075_v19 = vpop.f32.mrb[6].mxu1  ;;  %5309 = vmatpush3.bf16.msra.mxu1 %v5792_v52 }
 0x2e8   :  { %v5205_v60 = vpop.f32.mrb[13].mxu0  ;;  %v5076_v11 = vpop.f32.mrb[7].mxu1  ;;  %5310 = vmatprep.subr.bf16.mxu1 %v5793_v5 }
 0x2e9   :  { %v1557_v40 = vadd.f32 %v5074_v45, %v5052_v25  ;;  %v7516_v6 = vadd.f32 %v5205_v60, %v5204_v10  ;;  %v5207_v9 = vpop.f32.mrb[14].mxu0  ;;  %v4117_v10 = vld [vmem:[%s7636_s10] sm:$0xff]  ;;  %v4118_v45 = vld [vmem:[%s7636_s10 + $0x8] sm:$0xff] }
 0x2ea   :  { %v5208_v49 = vpop.f32.mrb[15].mxu0  ;;  %v5415_v60 = vpack.c.bf16 %v4118_v45, %v4117_v10 }
 0x2eb   :  { %5311 = vmatpush3.bf16.msra.mxu1 %v5794_v59  ;;  %v5842_v59 = vmov 0.0|0.0  }
 0x2ec   :  { %5312 = vmatprep.subr.bf16.mxu1 %v5795_v33 }
 0x2ef   :  { %5313 = vmatpush3.bf16.msra.mxu1 %v5796_v14 }
 0x2f0   :  { %5342 = vmatprep.subr.bf16.mxu1 %v5797_v56 }
 0x2f2   :  { %3552 = vmatmul.mubr.bf16.vlgmr.msra.gmra.mrb[32].mxu1 %v3388_v26 }
 0x2f3   :  { %5343 = vmatpush3.bf16.msra.mxu1 %v5798_v7  ;;  %3915 = vmatprep.mubr.bf16.mxu1 %v3753_v15 }
 0x2f4   :  { %5344 = vmatprep.subr.bf16.mxu1 %v5799_v42 }
 0x2f7   :  { %5345 = vmatpush3.bf16.msra.mxu1 %v5800_v31 }
 0x2f8   :  { %5346 = vmatprep.subr.bf16.mxu1 %v5801_v55 }
 0x2fb   :  { %5347 = vmatpush3.bf16.msra.mxu1 %v5802_v34  ;;  %v4119_v34 = vld [vmem:[%s7636_s10 + $0x10] sm:$0xff] }
 0x2fc   :  { %5348 = vmatprep.subr.bf16.mxu1 %v5803_v20  ;;  %v4121_v20 = vld [vmem:[%s7636_s10 + $0x20] sm:$0xff] }
 0x2ff   :  { %5349 = vmatpush3.bf16.msra.mxu1 %v5804_v48 }
 0x300   :  { %5350 = vmatprep.subr.bf16.mxu1 %v5805_v3  ;;  %v4122_v3 = vld [vmem:[%s7636_s10 + $0x28] sm:$0xff] }
 0x303   :  { %5351 = vmatpush3.bf16.msra.mxu1 %v5806_v43  ;;  %v5844_v43 = vmov 0.0  }
 0x304   :  { %5352 = vmatprep.subr.bf16.mxu1 %v5807_v22  ;;  %v4123_v22 = vld [vmem:[%s7636_s10 + $0x30] sm:$0xff] }
 0x305   :  { %v5094_v50 = vpop.f32.mrb[8].mxu1 }
 0x306   :  { %v5095_v38 = vpop.f32.mrb[9].mxu1 }
 0x307   :  { %v5248_v21 = vpop.f32.mrb[16].mxu0  ;;  %v5096_v53 = vadd.f32 %v5095_v38, %v5094_v50  ;;  %v5097_v35 = vpop.f32.mrb[10].mxu1  ;;  %5353 = vmatpush3.bf16.msra.mxu1 %v5808_v28  ;;  %v4124_v28 = vld [vmem:[%s7636_s10 + $0x38] sm:$0xff] }
 0x308   :  { %v5249_v36 = vpop.f32.mrb[17].mxu0  ;;  %v5098_v1 = vpop.f32.mrb[11].mxu1  ;;  %5354 = vmatprep.subr.bf16.mxu1 %v5809_v63  ;;  %v5424_v63 = vpack.c.bf16 %v4124_v28, %v4123_v22 }
 0x309   :  { %v1743_v25 = vadd.f32 %v5096_v53, %v1557_v40  ;;  %v7570_v37 = vadd.f32 %v5249_v36, %v5248_v21  ;;  %v5251_v39 = vpop.f32.mrb[18].mxu0 }
 0x30a   :  { %v5252_v47 = vpop.f32.mrb[19].mxu0 }
 0x30b   :  { %5355 = vmatpush3.bf16.msra.mxu1 %v5810_v62 }
 0x30c   :  { %5356 = vmatprep.subr.bf16.mxu1 %v5811_v32 }
 0x30f   :  { %5357 = vmatpush3.bf16.msra.mxu1 %v5812_v23 }
 0x310   :  { %5414 = vmatprep.subr.bf16.mxu1 %v5842_v59 }
 0x312   :  { %3916 = vmatmul.mubr.bf16.vlgmr.msra.gmra.mrb[36].mxu1 %v3752_v57 }
 0x313   :  { %5416 = vmatpush3.bf16.msra.mxu1 %v5415_v60  ;;  %5411 = vmatprep.mubr.msk.f32.mxu1 %vm5843_vm14, %v5844_v43 }
 0x314   :  { %5417 = vmatprep.subr.bf16.mxu1 %v5842_v59 }
 0x325   :  { %v5116_v17 = vpop.f32.mrb[12].mxu1 }
 0x326   :  { %v5117_v54 = vpop.f32.mrb[13].mxu1 }
 0x327   :  { %v5292_v12 = vpop.f32.mrb[20].mxu0  ;;  %v5118_v4 = vadd.f32 %v5117_v54, %v5116_v17  ;;  %v5119_v29 = vpop.f32.mrb[14].mxu1 }
 0x328   :  { %v5293_v0 = vpop.f32.mrb[21].mxu0  ;;  %v5120_v27 = vpop.f32.mrb[15].mxu1 }
 0x329   :  { %v1925_v13 = vadd.f32 %v5118_v4, %v1743_v25  ;;  %v7577_v41 = vadd.f32 %v5293_v0, %v5292_v12  ;;  %v5295_v51 = vpop.f32.mrb[22].mxu0 }
 0x32a   :  { %v5296_v2 = vpop.f32.mrb[23].mxu0 }
 0x345   :  { %v5138_v16 = vpop.f32.mrb[16].mxu1 }
 0x346   :  { %v5139_v18 = vpop.f32.mrb[17].mxu1 }
 0x347   :  { %v5336_v24 = vpop.f32.mrb[24].mxu0  ;;  %v5140_v44 = vadd.f32 %v5139_v18, %v5138_v16  ;;  %v5141_v61 = vpop.f32.mrb[18].mxu1 }
 0x348   :  { %v5337_v52 = vpop.f32.mrb[25].mxu0  ;;  %v5142_v46 = vpop.f32.mrb[19].mxu1 }
 0x349   :  { %v2107_v5 = vadd.f32 %v5140_v44, %v1925_v13  ;;  %v5338_v8 = vadd.f32 %v5337_v52, %v5336_v24  ;;  %v5339_v30 = vpop.f32.mrb[26].mxu0  ;;  %v5031_v24 = vld [vmem:[%s7635_s9] ss:$0 sm:$0xff]  ;;  %s5817_s9 = scalar_lea.vmem %s4214_s18, 32 }
 0x34a   :  { %v5340_v19 = vpop.f32.mrb[27].mxu0  ;;  %v5032_v46 = vld [vmem:[%s7637_s11] ss:$0 sm:$0xff]  ;;  %p5818_p0 = scmp.ne.s32.totalorder %s4214_s18, %s5817_s9  ;;  %p5823_p2 = scmp.lt.s32.totalorder %s5817_s9, %s5817_s9 }
 0x34b   :  { %v2289_v11 = vadd.f32 %v7462_v58, %v2107_v5  ;;  %v4120_v58 = vld [vmem:[%s7636_s10 + $0x18] sm:$0xff] }
 0x34c   :  { %v5418_v48 = vpack.c.bf16 %v4120_v58, %v4119_v34  ;;  %p5824_p3 = por %p5823_p2, %p5822_p1 }
 0x34e   :  { %5419 = vmatpush3.bf16.msra.mxu1 %v5418_v48  ;;  %p5825_p4 = pnand %p5824_p3, %p5818_p0 }
 0x34f   :  { %5420 = vmatprep.subr.bf16.mxu1 %v5842_v59 }
 0x365   :  { %v5182_v33 = vpop.f32.mrb[20].mxu1 }
 0x366   :  { %v5183_v40 = vpop.f32.mrb[21].mxu1 }
 0x367   :  { %v5380_v9 = vpop.f32.mrb[28].mxu0  ;;  %v5184_v49 = vadd.f32 %v5183_v40, %v5182_v33  ;;  %v5185_v14 = vpop.f32.mrb[22].mxu1 }
 0x368   :  { %v5381_v56 = vpop.f32.mrb[29].mxu0  ;;  %v5186_v7 = vpop.f32.mrb[23].mxu1 }
 0x369   :  { %v2471_v26 = vadd.f32 %v5184_v49, %v2289_v11  ;;  %v5382_v42 = vadd.f32 %v5381_v56, %v5380_v9  ;;  %v5383_v15 = vpop.f32.mrb[30].mxu0 }
 0x36a   :  { %v5384_v31 = vpop.f32.mrb[31].mxu0 }
 0x36b   :  { %v2653_v55 = vadd.f32 %v7516_v6, %v2471_v26  ;;  %v5421_v6 = vpack.c.bf16 %v4122_v3, %v4121_v20 }
 0x36d   :  { %5422 = vmatpush3.bf16.msra.mxu1 %v5421_v6 }
 0x36e   :  { %5423 = vmatprep.subr.bf16.mxu1 %v5842_v59 }
 0x371   :  { %5425 = vmatpush3.bf16.msra.mxu1 %v5424_v63 }
 0x385   :  { %v5226_v50 = vpop.f32.mrb[24].mxu1 }
 0x386   :  { %v5227_v38 = vpop.f32.mrb[25].mxu1 }
 0x387   :  { %v5228_v21 = vadd.f32 %v5227_v38, %v5226_v50  ;;  %v5229_v53 = vpop.f32.mrb[26].mxu1 }
 0x388   :  { %v5230_v35 = vpop.f32.mrb[27].mxu1 }
 0x389   :  { %v2833_v62 = vadd.f32 %v5228_v21, %v2653_v55 }
 0x38b   :  { %v3013_v36 = vadd.f32 %v7570_v37, %v2833_v62 }
 0x3a5   :  { %v5270_v1 = vpop.f32.mrb[28].mxu1 }
 0x3a6   :  { %v5271_v32 = vpop.f32.mrb[29].mxu1 }
 0x3a7   :  { %v5272_v25 = vadd.f32 %v5271_v32, %v5270_v1  ;;  %v5273_v39 = vpop.f32.mrb[30].mxu1 }
 0x3a8   :  { %v5274_v47 = vpop.f32.mrb[31].mxu1 }
 0x3a9   :  { %v3195_v23 = vadd.f32 %v5272_v25, %v3013_v36 }
 0x3ab   :  { %v3377_v57 = vadd.f32 %v7577_v41, %v3195_v23 }
 0x3c5   :  { %v5314_v17 = vpop.f32.mrb[32].mxu1 }
 0x3c6   :  { %v5315_v54 = vpop.f32.mrb[33].mxu1 }
 0x3c7   :  { %v5316_v12 = vadd.f32 %v5315_v54, %v5314_v17  ;;  %v5317_v4 = vpop.f32.mrb[34].mxu1 }
 0x3c8   :  { %v5318_v29 = vpop.f32.mrb[35].mxu1 }
 0x3c9   :  { %v3559_v0 = vadd.f32 %v5316_v12, %v3377_v57 }
 0x3cb   :  { %v3741_v27 = vadd.f32 %v5338_v8, %v3559_v0 }
 0x3e5   :  { %v5358_v13 = vpop.f32.mrb[36].mxu1 }
 0x3e6   :  { %v5359_v51 = vpop.f32.mrb[37].mxu1 }
 0x3e7   :  { %v5360_v2 = vadd.f32 %v5359_v51, %v5358_v13  ;;  %v5361_v16 = vpop.f32.mrb[38].mxu1 }
 0x3e8   :  { %v5362_v37 = vpop.f32.mrb[39].mxu1 }
 0x3e9   :  { %v3923_v18 = vadd.f32 %v5360_v2, %v3741_v27 }
 0x3eb   :  { %v4105_v44 = vadd.f32 %v5382_v42, %v3923_v18 }
 0x3ed   :  { %v4113_v61 = vadd.f32 %v5031_v24, %v4105_v44 }
 0x3ef   :  { %vm4114_vm15 = vcmp.ge.f32.partialorder %v4113_v61, 0.0  ;;  %v4115_v41 = vmul.f32 0.01, %v4113_v61 }
 0x3f1   :  { %v4116_v52 = vsel %vm4114_vm15, %v4113_v61, %v4115_v41 }
 0x3f2   :  { %5412 = vmatmul.mubr.msk.f32.vlgmr.msra.gmra.mrb[40].mxu1 %vm523_vm0, %v4116_v52 }
 0x4c5   :  { %v4201_v5 = vpop.f32.mrb[40].mxu1 }
 0x4c6   :  { %v4202_v8 = vadd.f32 %v5032_v46, %v4201_v5  ;;  %v5413_v30 = vpop.f32.mrb[41].mxu1 }
 0x4c8   :  { %4206 = vst.msk [vmem:[#allocation2] sm:$0x3] %vm4205_vm1, %v4202_v8 }
 0x4c9   :  { %5828 = shalt.err (!%p5825_p4)
}
 0x4ca   :  { %s5829_s1 = scalar_lea.hbm %s7638_s12, 32 }
 0x4cb   :  { %p5830_p5 = scmp.ne.s32.totalorder %s7638_s12, %s5829_s1  ;;  %p5833_p6 = scmp.lt.u32.totalorder %s5829_s1, %s7638_s12 }
 0x4cd   :  { %p5835_p7 = pnand %p5833_p6, %p5830_p5 }
 0x4cf   :  { %5838 = shalt.err (!%p5835_p7)
}
 0x4d0   :  { %4216 = dma.vmem_to_hbm [thread:$0]  %s4214_s18, 32, %s7638_s12, [#allocation3]  }
 0x4d1   :  { %5839 = dma.done.wait [#allocation3], 32  }
 0x4d2   :  { %5840 = vsyncadd [#allocation3], 4294967264 }
 0x4d3   :  { %4220 = vsyncpa [#allocation3], 1 }

</bundles_post_ra>
